<compile_context>
chip_gen: v7x
topology: tpu7x:2x2x1
jax: 0.10.0
libtpu: 0.0.40
codegen_flags: <defaults>
</compile_context>

<pallas_src>
import functools
import math

import jax
import jax.numpy as jnp
from jax.experimental import pallas as pl
from jax.experimental.pallas import tpu as pltpu


def _round_up(v: int, m: int) -> int:
    return (v + m - 1) // m * m


def _kan_kernel(x_ref, g_lo_ref, g_hi_ref, gl_ref, rl_ref, gr_ref, rr_ref,
                base_wt_ref, spline_wt_ref, out_ref,
                *, spline_order: int, n_rep: int, f_pad: int):
    """One (batch_tile, out_tile) block of the KANLinear forward pass."""
    x = x_ref[...]                                          # (tb, F_pad) f32

    # ---- base branch: relu(x) @ W_base (weight pre-transposed in wrapper) --
    base_out = jnp.dot(jnp.maximum(x, 0.0), base_wt_ref[...],
                       preferred_element_type=jnp.float32)  # (tb, to)

    # ---- B-spline bases, flattened lane-dense layout ----------------------
    # Column c*F_pad + f  <->  basis index c of input feature f.
    x_rep = jnp.concatenate([x] * n_rep, axis=1)            # (tb, n_rep*F_pad)
    bases = jnp.logical_and(x_rep >= g_lo_ref[...],
                            x_rep < g_hi_ref[...]).astype(jnp.float32)

    # Cox-de Boor recursion; denominators arrive as precomputed reciprocals,
    # the "+1 knot" shift is a 128-aligned lane slice (F_pad multiple of 128).
    for k in range(1, spline_order + 1):
        w = (n_rep - k) * f_pad
        xk = x_rep[:, :w]
        left = (xk - gl_ref[k - 1:k, :w]) * rl_ref[k - 1:k, :w]
        right = (gr_ref[k - 1:k, :w] - xk) * rr_ref[k - 1:k, :w]
        bases = left * bases[:, :w] + right * bases[:, f_pad:f_pad + w]

    # bases is now (tb, C*F_pad): single fused MXU matmul for the spline branch
    spline_out = jnp.dot(bases, spline_wt_ref[...],
                         preferred_element_type=jnp.float32)  # (tb, to)

    out_ref[...] = base_out + spline_out


def kan_linear_forward(x, grid, base_weight, spline_weight, spline_scaler,
                       *, grid_size: int, spline_order: int):
    batch, in_features = x.shape
    out_features = base_weight.shape[0]
    n_coef = grid_size + spline_order            # C
    n_rep = grid_size + 2 * spline_order         # P - 1 (level-0 basis count)

    f32 = jnp.float32
    x = x.astype(f32)
    grid = grid.astype(f32)
    base_weight = base_weight.astype(f32)
    spline_weight = spline_weight.astype(f32)
    spline_scaler = spline_scaler.astype(f32)

    # -------- layout plumbing (pure JAX, outside the kernel) ---------------
    f_pad = _round_up(in_features, 128)
    o_pad = _round_up(out_features, 128)
    tb = 128 if batch >= 128 else _round_up(batch, 8)
    b_pad = _round_up(batch, tb)
    to = 256 if (o_pad % 256 == 0 and o_pad >= 512) else 128

    x_p = jnp.pad(x, ((0, b_pad - batch), (0, f_pad - in_features)))
    # Pad the knot table by edge replication: padded features get a valid grid
    # (finite bases) but their weight columns are zero, so they contribute 0.
    grid_p = jnp.pad(grid, ((0, f_pad - in_features), (0, 0)), mode="edge")
    g_t = grid_p.T                                          # (P, F_pad)

    w0 = n_rep * f_pad
    g_lo = g_t[:-1, :].reshape(1, w0)
    g_hi = g_t[1:, :].reshape(1, w0)

    # Per-level knot offsets and reciprocal denominators, packed row-per-level.
    gl_rows, rl_rows, gr_rows, rr_rows = [], [], [], []
    for k in range(1, spline_order + 1):
        nk = n_rep - k
        gl = g_t[:-(k + 1), :]                              # (nk, F_pad)
        dl = g_t[k:-1, :] - g_t[:-(k + 1), :]
        gr = g_t[k + 1:, :]
        dr = g_t[k + 1:, :] - g_t[1:-k, :]
        rl = jnp.where(dl != 0, 1.0 / dl, 0.0)              # guard repeated knots
        rr = jnp.where(dr != 0, 1.0 / dr, 0.0)
        pad = w0 - nk * f_pad

        def _flat(a, pad=pad):
            return jnp.pad(a.reshape(1, -1), ((0, 0), (0, pad)))

        gl_rows.append(_flat(gl))
        rl_rows.append(_flat(rl))
        gr_rows.append(_flat(gr))
        rr_rows.append(_flat(rr))
    gl_pack = jnp.concatenate(gl_rows, axis=0)              # (K, w0)
    rl_pack = jnp.concatenate(rl_rows, axis=0)
    gr_pack = jnp.concatenate(gr_rows, axis=0)
    rr_pack = jnp.concatenate(rr_rows, axis=0)

    # Base weight pre-transposed: kernel does x @ W, no in-kernel .T
    base_wt = jnp.pad(base_weight.T,
                      ((0, f_pad - in_features), (0, o_pad - out_features)))

    # Scaled spline weight, reordered so flat row index = c*F_pad + f,
    # matching the kernel's flattened bases layout.
    sw = spline_weight * spline_scaler[:, :, None]          # (O, F, C)
    sw = jnp.transpose(sw, (2, 1, 0))                       # (C, F, O)
    sw = jnp.pad(sw, ((0, 0),
                      (0, f_pad - in_features),
                      (0, o_pad - out_features)))
    spline_wt = sw.reshape(n_coef * f_pad, o_pad)           # (C*F_pad, O_pad)

    # -------- pallas_call ---------------------------------------------------
    kernel = functools.partial(_kan_kernel, spline_order=spline_order,
                               n_rep=n_rep, f_pad=f_pad)

    grid_dims = (o_pad // to, b_pad // tb)   # batch tile innermost -> weight
                                             # tiles are not re-fetched per step
    flops = (2 * b_pad * o_pad * f_pad * (1 + n_coef)
             + 10 * b_pad * w0 * spline_order)
    bytes_accessed = 4 * (x_p.size + base_wt.size + spline_wt.size
                          + g_lo.size + g_hi.size + 4 * gl_pack.size
                          + b_pad * o_pad)

    out_p = pl.pallas_call(
        kernel,
        out_shape=jax.ShapeDtypeStruct((b_pad, o_pad), f32),
        grid=grid_dims,
        in_specs=[
            pl.BlockSpec((tb, f_pad), lambda oi, bi: (bi, 0)),             # x
            pl.BlockSpec((1, w0), lambda oi, bi: (0, 0)),                  # g_lo
            pl.BlockSpec((1, w0), lambda oi, bi: (0, 0)),                  # g_hi
            pl.BlockSpec((spline_order, w0), lambda oi, bi: (0, 0)),       # gl
            pl.BlockSpec((spline_order, w0), lambda oi, bi: (0, 0)),       # rl
            pl.BlockSpec((spline_order, w0), lambda oi, bi: (0, 0)),       # gr
            pl.BlockSpec((spline_order, w0), lambda oi, bi: (0, 0)),       # rr
            pl.BlockSpec((f_pad, to), lambda oi, bi: (0, oi)),             # W_base^T
            pl.BlockSpec((n_coef * f_pad, to), lambda oi, bi: (0, oi)),    # W_spline
        ],
        out_specs=pl.BlockSpec((tb, to), lambda oi, bi: (bi, oi)),
        compiler_params=pltpu.CompilerParams(
            dimension_semantics=("parallel", "parallel"),
            vmem_limit_bytes=48 * 1024 * 1024),
        cost_estimate=pl.CostEstimate(flops=flops, transcendentals=0,
                                      bytes_accessed=bytes_accessed),
    )(x_p, g_lo, g_hi, gl_pack, rl_pack, gr_pack, rr_pack, base_wt, spline_wt)

    return out_p[:batch, :out_features]


# ---------------- pure-JAX reference (mirrors the PyTorch module) -----------
def _b_splines_ref(x, grid, spline_order):
    xe = x[:, :, None]
    g = grid[None, :, :]
    bases = jnp.logical_and(xe >= g[:, :, :-1], xe < g[:, :, 1:]).astype(x.dtype)
    for k in range(1, spline_order + 1):
        left = (xe - g[:, :, :-(k + 1)]) / (g[:, :, k:-1] - g[:, :, :-(k + 1)])
        right = (g[:, :, k + 1:] - xe) / (g[:, :, k + 1:] - g[:, :, 1:-k])
        bases = left * bases[:, :, :-1] + right * bases[:, :, 1:]
    return bases


def kan_linear_ref(x, grid, base_weight, spline_weight, spline_scaler,
                   *, spline_order: int):
    base_out = jnp.maximum(x, 0.0) @ base_weight.T
    bases = _b_splines_ref(x, grid, spline_order)            # (B, F, C)
    sw = spline_weight * spline_scaler[:, :, None]           # (O, F, C)
    spline_out = bases.reshape(x.shape[0], -1) @ sw.reshape(sw.shape[0], -1).T
    return base_out + spline_out


if __name__ == "__main__":
    # Module hyperparameters (KANLinear defaults) at small shapes.
    in_features = 32
    out_features = 160
    grid_size = 5
    spline_order = 3
    grid_range = (-1.0, 1.0)
    batch = 256

    # Grid buffer: arange(-K, G+K+1) * h + grid_range[0], expanded to (F, P).
    h = (grid_range[1] - grid_range[0]) / grid_size
    grid_1d = (jnp.arange(-spline_order, grid_size + spline_order + 1,
                          dtype=jnp.float32) * h + grid_range[0])
    grid = jnp.broadcast_to(grid_1d, (in_features, grid_1d.shape[0]))

    # Deterministic synthetic parameters (shapes match the module's __init__).
    key = jax.random.PRNGKey(0)
    k_x, k_bw, k_sw, k_sc = jax.random.split(key, 4)
    bound = 1.0 / math.sqrt(in_features)
    base_weight = jax.random.uniform(
        k_bw, (out_features, in_features), jnp.float32, -bound, bound)
    spline_weight = jax.random.uniform(
        k_sw, (out_features, in_features, grid_size + spline_order),
        jnp.float32, -0.1, 0.1)
    spline_scaler = jax.random.uniform(
        k_sc, (out_features, in_features), jnp.float32, -bound, bound)

    # Inputs inside the grid range so the splines are active.
    x = jax.random.uniform(k_x, (batch, in_features), jnp.float32, -1.0, 1.0)

    out = kan_linear_forward(x, grid, base_weight, spline_weight, spline_scaler,
                             grid_size=grid_size, spline_order=spline_order)
    out = jax.block_until_ready(out)

    ref = kan_linear_ref(x, grid, base_weight, spline_weight, spline_scaler,
                         spline_order=spline_order)
    ref = jax.block_until_ready(ref)

    assert out.shape == (batch, out_features)
    max_err = float(jnp.max(jnp.abs(out - ref)))
    assert jnp.allclose(out, ref, atol=1e-4, rtol=1e-4), max_err
    print("KERNEL_OK")
</pallas_src>

<mosaic_0001>
module attributes {stable_mosaic.version = 11 : i64} {
  func.func @_kan_kernel(%arg0: i32, %arg1: i32, %arg2: memref<128x128xf32, #tpu.memory_space<vmem>>, %arg3: memref<1x1408xf32, #tpu.memory_space<vmem>>, %arg4: memref<1x1408xf32, #tpu.memory_space<vmem>>, %arg5: memref<3x1408xf32, #tpu.memory_space<vmem>>, %arg6: memref<3x1408xf32, #tpu.memory_space<vmem>>, %arg7: memref<3x1408xf32, #tpu.memory_space<vmem>>, %arg8: memref<3x1408xf32, #tpu.memory_space<vmem>>, %arg9: memref<128x128xf32, #tpu.memory_space<vmem>>, %arg10: memref<1024x128xf32, #tpu.memory_space<vmem>>, %arg11: memref<128x128xf32, #tpu.memory_space<vmem>>) attributes {dimension_semantics = [#tpu.dimension_semantics<parallel>, #tpu.dimension_semantics<parallel>], iteration_bounds = array<i64: 2, 2>, scalar_prefetch = 0 : i64, scratch_operands = 0 : i64, tpu.core_type = #tpu.core_type<tc>, window_params = [{transform_indices = @transform_0, window_bounds = array<i64: 128, 128>}, {pipeline_mode = #tpu.pipeline_mode<synchronous>, transform_indices = @transform_1, window_bounds = array<i64: 1, 1408>}, {pipeline_mode = #tpu.pipeline_mode<synchronous>, transform_indices = @transform_2, window_bounds = array<i64: 1, 1408>}, {pipeline_mode = #tpu.pipeline_mode<synchronous>, transform_indices = @transform_3, window_bounds = array<i64: 3, 1408>}, {pipeline_mode = #tpu.pipeline_mode<synchronous>, transform_indices = @transform_4, window_bounds = array<i64: 3, 1408>}, {pipeline_mode = #tpu.pipeline_mode<synchronous>, transform_indices = @transform_5, window_bounds = array<i64: 3, 1408>}, {pipeline_mode = #tpu.pipeline_mode<synchronous>, transform_indices = @transform_6, window_bounds = array<i64: 3, 1408>}, {transform_indices = @transform_7, window_bounds = array<i64: 128, 128>}, {transform_indices = @transform_8, window_bounds = array<i64: 1024, 128>}, {transform_indices = @transform_9, window_bounds = array<i64: 128, 128>}]} {
    %c0 = arith.constant 0 : index
    %c0_0 = arith.constant 0 : index
    %0 = vector.load %arg2[%c0, %c0_0] : memref<128x128xf32, #tpu.memory_space<vmem>>, vector<128x128xf32>
    %cst = arith.constant 0.000000e+00 : f32
    %1 = vector.broadcast %cst : f32 to vector<128x128xf32>
    %2 = arith.maximumf %0, %1 : vector<128x128xf32>
    %c0_1 = arith.constant 0 : index
    %c0_2 = arith.constant 0 : index
    %3 = vector.load %arg9[%c0_1, %c0_2] : memref<128x128xf32, #tpu.memory_space<vmem>>, vector<128x128xf32>
    %cst_3 = arith.constant dense<0.000000e+00> : vector<128x128xf32>
    %4 = tpu.matmul %2, %3, %cst_3 {dimension_numbers = #tpu.dot_dimension_numbers<[1], [0], [0], [1], [0, 0, 1, 1], [], []>} : vector<128x128xf32>, vector<128x128xf32>, vector<128x128xf32> -> vector<128x128xf32>
    %5 = tpu.concatenate %0, %0, %0, %0, %0, %0, %0, %0, %0, %0, %0 in 1 : vector<128x128xf32>, vector<128x128xf32>, vector<128x128xf32>, vector<128x128xf32>, vector<128x128xf32>, vector<128x128xf32>, vector<128x128xf32>, vector<128x128xf32>, vector<128x128xf32>, vector<128x128xf32>, vector<128x128xf32> -> vector<128x1408xf32>
    %c0_4 = arith.constant 0 : index
    %c0_5 = arith.constant 0 : index
    %6 = vector.load %arg3[%c0_4, %c0_5] : memref<1x1408xf32, #tpu.memory_space<vmem>>, vector<1x1408xf32>
    %7 = vector.broadcast %6 : vector<1x1408xf32> to vector<128x1408xf32>
    %8 = arith.cmpf oge, %5, %7 : vector<128x1408xf32>
    %c0_6 = arith.constant 0 : index
    %c0_7 = arith.constant 0 : index
    %9 = vector.load %arg4[%c0_6, %c0_7] : memref<1x1408xf32, #tpu.memory_space<vmem>>, vector<1x1408xf32>
    %10 = vector.broadcast %9 : vector<1x1408xf32> to vector<128x1408xf32>
    %11 = arith.cmpf olt, %5, %10 : vector<128x1408xf32>
    %12 = arith.andi %8, %11 : vector<128x1408xi1>
    %13 = arith.extui %12 : vector<128x1408xi1> to vector<128x1408xi32>
    %14 = arith.sitofp %13 : vector<128x1408xi32> to vector<128x1408xf32>
    %15 = vector.extract_strided_slice %5 {offsets = [0, 0], sizes = [128, 1280], strides = [1, 1]} : vector<128x1408xf32> to vector<128x1280xf32>
    %c0_8 = arith.constant 0 : index
    %c0_9 = arith.constant 0 : index
    %16 = vector.load %arg5[%c0_8, %c0_9] : memref<3x1408xf32, #tpu.memory_space<vmem>>, vector<1x1280xf32>
    %17 = vector.broadcast %16 : vector<1x1280xf32> to vector<128x1280xf32>
    %18 = arith.subf %15, %17 : vector<128x1280xf32>
    %c0_10 = arith.constant 0 : index
    %c0_11 = arith.constant 0 : index
    %19 = vector.load %arg6[%c0_10, %c0_11] : memref<3x1408xf32, #tpu.memory_space<vmem>>, vector<1x1280xf32>
    %20 = vector.broadcast %19 : vector<1x1280xf32> to vector<128x1280xf32>
    %21 = arith.mulf %18, %20 : vector<128x1280xf32>
    %c0_12 = arith.constant 0 : index
    %c0_13 = arith.constant 0 : index
    %22 = vector.load %arg7[%c0_12, %c0_13] : memref<3x1408xf32, #tpu.memory_space<vmem>>, vector<1x1280xf32>
    %23 = vector.broadcast %22 : vector<1x1280xf32> to vector<128x1280xf32>
    %24 = arith.subf %23, %15 : vector<128x1280xf32>
    %c0_14 = arith.constant 0 : index
    %c0_15 = arith.constant 0 : index
    %25 = vector.load %arg8[%c0_14, %c0_15] : memref<3x1408xf32, #tpu.memory_space<vmem>>, vector<1x1280xf32>
    %26 = vector.broadcast %25 : vector<1x1280xf32> to vector<128x1280xf32>
    %27 = arith.mulf %24, %26 : vector<128x1280xf32>
    %28 = vector.extract_strided_slice %14 {offsets = [0, 0], sizes = [128, 1280], strides = [1, 1]} : vector<128x1408xf32> to vector<128x1280xf32>
    %29 = arith.mulf %21, %28 : vector<128x1280xf32>
    %30 = vector.extract_strided_slice %14 {offsets = [0, 128], sizes = [128, 1280], strides = [1, 1]} : vector<128x1408xf32> to vector<128x1280xf32>
    %31 = arith.mulf %27, %30 : vector<128x1280xf32>
    %32 = arith.addf %29, %31 : vector<128x1280xf32>
    %33 = vector.extract_strided_slice %5 {offsets = [0, 0], sizes = [128, 1152], strides = [1, 1]} : vector<128x1408xf32> to vector<128x1152xf32>
    %c1 = arith.constant 1 : index
    %c0_16 = arith.constant 0 : index
    %34 = vector.load %arg5[%c1, %c0_16] : memref<3x1408xf32, #tpu.memory_space<vmem>>, vector<1x1152xf32>
    %35 = vector.broadcast %34 : vector<1x1152xf32> to vector<128x1152xf32>
    %36 = arith.subf %33, %35 : vector<128x1152xf32>
    %c1_17 = arith.constant 1 : index
    %c0_18 = arith.constant 0 : index
    %37 = vector.load %arg6[%c1_17, %c0_18] : memref<3x1408xf32, #tpu.memory_space<vmem>>, vector<1x1152xf32>
    %38 = vector.broadcast %37 : vector<1x1152xf32> to vector<128x1152xf32>
    %39 = arith.mulf %36, %38 : vector<128x1152xf32>
    %c1_19 = arith.constant 1 : index
    %c0_20 = arith.constant 0 : index
    %40 = vector.load %arg7[%c1_19, %c0_20] : memref<3x1408xf32, #tpu.memory_space<vmem>>, vector<1x1152xf32>
    %41 = vector.broadcast %40 : vector<1x1152xf32> to vector<128x1152xf32>
    %42 = arith.subf %41, %33 : vector<128x1152xf32>
    %c1_21 = arith.constant 1 : index
    %c0_22 = arith.constant 0 : index
    %43 = vector.load %arg8[%c1_21, %c0_22] : memref<3x1408xf32, #tpu.memory_space<vmem>>, vector<1x1152xf32>
    %44 = vector.broadcast %43 : vector<1x1152xf32> to vector<128x1152xf32>
    %45 = arith.mulf %42, %44 : vector<128x1152xf32>
    %46 = vector.extract_strided_slice %32 {offsets = [0, 0], sizes = [128, 1152], strides = [1, 1]} : vector<128x1280xf32> to vector<128x1152xf32>
    %47 = arith.mulf %39, %46 : vector<128x1152xf32>
    %48 = vector.extract_strided_slice %32 {offsets = [0, 128], sizes = [128, 1152], strides = [1, 1]} : vector<128x1280xf32> to vector<128x1152xf32>
    %49 = arith.mulf %45, %48 : vector<128x1152xf32>
    %50 = arith.addf %47, %49 : vector<128x1152xf32>
    %51 = vector.extract_strided_slice %5 {offsets = [0, 0], sizes = [128, 1024], strides = [1, 1]} : vector<128x1408xf32> to vector<128x1024xf32>
    %c2 = arith.constant 2 : index
    %c0_23 = arith.constant 0 : index
    %52 = vector.load %arg5[%c2, %c0_23] : memref<3x1408xf32, #tpu.memory_space<vmem>>, vector<1x1024xf32>
    %53 = vector.broadcast %52 : vector<1x1024xf32> to vector<128x1024xf32>
    %54 = arith.subf %51, %53 : vector<128x1024xf32>
    %c2_24 = arith.constant 2 : index
    %c0_25 = arith.constant 0 : index
    %55 = vector.load %arg6[%c2_24, %c0_25] : memref<3x1408xf32, #tpu.memory_space<vmem>>, vector<1x1024xf32>
    %56 = vector.broadcast %55 : vector<1x1024xf32> to vector<128x1024xf32>
    %57 = arith.mulf %54, %56 : vector<128x1024xf32>
    %c2_26 = arith.constant 2 : index
    %c0_27 = arith.constant 0 : index
    %58 = vector.load %arg7[%c2_26, %c0_27] : memref<3x1408xf32, #tpu.memory_space<vmem>>, vector<1x1024xf32>
    %59 = vector.broadcast %58 : vector<1x1024xf32> to vector<128x1024xf32>
    %60 = arith.subf %59, %51 : vector<128x1024xf32>
    %c2_28 = arith.constant 2 : index
    %c0_29 = arith.constant 0 : index
    %61 = vector.load %arg8[%c2_28, %c0_29] : memref<3x1408xf32, #tpu.memory_space<vmem>>, vector<1x1024xf32>
    %62 = vector.broadcast %61 : vector<1x1024xf32> to vector<128x1024xf32>
    %63 = arith.mulf %60, %62 : vector<128x1024xf32>
    %64 = vector.extract_strided_slice %50 {offsets = [0, 0], sizes = [128, 1024], strides = [1, 1]} : vector<128x1152xf32> to vector<128x1024xf32>
    %65 = arith.mulf %57, %64 : vector<128x1024xf32>
    %66 = vector.extract_strided_slice %50 {offsets = [0, 128], sizes = [128, 1024], strides = [1, 1]} : vector<128x1152xf32> to vector<128x1024xf32>
    %67 = arith.mulf %63, %66 : vector<128x1024xf32>
    %68 = arith.addf %65, %67 : vector<128x1024xf32>
    %c0_30 = arith.constant 0 : index
    %c0_31 = arith.constant 0 : index
    %69 = vector.load %arg10[%c0_30, %c0_31] : memref<1024x128xf32, #tpu.memory_space<vmem>>, vector<1024x128xf32>
    %cst_32 = arith.constant dense<0.000000e+00> : vector<128x128xf32>
    %70 = tpu.matmul %68, %69, %cst_32 {dimension_numbers = #tpu.dot_dimension_numbers<[1], [0], [0], [1], [0, 0, 1, 1], [], []>} : vector<128x1024xf32>, vector<1024x128xf32>, vector<128x128xf32> -> vector<128x128xf32>
    %71 = arith.addf %4, %70 : vector<128x128xf32>
    %c0_33 = arith.constant 0 : index
    %c0_34 = arith.constant 0 : index
    %72 = vector.load %arg11[%c0_33, %c0_34] : memref<128x128xf32, #tpu.memory_space<vmem>>, vector<128x128xf32>
    tpu.vector_store %arg11[%c0_33, %c0_34], %71 {strides = array<i32>} : memref<128x128xf32, #tpu.memory_space<vmem>>, vector<128x128xf32>,
    return
  }
  func.func @transform_0(%arg0: i32, %arg1: i32) -> (i32, i32) {
    %c0_i32 = arith.constant 0 : i32
    %c0_i32_0 = arith.constant 0 : i32
    return %arg1, %c0_i32 : i32, i32
  }
  func.func @transform_1(%arg0: i32, %arg1: i32) -> (i32, i32) {
    %c0_i32 = arith.constant 0 : i32
    %c0_i32_0 = arith.constant 0 : i32
    %c0_i32_1 = arith.constant 0 : i32
    return %c0_i32, %c0_i32_0 : i32, i32
  }
  func.func @transform_2(%arg0: i32, %arg1: i32) -> (i32, i32) {
    %c0_i32 = arith.constant 0 : i32
    %c0_i32_0 = arith.constant 0 : i32
    %c0_i32_1 = arith.constant 0 : i32
    return %c0_i32, %c0_i32_0 : i32, i32
  }
  func.func @transform_3(%arg0: i32, %arg1: i32) -> (i32, i32) {
    %c0_i32 = arith.constant 0 : i32
    %c0_i32_0 = arith.constant 0 : i32
    %c0_i32_1 = arith.constant 0 : i32
    return %c0_i32, %c0_i32_0 : i32, i32
  }
  func.func @transform_4(%arg0: i32, %arg1: i32) -> (i32, i32) {
    %c0_i32 = arith.constant 0 : i32
    %c0_i32_0 = arith.constant 0 : i32
    %c0_i32_1 = arith.constant 0 : i32
    return %c0_i32, %c0_i32_0 : i32, i32
  }
  func.func @transform_5(%arg0: i32, %arg1: i32) -> (i32, i32) {
    %c0_i32 = arith.constant 0 : i32
    %c0_i32_0 = arith.constant 0 : i32
    %c0_i32_1 = arith.constant 0 : i32
    return %c0_i32, %c0_i32_0 : i32, i32
  }
  func.func @transform_6(%arg0: i32, %arg1: i32) -> (i32, i32) {
    %c0_i32 = arith.constant 0 : i32
    %c0_i32_0 = arith.constant 0 : i32
    %c0_i32_1 = arith.constant 0 : i32
    return %c0_i32, %c0_i32_0 : i32, i32
  }
  func.func @transform_7(%arg0: i32, %arg1: i32) -> (i32, i32) {
    %c0_i32 = arith.constant 0 : i32
    %c0_i32_0 = arith.constant 0 : i32
    return %c0_i32, %arg0 : i32, i32
  }
  func.func @transform_8(%arg0: i32, %arg1: i32) -> (i32, i32) {
    %c0_i32 = arith.constant 0 : i32
    %c0_i32_0 = arith.constant 0 : i32
    return %c0_i32, %arg0 : i32, i32
  }
  func.func @transform_9(%arg0: i32, %arg1: i32) -> (i32, i32) {
    %c0_i32 = arith.constant 0 : i32
    return %arg1, %arg0 : i32, i32
  }
}

</mosaic_0001>

<bundles_post_ra>
// kernel: tpu_custom_call.1
= control target key start
LH: loop header
LB: loop body
LE: loop exit
PB: predicated region body
PF: predicated region fallthrough
CT: control target
= control target key end

     0   :  { %s13804_s0 = inlined_call_operand.hbm [shape: f32[256,128], index: 0, kind: input, shape index: {}]   ;;  %s13805_s1 = inlined_call_operand.hbm [shape: f32[1,1408], index: 1, kind: input, shape index: {}]   ;;  %s13806_s2 = inlined_call_operand.hbm [shape: f32[1,1408], index: 2, kind: input, shape index: {}]   ;;  %s13807_s3 = inlined_call_operand.hbm [shape: f32[3,1408], index: 3, kind: input, shape index: {}]   ;;  %s13808_s4 = inlined_call_operand.hbm [shape: f32[3,1408], index: 4, kind: input, shape index: {}]   ;;  %s13809_s5 = inlined_call_operand.hbm [shape: f32[3,1408], index: 5, kind: input, shape index: {}]   ;;  %s13810_s6 = inlined_call_operand.hbm [shape: f32[3,1408], index: 6, kind: input, shape index: {}]   ;;  %s13811_s7 = inlined_call_operand.hbm [shape: f32[128,256], index: 7, kind: input, shape index: {}]   ;;  %s13812_s8 = inlined_call_operand.hbm [shape: f32[1024,256], index: 8, kind: input, shape index: {}]   ;;  %s13813_s9 = inlined_call_operand.hbm [shape: f32[256,256], index: 9, kind: output, shape index: {}]  }
   0x1   :  { %14290 = sst [smem:[#allocation153_spill]] %s13804_s0 }
   0x2   :  { %14291 = sst [smem:[#allocation154_spill]] %s13805_s1 }
   0x3   :  { %14292 = sst [smem:[#allocation155_spill]] %s13806_s2 }
   0x4   :  { %14293 = sst [smem:[#allocation156_spill]] %s13807_s3 }
   0x5   :  { %14294 = sst [smem:[#allocation157_spill]] %s13808_s4 }
   0x6   :  { %14295 = sst [smem:[#allocation158_spill]] %s13809_s5 }
   0x7   :  { %14296 = sst [smem:[#allocation159_spill]] %s13810_s6 }
   0x8   :  { %14297 = sst [smem:[#allocation160_spill]] %s13811_s7 }
   0x9   :  { %14298 = sst [smem:[#allocation161_spill]] %s13813_s9 }
   0xa   :  { %14 = vsyncpa [#allocation3], 0 }
   0xb   :  { %16 = vsyncpa [#allocation3 + $0x1], 0 }
   0xc   :  { %17 = vsyncpa [#allocation6], 0 }
   0xd   :  { %18 = vsyncpa [#allocation9], 0 }
   0xe   :  { %19 = vsyncpa [#allocation12], 0 }
   0xf   :  { %20 = vsyncpa [#allocation15], 0 }
  0x10   :  { %22 = vsyncpa [#allocation15 + $0x1], 0 }
  0x11   :  { %23 = vsyncpa [#allocation4], 0 }
  0x12   :  { %25 = vsyncpa [#allocation4 + $0x1], 0  ;;  %s7784_s30 = smov 0   ;;  %s7786_s10 = smov 0  }
  0x13   :  { %s7788_s11 = smov 0   ;;  %s7790_s12 = smov 0  }
  0x14   :  { %s7792_s13 = smov 0   ;;  %s7794_s14 = smov 0  }
  0x15   :  { %s7796_s15 = smov 0   ;;  %s7798_s16 = smov 0  }
  0x16   :  { %s7800_s17 = smov 0   ;;  %s7802_s18 = smov 0  }
  0x17   :  { %s7804_s19 = smov 0   ;;  %s7806_s20 = smov 0  }
  0x18   :  { %s7808_s21 = smov 0   ;;  %s7810_s22 = smov 0  }
  0x19 LB: > { %14299 = sst [smem:[#allocation24_spill]] %s7663_s30  ;;  %s7855_s23 = sadd.s32 4294967295, %s7715_s22   ;;  %s7715_s22 = sphi %s7810_s22, %s31_s22   ;;  %s7711_s21 = sphi %s7808_s21, %s15679_s21   ;;  %s7707_s20 = sphi %s7806_s20, %s15678_s20   ;;  %s7703_s19 = sphi %s7804_s19, %s15677_s19   ;;  %s7699_s18 = sphi %s7802_s18, %s15676_s18   ;;  %s7695_s17 = sphi %s7800_s17, %s15675_s17   ;;  %s7691_s16 = sphi %s7798_s16, %s15668_s16   ;;  %s7687_s15 = sphi %s7796_s15, %s15667_s15   ;;  %s7683_s14 = sphi %s7794_s14, %s15674_s14   ;;  %s7679_s13 = sphi %s7792_s13, %s15673_s13   ;;  %s7675_s12 = sphi %s7790_s12, %s15666_s12   ;;  %s7671_s11 = sphi %s7788_s11, %s15672_s11   ;;  %s7667_s10 = sphi %s7786_s10, %s15665_s10   ;;  %s7663_s30 = sphi %s7784_s30, %s15671_s30  }
  0x1a   : > { %14300 = sst [smem:[#allocation25_spill]] %s7667_s10  ;;  %p6256_p0 = scmp.ge.s32.totalorder %s7715_s22, 1 }
  0x1b   : > { %14301 = sst [smem:[#allocation26_spill]] %s7671_s11  ;;  %p13819_p1 = scmp.eq.s32.totalorder %s7855_s23, 0 }
  0x1c   : > { %14302 = sst [smem:[#allocation27_spill]] %s7679_s13  ;;  %p280_p2 = scmp.lt.s32.totalorder %s7715_s22, 5 }
  0x1d   : > { %14303 = sst [smem:[#allocation28_spill]] %s7687_s15  ;;  %s7717_s25 = smov [#allocation5]  }
  0x1e   : > { %14304 = sst [smem:[#allocation29_spill]] %s7691_s16  ;;  %p7860_p3 = pnand %p6256_p0, %p280_p2 }
  0x1f   : > { %14305 = sst [smem:[#allocation30_spill]] %s7695_s17  ;;  %s293_s26 = sshll.u32 %s7717_s25, 4  ;;  %s294_s26 = int_to_ptr.vmem [resolvable:$true] %s293_s26 }
  0x20   : > { %14306 = sst [smem:[#allocation31_spill]] %s7699_s18  ;;  %p7082_p4 = pneg %p7860_p3 }
  0x21   : > { %14307 = sst [smem:[#allocation32_spill]] %s7703_s19  ;;  %s7718_s27 = smov [#allocation8]  }
  0x22   : > { %14308 = sst [smem:[#allocation33_spill]] %s7855_s23  ;;  %s315_s28 = sshll.u32 %s7718_s27, 4  ;;  %s7872_s28 = int_to_ptr.vmem [resolvable:$true] %s315_s28 }
  0x23   : > { %s14309_s24 = scalar_select %p7860_p3, 1, 0 }
  0x24   : > { %p7868_p5 = pnand %p7082_p4, %p13819_p1  ;;  %s7719_s9 = smov [#allocation11]  }
  0x25   : > { %14310 = sst [smem:[#allocation34_spill]] %s14309_s24  ;;  %s337_s19 = sshll.u32 %s7719_s9, 4  ;;  %s7874_s19 = int_to_ptr.vmem [resolvable:$true] %s337_s19 }
  0x26   : > { %s14311_s29 = scalar_select %p7868_p5, 1, 0 }
  0x27   : > { %s14312_s1 = sld [smem:[#allocation154_spill]]  ;;  %p7884_p7 = pneg %p7868_p5 }
  0x2d   : > { %s7295_s25 = scalar_lea.hbm %s14312_s1, 176 }
  0x2e   : > { %p7296_p6 = scmp.ne.s32.totalorder %s14312_s1, %s7295_s25  ;;  %p7302_p10 = scmp.lt.u32.totalorder %s7295_s25, %s14312_s1 }
  0x30   : > { %p7298_p8 = pnand %p7884_p7, %p7296_p6 }
  0x32   : > { %p7299_p9 = pneg %p7298_p8 }
  0x34   : > { %p7304_p11 = pnand %p7302_p10, %p7299_p9 }
  0x36   : > { %7307 = shalt.err (!%p7304_p11)
}
  0x37   : > { %s7308_s0 = scalar_lea.vmem %s294_s26, 176  ;;  %s7315_s30 = scalar_lea.vmem %s294_s26, 192 }
  0x38   : > { %p7309_p12 = scmp.ne.s32.totalorder %s294_s26, %s7308_s0  ;;  %p7316_p2 = scmp.lt.s32.totalorder %s294_s26, %s294_s26 }
  0x39   : > { %p7317_p4 = scmp.lt.s32.totalorder %s7315_s30, %s7308_s0 }
  0x3a   : > { %p7311_p13 = pnand %p7309_p12, %p7884_p7 }
  0x3b   : > { %p7318_p1 = por %p7317_p4, %p7316_p2 }
  0x3c   : > { %p7312_p0 = pneg %p7311_p13 }
  0x3e   : > { %p7319_p3 = pnand %p7318_p1, %p7312_p0 }
  0x40   : > { %7322 = shalt.err (!%p7319_p3)
}
  0x41   : > { %7085 = dma.hbm_to_vmem [thread:$0]  (!%p7868_p5), %s14312_s1, 176, %s294_s26, [#allocation6]  }
  0x42   : > { %s14314_s3 = sld [smem:[#allocation156_spill]] }
  0x48   : > { %s7323_s9 = scalar_lea.hbm %s14314_s3, 704 }
  0x49   : > { %p7324_p6 = scmp.ne.s32.totalorder %s14314_s3, %s7323_s9  ;;  %p7330_p1 = scmp.lt.u32.totalorder %s7323_s9, %s14314_s3 }
  0x4b   : > { %p7326_p8 = pnand %p7324_p6, %p7884_p7 }
  0x4d   : > { %p7327_p9 = pneg %p7326_p8 }
  0x4f   : > { %p7332_p3 = pnand %p7330_p1, %p7327_p9 }
  0x51   : > { %7335 = shalt.err (!%p7332_p3)
}
  0x52   : > { %s7336_s26 = scalar_lea.vmem %s7872_s28, 704  ;;  %p7344_p13 = scmp.lt.s32.totalorder %s7872_s28, %s7872_s28 }
  0x53   : > { %p7337_p10 = scmp.ne.s32.totalorder %s7872_s28, %s7336_s26  ;;  %p7345_p0 = scmp.lt.s32.totalorder %s7336_s26, %s7336_s26 }
  0x55   : > { %p7339_p11 = pnand %p7337_p10, %p7884_p7  ;;  %p7346_p2 = por %p7345_p0, %p7344_p13 }
  0x57   : > { %p7340_p12 = pneg %p7339_p11 }
  0x59   : > { %p7347_p4 = pnand %p7346_p2, %p7340_p12 }
  0x5b   : > { %7350 = shalt.err (!%p7347_p4)
}
  0x5c   : > { %7091 = dma.hbm_to_vmem [thread:$0]  (!%p7868_p5), %s14314_s3, 704, %s7872_s28, [#allocation9]  }
  0x5d   : > { %s14315_s5 = sld [smem:[#allocation158_spill]] }
  0x63   : > { %s7351_s10 = scalar_lea.hbm %s14315_s5, 704 }
  0x64   : > { %p7352_p6 = scmp.ne.s32.totalorder %s14315_s5, %s7351_s10  ;;  %p7358_p1 = scmp.lt.u32.totalorder %s7351_s10, %s14315_s5 }
  0x66   : > { %p7354_p8 = pnand %p7352_p6, %p7884_p7 }
  0x68   : > { %p7355_p9 = pneg %p7354_p8 }
  0x6a   : > { %p7360_p3 = pnand %p7358_p1, %p7355_p9 }
  0x6c   : > { %7363 = shalt.err (!%p7360_p3)
}
  0x6d   : > { %s7364_s28 = scalar_lea.vmem %s7874_s19, 704  ;;  %p7372_p13 = scmp.lt.s32.totalorder %s7874_s19, %s7874_s19 }
  0x6e   : > { %p7365_p10 = scmp.ne.s32.totalorder %s7874_s19, %s7364_s28  ;;  %p7373_p0 = scmp.lt.s32.totalorder %s7364_s28, %s7364_s28 }
  0x70   : > { %p7367_p11 = pnand %p7365_p10, %p7884_p7  ;;  %p7374_p2 = por %p7373_p0, %p7372_p13 }
  0x72   : > { %p7368_p12 = pneg %p7367_p11 }
  0x74   : > { %p7375_p4 = pnand %p7374_p2, %p7368_p12 }
  0x76   : > { %7378 = shalt.err (!%p7375_p4)
}
  0x77   : > { %7097 = dma.hbm_to_vmem [thread:$0]  (!%p7868_p5), %s14315_s5, 704, %s7874_s19, [#allocation12]  }
  0x78   : > { %p13824_p6 = scmp.eq.s32.totalorder %s7715_s22, 0  ;;  %p209_p8 = scmp.ne.s32.totalorder %s7683_s14, %s7679_s13 }
  0x79   : > { %p215_p9 = scmp.ne.s32.totalorder %s7679_s13, %s7675_s12  ;;  %p13823_p1 = scmp.lt.s32.totalorder %s7715_s22, 4 }
  0x7a   : > { %p211_p3 = por %p209_p8, %p13824_p6  ;;  %p14316_p10 = scmp.eq.s32.totalorder %s7855_s23, 0 }
  0x7b   : > { %s380_s24 = sand.u32 1, %s7715_s22   ;;  %s382_s10 = sand.u32 1, %s7683_s14  }
  0x7c   : > { %p7957_p11 = por %p215_p9, %p14316_p10  ;;  %s6267_s25 = sshll.u32 %s382_s10, 7 }
  0x7d   : > { %s13822_s9 = sshll.u32 %s7711_s21, 7  ;;  %s14319_s7 = sld [smem:[#allocation160_spill]] }
  0x7e   : > { %s14317_s18 = scalar_select %p7957_p11, 1, 0 }
  0x7f   : > { %s384_s12 = scalar_lea.vmem [#allocation14], %s6267_s25  ;;  %p7973_p12 = pnand %p13823_p1, %p211_p3 }
  0x80   : > { %14318 = sst [smem:[#allocation35_spill]] %s14317_s18  ;;  %s390_s28 = sshll.u32 %s384_s12, 4  ;;  %s7977_s28 = int_to_ptr.vmem [resolvable:$true] %s390_s28 }
  0x81   : > { %s14320_s26 = scalar_select %p7973_p12, 1, 0 }
  0x82   : > { %s7979_s11 = sshll.u32 %s382_s10, 10  ;;  %s7981_s0 = scalar_lea.sflag [#allocation15], %s380_s24 }
  0x83   : > { %s7969_s19 = scalar_lea.hbm %s14319_s7, %s13822_s9  ;;  %14321 = sst [smem:[#allocation36_spill]] %s14320_s26 }
  0x84   : > { %s7379_s30 = scalar_lea.hbm %s7969_s19, 2048  ;;  %p13838_p0 = pneg %p7973_p12 }
  0x85   : > { %p7380_p13 = scmp.ne.s32.totalorder %s7969_s19, %s7379_s30  ;;  %s7384_s15 = scalar_lea.hbm %s14319_s7, 4096 }
  0x86   : > { %p7385_p8 = scmp.lt.u32.totalorder %s7969_s19, %s14319_s7  ;;  %p7386_p9 = scmp.lt.u32.totalorder %s7384_s15, %s7379_s30 }
  0x87   : > { %p7382_p2 = pnand %p13838_p0, %p7380_p13  ;;  %p7388_p10 = scmp.lt.u32.totalorder %s7379_s30, %s7969_s19 }
  0x88   : > { %p7387_p3 = por %p7386_p9, %p7385_p8 }
  0x89   : > { %p7383_p4 = pneg %p7382_p2 }
  0x8a   : > { %p7389_p1 = por %p7388_p10, %p7387_p3 }
  0x8c   : > { %p7390_p6 = pnand %p7389_p1, %p7383_p4 }
  0x8e   : > { %7393 = shalt.err (!%p7390_p6)
}
  0x8f   : > { %s7394_s24 = scalar_lea.vmem %s7977_s28, 2048  ;;  %s7720_s10 = smov [#allocation14]  }
  0x90   : > { %p7395_p13 = scmp.ne.s32.totalorder %s7977_s28, %s7394_s24  ;;  %s7399_s25 = sshll.u32 %s7720_s10, 4  ;;  %s7400_s25 = int_to_ptr.vmem [resolvable:$false] %s7399_s25 }
  0x91   : > { %s7401_s1 = scalar_lea.vmem %s7400_s25, 4096  ;;  %p7402_p5 = scmp.lt.s32.totalorder %s7977_s28, %s7400_s25 }
  0x92   : > { %p7397_p2 = pnand %p7395_p13, %p13838_p0  ;;  %p7403_p8 = scmp.lt.s32.totalorder %s7401_s1, %s7394_s24 }
  0x94   : > { %p7398_p11 = pneg %p7397_p2  ;;  %p7404_p9 = por %p7403_p8, %p7402_p5 }
  0x96   : > { %p7405_p3 = pnand %p7404_p9, %p7398_p11 }
  0x98   : > { %7408 = shalt.err (!%p7405_p3)
}
  0x99   : > { %s13841_s15 = smov 256   ;;  %s13842_s9 = smov 128  }
  0x9a   : > { %s13844_s30 = smov 8   ;;  %s202_s12 = sadd.s32 1, %s7683_s14 }
  0x9b   : > { %7107 = dma.hbm_to_vmem [thread:$0]  (!%p7973_p12), %s7969_s19, 2048, %s7977_s28, %s7981_s0, %s13841_s15, %s13842_s9, %s13844_s30  }
  0x9c   : > { %s14322_s24 = sshll.u32 %s7711_s21, 7  ;;  %s404_s3 = scalar_lea.vmem [#allocation16], %s7979_s11 }
  0x9d   : > { %s8018_s1 = scalar_lea.hbm %s13812_s8, %s14322_s24  ;;  %s8021_s5 = sshll.u32 %s404_s3, 4  ;;  %s8148_s5 = int_to_ptr.vmem [resolvable:$true] %s8021_s5 }
  0x9e   : > { %s7724_s7 = smov [#allocation7]   ;;  %s14323_s2 = sld [smem:[#allocation155_spill]] }
  0x9f   : > { %s304_s18 = sshll.u32 %s7724_s7, 4  ;;  %s305_s18 = int_to_ptr.vmem [resolvable:$true] %s304_s18 }
  0xa4   : > { %s7409_s26 = scalar_lea.hbm %s14323_s2, 176 }
  0xa5   : > { %p7410_p5 = scmp.ne.s32.totalorder %s14323_s2, %s7409_s26  ;;  %p7416_p11 = scmp.lt.u32.totalorder %s7409_s26, %s14323_s2 }
  0xa7   : > { %p7412_p6 = pnand %p7410_p5, %p7884_p7 }
  0xa9   : > { %p7413_p1 = pneg %p7412_p6 }
  0xab   : > { %p7418_p4 = pnand %p7416_p11, %p7413_p1 }
  0xad   : > { %7421 = shalt.err (!%p7418_p4)
}
  0xae   : > { %s7422_s3 = scalar_lea.vmem %s305_s18, 176  ;;  %s7429_s7 = scalar_lea.vmem %s305_s18, 192 }
  0xaf   : > { %p7423_p10 = scmp.ne.s32.totalorder %s305_s18, %s7422_s3  ;;  %p7430_p8 = scmp.lt.s32.totalorder %s305_s18, %s305_s18 }
  0xb0   : > { %p7431_p9 = scmp.lt.s32.totalorder %s7429_s7, %s7422_s3 }
  0xb1   : > { %p7425_p13 = pnand %p7423_p10, %p7884_p7 }
  0xb2   : > { %p7432_p3 = por %p7431_p9, %p7430_p8 }
  0xb3   : > { %p7426_p2 = pneg %p7425_p13 }
  0xb5   : > { %p7433_p0 = pnand %p7432_p3, %p7426_p2 }
  0xb7   : > { %7436 = shalt.err (!%p7433_p0)
}
  0xb8   : > { %p14324_p5 = scmp.ne.s32.totalorder %s14311_s29, 0  ;;  %s7725_s17 = smov [#allocation10]  }
  0xb9   : > { %s326_s23 = sshll.u32 %s7725_s17, 4  ;;  %s7726_s26 = smov [#allocation13]   ;;  %s327_s23 = int_to_ptr.vmem [resolvable:$true] %s326_s23 }
  0xba   : > { %7088 = dma.hbm_to_vmem [thread:$0]  (!%p14324_p5), %s14323_s2, 176, %s305_s18, [#allocation6]  }
  0xbb   : > { %s348_s11 = sshll.u32 %s7726_s26, 4  ;;  %s14325_s4 = sld [smem:[#allocation157_spill]]  ;;  %s349_s11 = int_to_ptr.vmem [resolvable:$true] %s348_s11 }
  0xc1   : > { %s7437_s25 = scalar_lea.hbm %s14325_s4, 704 }
  0xc2   : > { %p7438_p0 = scmp.ne.s32.totalorder %s14325_s4, %s7437_s25  ;;  %p7444_p11 = scmp.lt.u32.totalorder %s7437_s25, %s14325_s4 }
  0xc4   : > { %p7440_p6 = pnand %p7438_p0, %p7884_p7 }
  0xc6   : > { %p7441_p1 = pneg %p7440_p6 }
  0xc8   : > { %p7446_p4 = pnand %p7444_p11, %p7441_p1 }
  0xca   : > { %7449 = shalt.err (!%p7446_p4)
}
  0xcb   : > { %s7450_s18 = scalar_lea.vmem %s327_s23, 704  ;;  %p7458_p8 = scmp.lt.s32.totalorder %s327_s23, %s327_s23 }
  0xcc   : > { %p7451_p10 = scmp.ne.s32.totalorder %s327_s23, %s7450_s18  ;;  %p7459_p9 = scmp.lt.s32.totalorder %s7450_s18, %s7450_s18 }
  0xce   : > { %p7453_p13 = pnand %p7451_p10, %p7884_p7  ;;  %p7460_p3 = por %p7459_p9, %p7458_p8 }
  0xd0   : > { %p7454_p2 = pneg %p7453_p13 }
  0xd2   : > { %p7461_p12 = pnand %p7460_p3, %p7454_p2 }
  0xd4   : > { %7464 = shalt.err (!%p7461_p12)
}
  0xd5   : > { %7094 = dma.hbm_to_vmem [thread:$0]  (!%p14324_p5), %s14325_s4, 704, %s327_s23, [#allocation9]  }
  0xd6   : > { %s14326_s6 = sld [smem:[#allocation159_spill]] }
  0xdc   : > { %s7465_s24 = scalar_lea.hbm %s14326_s6, 704 }
  0xdd   : > { %p7466_p0 = scmp.ne.s32.totalorder %s14326_s6, %s7465_s24  ;;  %p7472_p12 = scmp.lt.u32.totalorder %s7465_s24, %s14326_s6 }
  0xdf   : > { %p7468_p6 = pnand %p7466_p0, %p7884_p7 }
  0xe1   : > { %p7469_p1 = pneg %p7468_p6 }
  0xe3   : > { %p7474_p11 = pnand %p7472_p12, %p7469_p1 }
  0xe5   : > { %7477 = shalt.err (!%p7474_p11)
}
  0xe6   : > { %s7478_s3 = scalar_lea.vmem %s349_s11, 704  ;;  %p7486_p2 = scmp.lt.s32.totalorder %s349_s11, %s349_s11 }
  0xe7   : > { %p7479_p4 = scmp.ne.s32.totalorder %s349_s11, %s7478_s3  ;;  %p7487_p8 = scmp.lt.s32.totalorder %s7478_s3, %s7478_s3 }
  0xe9   : > { %p7481_p10 = pnand %p7479_p4, %p7884_p7  ;;  %p7488_p9 = por %p7487_p8, %p7486_p2 }
  0xeb   : > { %p7482_p13 = pneg %p7481_p10 }
  0xed   : > { %p7489_p3 = pnand %p7488_p9, %p7482_p13 }
  0xef   : > { %7492 = shalt.err (!%p7489_p3)
}
  0xf0   : > { %s14327_s18 = sld [smem:[#allocation30_spill]]  ;;  %s14328_s13 = sld [smem:[#allocation29_spill]] }
  0xf1   : > { %s14329_s16 = sld [smem:[#allocation28_spill]]  ;;  %s14330_s27 = sld [smem:[#allocation26_spill]] }
  0xf2   : > { %s14331_s17 = sld [smem:[#allocation33_spill]]  ;;  %s14332_s26 = sld [smem:[#allocation25_spill]] }
  0xf3   : > { %7100 = dma.hbm_to_vmem [thread:$0]  (!%p14324_p5), %s14326_s6, 704, %s349_s11, [#allocation12]  }
  0xf4   : > { %s6255_s29 = sadd.s32 4294967294, %s7715_s22   ;;  %s40_s24 = sadd.s32 1, %s7707_s20 }
  0xf5   : > { %p41_p7 = scmp.ge.s32.totalorder %s40_s24, 2  ;;  %s14333_s19 = sadd.s32 1, %s7711_s21 }
  0xf6   : > { %s50_s10 = sadd.s32 1, %s14327_s18  ;;  %p57_p0 = scmp.ne.s32.totalorder %s14327_s18, %s14328_s13 }
  0xf7   : > { %p63_p6 = scmp.ne.s32.totalorder %s14328_s13, %s14329_s16  ;;  %s256_s25 = sadd.s32 1, %s14330_s27 }
  0xf8   : > { %s15681_s24 = smov (%p41_p7, %s40_s24), 0  ;;  %s15683_s19 = smov (!%p41_p7, %s14333_s19), %s7711_s21 }
  0xf9   : > { %s47_s28 = ssub.s32 %s7707_s20, %s15681_s24  ;;  %p14334_p5 = scmp.eq.s32.totalorder %s7715_s22, 0 }
  0xfa   : > { %s14335_s11 = sld [smem:[#allocation24_spill]]  ;;  %p45_p12 = scmp.ge.s32.totalorder %s15683_s19, 2 }
  0xfb   : > { %p8094_p1 = por %p14334_p5, %p57_p0  ;;  %p48_p11 = scmp.eq.s32.totalorder %s47_s28, 0 }
  0xfc   : > { %p14337_p4 = scmp.eq.s32.totalorder %s14331_s17, 0  ;;  %p266_p13 = scmp.ne.s32.totalorder %s14330_s27, %s14332_s26 }
  0xfd   : > { %s15685_s19 = smov (%p45_p12, %s15683_s19), 0  ;;  %p267_p2 = scmp.eq.s32.totalorder %s14331_s17, 3 }
  0xfe   : > { %p8100_p10 = por %p14337_p4, %p63_p6  ;;  %s199_s13 = ssub.s32 %s7711_s21, %s15685_s19 }
  0xff   : > { %s8109_s7 = scalar_select %p48_p11, %s14327_s18, %s50_s10  }
 0x100   : > { %p200_p8 = scmp.eq.s32.totalorder %s199_s13, 0  ;;  %s253_s16 = sor.u32 %s199_s13, %s47_s28 }
 0x101   : > { %p254_p9 = scmp.eq.s32.totalorder %s253_s16, 0  ;;  %p8114_p3 = por %p267_p2, %p266_p13 }
 0x102   : > { %s8121_s9 = scalar_select %p200_p8, %s7683_s14, %s202_s12  }
 0x103   : > { %s14339_s15 = scalar_select %p8114_p3, 1, 0 }
 0x104   : > { %s15687_s27 = smov (!%p254_p9, %s14330_s27), %s256_s25  ;;  %p272_p7 = scmp.ne.s32.totalorder %s14332_s26, %s14335_s11 }
 0x105   : > { %p273_p0 = scmp.eq.s32.totalorder %s6255_s29, 3  ;;  %s359_s10 = sand.u32 1, %s14327_s18  }
 0x106   : > { %s6464_s30 = sshll.u32 %s7707_s20, 11  ;;  %s6264_s17 = sshll.u32 %s359_s10, 7 }
 0x107   : > { %p8130_p6 = por %p273_p0, %p272_p7  ;;  %s14341_s16 = sld [smem:[#allocation153_spill]] }
 0x108   : > { %p14343_p5 = scmp.lt.s32.totalorder %s7715_s22, 4  ;;  %s363_s18 = scalar_lea.vmem [#allocation2], %s6264_s17 }
 0x109   : > { %s14340_s2 = scalar_select %p8130_p6, 1, 0 }
 0x10a   : > { %p8143_p12 = pnand %p14343_p5, %p8094_p1  ;;  %s370_s26 = sshll.u32 %s363_s18, 4  ;;  %s8150_s26 = int_to_ptr.vmem [resolvable:$true] %s370_s26 }
 0x10c   : > { %p7495_p4 = pneg %p8143_p12 }
 0x10d   : > { %s14342_s4 = smov %s14341_s16  ;;  %s8137_s6 = scalar_lea.hbm %s14341_s16, %s6464_s30 }
 0x10e   : > { %s8152_s30 = scalar_lea.sflag [#allocation3], %s359_s10  ;;  %s7493_s29 = scalar_lea.hbm %s8137_s6, 2048 }
 0x10f   : > { %p7494_p11 = scmp.ne.s32.totalorder %s8137_s6, %s7493_s29  ;;  %s7498_s3 = scalar_lea.hbm %s14342_s4, 4096 }
 0x110   : > { %p7499_p2 = scmp.lt.u32.totalorder %s8137_s6, %s14342_s4  ;;  %p7500_p8 = scmp.lt.u32.totalorder %s7498_s3, %s7493_s29 }
 0x111   : > { %p7496_p1 = pnand %p7495_p4, %p7494_p11  ;;  %p7502_p7 = scmp.lt.u32.totalorder %s7493_s29, %s8137_s6 }
 0x112   : > { %p7501_p9 = por %p7500_p8, %p7499_p2 }
 0x113   : > { %p7497_p13 = pneg %p7496_p1 }
 0x114   : > { %p7503_p0 = por %p7502_p7, %p7501_p9 }
 0x116   : > { %p7504_p5 = pnand %p7503_p0, %p7497_p13 }
 0x118   : > { %7507 = shalt.err (!%p7504_p5)
}
 0x119   : > { %s7508_s10 = scalar_lea.vmem %s8150_s26, 2048  ;;  %s7727_s17 = smov [#allocation2]  }
 0x11a   : > { %p7509_p11 = scmp.ne.s32.totalorder %s8150_s26, %s7508_s10  ;;  %s7513_s16 = sshll.u32 %s7727_s17, 4  ;;  %s7514_s16 = int_to_ptr.vmem [resolvable:$false] %s7513_s16 }
 0x11b   : > { %s7515_s18 = scalar_lea.vmem %s7514_s16, 4096  ;;  %p7516_p3 = scmp.lt.s32.totalorder %s8150_s26, %s7514_s16 }
 0x11c   : > { %p7511_p1 = pnand %p7509_p11, %p7495_p4  ;;  %p7517_p2 = scmp.lt.s32.totalorder %s7515_s18, %s7508_s10 }
 0x11e   : > { %p7512_p6 = pneg %p7511_p1  ;;  %p7518_p8 = por %p7517_p2, %p7516_p3 }
 0x120   : > { %p7519_p9 = pnand %p7518_p8, %p7512_p6 }
 0x122   : > { %7522 = shalt.err (!%p7519_p9)
}
 0x123   : > { %s14345_s29 = smov 8   ;;  %s14346_s25 = smov 128  }
 0x124   : > { %s14347_s11 = sld [smem:[#allocation36_spill]]  ;;  %s7523_s3 = scalar_lea.hbm %s8018_s1, 16384 }
 0x125   : > { %7104 = dma.hbm_to_vmem [thread:$0]  (!%p8143_p12), %s8137_s6, 2048, %s8150_s26, %s8152_s30, %s14346_s25, %s14346_s25, %s14345_s29  }
 0x126   : > { %p7524_p4 = scmp.ne.s32.totalorder %s8018_s1, %s7523_s3  ;;  %s7528_s13 = scalar_lea.hbm %s13812_s8, 32768 }
 0x127   : > { %p7529_p0 = scmp.lt.u32.totalorder %s8018_s1, %s13812_s8  ;;  %p7530_p5 = scmp.lt.u32.totalorder %s7528_s13, %s7523_s3 }
 0x128   : > { %p7532_p1 = scmp.lt.u32.totalorder %s7523_s3, %s8018_s1 }
 0x129   : > { %p7531_p11 = por %p7530_p5, %p7529_p0 }
 0x12a   : > { %p14348_p13 = scmp.ne.s32.totalorder %s14347_s11, 0 }
 0x12b   : > { %p7533_p2 = por %p7532_p1, %p7531_p11 }
 0x12c   : > { %p14349_p3 = pneg %p14348_p13 }
 0x12e   : > { %p7526_p6 = pnand %p7524_p4, %p14349_p3 }
 0x130   : > { %p7527_p7 = pneg %p7526_p6 }
 0x132   : > { %p7534_p8 = pnand %p7533_p2, %p7527_p7 }
 0x134   : > { %7537 = shalt.err (!%p7534_p8)
}
 0x135   : > { %s7538_s6 = scalar_lea.vmem %s8148_s5, 16384  ;;  %p14350_p9 = pmov %p14349_p3 }
 0x136   : > { %p7539_p12 = scmp.ne.s32.totalorder %s8148_s5, %s7538_s6  ;;  %s7728_s26 = smov [#allocation16]  }
 0x137   : > { %s7543_s30 = sshll.u32 %s7728_s26, 4  ;;  %s7544_s30 = int_to_ptr.vmem [resolvable:$false] %s7543_s30 }
 0x138   : > { %p7541_p4 = pnand %p7539_p12, %p14350_p9  ;;  %s7545_s16 = scalar_lea.vmem %s7544_s30, 32768 }
 0x139   : > { %p7546_p6 = scmp.lt.s32.totalorder %s8148_s5, %s7544_s30  ;;  %p7547_p0 = scmp.lt.s32.totalorder %s7545_s16, %s7538_s6 }
 0x13a   : > { %p7542_p3 = pneg %p7541_p4 }
 0x13b   : > { %p7548_p5 = por %p7547_p0, %p7546_p6 }
 0x13d   : > { %p7549_p11 = pnand %p7548_p5, %p7542_p3 }
 0x13f   : > { %7552 = shalt.err (!%p7549_p11)
}
 0x140   : > { %s14351_s18 = smov 256   ;;  %s14352_s3 = sld [smem:[#allocation34_spill]] }
 0x141   : > { %7110 = dma.hbm_to_vmem [thread:$0]  (!%p14348_p13), %s8018_s1, 16384, %s8148_s5, %s7981_s0, %s14351_s18, %s14346_s25, %s14345_s29  }
 0x146   : > { %p14353_p7 = scmp.ne.s32.totalorder %s14352_s3, 0 }
 0x148   : > { %422 = sbr.rel (%p14353_p7) target bundleno = 1603 (0x643), region = 56 }
 0x14f   : > { %s14354_s28 = sld [smem:[#allocation29_spill]] }
 0x155   : > { %s424_s12 = sand.u32 1, %s14354_s28  }
 0x156   : > { %s6272_s13 = sshll.u32 %s424_s12, 7  ;;  %s425_s10 = scalar_lea.sflag [#allocation3], %s424_s12 }
 0x157   : > { %s8213_s17 = scalar_lea.vmem [#allocation2], %s6272_s13 }
 0x158   : > { %7638 = dma.done.wait (%p8100_p10), %s425_s10, 2048  }
 0x159   : > { %7640 = vsyncadd (%p8100_p10), %s425_s10, 4294965248  ;;  %s14355_s11 = sld [smem:[#allocation33_spill]] }
 0x15f   : > { %p14356_p1 = scmp.eq.s32.totalorder %s14355_s11, 0 }
 0x161   : > { %7642 = dma.done.wait (%p14356_p1), [#allocation6], 352   ;;  %p14357_p13 = pmov %p14356_p1 }
 0x162   : > { %p14358_p2 = pmov %p14356_p1 }
 0x163   : > { %7644 = vsyncadd (%p14357_p13), [#allocation6], 4294966944 }
 0x164   : > { %7646 = dma.done.wait (%p14358_p2), [#allocation9], 1408   ;;  %p14359_p8 = pmov %p14356_p1 }
 0x165   : > { %p14360_p12 = pmov %p14356_p1 }
 0x166   : > { %7648 = vsyncadd (%p14359_p8), [#allocation9], 4294965888 }
 0x167   : > { %7650 = dma.done.wait (%p14360_p12), [#allocation12], 1408   ;;  %p14361_p9 = pmov %p14356_p1 }
 0x168   : > { %s14362_s5 = sld [smem:[#allocation27_spill]]  ;;  %s14363_s0 = sld [smem:[#allocation35_spill]] }
 0x169   : > { %7652 = vsyncadd (%p14361_p9), [#allocation12], 4294965888  ;;  %s457_s1 = sand.u32 1, %s14355_s11  }
 0x16a   : > { %s458_s25 = scalar_lea.sflag [#allocation15], %s457_s1 }
 0x16e   : > { %s459_s23 = sand.u32 1, %s14362_s5   ;;  %p14364_p10 = scmp.ne.s32.totalorder %s14363_s0, 0 }
 0x16f   : > { %s6279_s29 = sshll.u32 %s459_s23, 7 }
 0x170   : > { %s8233_s6 = scalar_lea.vmem [#allocation14], %s6279_s29 }
 0x171   : > { %7654 = dma.done.wait (%p14364_p10), %s458_s25, 18432  }
 0x172   : > { %7656 = vsyncadd (%p14364_p10), %s458_s25, 4294948864  ;;  %s6280_s26 = sshll.u32 %s459_s23, 10  ;;  %v569_v43 = vlaneseq  ;;  %s15656_s16 = sld [smem:[#allocation25_spill]] }
 0x173   : > { %s8239_s30 = scalar_lea.vmem [#allocation16], %s6280_s26  ;;  %s15657_s28 = sld [smem:[#allocation31_spill]] }
 0x174   : > { %v5199_v0 = vld [vmem:[%s8239_s30 + $0x80] sm:$0xff]  ;;  %v5200_v1 = vld [vmem:[%s8239_s30 + $0x88] sm:$0xff]  ;;  %v5201_v11 = vld [vmem:[%s8239_s30 + $0x90] sm:$0xff]  ;;  %v8283_v60 = vshrl.u32 %v569_v43, 7  ;;  %s15658_s13 = sld [smem:[#allocation32_spill]]  ;;  %s15659_s23 = sld [smem:[#allocation161_spill]] }
 0x175   : > { %v5231_v2 = vld [vmem:[%s8239_s30 + $0x180] sm:$0xff]  ;;  %v6874_v3 = vpack.c.bf16 %v5200_v1, %v5199_v0  ;;  %v5232_v4 = vld [vmem:[%s8239_s30 + $0x188] sm:$0xff]  ;;  %v5202_v13 = vld [vmem:[%s8239_s30 + $0x98] sm:$0xff]  ;;  %p15660_p3 = scmp.ne.s32.totalorder %s14339_s15, 0  ;;  %s7730_s26 = smov [#allocation17]  }
 0x176   : > { %v5183_v5 = vld [vmem:[%s8239_s30] sm:$0xff]  ;;  %v5184_v6 = vld [vmem:[%s8239_s30 + $0x8] sm:$0xff]  ;;  %v6906_v7 = vpack.c.bf16 %v5232_v4, %v5231_v2  ;;  %v5233_v14 = vld [vmem:[%s8239_s30 + $0x190] sm:$0xff]  ;;  %v6878_v16 = vpack.c.bf16 %v5202_v13, %v5201_v11  ;;  %v8308_v13 = vsub.s32 0, %v8283_v60 }
 0x177   : > { %v6876_v8 = vpack.c.bf16 %v5184_v6, %v5183_v5  ;;  %v5215_v9 = vld [vmem:[%s8239_s30 + $0x100] sm:$0xff]  ;;  %v5216_v10 = vld [vmem:[%s8239_s30 + $0x108] sm:$0xff]  ;;  %6875 = vmatprep.subr.bf16.mxu0 %v6874_v3  ;;  %v5234_v15 = vld [vmem:[%s8239_s30 + $0x198] sm:$0xff] }
 0x178   : > { %v6908_v12 = vpack.c.bf16 %v5216_v10, %v5215_v9  ;;  %6907 = vmatprep.subr.bf16.mxu1 %v6906_v7  ;;  %v6910_v17 = vpack.c.bf16 %v5234_v15, %v5233_v14  ;;  %v5185_v18 = vld [vmem:[%s8239_s30 + $0x10] sm:$0xff]  ;;  %v5186_v19 = vld [vmem:[%s8239_s30 + $0x18] sm:$0xff]  ;;  %v5203_v23 = vld [vmem:[%s8239_s30 + $0xa0] sm:$0xff]  ;;  %14365 = vst [vmem:[#allocation37_spill] sm:$0xff] %v8308_v13  ;;  %s512_s18 = sand.u32 1, %s15656_s16  }
 0x179   : > { %6877 = vmatpush3.bf16.msra.mxu0 %v6876_v8  ;;  %v5217_v20 = vld [vmem:[%s8239_s30 + $0x110] sm:$0xff]  ;;  %v6880_v21 = vpack.c.bf16 %v5186_v19, %v5185_v18  ;;  %v5218_v22 = vld [vmem:[%s8239_s30 + $0x118] sm:$0xff]  ;;  %v5204_v24 = vld [vmem:[%s8239_s30 + $0xa8] sm:$0xff]  ;;  %v8320_v18 = vsub.s32 1, %v8283_v60  ;;  %v8323_v19 = vsub.s32 2, %v8283_v60  ;;  %s6281_s3 = sshll.u32 %s512_s18, 7 }
 0x17a   : > { %6909 = vmatpush3.bf16.msra.mxu1 %v6908_v12  ;;  %6879 = vmatprep.subr.bf16.mxu0 %v6878_v16  ;;  %v6912_v25 = vpack.c.bf16 %v5218_v22, %v5217_v20  ;;  %v6882_v26 = vpack.c.bf16 %v5204_v24, %v5203_v23  ;;  %v5235_v27 = vld [vmem:[%s8239_s30 + $0x1a0] sm:$0xff]  ;;  %v5236_v28 = vld [vmem:[%s8239_s30 + $0x1a8] sm:$0xff]  ;;  %v5205_v35 = vld [vmem:[%s8239_s30 + $0xb0] sm:$0xff]  ;;  %v8326_v20 = vsub.s32 3, %v8283_v60  ;;  %s13688_s12 = scalar_lea.vmem [#allocation17], %s6281_s3  ;;  %s6465_s10 = sshll.u32 %s15657_s28, 5 }
 0x17b   : > { %6911 = vmatprep.subr.bf16.mxu1 %v6910_v17  ;;  %v5187_v29 = vld [vmem:[%s8239_s30 + $0x20] sm:$0xff]  ;;  %v6914_v30 = vpack.c.bf16 %v5236_v28, %v5235_v27  ;;  %v5188_v31 = vld [vmem:[%s8239_s30 + $0x28] sm:$0xff]  ;;  %v5206_v36 = vld [vmem:[%s8239_s30 + $0xb8] sm:$0xff]  ;;  %14366 = vst [vmem:[#allocation38_spill] sm:$0xff] %v8320_v18  ;;  %v8343_v27 = vsub.s32 5, %v8283_v60  ;;  %s6068_s5 = sshll.u32 %s13688_s12, 4  ;;  %s13721_s5 = int_to_ptr.vmem [resolvable:$true] %s6068_s5 }
 0x17c   : > { %v5219_v32 = vld [vmem:[%s8239_s30 + $0x120] sm:$0xff]  ;;  %v5220_v33 = vld [vmem:[%s8239_s30 + $0x128] sm:$0xff]  ;;  %v6884_v34 = vpack.c.bf16 %v5188_v31, %v5187_v29  ;;  %v5237_v37 = vld [vmem:[%s8239_s30 + $0x1b0] sm:$0xff]  ;;  %v6886_v39 = vpack.c.bf16 %v5206_v36, %v5205_v35  ;;  %14367 = vst [vmem:[#allocation39_spill] sm:$0xff] %v8323_v19  ;;  %s13728_s25 = scalar_lea.sflag [#allocation4], %s512_s18 }
 0x17d   : > { %6881 = vmatpush3.bf16.msra.mxu0 %v6880_v21  ;;  %v6916_v38 = vpack.c.bf16 %v5220_v33, %v5219_v32  ;;  %v5238_v40 = vld [vmem:[%s8239_s30 + $0x1b8] sm:$0xff]  ;;  %v5189_v41 = vld [vmem:[%s8239_s30 + $0x30] sm:$0xff]  ;;  %v5207_v47 = vld [vmem:[%s8239_s30 + $0xc0] sm:$0xff]  ;;  %14368 = vst [vmem:[#allocation40_spill] sm:$0xff] %v8343_v27 }
 0x17e   : > { %6913 = vmatpush3.bf16.msra.mxu1 %v6912_v25  ;;  %6883 = vmatprep.subr.bf16.mxu0 %v6882_v26  ;;  %v5190_v42 = vld [vmem:[%s8239_s30 + $0x38] sm:$0xff]  ;;  %v6918_v44 = vpack.c.bf16 %v5238_v40, %v5237_v37  ;;  %v5221_v45 = vld [vmem:[%s8239_s30 + $0x130] sm:$0xff]  ;;  %v5208_v48 = vld [vmem:[%s8239_s30 + $0xc8] sm:$0xff]  ;;  %v8340_v26 = vsub.s32 4, %v8283_v60 }
 0x17f   : > { %6915 = vmatprep.subr.bf16.mxu1 %v6914_v30  ;;  %v5222_v46 = vld [vmem:[%s8239_s30 + $0x138] sm:$0xff]  ;;  %v5239_v49 = vld [vmem:[%s8239_s30 + $0x1c0] sm:$0xff]  ;;  %v5240_v50 = vld [vmem:[%s8239_s30 + $0x1c8] sm:$0xff]  ;;  %v6888_v51 = vpack.c.bf16 %v5190_v42, %v5189_v41  ;;  %v6890_v56 = vpack.c.bf16 %v5208_v48, %v5207_v47  ;;  %v8374_v41 = vsub.s32 6, %v8283_v60 }
 0x180   : > { %v5191_v52 = vld [vmem:[%s8239_s30 + $0x40] sm:$0xff]  ;;  %v5192_v53 = vld [vmem:[%s8239_s30 + $0x48] sm:$0xff]  ;;  %v6920_v55 = vpack.c.bf16 %v5222_v46, %v5221_v45  ;;  %v5209_v58 = vld [vmem:[%s8239_s30 + $0xd0] sm:$0xff]  ;;  %v6922_v61 = vpack.c.bf16 %v5240_v50, %v5239_v49 }
 0x181   : > { %6885 = vmatpush3.bf16.msra.mxu0 %v6884_v34  ;;  %v5223_v54 = vld [vmem:[%s8239_s30 + $0x140] sm:$0xff]  ;;  %v5224_v57 = vld [vmem:[%s8239_s30 + $0x148] sm:$0xff]  ;;  %v5210_v59 = vld [vmem:[%s8239_s30 + $0xd8] sm:$0xff]  ;;  %v6892_v4 = vpack.c.bf16 %v5192_v53, %v5191_v52  ;;  %14369 = vst [vmem:[#allocation41_spill] sm:$0xff] %v8374_v41 }
 0x182   : > { %6917 = vmatpush3.bf16.msra.mxu1 %v6916_v38  ;;  %6887 = vmatprep.subr.bf16.mxu0 %v6886_v39  ;;  %v5241_v62 = vld [vmem:[%s8239_s30 + $0x1d0] sm:$0xff]  ;;  %v5242_v63 = vld [vmem:[%s8239_s30 + $0x1d8] sm:$0xff]  ;;  %v5211_v5 = vld [vmem:[%s8239_s30 + $0xe0] sm:$0xff]  ;;  %v6924_v8 = vpack.c.bf16 %v5224_v57, %v5223_v54  ;;  %v6894_v9 = vpack.c.bf16 %v5210_v59, %v5209_v58  ;;  %v8429_v54 = vsub.s32 7, %v8283_v60  ;;  %v13847_v58 = vmov 0.0  }
 0x183   : > { %6919 = vmatprep.subr.bf16.mxu1 %v6918_v44  ;;  %v5193_v0 = vld [vmem:[%s8239_s30 + $0x50] sm:$0xff]  ;;  %v5194_v1 = vld [vmem:[%s8239_s30 + $0x58] sm:$0xff]  ;;  %v5212_v6 = vld [vmem:[%s8239_s30 + $0xe8] sm:$0xff]  ;;  %v6926_v14 = vpack.c.bf16 %v5242_v63, %v5241_v62 }
 0x184   : > { %v8290_v2 = vld [vmem:[%s8239_s30 + $0x150] sm:$0xff]  ;;  %v8293_v3 = vld [vmem:[%s8239_s30 + $0x158] sm:$0xff]  ;;  %v8298_v7 = vld [vmem:[%s8239_s30 + $0x1e0] sm:$0xff]  ;;  %v6896_v21 = vpack.c.bf16 %v5194_v1, %v5193_v0  ;;  %v6898_v28 = vpack.c.bf16 %v5212_v6, %v5211_v5  ;;  %14370 = vst [vmem:[#allocation42_spill] sm:$0xff] %v8429_v54 }
 0x185   : > { %6889 = vmatpush3.bf16.msra.mxu0 %v6888_v51  ;;  %v5244_v10 = vld [vmem:[%s8239_s30 + $0x1e8] sm:$0xff]  ;;  %v8302_v11 = vld [vmem:[%s8239_s30 + $0x60] sm:$0xff]  ;;  %v8317_v17 = vld [vmem:[%s8239_s30 + $0xf0] sm:$0xff]  ;;  %v6928_v22 = vpack.c.bf16 %v8293_v3, %v8290_v2 }
 0x186   : > { %6921 = vmatpush3.bf16.msra.mxu1 %v6920_v55  ;;  %6891 = vmatprep.subr.bf16.mxu0 %v6890_v56  ;;  %v8305_v12 = vld [vmem:[%s8239_s30 + $0x68] sm:$0xff]  ;;  %v8311_v15 = vld [vmem:[%s8239_s30 + $0x160] sm:$0xff]  ;;  %v8331_v23 = vld [vmem:[%s8239_s30 + $0xf8] sm:$0xff]  ;;  %v6930_v29 = vpack.c.bf16 %v5244_v10, %v8298_v7 }
 0x187   : > { %6923 = vmatprep.subr.bf16.mxu1 %v6922_v61  ;;  %v8314_v16 = vld [vmem:[%s8239_s30 + $0x168] sm:$0xff]  ;;  %v8334_v24 = vld [vmem:[%s8239_s30 + $0x1f0] sm:$0xff]  ;;  %v8337_v25 = vld [vmem:[%s8239_s30 + $0x1f8] sm:$0xff]  ;;  %v6900_v30 = vpack.c.bf16 %v8305_v12, %v8302_v11  ;;  %v6902_v35 = vpack.c.bf16 %v8331_v23, %v8317_v17 }
 0x188   : > { %v6932_v31 = vpack.c.bf16 %v8314_v16, %v8311_v15  ;;  %v8351_v32 = vld [vmem:[%s8239_s30 + $0x70] sm:$0xff]  ;;  %v8354_v33 = vld [vmem:[%s8239_s30 + $0x78] sm:$0xff]  ;;  %v6934_v36 = vpack.c.bf16 %v8337_v25, %v8334_v24  ;;  %v8390_v46 = vld [vmem:[#allocation7] sm:$0xff] }
 0x189   : > { %6893 = vmatpush3.bf16.msra.mxu0 %v6892_v4  ;;  %v8357_v34 = vld [vmem:[%s8239_s30 + $0x170] sm:$0xff]  ;;  %v6904_v37 = vpack.c.bf16 %v8354_v33, %v8351_v32  ;;  %v8366_v38 = vld [vmem:[%s8239_s30 + $0x178] sm:$0xff]  ;;  %v8398_v48 = vrot.slane %v8390_v46, %v8320_v18  ;;  %v8402_v49 = vrot.slane %v8390_v46, %v8323_v19  ;;  %v8406_v50 = vrot.slane %v8390_v46, %v8326_v20 }
 0x18a   : > { %6925 = vmatpush3.bf16.msra.mxu1 %v6924_v8  ;;  %6895 = vmatprep.subr.bf16.mxu0 %v6894_v9  ;;  %v8369_v39 = vld [vmem:[%s8213_s17] sm:$0xff]  ;;  %v6936_v42 = vpack.c.bf16 %v8366_v38, %v8357_v34  ;;  %v8418_v52 = vrot.slane %v8390_v46, %v8340_v26 }
 0x18b   : > { %v8371_v40 = vld [vmem:[#allocation5] sm:$0xff]  ;;  %6927 = vmatprep.subr.bf16.mxu1 %v6926_v14  ;;  %vm860_vm4 = vcmp.lt.f32.partialorder %v8369_v39, %v8398_v48  ;;  %vm861_vm5 = vcmp.lt.f32.partialorder %v8369_v39, %v8402_v49  ;;  %vm862_vm6 = vcmp.lt.f32.partialorder %v8369_v39, %v8406_v50 }
 0x18c   : > { %v8380_v43 = vrot.slane %v8371_v40, %v8320_v18  ;;  %v8384_v44 = vrot.slane %v8371_v40, %v8323_v19  ;;  %v8388_v45 = vrot.slane %v8371_v40, %v8326_v20  ;;  %v8394_v47 = vrot.slane %v8371_v40, %v8340_v26  ;;  %v8408_v51 = vld [vmem:[#allocation8] ss:$4 sm:$0xff]  ;;  %v8527_v24 = vld [vmem:[#allocation8 + $0x1] ss:$4 sm:$0xff] }
 0x18d   : > { %6897 = vmatpush3.bf16.msra.mxu0 %v6896_v21  ;;  %v8420_v53 = vld [vmem:[#allocation10] ss:$4 sm:$0xff]  ;;  %vm863_vm7 = vcmp.lt.f32.partialorder %v8369_v39, %v8418_v52  ;;  %v8437_v55 = vrot.slane %v8408_v51, %v8320_v18  ;;  %v8441_v56 = vrot.slane %v8408_v51, %v8323_v19  ;;  %v8451_v60 = vrot.slane %v8408_v51, %v8326_v20  ;;  %v8529_v25 = vld [vmem:[#allocation10 + $0x1] ss:$4 sm:$0xff] }
 0x18e   : > { %vm625_vm0 = vcmp.ge.f32.partialorder %v8369_v39, %v8380_v43  ;;  %vm626_vm1 = vcmp.ge.f32.partialorder %v8369_v39, %v8384_v44  ;;  %vm627_vm2 = vcmp.ge.f32.partialorder %v8369_v39, %v8388_v45  ;;  %6929 = vmatpush3.bf16.msra.mxu1 %v6928_v22  ;;  %6899 = vmatprep.subr.bf16.mxu0 %v6898_v28  ;;  %v8443_v57 = vld [vmem:[#allocation11] ss:$4 sm:$0xff] }
 0x18f   : > { %vm628_vm3 = vcmp.ge.f32.partialorder %v8369_v39, %v8394_v47  ;;  %6931 = vmatprep.subr.bf16.mxu1 %v6930_v29  ;;  %vm1036_vm8 = vmand %vm625_vm0, %vm860_vm4  ;;  %v8455_v61 = vrot.slane %v8420_v53, %v8320_v18  ;;  %v8459_v62 = vrot.slane %v8420_v53, %v8323_v19  ;;  %v1619_v0 = vsub.f32 %v8369_v39, %v8437_v55  ;;  %v8490_v7 = vld [vmem:[#allocation13] ss:$4 sm:$0xff] }
 0x190   : > { %vm1037_vm9 = vmand %vm626_vm1, %vm861_vm5  ;;  %v6283_v59 = vsel %vm1036_vm8, 1.0, %v13847_v58  ;;  %v1620_v1 = vsub.f32 %v8369_v39, %v8441_v56  ;;  %v8471_v2 = vrot.slane %v8420_v53, %v8326_v20  ;;  %v1621_v4 = vsub.f32 %v8369_v39, %v8451_v60 }
 0x191   : > { %14371 = vst [vmem:[#allocation43_spill] sm:$0xff] %v8455_v61  ;;  %14372 = vst [vmem:[#allocation44_spill] sm:$0xff] %v8459_v62  ;;  %6901 = vmatpush3.bf16.msra.mxu0 %v6900_v30  ;;  %v6284_v63 = vsel %vm1037_vm9, 1.0, %v13847_v58  ;;  %v8484_v5 = vrot.slane %v8443_v57, %v8308_v13  ;;  %v8488_v6 = vrot.slane %v8443_v57, %v8320_v18 }
 0x192   : > { %vm1038_vm10 = vmand %vm627_vm2, %vm862_vm6  ;;  %14373 = vst [vmem:[#allocation45_spill] sm:$0xff] %v8471_v2  ;;  %6933 = vmatpush3.bf16.msra.mxu1 %v6932_v31  ;;  %6903 = vmatprep.subr.bf16.mxu0 %v6902_v35  ;;  %v1834_v9 = vmul.f32 %v8455_v61, %v1619_v0  ;;  %v1835_v10 = vmul.f32 %v8459_v62, %v1620_v1  ;;  %v8558_v1 = vld [vmem:[#allocation13 + $0x1] ss:$4 sm:$0xff] }
 0x193   : > { %vm1039_vm11 = vmand %vm628_vm3, %vm863_vm7  ;;  %v6285_v3 = vsel %vm1038_vm10, 1.0, %v13847_v58  ;;  %14374 = vst [vmem:[#allocation46_spill] sm:$0xff] %v8484_v5  ;;  %6935 = vmatprep.subr.bf16.mxu1 %v6934_v36  ;;  %v8499_v11 = vrot.slane %v8443_v57, %v8323_v19  ;;  %v1836_v12 = vmul.f32 %v8471_v2, %v1621_v4  ;;  %v8504_v14 = vrot.slane %v8443_v57, %v8326_v20 }
 0x194   : > { %14375 = vst [vmem:[#allocation47_spill] sm:$0xff] %v8488_v6  ;;  %v8493_v8 = vsel %vm1039_vm11, 1.0, %v13847_v58  ;;  %v2048_v15 = vsub.f32 %v8484_v5, %v8369_v39  ;;  %v2049_v16 = vsub.f32 %v8488_v6, %v8369_v39  ;;  %v8517_v21 = vrot.slane %v8490_v7, %v8308_v13 }
 0x195   : > { %14376 = vst [vmem:[#allocation48_spill] sm:$0xff] %v8499_v11  ;;  %14377 = vst [vmem:[#allocation49_spill] sm:$0xff] %v8504_v14  ;;  %6905 = vmatpush3.bf16.msra.mxu0 %v6904_v37  ;;  %v2050_v17 = vsub.f32 %v8499_v11, %v8369_v39  ;;  %v8521_v22 = vrot.slane %v8490_v7, %v8320_v18  ;;  %v8525_v23 = vrot.slane %v8490_v7, %v8323_v19  ;;  %v8543_v37 = vld [vmem:[#allocation11 + $0x1] ss:$4 sm:$0xff] }
 0x196   : > { %14378 = vst [vmem:[#allocation50_spill] sm:$0xff] %v8517_v21  ;;  %6937 = vmatpush3.bf16.msra.mxu1 %v6936_v42  ;;  %v2051_v28 = vsub.f32 %v8504_v14, %v8369_v39  ;;  %v8538_v29 = vrot.slane %v8490_v7, %v8326_v20  ;;  %v2424_v30 = vmul.f32 %v6283_v59, %v1834_v9 }
 0x197   : > { %14379 = vst [vmem:[#allocation51_spill] sm:$0xff] %v8521_v22  ;;  %14380 = vst [vmem:[#allocation52_spill] sm:$0xff] %v8525_v23  ;;  %v2425_v31 = vmul.f32 %v6284_v63, %v1835_v10  ;;  %v2263_v32 = vmul.f32 %v8517_v21, %v2048_v15  ;;  %v2264_v33 = vmul.f32 %v8521_v22, %v2049_v16 }
 0x198   : > { %14381 = vst [vmem:[#allocation53_spill] sm:$0xff] %v8538_v29  ;;  %v2265_v35 = vmul.f32 %v8525_v23, %v2050_v17  ;;  %v2426_v36 = vmul.f32 %v6285_v3, %v1836_v12  ;;  %v2266_v34 = vmul.f32 %v8538_v29, %v2051_v28  ;;  %v8548_v38 = vrot.slane %v8527_v24, %v8320_v18 }
 0x199   : > { %v8552_v42 = vrot.slane %v8527_v24, %v8323_v19  ;;  %v8556_v0 = vrot.slane %v8529_v25, %v8320_v18  ;;  %v8560_v4 = vmul.f32 %v6283_v59, %v2263_v32  ;;  %v2584_v9 = vmul.f32 %v6284_v63, %v2264_v33  ;;  %v8575_v59 = vld [vmem:[#allocation8 + $0x2] ss:$4 sm:$0xff] }
 0x19a   : > { %14382 = vst [vmem:[#allocation54_spill] sm:$0xff] %v8548_v38  ;;  %v2585_v10 = vmul.f32 %v6285_v3, %v2265_v35  ;;  %v8564_v12 = vrot.slane %v8529_v25, %v8323_v19  ;;  %v2586_v15 = vmul.f32 %v8493_v8, %v2266_v34  ;;  %v2955_v16 = vsub.f32 %v8369_v39, %v8548_v38  ;;  %v8577_v63 = vld [vmem:[#allocation10 + $0x2] ss:$4 sm:$0xff] }
 0x19b   : > { %14383 = vst [vmem:[#allocation55_spill] sm:$0xff] %v8552_v42  ;;  %14384 = vst [vmem:[#allocation56_spill] sm:$0xff] %v8556_v0  ;;  %v2956_v17 = vsub.f32 %v8369_v39, %v8552_v42  ;;  %v8573_v28 = vrot.slane %v8543_v37, %v8320_v18  ;;  %v8579_v3 = vadd.f32 %v2584_v9, %v2424_v30  ;;  %v8589_v34 = vld [vmem:[#allocation11 + $0x2] ss:$4 sm:$0xff] }
 0x19c   : > { %14385 = vst [vmem:[#allocation57_spill] sm:$0xff] %v8564_v12  ;;  %v2745_v32 = vadd.f32 %v2585_v10, %v2425_v31  ;;  %v8583_v33 = vrot.slane %v8543_v37, %v8323_v19  ;;  %v8587_v35 = vrot.slane %v8558_v1, %v8320_v18  ;;  %v8591_v58 = vadd.f32 %v2586_v15, %v2426_v36  ;;  %v8597_v31 = vld [vmem:[#allocation13 + $0x2] ss:$4 sm:$0xff] }
 0x19d   : > { %14386 = vst [vmem:[#allocation58_spill] sm:$0xff] %v8573_v28  ;;  %v3150_v21 = vmul.f32 %v8556_v0, %v2955_v16  ;;  %v3151_v5 = vmul.f32 %v8564_v12, %v2956_v17  ;;  %v3345_v30 = vsub.f32 %v8573_v28, %v8369_v39  ;;  %v8603_v10 = vrot.slane %v8558_v1, %v8323_v19 }
 0x19e   : > { %14387 = vst [vmem:[#allocation59_spill] sm:$0xff] %v8583_v33  ;;  %14388 = vst [vmem:[#allocation60_spill] sm:$0xff] %v8587_v35  ;;  %v3346_v9 = vsub.f32 %v8583_v33, %v8369_v39  ;;  %v8607_v36 = vrot.slane %v8575_v59, %v8320_v18  ;;  %v8611_v15 = vrot.slane %v8577_v63, %v8320_v18 }
 0x19f   : > { %14389 = vst [vmem:[#allocation61_spill] sm:$0xff] %v8603_v10  ;;  %v3540_v16 = vmul.f32 %v8587_v35, %v3345_v30  ;;  %v3684_v17 = vmul.f32 %v3150_v21, %v8579_v3  ;;  %v3685_v12 = vmul.f32 %v3151_v5, %v2745_v32  ;;  %v8617_v33 = vrot.slane %v8589_v34, %v8320_v18 }
 0x1a0   : > { %14390 = vst [vmem:[#allocation62_spill] sm:$0xff] %v8607_v36  ;;  %14391 = vst [vmem:[#allocation63_spill] sm:$0xff] %v8611_v15  ;;  %v3541_v0 = vmul.f32 %v8603_v10, %v3346_v9  ;;  %v4159_v28 = vsub.f32 %v8369_v39, %v8607_v36  ;;  %v8624_v42 = vrot.slane %v8597_v31, %v8320_v18 }
 0x1a1   : > { %14392 = vst [vmem:[#allocation64_spill] sm:$0xff] %v8617_v33  ;;  %v8628_v29 = vrot.slane %v8371_v40, %v8343_v27  ;;  %v3828_v30 = vmul.f32 %v3540_v16, %v2745_v32  ;;  %v4501_v5 = vsub.f32 %v8617_v33, %v8369_v39  ;;  %v8634_v21 = vrot.slane %v8371_v40, %v8374_v41 }
 0x1a2   : > { %14393 = vst [vmem:[#allocation65_spill] sm:$0xff] %v8624_v42  ;;  %v8638_v9 = vrot.slane %v8371_v40, %v8429_v54  ;;  %v3829_v10 = vmul.f32 %v3541_v0, %v8591_v58  ;;  %v4330_v18 = vmul.f32 %v8611_v15, %v4159_v28  ;;  %v8646_v32 = vrot.slane %v8390_v46, %v8343_v27 }
 0x1a3   : > { %14394 = vst [vmem:[#allocation66_spill] sm:$0xff] %v8628_v29  ;;  %14395 = vst [vmem:[#allocation67_spill] sm:$0xff] %v8634_v21  ;;  %vm629_vm12 = vcmp.ge.f32.partialorder %v8369_v39, %v8628_v29  ;;  %v8648_v16 = vadd.f32 %v3828_v30, %v3684_v17  ;;  %v4672_v33 = vmul.f32 %v8624_v42, %v4501_v5 }
 0x1a4   : > { %14396 = vst [vmem:[#allocation68_spill] sm:$0xff] %v8638_v9  ;;  %14397 = vst [vmem:[#allocation69_spill] sm:$0xff] %v8646_v32  ;;  %vm630_vm13 = vcmp.ge.f32.partialorder %v8369_v39, %v8634_v21  ;;  %vm631_vm14 = vcmp.ge.f32.partialorder %v8369_v39, %v8638_v9  ;;  %v8655_v0 = vadd.f32 %v3829_v10, %v3685_v12 }
 0x1a5   : > { %v8659_v28 = vrot.slane %v8390_v46, %v8374_v41  ;;  %v8663_v29 = vrot.slane %v8390_v46, %v8429_v54  ;;  %vm864_vm15 = vcmp.lt.f32.partialorder %v8369_v39, %v8646_v32  ;;  %v4800_v17 = vmul.f32 %v4330_v18, %v8648_v16 }
 0x1a6   : > { %vm1040_vm0 = vmand %vm629_vm12, %vm864_vm15  ;;  %v8670_v30 = vrot.slane %v8408_v51, %v8340_v26  ;;  %v8674_v12 = vrot.slane %v8408_v51, %v8343_v27  ;;  %v8678_v10 = vrot.slane %v8408_v51, %v8374_v41  ;;  %v4928_v5 = vmul.f32 %v4672_v33, %v8655_v0 }
 0x1a7   : > { %14398 = vst [vmem:[#allocation70_spill] sm:$0xff] %v8659_v28  ;;  %14399 = vst [vmem:[#allocation71_spill] sm:$0xff] %v8663_v29  ;;  %vm865_vm1 = vcmp.lt.f32.partialorder %v8369_v39, %v8659_v28  ;;  %vm866_vm2 = vcmp.lt.f32.partialorder %v8369_v39, %v8663_v29  ;;  %v14403_v18 = vmov 0.0   ;;  %v8697_v28 = vrot.slane %v8420_v53, %v8340_v26 }
 0x1a8   : > { %14400 = vst [vmem:[#allocation72_spill] sm:$0xff] %v8670_v30  ;;  %14401 = vst [vmem:[#allocation73_spill] sm:$0xff] %v8674_v12  ;;  %v6287_v54 = vsel %vm1040_vm0, 1.0, %v14403_v18  ;;  %v1622_v32 = vsub.f32 %v8369_v39, %v8670_v30  ;;  %v1623_v42 = vsub.f32 %v8369_v39, %v8674_v12  ;;  %v1624_v33 = vsub.f32 %v8369_v39, %v8678_v10 }
 0x1a9   : > { %14402 = vst [vmem:[#allocation74_spill] sm:$0xff] %v8678_v10  ;;  %vm1041_vm3 = vmand %vm630_vm13, %vm865_vm1  ;;  %v5056_v29 = vadd.f32 %v4928_v5, %v4800_v17  ;;  %v8705_v30 = vrot.slane %v8420_v53, %v8343_v27  ;;  %v8709_v12 = vrot.slane %v8420_v53, %v8374_v41  ;;  %v8717_v17 = vrot.slane %v8443_v57, %v8340_v26 }
 0x1aa   : > { %14404 = vst [vmem:[#allocation75_spill] sm:$0xff] %v8697_v28  ;;  %vm1042_vm4 = vmand %vm631_vm14, %vm866_vm2  ;;  %v6288_v21 = vsel %vm1041_vm3, 1.0, %v14403_v18  ;;  %v1837_v15 = vmul.f32 %v8697_v28, %v1622_v32  ;;  %v8721_v5 = vrot.slane %v8443_v57, %v8343_v27  ;;  %v8727_v36 = vrot.slane %v8443_v57, %v8374_v41 }
 0x1ab   : > { %14405 = vst [vmem:[#allocation76_spill] sm:$0xff] %v8705_v30  ;;  %14406 = vst [vmem:[#allocation77_spill] sm:$0xff] %v8709_v12  ;;  %v8712_v10 = vsel %vm1042_vm4, 1.0, %v14403_v18  ;;  %5375 = vmatprep.mubr.f32.mxu0 %v5056_v29  ;;  %v1838_v9 = vmul.f32 %v8705_v30, %v1623_v42  ;;  %v1839_v35 = vmul.f32 %v8709_v12, %v1624_v33 }
 0x1ac   : > { %14407 = vst [vmem:[#allocation78_spill] sm:$0xff] %v8712_v10  ;;  %14408 = vst [vmem:[#allocation79_spill] sm:$0xff] %v8717_v17  ;;  %v8731_v32 = vrot.slane %v8490_v7, %v8340_v26  ;;  %v2052_v28 = vsub.f32 %v8717_v17, %v8369_v39  ;;  %v2053_v38 = vsub.f32 %v8721_v5, %v8369_v39 }
 0x1ad   : > { %14409 = vst [vmem:[#allocation80_spill] sm:$0xff] %v8721_v5  ;;  %14410 = vst [vmem:[#allocation81_spill] sm:$0xff] %v8727_v36  ;;  %v8739_v29 = vrot.slane %v8490_v7, %v8343_v27  ;;  %v8743_v42 = vrot.slane %v8490_v7, %v8374_v41  ;;  %v2054_v57 = vsub.f32 %v8727_v36, %v8369_v39 }
 0x1ae   : > { %14411 = vst [vmem:[#allocation82_spill] sm:$0xff] %v8731_v32  ;;  %v2427_v33 = vmul.f32 %v8493_v8, %v1837_v15  ;;  %v2428_v12 = vmul.f32 %v6287_v54, %v1838_v9  ;;  %v2429_v30 = vmul.f32 %v6288_v21, %v1839_v35  ;;  %v2267_v17 = vmul.f32 %v8731_v32, %v2052_v28 }
 0x1af   : > { %14412 = vst [vmem:[#allocation83_spill] sm:$0xff] %v8739_v29  ;;  %14413 = vst [vmem:[#allocation84_spill] sm:$0xff] %v8743_v42  ;;  %v2268_v23 = vmul.f32 %v8739_v29, %v2053_v38  ;;  %v8752_v5 = vrot.slane %v8527_v24, %v8326_v20  ;;  %v8756_v22 = vrot.slane %v8527_v24, %v8340_v26 }
 0x1b0   : > { %v2269_v7 = vmul.f32 %v8743_v42, %v2054_v57  ;;  %v8761_v36 = vrot.slane %v8527_v24, %v8343_v27  ;;  %v8765_v8 = vrot.slane %v8529_v25, %v8326_v20  ;;  %v8769_v38 = vrot.slane %v8529_v25, %v8340_v26 }
 0x1b1   : > { %14414 = vst [vmem:[#allocation85_spill] sm:$0xff] %v8752_v5  ;;  %14415 = vst [vmem:[#allocation86_spill] sm:$0xff] %v8756_v22  ;;  %v2587_v35 = vmul.f32 %v6287_v54, %v2267_v17  ;;  %v2588_v15 = vmul.f32 %v6288_v21, %v2268_v23  ;;  %v2957_v9 = vsub.f32 %v8369_v39, %v8752_v5 }
 0x1b2   : > { %14416 = vst [vmem:[#allocation87_spill] sm:$0xff] %v8761_v36  ;;  %14417 = vst [vmem:[#allocation88_spill] sm:$0xff] %v8765_v8  ;;  %v2958_v28 = vsub.f32 %v8369_v39, %v8756_v22  ;;  %v2589_v57 = vmul.f32 %v8712_v10, %v2269_v7  ;;  %v2959_v42 = vsub.f32 %v8369_v39, %v8761_v36 }
 0x1b3   : > { %14418 = vst [vmem:[#allocation89_spill] sm:$0xff] %v8769_v38  ;;  %v8780_v41 = vrot.slane %v8529_v25, %v8343_v27  ;;  %v8784_v29 = vrot.slane %v8543_v37, %v8326_v20  ;;  %v2747_v54 = vadd.f32 %v2587_v35, %v2427_v33  ;;  %v2748_v23 = vadd.f32 %v2588_v15, %v2428_v12 }
 0x1b4   : > { %v3152_v21 = vmul.f32 %v8765_v8, %v2957_v9  ;;  %v3153_v17 = vmul.f32 %v8769_v38, %v2958_v28  ;;  %v8788_v22 = vadd.f32 %v2589_v57, %v2429_v30  ;;  %v8793_v36 = vrot.slane %v8543_v37, %v8340_v26 }
 0x1b5   : > { %14419 = vst [vmem:[#allocation90_spill] sm:$0xff] %v8780_v41  ;;  %14420 = vst [vmem:[#allocation91_spill] sm:$0xff] %v8784_v29  ;;  %v3154_v7 = vmul.f32 %v8780_v41, %v2959_v42  ;;  %v8797_v10 = vrot.slane %v8543_v37, %v8343_v27  ;;  %v3347_v33 = vsub.f32 %v8784_v29, %v8369_v39 }
 0x1b6   : > { %14421 = vst [vmem:[#allocation92_spill] sm:$0xff] %v8788_v22  ;;  %14422 = vst [vmem:[#allocation93_spill] sm:$0xff] %v8793_v36  ;;  %v8803_v12 = vrot.slane %v8558_v1, %v8326_v20  ;;  %v8807_v30 = vrot.slane %v8558_v1, %v8340_v26  ;;  %v8811_v42 = vrot.slane %v8558_v1, %v8343_v27 }
 0x1b7   : > { %14423 = vst [vmem:[#allocation94_spill] sm:$0xff] %v8797_v10  ;;  %v3348_v35 = vsub.f32 %v8793_v36, %v8369_v39  ;;  %v3349_v15 = vsub.f32 %v8797_v10, %v8369_v39  ;;  %v3686_v9 = vmul.f32 %v3152_v21, %v8591_v58  ;;  %v3687_v28 = vmul.f32 %v3153_v17, %v2747_v54 }
 0x1b8   : > { %14424 = vst [vmem:[#allocation95_spill] sm:$0xff] %v8803_v12  ;;  %14425 = vst [vmem:[#allocation96_spill] sm:$0xff] %v8807_v30  ;;  %v3542_v57 = vmul.f32 %v8803_v12, %v3347_v33  ;;  %v3688_v41 = vmul.f32 %v3154_v7, %v2748_v23  ;;  %v8821_v38 = vrot.slane %v8575_v59, %v8326_v20 }
 0x1b9   : > { %14426 = vst [vmem:[#allocation97_spill] sm:$0xff] %v8811_v42  ;;  %v8825_v27 = vrot.slane %v8575_v59, %v8340_v26  ;;  %v3543_v29 = vmul.f32 %v8807_v30, %v3348_v35  ;;  %v3544_v36 = vmul.f32 %v8811_v42, %v3349_v15  ;;  %v8831_v10 = vrot.slane %v8577_v63, %v8326_v20 }
 0x1ba   : > { %14427 = vst [vmem:[#allocation98_spill] sm:$0xff] %v8821_v38  ;;  %v8835_v58 = vrot.slane %v8577_v63, %v8340_v26  ;;  %v3830_v21 = vmul.f32 %v3542_v57, %v2747_v54  ;;  %v4161_v17 = vsub.f32 %v8369_v39, %v8821_v38  ;;  %v8843_v33 = vrot.slane %v8589_v34, %v8326_v20 }
 0x1bb   : > { %14428 = vst [vmem:[#allocation99_spill] sm:$0xff] %v8825_v27  ;;  %14429 = vst [vmem:[#allocation100_spill] sm:$0xff] %v8831_v10  ;;  %v4162_v7 = vsub.f32 %v8369_v39, %v8825_v27  ;;  %v3831_v35 = vmul.f32 %v3543_v29, %v2748_v23  ;;  %v3832_v15 = vmul.f32 %v3544_v36, %v8788_v22 }
 0x1bc   : > { %14430 = vst [vmem:[#allocation101_spill] sm:$0xff] %v8835_v58  ;;  %14431 = vst [vmem:[#allocation102_spill] sm:$0xff] %v8843_v33  ;;  %v8848_v42 = vrot.slane %v8589_v34, %v8340_v26  ;;  %v8852_v54 = vrot.slane %v8597_v31, %v8326_v20  ;;  %v8854_v57 = vadd.f32 %v3830_v21, %v3686_v9 }
 0x1bd   : > { %v4332_v30 = vmul.f32 %v8831_v10, %v4161_v17  ;;  %v4333_v27 = vmul.f32 %v8835_v58, %v4162_v7  ;;  %v4503_v12 = vsub.f32 %v8843_v33, %v8369_v39  ;;  %v3975_v29 = vadd.f32 %v3831_v35, %v3687_v28  ;;  %v5296_v58 = vld [vmem:[%s8239_s30 + $0x388] sm:$0xff] }
 0x1be   : > { %14432 = vst [vmem:[#allocation103_spill] sm:$0xff] %v8848_v42  ;;  %14433 = vst [vmem:[#allocation104_spill] sm:$0xff] %v8852_v54  ;;  %v8860_v23 = vadd.f32 %v3832_v15, %v3688_v41  ;;  %v4504_v36 = vsub.f32 %v8848_v42, %v8369_v39  ;;  %v8866_v22 = vrot.slane %v8597_v31, %v8340_v26  ;;  %v5247_v42 = vld [vmem:[%s8239_s30 + $0x200] sm:$0xff] }
 0x1bf   : > { %v4674_v20 = vmul.f32 %v8852_v54, %v4503_v12  ;;  %v4802_v9 = vmul.f32 %v4332_v30, %v8854_v57  ;;  %v8872_v21 = vrot.slane %v8371_v40, %v8308_v13  ;;  %v8876_v28 = vrot.slane %v8390_v46, %v8308_v13 }
 0x1c0   : > { %14434 = vst [vmem:[#allocation105_spill] sm:$0xff] %v8860_v23  ;;  %14435 = vst [vmem:[#allocation106_spill] sm:$0xff] %v8866_v22  ;;  %v4675_v41 = vmul.f32 %v8866_v22, %v4504_v36  ;;  %v4803_v17 = vmul.f32 %v4333_v27, %v3975_v29  ;;  %v8881_v7 = vrot.slane %v8408_v51, %v8308_v13  ;;  %v5295_v22 = vld [vmem:[%s8239_s30 + $0x380] sm:$0xff] }
 0x1c1   : > { %14436 = vst [vmem:[#allocation107_spill] sm:$0xff] %v8872_v21  ;;  %14437 = vst [vmem:[#allocation108_spill] sm:$0xff] %v8876_v28  ;;  %v8885_v26 = vrot.slane %v8420_v53, %v8308_v13  ;;  %v4930_v12 = vmul.f32 %v4674_v20, %v3975_v29  ;;  %vm624_vm5 = vcmp.ge.f32.partialorder %v8369_v39, %v8872_v21 }
 0x1c2   : > { %14438 = vst [vmem:[#allocation109_spill] sm:$0xff] %v8881_v7  ;;  %vm859_vm6 = vcmp.lt.f32.partialorder %v8369_v39, %v8876_v28  ;;  %v8893_v40 = vrot.slane %v8527_v24, %v8308_v13  ;;  %v4931_v27 = vmul.f32 %v4675_v41, %v8860_v23  ;;  %v1618_v46 = vsub.f32 %v8369_v39, %v8881_v7 }
 0x1c3   : > { %14439 = vst [vmem:[#allocation110_spill] sm:$0xff] %v8885_v26  ;;  %vm1035_vm7 = vmand %vm624_vm5, %vm859_vm6  ;;  %v8900_v51 = vrot.slane %v8529_v25, %v8308_v13  ;;  %v8904_v53 = vrot.slane %v8543_v37, %v8308_v13  ;;  %v5058_v30 = vadd.f32 %v4930_v12, %v4802_v9  ;;  %v8911_v15 = vrot.slane %v8558_v1, %v8308_v13  ;;  %v5264_v12 = vld [vmem:[%s8239_s30 + $0x288] sm:$0xff] }
 0x1c4   : > { %14440 = vst [vmem:[#allocation111_spill] sm:$0xff] %v8893_v40  ;;  %v6282_v24 = vsel %vm1035_vm7, 1.0, %v14403_v18  ;;  %v2954_v35 = vsub.f32 %v8369_v39, %v8893_v40  ;;  %v8913_v29 = vadd.f32 %v4931_v27, %v4803_v17  ;;  %v1833_v25 = vmul.f32 %v8885_v26, %v1618_v46  ;;  %v5263_v17 = vld [vmem:[%s8239_s30 + $0x280] sm:$0xff] }
 0x1c5   : > { %14441 = vst [vmem:[#allocation112_spill] sm:$0xff] %v8900_v51  ;;  %14442 = vst [vmem:[#allocation113_spill] sm:$0xff] %v8904_v53  ;;  %v3344_v37 = vsub.f32 %v8904_v53, %v8369_v39  ;;  %v8920_v36 = vrot.slane %v8575_v59, %v8308_v13  ;;  %5520 = vmatprep.mubr.f32.mxu1 %v5058_v30  ;;  %v8925_v1 = vrot.slane %v8577_v63, %v8308_v13 }
 0x1c6   : > { %14443 = vst [vmem:[#allocation114_spill] sm:$0xff] %v8911_v15  ;;  %14444 = vst [vmem:[#allocation115_spill] sm:$0xff] %v8913_v29  ;;  %v3149_v20 = vmul.f32 %v8900_v51, %v2954_v35  ;;  %v8929_v9 = vrot.slane %v8589_v34, %v8308_v13  ;;  %v8933_v41 = vrot.slane %v8597_v31, %v8308_v13  ;;  %v5280_v13 = vld [vmem:[%s8239_s30 + $0x308] sm:$0xff]  ;;  %v8970_v51 = vld [vmem:[%s8213_s17 + $0x8] sm:$0xff] }
 0x1c7   : > { %14445 = vst [vmem:[#allocation116_spill] sm:$0xff] %v8920_v36  ;;  %14446 = vst [vmem:[#allocation117_spill] sm:$0xff] %v8925_v1  ;;  %v2423_v27 = vmul.f32 %v6282_v24, %v1833_v25  ;;  %v3539_v46 = vmul.f32 %v8911_v15, %v3344_v37  ;;  %v4158_v30 = vsub.f32 %v8369_v39, %v8920_v36  ;;  %v5279_v37 = vld [vmem:[%s8239_s30 + $0x300] sm:$0xff] }
 0x1c8   : > { %14447 = vst [vmem:[#allocation118_spill] sm:$0xff] %v8929_v9  ;;  %v8942_v35 = vrot.slane %v8575_v59, %v8323_v19  ;;  %v4500_v29 = vsub.f32 %v8929_v9, %v8369_v39  ;;  %v8951_v23 = vrot.slane %v8577_v63, %v8323_v19  ;;  %v8955_v24 = vrot.slane %v8589_v34, %v8323_v19  ;;  %v5248_v59 = vld [vmem:[%s8239_s30 + $0x208] sm:$0xff] }
 0x1c9   : > { %v8959_v25 = vrot.slane %v8597_v31, %v8323_v19  ;;  %v2743_v15 = vadd.f32 %v8560_v4, %v2423_v27  ;;  %v3827_v36 = vmul.f32 %v3539_v46, %v8579_v3  ;;  %v4329_v9 = vmul.f32 %v8925_v1, %v4158_v30 }
 0x1ca   : > { %14448 = vst [vmem:[#allocation119_spill] sm:$0xff] %v8942_v35  ;;  %v4160_v63 = vsub.f32 %v8369_v39, %v8942_v35  ;;  %v4671_v34 = vmul.f32 %v8933_v41, %v4500_v29  ;;  %v4502_v31 = vsub.f32 %v8955_v24, %v8369_v39  ;;  %v6938_v19 = vpack.c.bf16 %v5264_v12, %v5263_v17  ;;  %v14449_v12 = vld [vmem:[#allocation51_spill] sm:$0xff] }
 0x1cb   : > { %v6970_v53 = vpack.c.bf16 %v5296_v58, %v5295_v22  ;;  %v3683_v26 = vmul.f32 %v3149_v20, %v2743_v15  ;;  %v6940_v4 = vpack.c.bf16 %v5248_v59, %v5247_v42  ;;  %v6972_v27 = vpack.c.bf16 %v5280_v13, %v5279_v37 }
 0x1cc   : > { %v4331_v40 = vmul.f32 %v8951_v23, %v4160_v63  ;;  %v4927_v3 = vmul.f32 %v4671_v34, %v8648_v16  ;;  %v4673_v46 = vmul.f32 %v8959_v25, %v4502_v31  ;;  %6939 = vmatprep.subr.bf16.mxu0 %v6938_v19  ;;  %vm636_vm8 = vcmp.ge.f32.partialorder %v8970_v51, %v8380_v43  ;;  %v14450_v63 = vld [vmem:[#allocation52_spill] sm:$0xff] }
 0x1cd   : > { %6971 = vmatprep.subr.bf16.mxu1 %v6970_v53  ;;  %v3971_v29 = vadd.f32 %v3827_v36, %v3683_v26  ;;  %vm637_vm9 = vcmp.ge.f32.partialorder %v8970_v51, %v8384_v44  ;;  %vm638_vm10 = vcmp.ge.f32.partialorder %v8970_v51, %v8388_v45  ;;  %vm639_vm11 = vcmp.ge.f32.partialorder %v8970_v51, %v8394_v47 }
 0x1ce   : > { %v4801_v30 = vmul.f32 %v4331_v40, %v8655_v0  ;;  %v4929_v13 = vmul.f32 %v4673_v46, %v8854_v57  ;;  %vm871_vm12 = vcmp.lt.f32.partialorder %v8970_v51, %v8398_v48  ;;  %vm872_vm13 = vcmp.lt.f32.partialorder %v8970_v51, %v8402_v49  ;;  %v14451_v46 = vld [vmem:[#allocation54_spill] sm:$0xff] }
 0x1cf   : > { %v4799_v19 = vmul.f32 %v4329_v9, %v3971_v29  ;;  %vm873_vm14 = vcmp.lt.f32.partialorder %v8970_v51, %v8406_v50  ;;  %vm874_vm15 = vcmp.lt.f32.partialorder %v8970_v51, %v8418_v52  ;;  %vm1047_vm0 = vmand %vm636_vm8, %vm871_vm12  ;;  %v1629_v39 = vsub.f32 %v8970_v51, %v8437_v55 }
 0x1d0   : > { %v5057_v22 = vadd.f32 %v4929_v13, %v4801_v30  ;;  %vm1048_vm1 = vmand %vm637_vm9, %vm872_vm13  ;;  %v8999_v16 = vsel %vm1047_vm0, 1.0, %v14403_v18  ;;  %v1630_v0 = vsub.f32 %v8970_v51, %v8441_v56  ;;  %v1631_v42 = vsub.f32 %v8970_v51, %v8451_v60  ;;  %v14452_v30 = vld [vmem:[#allocation53_spill] sm:$0xff] }
 0x1d1   : > { %v5055_v58 = vadd.f32 %v4927_v3, %v4799_v19  ;;  %vm1049_vm2 = vmand %vm638_vm10, %vm873_vm14  ;;  %v6295_v57 = vsel %vm1048_vm1, 1.0, %v14403_v18  ;;  %v1844_v26 = vmul.f32 %v8455_v61, %v1629_v39  ;;  %v2059_v40 = vsub.f32 %v8488_v6, %v8970_v51  ;;  %v14453_v19 = vld [vmem:[#allocation55_spill] sm:$0xff] }
 0x1d2   : > { %5521 = vmatmul.mubr.f32.vlgmr.msra.gmra.mrb[0].mxu1 %v5057_v22  ;;  %vm1050_vm3 = vmand %vm639_vm11, %vm874_vm15  ;;  %v6296_v53 = vsel %vm1049_vm2, 1.0, %v14403_v18  ;;  %v1845_v15 = vmul.f32 %v8459_v62, %v1630_v0  ;;  %v1846_v36 = vmul.f32 %v8471_v2, %v1631_v42  ;;  %v2060_v20 = vsub.f32 %v8499_v11, %v8970_v51  ;;  %v14454_v22 = vld [vmem:[#allocation58_spill] sm:$0xff] }
 0x1d3   : > { %5376 = vmatmul.mubr.f32.vlgmr.msra.gmra.mrb[0].mxu0 %v5055_v58  ;;  %6973 = vmatpush3.bf16.msra.mxu1 %v6972_v27  ;;  %v6297_v9 = vsel %vm1050_vm3, 1.0, %v14403_v18  ;;  %v2061_v17 = vsub.f32 %v8504_v14, %v8970_v51  ;;  %v2274_v59 = vmul.f32 %v14449_v12, %v2059_v40  ;;  %v2434_v37 = vmul.f32 %v8999_v16, %v1844_v26  ;;  %v14455_v58 = vld [vmem:[#allocation56_spill] sm:$0xff]  ;;  %v14463_v14 = vld [vmem:[#allocation66_spill] sm:$0xff] }
 0x1d4   : > { %6941 = vmatpush3.bf16.msra.mxu0 %v6940_v4  ;;  %v2275_v34 = vmul.f32 %v14450_v63, %v2060_v20  ;;  %v2435_v31 = vmul.f32 %v6295_v57, %v1845_v15  ;;  %v2436_v3 = vmul.f32 %v6296_v53, %v1846_v36  ;;  %v2964_v29 = vsub.f32 %v8970_v51, %v14451_v46  ;;  %v14456_v4 = vld [vmem:[#allocation59_spill] sm:$0xff]  ;;  %v14457_v15 = vld [vmem:[#allocation62_spill] sm:$0xff]  ;;  %v14460_v63 = vld [vmem:[#allocation61_spill] sm:$0xff] }
 0x1d5   : > { %v2276_v13 = vmul.f32 %v14452_v30, %v2061_v17  ;;  %v2594_v27 = vmul.f32 %v6295_v57, %v2274_v59  ;;  %v2965_v39 = vsub.f32 %v8970_v51, %v14453_v19  ;;  %v3354_v0 = vsub.f32 %v14454_v22, %v8970_v51  ;;  %v14458_v17 = vld [vmem:[#allocation57_spill] sm:$0xff]  ;;  %v14459_v59 = vld [vmem:[#allocation60_spill] sm:$0xff]  ;;  %v14461_v22 = vld [vmem:[#allocation63_spill] sm:$0xff] }
 0x1d6   : > { %v2595_v42 = vmul.f32 %v6296_v53, %v2275_v34  ;;  %v3159_v26 = vmul.f32 %v14455_v58, %v2964_v29  ;;  %v3355_v40 = vsub.f32 %v14456_v4, %v8970_v51  ;;  %v4167_v36 = vsub.f32 %v8970_v51, %v14457_v15  ;;  %v14462_v34 = vld [vmem:[#allocation64_spill] sm:$0xff] }
 0x1d7   : > { %v2596_v20 = vmul.f32 %v6297_v9, %v2276_v13  ;;  %v9038_v46 = vadd.f32 %v2594_v27, %v2434_v37  ;;  %v3160_v57 = vmul.f32 %v14458_v17, %v2965_v39  ;;  %v3549_v30 = vmul.f32 %v14459_v59, %v3354_v0  ;;  %v14464_v37 = vld [vmem:[#allocation67_spill] sm:$0xff]  ;;  %v14465_v39 = vld [vmem:[#allocation65_spill] sm:$0xff] }
 0x1d8   : > { %v2755_v19 = vadd.f32 %v2595_v42, %v2435_v31  ;;  %v3550_v12 = vmul.f32 %v14460_v63, %v3355_v40  ;;  %v4338_v53 = vmul.f32 %v14461_v22, %v4167_v36  ;;  %v4509_v29 = vsub.f32 %v14462_v34, %v8970_v51  ;;  %v14466_v0 = vld [vmem:[#allocation69_spill] sm:$0xff]  ;;  %v14467_v40 = vld [vmem:[#allocation70_spill] sm:$0xff]  ;;  %v14475_v34 = vld [vmem:[#allocation83_spill] sm:$0xff] }
 0x1d9   : > { %v2756_v58 = vadd.f32 %v2596_v20, %v2436_v3  ;;  %v3693_v4 = vmul.f32 %v3159_v26, %v9038_v46  ;;  %vm640_vm4 = vcmp.ge.f32.partialorder %v8970_v51, %v14463_v14  ;;  %vm641_vm5 = vcmp.ge.f32.partialorder %v8970_v51, %v14464_v37  ;;  %v14468_v3 = vld [vmem:[#allocation72_spill] sm:$0xff]  ;;  %v14469_v36 = vld [vmem:[#allocation73_spill] sm:$0xff]  ;;  %v14476_v63 = vld [vmem:[#allocation86_spill] sm:$0xff] }
 0x1da   : > { %v3694_v13 = vmul.f32 %v3160_v57, %v2755_v19  ;;  %v3837_v27 = vmul.f32 %v3549_v30, %v2755_v19  ;;  %v4680_v31 = vmul.f32 %v14465_v39, %v4509_v29  ;;  %vm875_vm6 = vcmp.lt.f32.partialorder %v8970_v51, %v14466_v0  ;;  %v14470_v19 = vld [vmem:[#allocation79_spill] sm:$0xff]  ;;  %v14474_v37 = vld [vmem:[#allocation76_spill] sm:$0xff] }
 0x1db   : > { %v3838_v42 = vmul.f32 %v3550_v12, %v2756_v58  ;;  %vm876_vm7 = vcmp.lt.f32.partialorder %v8970_v51, %v14467_v40  ;;  %vm1051_vm8 = vmand %vm640_vm4, %vm875_vm6  ;;  %v1632_v26 = vsub.f32 %v8970_v51, %v14468_v3  ;;  %v1633_v20 = vsub.f32 %v8970_v51, %v14469_v36  ;;  %v14471_v12 = vld [vmem:[#allocation80_spill] sm:$0xff]  ;;  %v14473_v3 = vld [vmem:[#allocation75_spill] sm:$0xff] }
 0x1dc   : > { %v9060_v14 = vadd.f32 %v3837_v27, %v3693_v4  ;;  %vm1052_vm9 = vmand %vm641_vm5, %vm876_vm7  ;;  %v6298_v30 = vsel %vm1051_vm8, 1.0, %v14403_v18  ;;  %v2062_v57 = vsub.f32 %v14470_v19, %v8970_v51  ;;  %v2063_v29 = vsub.f32 %v14471_v12, %v8970_v51 }
 0x1dd   : > { %v9067_v39 = vadd.f32 %v3838_v42, %v3694_v13  ;;  %v9070_v40 = vsel %vm1052_vm9, 1.0, %v14403_v18  ;;  %v1847_v0 = vmul.f32 %v14473_v3, %v1632_v26  ;;  %v1848_v36 = vmul.f32 %v14474_v37, %v1633_v20 }
 0x1de   : > { %14472 = vst [vmem:[#allocation120_spill] sm:$0xff] %v9070_v40  ;;  %v4808_v4 = vmul.f32 %v4338_v53, %v9060_v14  ;;  %v2277_v27 = vmul.f32 %v8731_v32, %v2062_v57  ;;  %v2278_v22 = vmul.f32 %v14475_v34, %v2063_v29  ;;  %v2966_v19 = vsub.f32 %v8970_v51, %v8752_v5  ;;  %v14477_v53 = vld [vmem:[#allocation91_spill] sm:$0xff]  ;;  %v14478_v29 = vld [vmem:[#allocation89_spill] sm:$0xff] }
 0x1df   : > { %v4936_v12 = vmul.f32 %v4680_v31, %v9067_v39  ;;  %v2437_v13 = vmul.f32 %v6297_v9, %v1847_v0  ;;  %v2438_v42 = vmul.f32 %v6298_v30, %v1848_v36  ;;  %v2967_v59 = vsub.f32 %v8970_v51, %v14476_v63  ;;  %v14479_v5 = vld [vmem:[#allocation93_spill] sm:$0xff]  ;;  %v14481_v36 = vld [vmem:[#allocation95_spill] sm:$0xff] }
 0x1e0   : > { %v2597_v17 = vmul.f32 %v6298_v30, %v2277_v27  ;;  %v2598_v26 = vmul.f32 %v9070_v40, %v2278_v22  ;;  %v3161_v20 = vmul.f32 %v8765_v8, %v2966_v19  ;;  %v3356_v57 = vsub.f32 %v14477_v53, %v8970_v51  ;;  %v14482_v19 = vld [vmem:[#allocation96_spill] sm:$0xff] }
 0x1e1   : > { %v5064_v32 = vadd.f32 %v4936_v12, %v4808_v4  ;;  %v3162_v34 = vmul.f32 %v14478_v29, %v2967_v59  ;;  %v3357_v37 = vsub.f32 %v14479_v5, %v8970_v51  ;;  %v4169_v9 = vsub.f32 %v8970_v51, %v8821_v38 }
 0x1e2   : > { %v2757_v31 = vadd.f32 %v2597_v17, %v2437_v13  ;;  %v9091_v0 = vadd.f32 %v2598_v26, %v2438_v42  ;;  %v3551_v30 = vmul.f32 %v14481_v36, %v3356_v57  ;;  %v3695_v22 = vmul.f32 %v3161_v20, %v2756_v58  ;;  %v14484_v42 = vld [vmem:[#allocation111_spill] sm:$0xff]  ;;  %v14485_v57 = vld [vmem:[#allocation110_spill] sm:$0xff] }
 0x1e3   : > { %5380 = vmatprep.mubr.f32.mxu0 %v5064_v32  ;;  %v3552_v27 = vmul.f32 %v14482_v19, %v3357_v37  ;;  %v4340_v40 = vmul.f32 %v8831_v10, %v4169_v9  ;;  %v4511_v59 = vsub.f32 %v8843_v33, %v8970_v51  ;;  %vm635_vm10 = vcmp.ge.f32.partialorder %v8970_v51, %v8872_v21  ;;  %v14483_v37 = vld [vmem:[#allocation46_spill] sm:$0xff] }
 0x1e4   : > { %14480 = vst [vmem:[#allocation121_spill] sm:$0xff] %v9091_v0  ;;  %v3696_v12 = vmul.f32 %v3162_v34, %v2757_v31  ;;  %v3839_v4 = vmul.f32 %v3551_v30, %v2757_v31  ;;  %vm870_vm11 = vcmp.lt.f32.partialorder %v8970_v51, %v8876_v28  ;;  %v1628_v58 = vsub.f32 %v8970_v51, %v8881_v7  ;;  %v14486_v31 = vld [vmem:[#allocation113_spill] sm:$0xff]  ;;  %v14490_v28 = vld [vmem:[#allocation116_spill] sm:$0xff]  ;;  %v9121_v10 = vld [vmem:[%s8213_s17 + $0x10] sm:$0xff] }
 0x1e5   : > { %v3840_v32 = vmul.f32 %v3552_v27, %v9091_v0  ;;  %v4682_v17 = vmul.f32 %v8852_v54, %v4511_v59  ;;  %vm1046_vm12 = vmand %vm635_vm10, %vm870_vm11  ;;  %v2058_v13 = vsub.f32 %v14483_v37, %v8970_v51  ;;  %v2963_v26 = vsub.f32 %v8970_v51, %v14484_v42  ;;  %v14488_v27 = vld [vmem:[#allocation50_spill] sm:$0xff]  ;;  %v14489_v59 = vld [vmem:[#allocation112_spill] sm:$0xff] }
 0x1e6   : > { %v3983_v34 = vadd.f32 %v3839_v4, %v3695_v22  ;;  %v6293_v20 = vsel %vm1046_vm12, 1.0, %v14403_v18  ;;  %v1843_v9 = vmul.f32 %v14485_v57, %v1628_v58  ;;  %v3353_v30 = vsub.f32 %v14486_v31, %v8970_v51  ;;  %v14491_v4 = vld [vmem:[#allocation114_spill] sm:$0xff] }
 0x1e7   : > { %v9114_v7 = vadd.f32 %v3840_v32, %v3696_v12  ;;  %v2273_v0 = vmul.f32 %v14488_v27, %v2058_v13  ;;  %v3158_v54 = vmul.f32 %v14489_v59, %v2963_v26  ;;  %v4166_v37 = vsub.f32 %v8970_v51, %v14490_v28  ;;  %v14492_v58 = vld [vmem:[#allocation118_spill] sm:$0xff] }
 0x1e8   : > { %v4810_v42 = vmul.f32 %v4340_v40, %v3983_v34  ;;  %v2433_v22 = vmul.f32 %v6293_v20, %v1843_v9  ;;  %v3548_v19 = vmul.f32 %v14491_v4, %v3353_v30  ;;  %v4508_v57 = vsub.f32 %v14492_v58, %v8970_v51 }
 0x1e9   : > { %14487 = vst [vmem:[#allocation122_spill] sm:$0xff] %v9114_v7  ;;  %v4938_v31 = vmul.f32 %v4682_v17, %v9114_v7  ;;  %v2593_v12 = vmul.f32 %v8999_v16, %v2273_v0  ;;  %v4337_v32 = vmul.f32 %v8925_v1, %v4166_v37  ;;  %v4168_v13 = vsub.f32 %v8970_v51, %v8942_v35  ;;  %v14497_v7 = vld [vmem:[#allocation54_spill] sm:$0xff] }
 0x1ea   : > { %v3836_v26 = vmul.f32 %v3548_v19, %v9038_v46  ;;  %v4679_v59 = vmul.f32 %v8933_v41, %v4508_v57  ;;  %v4510_v40 = vsub.f32 %v8955_v24, %v8970_v51  ;;  %vm647_vm13 = vcmp.ge.f32.partialorder %v9121_v10, %v8380_v43 }
 0x1eb   : > { %v5066_v20 = vadd.f32 %v4938_v31, %v4810_v42  ;;  %v2753_v9 = vadd.f32 %v2593_v12, %v2433_v22  ;;  %v4339_v17 = vmul.f32 %v8951_v23, %v4168_v13  ;;  %vm648_vm14 = vcmp.ge.f32.partialorder %v9121_v10, %v8384_v44 }
 0x1ec   : > { %v4935_v16 = vmul.f32 %v4679_v59, %v9060_v14  ;;  %v4681_v0 = vmul.f32 %v8959_v25, %v4510_v40  ;;  %vm649_vm15 = vcmp.ge.f32.partialorder %v9121_v10, %v8388_v45  ;;  %vm650_vm0 = vcmp.ge.f32.partialorder %v9121_v10, %v8394_v47 }
 0x1ed   : > { %5525 = vmatprep.mubr.f32.mxu1 %v5066_v20  ;;  %v3692_v51 = vmul.f32 %v3158_v54, %v2753_v9  ;;  %v4809_v46 = vmul.f32 %v4339_v17, %v9067_v39  ;;  %vm882_vm1 = vcmp.lt.f32.partialorder %v9121_v10, %v8398_v48  ;;  %vm883_vm2 = vcmp.lt.f32.partialorder %v9121_v10, %v8402_v49  ;;  %v14493_v20 = vld [vmem:[#allocation49_spill] sm:$0xff] }
 0x1ee   : > { %v4937_v19 = vmul.f32 %v4681_v0, %v3983_v34  ;;  %vm884_vm3 = vcmp.lt.f32.partialorder %v9121_v10, %v8406_v50  ;;  %vm885_vm4 = vcmp.lt.f32.partialorder %v9121_v10, %v8418_v52  ;;  %vm1058_vm5 = vmand %vm647_vm13, %vm882_vm1  ;;  %v1639_v14 = vsub.f32 %v9121_v10, %v8437_v55 }
 0x1ef   : > { %v3980_v54 = vadd.f32 %v3836_v26, %v3692_v51  ;;  %vm1059_vm6 = vmand %vm648_vm14, %vm883_vm2  ;;  %v9164_v39 = vsel %vm1058_vm5, 1.0, %v14403_v18  ;;  %v1640_v37 = vsub.f32 %v9121_v10, %v8441_v56  ;;  %v1641_v42 = vsub.f32 %v9121_v10, %v8451_v60 }
 0x1f0   : > { %v5065_v34 = vadd.f32 %v4937_v19, %v4809_v46  ;;  %vm1060_vm7 = vmand %vm649_vm15, %vm884_vm3  ;;  %v6306_v57 = vsel %vm1059_vm6, 1.0, %v14403_v18  ;;  %v1854_v31 = vmul.f32 %v8455_v61, %v1639_v14  ;;  %v2069_v30 = vsub.f32 %v8488_v6, %v9121_v10  ;;  %v14495_v14 = vld [vmem:[#allocation52_spill] sm:$0xff] }
 0x1f1   : > { %v4807_v59 = vmul.f32 %v4337_v32, %v3980_v54  ;;  %vm1061_vm8 = vmand %vm650_vm0, %vm885_vm4  ;;  %v6307_v22 = vsel %vm1060_vm7, 1.0, %v14403_v18  ;;  %v1855_v12 = vmul.f32 %v8459_v62, %v1640_v37  ;;  %v1856_v13 = vmul.f32 %v8471_v2, %v1641_v42  ;;  %v14494_v32 = vld [vmem:[#allocation51_spill] sm:$0xff]  ;;  %v14496_v37 = vld [vmem:[#allocation53_spill] sm:$0xff] }
 0x1f2   : > { %5526 = vmatmul.mubr.f32.gmra.mrb[2].mxu1 %v5065_v34  ;;  %v6308_v26 = vsel %vm1061_vm8, 1.0, %v14403_v18  ;;  %v2070_v40 = vsub.f32 %v8499_v11, %v9121_v10  ;;  %v2071_v9 = vsub.f32 %v14493_v20, %v9121_v10  ;;  %v2284_v17 = vmul.f32 %v14494_v32, %v2069_v30  ;;  %v14498_v62 = vld [vmem:[#allocation55_spill] sm:$0xff]  ;;  %v14499_v20 = vld [vmem:[#allocation58_spill] sm:$0xff] }
 0x1f3   : > { %v5063_v0 = vadd.f32 %v4935_v16, %v4807_v59  ;;  %v2444_v51 = vmul.f32 %v9164_v39, %v1854_v31  ;;  %v2445_v46 = vmul.f32 %v6306_v57, %v1855_v12  ;;  %v2446_v19 = vmul.f32 %v6307_v22, %v1856_v13  ;;  %v14500_v16 = vld [vmem:[#allocation59_spill] sm:$0xff] }
 0x1f4   : > { %v2285_v54 = vmul.f32 %v14495_v14, %v2070_v40  ;;  %v2286_v42 = vmul.f32 %v14496_v37, %v2071_v9  ;;  %v2604_v34 = vmul.f32 %v6306_v57, %v2284_v17  ;;  %v2973_v2 = vsub.f32 %v9121_v10, %v14497_v7  ;;  %v14501_v57 = vld [vmem:[#allocation56_spill] sm:$0xff]  ;;  %v14502_v17 = vld [vmem:[#allocation57_spill] sm:$0xff]  ;;  %v14505_v32 = vld [vmem:[#allocation63_spill] sm:$0xff] }
 0x1f5   : > { %5381 = vmatmul.mubr.f32.gmra.mrb[2].mxu0 %v5063_v0  ;;  %v2974_v61 = vsub.f32 %v9121_v10, %v14498_v62  ;;  %v3363_v30 = vsub.f32 %v14499_v20, %v9121_v10  ;;  %v3364_v31 = vsub.f32 %v14500_v16, %v9121_v10  ;;  %v4175_v59 = vsub.f32 %v9121_v10, %v14457_v15  ;;  %v14503_v7 = vld [vmem:[#allocation60_spill] sm:$0xff]  ;;  %v14504_v62 = vld [vmem:[#allocation61_spill] sm:$0xff] }
 0x1f6   : > { %v2605_v12 = vmul.f32 %v6307_v22, %v2285_v54  ;;  %v2606_v13 = vmul.f32 %v6308_v26, %v2286_v42  ;;  %v9202_v40 = vadd.f32 %v2604_v34, %v2444_v51  ;;  %v3168_v9 = vmul.f32 %v14501_v57, %v2973_v2  ;;  %v14506_v15 = vld [vmem:[#allocation64_spill] sm:$0xff]  ;;  %v14507_v54 = vld [vmem:[#allocation66_spill] sm:$0xff]  ;;  %v14508_v51 = vld [vmem:[#allocation67_spill] sm:$0xff] }
 0x1f7   : > { %v3169_v0 = vmul.f32 %v14502_v17, %v2974_v61  ;;  %v3558_v37 = vmul.f32 %v14503_v7, %v3363_v30  ;;  %v3559_v14 = vmul.f32 %v14504_v62, %v3364_v31  ;;  %v4346_v20 = vmul.f32 %v14505_v32, %v4175_v59  ;;  %v14509_v61 = vld [vmem:[#allocation69_spill] sm:$0xff]  ;;  %v14510_v2 = vld [vmem:[#allocation70_spill] sm:$0xff]  ;;  %v14512_v59 = vld [vmem:[#allocation72_spill] sm:$0xff] }
 0x1f8   : > { %v2765_v11 = vadd.f32 %v2605_v12, %v2445_v46  ;;  %v2766_v6 = vadd.f32 %v2606_v13, %v2446_v19  ;;  %v3702_v16 = vmul.f32 %v3168_v9, %v9202_v40  ;;  %v4517_v22 = vsub.f32 %v14506_v15, %v9121_v10  ;;  %v14511_v34 = vld [vmem:[#allocation65_spill] sm:$0xff] }
 0x1f9   : > { %vm651_vm9 = vcmp.ge.f32.partialorder %v9121_v10, %v14507_v54  ;;  %vm652_vm10 = vcmp.ge.f32.partialorder %v9121_v10, %v14508_v51  ;;  %vm886_vm11 = vcmp.lt.f32.partialorder %v9121_v10, %v14509_v61  ;;  %vm887_vm12 = vcmp.lt.f32.partialorder %v9121_v10, %v14510_v2  ;;  %v14513_v13 = vld [vmem:[#allocation73_spill] sm:$0xff]  ;;  %v14514_v61 = vld [vmem:[#allocation79_spill] sm:$0xff]  ;;  %v14517_v2 = vld [vmem:[#allocation76_spill] sm:$0xff] }
 0x1fa   : > { %v3703_v42 = vmul.f32 %v3169_v0, %v2765_v11  ;;  %v3846_v46 = vmul.f32 %v3558_v37, %v2765_v11  ;;  %v3847_v19 = vmul.f32 %v3559_v14, %v2766_v6  ;;  %v4688_v30 = vmul.f32 %v14511_v34, %v4517_v22  ;;  %vm1062_vm13 = vmand %vm651_vm9, %vm886_vm11  ;;  %v14516_v14 = vld [vmem:[#allocation80_spill] sm:$0xff]  ;;  %v14518_v34 = vld [vmem:[#allocation82_spill] sm:$0xff] }
 0x1fb   : > { %vm1063_vm14 = vmand %vm652_vm10, %vm887_vm12  ;;  %v6309_v31 = vsel %vm1062_vm13, 1.0, %v14403_v18  ;;  %v1642_v12 = vsub.f32 %v9121_v10, %v14512_v59  ;;  %v1643_v9 = vsub.f32 %v9121_v10, %v14513_v13  ;;  %v2072_v51 = vsub.f32 %v14514_v61, %v9121_v10  ;;  %v14519_v13 = vld [vmem:[#allocation85_spill] sm:$0xff] }
 0x1fc   : > { %v9228_v54 = vadd.f32 %v3846_v46, %v3702_v16  ;;  %v9230_v0 = vadd.f32 %v3847_v19, %v3703_v42  ;;  %v9233_v11 = vsel %vm1063_vm14, 1.0, %v14403_v18  ;;  %v2073_v37 = vsub.f32 %v14516_v14, %v9121_v10  ;;  %v14520_v46 = vld [vmem:[#allocation83_spill] sm:$0xff] }
 0x1fd   : > { %14515 = vst [vmem:[#allocation123_spill] sm:$0xff] %v9233_v11  ;;  %v1857_v22 = vmul.f32 %v14473_v3, %v1642_v12  ;;  %v1858_v59 = vmul.f32 %v14517_v2, %v1643_v9  ;;  %v2287_v15 = vmul.f32 %v14518_v34, %v2072_v51  ;;  %v2975_v32 = vsub.f32 %v9121_v10, %v14519_v13 }
 0x1fe   : > { %v4816_v16 = vmul.f32 %v4346_v20, %v9228_v54  ;;  %v4944_v42 = vmul.f32 %v4688_v30, %v9230_v0  ;;  %v2288_v19 = vmul.f32 %v14520_v46, %v2073_v37  ;;  %v2976_v61 = vsub.f32 %v9121_v10, %v14476_v63 }
 0x1ff   : > { %v2447_v62 = vmul.f32 %v6308_v26, %v1857_v22  ;;  %v2448_v14 = vmul.f32 %v6309_v31, %v1858_v59  ;;  %v2607_v7 = vmul.f32 %v6309_v31, %v2287_v15  ;;  %v3170_v12 = vmul.f32 %v8765_v8, %v2975_v32  ;;  %v14523_v59 = vld [vmem:[#allocation100_spill] sm:$0xff] }
 0x200   : > { %v5072_v9 = vadd.f32 %v4944_v42, %v4816_v16  ;;  %v2608_v51 = vmul.f32 %v9233_v11, %v2288_v19  ;;  %v3171_v34 = vmul.f32 %v14478_v29, %v2976_v61  ;;  %v3365_v20 = vsub.f32 %v14477_v53, %v9121_v10  ;;  %v14522_v61 = vld [vmem:[#allocation96_spill] sm:$0xff]  ;;  %v14526_v19 = vld [vmem:[#allocation109_spill] sm:$0xff]  ;;  %v14530_v11 = vld [vmem:[#allocation110_spill] sm:$0xff] }
 0x201   : > { %v2767_v2 = vadd.f32 %v2607_v7, %v2447_v62  ;;  %v3366_v30 = vsub.f32 %v14479_v5, %v9121_v10  ;;  %v3704_v37 = vmul.f32 %v3170_v12, %v2766_v6  ;;  %v4177_v26 = vsub.f32 %v9121_v10, %v8821_v38  ;;  %v14524_v22 = vld [vmem:[#allocation108_spill] sm:$0xff] }
 0x202   : > { %5385 = vmatprep.mubr.f32.mxu0 %v5072_v9  ;;  %v9256_v15 = vadd.f32 %v2608_v51, %v2448_v14  ;;  %v3560_v32 = vmul.f32 %v14481_v36, %v3365_v20  ;;  %v4519_v31 = vsub.f32 %v8843_v33, %v9121_v10  ;;  %vm646_vm15 = vcmp.ge.f32.partialorder %v9121_v10, %v8872_v21  ;;  %v14525_v14 = vld [vmem:[#allocation104_spill] sm:$0xff]  ;;  %v14527_v9 = vld [vmem:[#allocation46_spill] sm:$0xff] }
 0x203   : > { %v3561_v62 = vmul.f32 %v14522_v61, %v3366_v30  ;;  %v3705_v7 = vmul.f32 %v3171_v34, %v2767_v2  ;;  %v4348_v6 = vmul.f32 %v14523_v59, %v4177_v26  ;;  %vm881_vm0 = vcmp.lt.f32.partialorder %v9121_v10, %v14524_v22  ;;  %v14528_v30 = vld [vmem:[#allocation111_spill] sm:$0xff]  ;;  %v5282_v61 = vld [vmem:[%s8239_s30 + $0x318] sm:$0xff] }
 0x204   : > { %14521 = vst [vmem:[#allocation124_spill] sm:$0xff] %v9256_v15  ;;  %v3848_v16 = vmul.f32 %v3560_v32, %v2767_v2  ;;  %v4690_v42 = vmul.f32 %v14525_v14, %v4519_v31  ;;  %vm1057_vm1 = vmand %vm646_vm15, %vm881_vm0  ;;  %v1638_v12 = vsub.f32 %v9121_v10, %v14526_v19  ;;  %v2068_v51 = vsub.f32 %v14527_v9, %v9121_v10  ;;  %v14529_v2 = vld [vmem:[#allocation113_spill] sm:$0xff]  ;;  %v5265_v22 = vld [vmem:[%s8239_s30 + $0x290] sm:$0xff] }
 0x205   : > { %v3849_v34 = vmul.f32 %v3561_v62, %v9256_v15  ;;  %v6304_v20 = vsel %vm1057_vm1, 1.0, %v14403_v18  ;;  %v2972_v26 = vsub.f32 %v9121_v10, %v14528_v30  ;;  %v3362_v32 = vsub.f32 %v14529_v2, %v9121_v10  ;;  %v14532_v15 = vld [vmem:[#allocation112_spill] sm:$0xff] }
 0x206   : > { %v3992_v31 = vadd.f32 %v3848_v16, %v3704_v37  ;;  %v1853_v14 = vmul.f32 %v14530_v11, %v1638_v12  ;;  %v2283_v19 = vmul.f32 %v14488_v27, %v2068_v51  ;;  %v4174_v9 = vsub.f32 %v9121_v10, %v14490_v28  ;;  %v5266_v16 = vld [vmem:[%s8239_s30 + $0x298] sm:$0xff]  ;;  %v5297_v12 = vld [vmem:[%s8239_s30 + $0x390] sm:$0xff] }
 0x207   : > { %v9283_v62 = vadd.f32 %v3849_v34, %v3705_v7  ;;  %v3167_v59 = vmul.f32 %v14532_v15, %v2972_v26  ;;  %v3557_v30 = vmul.f32 %v14491_v4, %v3362_v32  ;;  %v4516_v37 = vsub.f32 %v14492_v58, %v9121_v10  ;;  %v5298_v2 = vld [vmem:[%s8239_s30 + $0x398] sm:$0xff]  ;;  %v5249_v34 = vld [vmem:[%s8239_s30 + $0x210] sm:$0xff] }
 0x208   : > { %v4818_v11 = vmul.f32 %v4348_v6, %v3992_v31  ;;  %v2443_v51 = vmul.f32 %v6304_v20, %v1853_v14  ;;  %v2603_v28 = vmul.f32 %v9164_v39, %v2283_v19  ;;  %v4345_v7 = vmul.f32 %v8925_v1, %v4174_v9  ;;  %v5250_v27 = vld [vmem:[%s8239_s30 + $0x218] sm:$0xff]  ;;  %v5281_v15 = vld [vmem:[%s8239_s30 + $0x310] sm:$0xff] }
 0x209   : > { %14531 = vst [vmem:[#allocation125_spill] sm:$0xff] %v9283_v62  ;;  %v4946_v26 = vmul.f32 %v4690_v42, %v9283_v62  ;;  %v3845_v32 = vmul.f32 %v3557_v30, %v9202_v40  ;;  %v4687_v4 = vmul.f32 %v8933_v41, %v4516_v37  ;;  %v4176_v58 = vsub.f32 %v9121_v10, %v8942_v35  ;;  %v9306_v9 = vld [vmem:[%s8213_s17 + $0x18] sm:$0xff] }
 0x20a   : > { %v2763_v6 = vadd.f32 %v2603_v28, %v2443_v51  ;;  %v4518_v14 = vsub.f32 %v8955_v24, %v9121_v10  ;;  %v6942_v39 = vpack.c.bf16 %v5266_v16, %v5265_v22  ;;  %v6974_v19 = vpack.c.bf16 %v5298_v2, %v5297_v12  ;;  %v14536_v12 = vld [vmem:[#allocation44_spill] sm:$0xff] }
 0x20b   : > { %v5074_v20 = vadd.f32 %v4946_v26, %v4818_v11  ;;  %v4943_v42 = vmul.f32 %v4687_v4, %v9228_v54  ;;  %v4347_v40 = vmul.f32 %v8951_v23, %v4176_v58  ;;  %v6944_v30 = vpack.c.bf16 %v5250_v27, %v5249_v34  ;;  %v14537_v34 = vld [vmem:[#allocation45_spill] sm:$0xff] }
 0x20c   : > { %v3701_v37 = vmul.f32 %v3167_v59, %v2763_v6  ;;  %v4689_v62 = vmul.f32 %v8959_v25, %v4518_v14  ;;  %6943 = vmatprep.subr.bf16.mxu0 %v6942_v39  ;;  %6975 = vmatprep.subr.bf16.mxu1 %v6974_v19  ;;  %v6976_v35 = vpack.c.bf16 %v5282_v61, %v5281_v15  ;;  %v14533_v15 = vld [vmem:[#allocation47_spill] sm:$0xff]  ;;  %v14534_v59 = vld [vmem:[#allocation48_spill] sm:$0xff] }
 0x20d   : > { %5530 = vmatprep.mubr.f32.mxu1 %v5074_v20  ;;  %v4817_v28 = vmul.f32 %v4347_v40, %v9230_v0  ;;  %6945 = vmatpush3.bf16.msra.mxu0 %v6944_v30  ;;  %vm658_vm2 = vcmp.ge.f32.partialorder %v9306_v9, %v8380_v43  ;;  %vm659_vm3 = vcmp.ge.f32.partialorder %v9306_v9, %v8384_v44  ;;  %v14539_v14 = vld [vmem:[#allocation51_spill] sm:$0xff]  ;;  %v14540_v20 = vld [vmem:[#allocation52_spill] sm:$0xff] }
 0x20e   : > { %v3989_v10 = vadd.f32 %v3845_v32, %v3701_v37  ;;  %v4945_v4 = vmul.f32 %v4689_v62, %v3992_v31  ;;  %6977 = vmatpush3.bf16.msra.mxu1 %v6976_v35  ;;  %vm660_vm4 = vcmp.ge.f32.partialorder %v9306_v9, %v8388_v45  ;;  %vm661_vm5 = vcmp.ge.f32.partialorder %v9306_v9, %v8394_v47  ;;  %v14535_v62 = vld [vmem:[#allocation43_spill] sm:$0xff]  ;;  %v14538_v32 = vld [vmem:[#allocation49_spill] sm:$0xff] }
 0x20f   : > { %vm893_vm6 = vcmp.lt.f32.partialorder %v9306_v9, %v8398_v48  ;;  %vm894_vm7 = vcmp.lt.f32.partialorder %v9306_v9, %v8402_v49  ;;  %vm895_vm8 = vcmp.lt.f32.partialorder %v9306_v9, %v8406_v50  ;;  %vm896_vm9 = vcmp.lt.f32.partialorder %v9306_v9, %v8418_v52  ;;  %v14541_v37 = vld [vmem:[#allocation53_spill] sm:$0xff] }
 0x210   : > { %v4815_v27 = vmul.f32 %v4345_v7, %v3989_v10  ;;  %v5073_v35 = vadd.f32 %v4945_v4, %v4817_v28  ;;  %vm1069_vm10 = vmand %vm658_vm2, %vm893_vm6  ;;  %v1649_v58 = vsub.f32 %v9306_v9, %v8437_v55  ;;  %v1650_v54 = vsub.f32 %v9306_v9, %v8441_v56 }
 0x211   : > { %vm1070_vm11 = vmand %vm659_vm3, %vm894_vm7  ;;  %v9336_v0 = vsel %vm1069_vm10, 1.0, %v14403_v18  ;;  %v1651_v11 = vsub.f32 %v9306_v9, %v8451_v60  ;;  %v2079_v61 = vsub.f32 %v14533_v15, %v9306_v9  ;;  %v2080_v22 = vsub.f32 %v14534_v59, %v9306_v9 }
 0x212   : > { %v5071_v2 = vadd.f32 %v4943_v42, %v4815_v27  ;;  %5531 = vmatmul.mubr.f32.gmra.mrb[4].mxu1 %v5073_v35  ;;  %vm1071_vm12 = vmand %vm660_vm4, %vm895_vm8  ;;  %v6317_v31 = vsel %vm1070_vm11, 1.0, %v14403_v18  ;;  %v1864_v16 = vmul.f32 %v14535_v62, %v1649_v58  ;;  %v1865_v51 = vmul.f32 %v14536_v12, %v1650_v54  ;;  %v14542_v27 = vld [vmem:[#allocation54_spill] sm:$0xff]  ;;  %v14543_v54 = vld [vmem:[#allocation55_spill] sm:$0xff] }
 0x213   : > { %vm1072_vm13 = vmand %vm661_vm5, %vm896_vm9  ;;  %v6318_v7 = vsel %vm1071_vm12, 1.0, %v14403_v18  ;;  %v1866_v26 = vmul.f32 %v14537_v34, %v1651_v11  ;;  %v2081_v6 = vsub.f32 %v14538_v32, %v9306_v9  ;;  %v2294_v39 = vmul.f32 %v14539_v14, %v2079_v61  ;;  %v14544_v61 = vld [vmem:[#allocation58_spill] sm:$0xff]  ;;  %v14545_v14 = vld [vmem:[#allocation59_spill] sm:$0xff] }
 0x214   : > { %5386 = vmatmul.mubr.f32.gmra.mrb[4].mxu0 %v5071_v2  ;;  %v6319_v19 = vsel %vm1072_vm13, 1.0, %v14403_v18  ;;  %v2295_v42 = vmul.f32 %v14540_v20, %v2080_v22  ;;  %v2454_v40 = vmul.f32 %v9336_v0, %v1864_v16  ;;  %v2455_v30 = vmul.f32 %v6317_v31, %v1865_v51  ;;  %v14549_v32 = vld [vmem:[#allocation63_spill] sm:$0xff] }
 0x215   : > { %v2296_v28 = vmul.f32 %v14541_v37, %v2081_v6  ;;  %v2456_v10 = vmul.f32 %v6318_v7, %v1866_v26  ;;  %v2614_v4 = vmul.f32 %v6317_v31, %v2294_v39  ;;  %v2982_v35 = vsub.f32 %v9306_v9, %v14542_v27  ;;  %v14546_v26 = vld [vmem:[#allocation62_spill] sm:$0xff]  ;;  %v14547_v39 = vld [vmem:[#allocation60_spill] sm:$0xff] }
 0x216   : > { %v2615_v58 = vmul.f32 %v6318_v7, %v2295_v42  ;;  %v2983_v11 = vsub.f32 %v9306_v9, %v14543_v54  ;;  %v3372_v2 = vsub.f32 %v14544_v61, %v9306_v9  ;;  %v3373_v22 = vsub.f32 %v14545_v14, %v9306_v9  ;;  %v14548_v54 = vld [vmem:[#allocation61_spill] sm:$0xff] }
 0x217   : > { %v2616_v20 = vmul.f32 %v6319_v19, %v2296_v28  ;;  %v9373_v16 = vadd.f32 %v2614_v4, %v2454_v40  ;;  %v3177_v51 = vmul.f32 %v14501_v57, %v2982_v35  ;;  %v4183_v31 = vsub.f32 %v9306_v9, %v14546_v26  ;;  %v14550_v40 = vld [vmem:[#allocation64_spill] sm:$0xff]  ;;  %v14551_v57 = vld [vmem:[#allocation66_spill] sm:$0xff] }
 0x218   : > { %v2775_v6 = vadd.f32 %v2615_v58, %v2455_v30  ;;  %v3178_v7 = vmul.f32 %v14502_v17, %v2983_v11  ;;  %v3567_v42 = vmul.f32 %v14547_v39, %v3372_v2  ;;  %v3568_v37 = vmul.f32 %v14548_v54, %v3373_v22  ;;  %v14552_v30 = vld [vmem:[#allocation67_spill] sm:$0xff]  ;;  %v14553_v11 = vld [vmem:[#allocation65_spill] sm:$0xff] }
 0x219   : > { %v2776_v27 = vadd.f32 %v2616_v20, %v2456_v10  ;;  %v3711_v61 = vmul.f32 %v3177_v51, %v9373_v16  ;;  %v4354_v14 = vmul.f32 %v14549_v32, %v4183_v31  ;;  %v4525_v28 = vsub.f32 %v14550_v40, %v9306_v9  ;;  %v14554_v22 = vld [vmem:[#allocation69_spill] sm:$0xff]  ;;  %v14555_v20 = vld [vmem:[#allocation70_spill] sm:$0xff]  ;;  %v14556_v51 = vld [vmem:[#allocation72_spill] sm:$0xff] }
 0x21a   : > { %v3712_v4 = vmul.f32 %v3178_v7, %v2775_v6  ;;  %v3855_v35 = vmul.f32 %v3567_v42, %v2775_v6  ;;  %vm662_vm14 = vcmp.ge.f32.partialorder %v9306_v9, %v14551_v57  ;;  %vm663_vm15 = vcmp.ge.f32.partialorder %v9306_v9, %v14552_v30  ;;  %v14557_v6 = vld [vmem:[#allocation73_spill] sm:$0xff]  ;;  %v14558_v42 = vld [vmem:[#allocation79_spill] sm:$0xff] }
 0x21b   : > { %v3856_v58 = vmul.f32 %v3568_v37, %v2776_v27  ;;  %v4696_v2 = vmul.f32 %v14553_v11, %v4525_v28  ;;  %vm897_vm0 = vcmp.lt.f32.partialorder %v9306_v9, %v14554_v22  ;;  %vm898_vm1 = vcmp.lt.f32.partialorder %v9306_v9, %v14555_v20  ;;  %v14559_v22 = vld [vmem:[#allocation80_spill] sm:$0xff] }
 0x21c   : > { %v9394_v10 = vadd.f32 %v3855_v35, %v3711_v61  ;;  %vm1073_vm2 = vmand %vm662_vm14, %vm897_vm0  ;;  %v1652_v31 = vsub.f32 %v9306_v9, %v14556_v51  ;;  %v1653_v7 = vsub.f32 %v9306_v9, %v14557_v6  ;;  %v2082_v37 = vsub.f32 %v14558_v42, %v9306_v9  ;;  %v14561_v11 = vld [vmem:[#allocation76_spill] sm:$0xff] }
 0x21d   : > { %v9402_v30 = vadd.f32 %v3856_v58, %v3712_v4  ;;  %vm1074_vm3 = vmand %vm663_vm15, %vm898_vm1  ;;  %v6320_v28 = vsel %vm1073_vm2, 1.0, %v14403_v18  ;;  %v2083_v20 = vsub.f32 %v14559_v22, %v9306_v9  ;;  %v2984_v61 = vsub.f32 %v9306_v9, %v14519_v13  ;;  %v14562_v58 = vld [vmem:[#allocation82_spill] sm:$0xff] }
 0x21e   : > { %v4824_v35 = vmul.f32 %v4354_v14, %v9394_v10  ;;  %v9411_v51 = vsel %vm1074_vm3, 1.0, %v14403_v18  ;;  %v1867_v6 = vmul.f32 %v14473_v3, %v1652_v31  ;;  %v1868_v42 = vmul.f32 %v14561_v11, %v1653_v7 }
 0x21f   : > { %14560 = vst [vmem:[#allocation47_spill] sm:$0xff] %v9411_v51  ;;  %v4952_v4 = vmul.f32 %v4696_v2, %v9402_v30  ;;  %v2297_v57 = vmul.f32 %v14562_v58, %v2082_v37  ;;  %v2298_v40 = vmul.f32 %v14520_v46, %v2083_v20  ;;  %v2985_v22 = vsub.f32 %v9306_v9, %v14476_v63 }
 0x220   : > { %v2457_v32 = vmul.f32 %v6319_v19, %v1867_v6  ;;  %v2458_v13 = vmul.f32 %v6320_v28, %v1868_v42  ;;  %v3179_v14 = vmul.f32 %v8765_v8, %v2984_v61  ;;  %v3374_v54 = vsub.f32 %v14477_v53, %v9306_v9 }
 0x221   : > { %v5080_v39 = vadd.f32 %v4952_v4, %v4824_v35  ;;  %v2617_v31 = vmul.f32 %v6320_v28, %v2297_v57  ;;  %v2618_v7 = vmul.f32 %v9411_v51, %v2298_v40  ;;  %v3180_v2 = vmul.f32 %v14478_v29, %v2985_v22  ;;  %v14564_v40 = vld [vmem:[#allocation96_spill] sm:$0xff] }
 0x222   : > { %v3375_v37 = vsub.f32 %v14479_v5, %v9306_v9  ;;  %v3569_v20 = vmul.f32 %v14481_v36, %v3374_v54  ;;  %v3713_v46 = vmul.f32 %v3179_v14, %v2776_v27  ;;  %v4185_v19 = vsub.f32 %v9306_v9, %v8821_v38  ;;  %v14565_v28 = vld [vmem:[#allocation100_spill] sm:$0xff]  ;;  %v14567_v27 = vld [vmem:[#allocation109_spill] sm:$0xff]  ;;  %v14569_v14 = vld [vmem:[#allocation46_spill] sm:$0xff] }
 0x223   : > { %5390 = vmatprep.mubr.f32.mxu0 %v5080_v39  ;;  %v2777_v6 = vadd.f32 %v2617_v31, %v2457_v32  ;;  %v9430_v42 = vadd.f32 %v2618_v7, %v2458_v13  ;;  %v4527_v57 = vsub.f32 %v8843_v33, %v9306_v9  ;;  %vm657_vm4 = vcmp.ge.f32.partialorder %v9306_v9, %v8872_v21  ;;  %v14566_v35 = vld [vmem:[#allocation108_spill] sm:$0xff]  ;;  %v14571_v21 = vld [vmem:[#allocation111_spill] sm:$0xff] }
 0x224   : > { %v3570_v22 = vmul.f32 %v14564_v40, %v3375_v37  ;;  %v4356_v61 = vmul.f32 %v14565_v28, %v4185_v19  ;;  %vm892_vm5 = vcmp.lt.f32.partialorder %v9306_v9, %v14566_v35  ;;  %v1648_v54 = vsub.f32 %v9306_v9, %v14567_v27  ;;  %v14568_v13 = vld [vmem:[#allocation104_spill] sm:$0xff]  ;;  %v14570_v19 = vld [vmem:[#allocation110_spill] sm:$0xff] }
 0x225   : > { %14563 = vst [vmem:[#allocation43_spill] sm:$0xff] %v9430_v42  ;;  %v3714_v39 = vmul.f32 %v3180_v2, %v2777_v6  ;;  %v3857_v32 = vmul.f32 %v3569_v20, %v2777_v6  ;;  %v4698_v4 = vmul.f32 %v14568_v13, %v4527_v57  ;;  %vm1068_vm6 = vmand %vm657_vm4, %vm892_vm5  ;;  %v2078_v31 = vsub.f32 %v14569_v14, %v9306_v9  ;;  %v14572_v27 = vld [vmem:[#allocation50_spill] sm:$0xff]  ;;  %v14573_v20 = vld [vmem:[#allocation113_spill] sm:$0xff] }
 0x226   : > { %v3858_v7 = vmul.f32 %v3570_v22, %v9430_v42  ;;  %v6315_v37 = vsel %vm1068_vm6, 1.0, %v14403_v18  ;;  %v1863_v51 = vmul.f32 %v14570_v19, %v1648_v54  ;;  %v2981_v35 = vsub.f32 %v9306_v9, %v14571_v21  ;;  %v14574_v57 = vld [vmem:[#allocation116_spill] sm:$0xff]  ;;  %v14577_v40 = vld [vmem:[#allocation118_spill] sm:$0xff] }
 0x227   : > { %v4001_v33 = vadd.f32 %v3857_v32, %v3713_v46  ;;  %v2293_v2 = vmul.f32 %v14572_v27, %v2078_v31  ;;  %v3371_v6 = vsub.f32 %v14573_v20, %v9306_v9  ;;  %v4182_v13 = vsub.f32 %v9306_v9, %v14574_v57  ;;  %v14576_v22 = vld [vmem:[#allocation112_spill] sm:$0xff]  ;;  %v14578_v32 = vld [vmem:[#allocation114_spill] sm:$0xff] }
 0x228   : > { %v9455_v28 = vadd.f32 %v3858_v7, %v3714_v39  ;;  %v2453_v14 = vmul.f32 %v6315_v37, %v1863_v51  ;;  %v3176_v42 = vmul.f32 %v14576_v22, %v2981_v35  ;;  %v4524_v54 = vsub.f32 %v14577_v40, %v9306_v9  ;;  %v9461_v19 = vld [vmem:[%s8213_s17 + $0x20] sm:$0xff]  ;;  %v14579_v7 = vld [vmem:[#allocation119_spill] sm:$0xff] }
 0x229   : > { %v4826_v21 = vmul.f32 %v4356_v61, %v4001_v33  ;;  %v2613_v46 = vmul.f32 %v9336_v0, %v2293_v2  ;;  %v3566_v31 = vmul.f32 %v14578_v32, %v3371_v6  ;;  %v4353_v27 = vmul.f32 %v8925_v1, %v4182_v13 }
 0x22a   : > { %14575 = vst [vmem:[#allocation126_spill] sm:$0xff] %v9455_v28  ;;  %v4954_v20 = vmul.f32 %v4698_v4, %v9455_v28  ;;  %v4695_v39 = vmul.f32 %v8933_v41, %v4524_v54  ;;  %v4184_v51 = vsub.f32 %v9306_v9, %v14579_v7  ;;  %v4526_v35 = vsub.f32 %v8955_v24, %v9306_v9 }
 0x22b   : > { %v2773_v37 = vadd.f32 %v2613_v46, %v2453_v14  ;;  %v3854_v40 = vmul.f32 %v3566_v31, %v9373_v16  ;;  %vm669_vm7 = vcmp.ge.f32.partialorder %v9461_v19, %v8380_v43  ;;  %vm670_vm8 = vcmp.ge.f32.partialorder %v9461_v19, %v8384_v44 }
 0x22c   : > { %v5082_v0 = vadd.f32 %v4954_v20, %v4826_v21  ;;  %v4951_v61 = vmul.f32 %v4695_v39, %v9394_v10  ;;  %v4355_v13 = vmul.f32 %v8951_v23, %v4184_v51  ;;  %v4697_v4 = vmul.f32 %v8959_v25, %v4526_v35 }
 0x22d   : > { %v3710_v2 = vmul.f32 %v3176_v42, %v2773_v37  ;;  %vm671_vm9 = vcmp.ge.f32.partialorder %v9461_v19, %v8388_v45  ;;  %vm672_vm10 = vcmp.ge.f32.partialorder %v9461_v19, %v8394_v47  ;;  %vm904_vm11 = vcmp.lt.f32.partialorder %v9461_v19, %v8398_v48  ;;  %v14580_v37 = vld [vmem:[#allocation49_spill] sm:$0xff] }
 0x22e   : > { %5535 = vmatprep.mubr.f32.mxu1 %v5082_v0  ;;  %v4825_v9 = vmul.f32 %v4355_v13, %v9402_v30  ;;  %v4953_v21 = vmul.f32 %v4697_v4, %v4001_v33  ;;  %vm905_vm12 = vcmp.lt.f32.partialorder %v9461_v19, %v8402_v49  ;;  %vm906_vm13 = vcmp.lt.f32.partialorder %v9461_v19, %v8406_v50  ;;  %vm1080_vm14 = vmand %vm669_vm7, %vm904_vm11  ;;  %v14581_v13 = vld [vmem:[#allocation51_spill] sm:$0xff] }
 0x22f   : > { %v3998_v16 = vadd.f32 %v3854_v40, %v3710_v2  ;;  %vm907_vm15 = vcmp.lt.f32.partialorder %v9461_v19, %v8418_v52  ;;  %vm1081_vm0 = vmand %vm670_vm8, %vm905_vm12  ;;  %v9500_v33 = vsel %vm1080_vm14, 1.0, %v14403_v18  ;;  %v1659_v30 = vsub.f32 %v9461_v19, %v8437_v55 }
 0x230   : > { %v5081_v10 = vadd.f32 %v4953_v21, %v4825_v9  ;;  %vm1082_vm1 = vmand %vm671_vm9, %vm906_vm13  ;;  %v6328_v42 = vsel %vm1081_vm0, 1.0, %v14403_v18  ;;  %v1660_v40 = vsub.f32 %v9461_v19, %v8441_v56  ;;  %v1661_v14 = vsub.f32 %v9461_v19, %v8451_v60  ;;  %v14582_v9 = vld [vmem:[#allocation52_spill] sm:$0xff] }
 0x231   : > { %v4823_v20 = vmul.f32 %v4353_v27, %v3998_v16  ;;  %vm1083_vm2 = vmand %vm672_vm10, %vm907_vm15  ;;  %v6329_v6 = vsel %vm1082_vm1, 1.0, %v14403_v18  ;;  %v1874_v54 = vmul.f32 %v14535_v62, %v1659_v30  ;;  %v2089_v46 = vsub.f32 %v14533_v15, %v9461_v19 }
 0x232   : > { %5536 = vmatmul.mubr.f32.gmra.mrb[6].mxu1 %v5081_v10  ;;  %v6330_v31 = vsel %vm1083_vm2, 1.0, %v14403_v18  ;;  %v1875_v39 = vmul.f32 %v14536_v12, %v1660_v40  ;;  %v1876_v51 = vmul.f32 %v14537_v34, %v1661_v14  ;;  %v2090_v27 = vsub.f32 %v14534_v59, %v9461_v19  ;;  %v14583_v10 = vld [vmem:[#allocation54_spill] sm:$0xff]  ;;  %v14584_v14 = vld [vmem:[#allocation53_spill] sm:$0xff]  ;;  %v14585_v12 = vld [vmem:[#allocation55_spill] sm:$0xff] }
 0x233   : > { %v5079_v35 = vadd.f32 %v4951_v61, %v4823_v20  ;;  %v2091_v0 = vsub.f32 %v14580_v37, %v9461_v19  ;;  %v2304_v4 = vmul.f32 %v14581_v13, %v2089_v46  ;;  %v2464_v2 = vmul.f32 %v9500_v33, %v1874_v54  ;;  %v14586_v20 = vld [vmem:[#allocation58_spill] sm:$0xff]  ;;  %v14587_v13 = vld [vmem:[#allocation56_spill] sm:$0xff] }
 0x234   : > { %v2305_v21 = vmul.f32 %v14582_v9, %v2090_v27  ;;  %v2465_v16 = vmul.f32 %v6328_v42, %v1875_v39  ;;  %v2466_v30 = vmul.f32 %v6329_v6, %v1876_v51  ;;  %v2991_v40 = vsub.f32 %v9461_v19, %v14583_v10  ;;  %v14588_v27 = vld [vmem:[#allocation59_spill] sm:$0xff]  ;;  %v14593_v59 = vld [vmem:[#allocation66_spill] sm:$0xff] }
 0x235   : > { %5391 = vmatmul.mubr.f32.gmra.mrb[6].mxu0 %v5079_v35  ;;  %v2306_v28 = vmul.f32 %v14584_v14, %v2091_v0  ;;  %v2624_v34 = vmul.f32 %v6328_v42, %v2304_v4  ;;  %v2992_v61 = vsub.f32 %v9461_v19, %v14585_v12  ;;  %v3381_v37 = vsub.f32 %v14586_v20, %v9461_v19  ;;  %v14589_v0 = vld [vmem:[#allocation60_spill] sm:$0xff]  ;;  %v14590_v14 = vld [vmem:[#allocation61_spill] sm:$0xff]  ;;  %v14591_v20 = vld [vmem:[#allocation63_spill] sm:$0xff] }
 0x236   : > { %v2625_v46 = vmul.f32 %v6329_v6, %v2305_v21  ;;  %v3186_v54 = vmul.f32 %v14587_v13, %v2991_v40  ;;  %v3382_v39 = vsub.f32 %v14588_v27, %v9461_v19  ;;  %v4191_v51 = vsub.f32 %v9461_v19, %v14546_v26  ;;  %v14592_v21 = vld [vmem:[#allocation64_spill] sm:$0xff] }
 0x237   : > { %v2626_v10 = vmul.f32 %v6330_v31, %v2306_v28  ;;  %v9541_v35 = vadd.f32 %v2624_v34, %v2464_v2  ;;  %v3187_v42 = vmul.f32 %v14502_v17, %v2992_v61  ;;  %v3576_v4 = vmul.f32 %v14589_v0, %v3381_v37  ;;  %v14594_v34 = vld [vmem:[#allocation67_spill] sm:$0xff]  ;;  %v14595_v37 = vld [vmem:[#allocation65_spill] sm:$0xff] }
 0x238   : > { %v2785_v12 = vadd.f32 %v2625_v46, %v2465_v16  ;;  %v3577_v9 = vmul.f32 %v14590_v14, %v3382_v39  ;;  %v4362_v6 = vmul.f32 %v14591_v20, %v4191_v51  ;;  %v4533_v40 = vsub.f32 %v14592_v21, %v9461_v19  ;;  %v14596_v61 = vld [vmem:[#allocation69_spill] sm:$0xff]  ;;  %v14597_v39 = vld [vmem:[#allocation70_spill] sm:$0xff] }
 0x239   : > { %v2786_v13 = vadd.f32 %v2626_v10, %v2466_v30  ;;  %v3720_v27 = vmul.f32 %v3186_v54, %v9541_v35  ;;  %vm673_vm3 = vcmp.ge.f32.partialorder %v9461_v19, %v14593_v59  ;;  %vm674_vm4 = vcmp.ge.f32.partialorder %v9461_v19, %v14594_v34  ;;  %v14598_v30 = vld [vmem:[#allocation72_spill] sm:$0xff]  ;;  %v14599_v54 = vld [vmem:[#allocation73_spill] sm:$0xff]  ;;  %v14603_v34 = vld [vmem:[#allocation83_spill] sm:$0xff] }
 0x23a   : > { %v3721_v28 = vmul.f32 %v3187_v42, %v2785_v12  ;;  %v3864_v2 = vmul.f32 %v3576_v4, %v2785_v12  ;;  %v4704_v16 = vmul.f32 %v14595_v37, %v4533_v40  ;;  %vm908_vm5 = vcmp.lt.f32.partialorder %v9461_v19, %v14596_v61  ;;  %v14600_v42 = vld [vmem:[#allocation79_spill] sm:$0xff]  ;;  %v14604_v21 = vld [vmem:[#allocation85_spill] sm:$0xff] }
 0x23b   : > { %v3865_v46 = vmul.f32 %v3577_v9, %v2786_v13  ;;  %vm909_vm6 = vcmp.lt.f32.partialorder %v9461_v19, %v14597_v39  ;;  %vm1084_vm7 = vmand %vm673_vm3, %vm908_vm5  ;;  %v1662_v10 = vsub.f32 %v9461_v19, %v14598_v30  ;;  %v1663_v51 = vsub.f32 %v9461_v19, %v14599_v54  ;;  %v14601_v9 = vld [vmem:[#allocation80_spill] sm:$0xff] }
 0x23c   : > { %v9563_v59 = vadd.f32 %v3864_v2, %v3720_v27  ;;  %vm1085_vm8 = vmand %vm674_vm4, %vm909_vm6  ;;  %v6331_v12 = vsel %vm1084_vm7, 1.0, %v14403_v18  ;;  %v2092_v4 = vsub.f32 %v14600_v42, %v9461_v19  ;;  %v2093_v40 = vsub.f32 %v14601_v9, %v9461_v19 }
 0x23d   : > { %v9570_v61 = vadd.f32 %v3865_v46, %v3721_v28  ;;  %v9573_v39 = vsel %vm1085_vm8, 1.0, %v14403_v18  ;;  %v1877_v30 = vmul.f32 %v14473_v3, %v1662_v10  ;;  %v1878_v54 = vmul.f32 %v14561_v11, %v1663_v51 }
 0x23e   : > { %14602 = vst [vmem:[#allocation127_spill] sm:$0xff] %v9573_v39  ;;  %v4832_v27 = vmul.f32 %v4362_v6, %v9563_v59  ;;  %v2307_v2 = vmul.f32 %v14562_v58, %v2092_v4  ;;  %v2308_v37 = vmul.f32 %v14603_v34, %v2093_v40  ;;  %v2993_v42 = vsub.f32 %v9461_v19, %v14604_v21 }
 0x23f   : > { %v4960_v9 = vmul.f32 %v4704_v16, %v9570_v61  ;;  %v2467_v28 = vmul.f32 %v6330_v31, %v1877_v30  ;;  %v2468_v46 = vmul.f32 %v6331_v12, %v1878_v54  ;;  %v2994_v20 = vsub.f32 %v9461_v19, %v14476_v63 }
 0x240   : > { %v2627_v14 = vmul.f32 %v6331_v12, %v2307_v2  ;;  %v2628_v10 = vmul.f32 %v9573_v39, %v2308_v37  ;;  %v3188_v51 = vmul.f32 %v8765_v8, %v2993_v42  ;;  %v3383_v6 = vsub.f32 %v14477_v53, %v9461_v19  ;;  %v14606_v12 = vld [vmem:[#allocation96_spill] sm:$0xff] }
 0x241   : > { %v5088_v4 = vadd.f32 %v4960_v9, %v4832_v27  ;;  %v3189_v40 = vmul.f32 %v14478_v29, %v2994_v20  ;;  %v3384_v21 = vsub.f32 %v14479_v5, %v9461_v19  ;;  %v4193_v31 = vsub.f32 %v9461_v19, %v8821_v38  ;;  %v14607_v2 = vld [vmem:[#allocation100_spill] sm:$0xff]  ;;  %v14608_v9 = vld [vmem:[#allocation102_spill] sm:$0xff]  ;;  %v14609_v27 = vld [vmem:[#allocation107_spill] sm:$0xff] }
 0x242   : > { %v2787_v16 = vadd.f32 %v2627_v14, %v2467_v28  ;;  %v9594_v30 = vadd.f32 %v2628_v10, %v2468_v46  ;;  %v3578_v54 = vmul.f32 %v14481_v36, %v3383_v6  ;;  %v3722_v37 = vmul.f32 %v3188_v51, %v2786_v13  ;;  %v14610_v38 = vld [vmem:[#allocation108_spill] sm:$0xff]  ;;  %v14611_v14 = vld [vmem:[#allocation109_spill] sm:$0xff]  ;;  %v14613_v10 = vld [vmem:[#allocation46_spill] sm:$0xff] }
 0x243   : > { %5395 = vmatprep.mubr.f32.mxu0 %v5088_v4  ;;  %v3579_v42 = vmul.f32 %v14606_v12, %v3384_v21  ;;  %v4364_v39 = vmul.f32 %v14607_v2, %v4193_v31  ;;  %v4535_v20 = vsub.f32 %v14608_v9, %v9461_v19  ;;  %vm668_vm9 = vcmp.ge.f32.partialorder %v9461_v19, %v14609_v27  ;;  %v14612_v28 = vld [vmem:[#allocation104_spill] sm:$0xff]  ;;  %v14614_v6 = vld [vmem:[#allocation111_spill] sm:$0xff]  ;;  %v9644_v2 = vld [vmem:[%s8213_s17 + $0x28] sm:$0xff] }
 0x244   : > { %14605 = vst [vmem:[#allocation128_spill] sm:$0xff] %v9594_v30  ;;  %v3723_v5 = vmul.f32 %v3189_v40, %v2787_v16  ;;  %v3866_v29 = vmul.f32 %v3578_v54, %v2787_v16  ;;  %vm903_vm10 = vcmp.lt.f32.partialorder %v9461_v19, %v14610_v38  ;;  %v1658_v13 = vsub.f32 %v9461_v19, %v14611_v14  ;;  %v14615_v16 = vld [vmem:[#allocation110_spill] sm:$0xff]  ;;  %v14616_v14 = vld [vmem:[#allocation113_spill] sm:$0xff] }
 0x245   : > { %v3867_v21 = vmul.f32 %v3579_v42, %v9594_v30  ;;  %v4706_v46 = vmul.f32 %v14612_v28, %v4535_v20  ;;  %vm1079_vm11 = vmand %vm668_vm9, %vm903_vm10  ;;  %v2088_v51 = vsub.f32 %v14613_v10, %v9461_v19  ;;  %v2990_v4 = vsub.f32 %v9461_v19, %v14614_v6  ;;  %v14618_v20 = vld [vmem:[#allocation50_spill] sm:$0xff] }
 0x246   : > { %v4010_v40 = vadd.f32 %v3866_v29, %v3722_v37  ;;  %v6326_v31 = vsel %vm1079_vm11, 1.0, %v14403_v18  ;;  %v1873_v54 = vmul.f32 %v14615_v16, %v1658_v13  ;;  %v3380_v42 = vsub.f32 %v14616_v14, %v9461_v19  ;;  %v5267_v29 = vld [vmem:[%s8239_s30 + $0x2a0] sm:$0xff]  ;;  %v5268_v37 = vld [vmem:[%s8239_s30 + $0x2a8] sm:$0xff] }
 0x247   : > { %v9617_v30 = vadd.f32 %v3867_v21, %v3723_v5  ;;  %v2303_v28 = vmul.f32 %v14618_v20, %v2088_v51  ;;  %v3185_v10 = vmul.f32 %v14576_v22, %v2990_v4  ;;  %v4190_v6 = vsub.f32 %v9461_v19, %v14574_v57  ;;  %v14619_v14 = vld [vmem:[#allocation118_spill] sm:$0xff]  ;;  %v5299_v21 = vld [vmem:[%s8239_s30 + $0x3a0] sm:$0xff] }
 0x248   : > { %v4834_v38 = vmul.f32 %v4364_v39, %v4010_v40  ;;  %v2463_v27 = vmul.f32 %v6326_v31, %v1873_v54  ;;  %v3575_v13 = vmul.f32 %v14578_v32, %v3380_v42  ;;  %v4532_v5 = vsub.f32 %v14619_v14, %v9461_v19  ;;  %v5300_v51 = vld [vmem:[%s8239_s30 + $0x3a8] sm:$0xff]  ;;  %v5251_v20 = vld [vmem:[%s8239_s30 + $0x220] sm:$0xff] }
 0x249   : > { %14617 = vst [vmem:[#allocation129_spill] sm:$0xff] %v9617_v30  ;;  %v4962_v4 = vmul.f32 %v4706_v46, %v9617_v30  ;;  %v2623_v22 = vmul.f32 %v9500_v33, %v2303_v28  ;;  %v4361_v57 = vmul.f32 %v8925_v1, %v4190_v6  ;;  %v4192_v16 = vsub.f32 %v9461_v19, %v14579_v7  ;;  %v5252_v39 = vld [vmem:[%s8239_s30 + $0x228] sm:$0xff]  ;;  %v5283_v31 = vld [vmem:[%s8239_s30 + $0x320] sm:$0xff] }
 0x24a   : > { %v5284_v54 = vld [vmem:[%s8239_s30 + $0x328] sm:$0xff]  ;;  %v3863_v42 = vmul.f32 %v3575_v13, %v9541_v35  ;;  %v4703_v32 = vmul.f32 %v8933_v41, %v4532_v5  ;;  %v4534_v14 = vsub.f32 %v8955_v24, %v9461_v19  ;;  %v6946_v9 = vpack.c.bf16 %v5268_v37, %v5267_v29  ;;  %v14622_v37 = vld [vmem:[#allocation45_spill] sm:$0xff] }
 0x24b   : > { %v5090_v46 = vadd.f32 %v4962_v4, %v4834_v38  ;;  %v2783_v33 = vadd.f32 %v2623_v22, %v2463_v27  ;;  %v4363_v28 = vmul.f32 %v8951_v23, %v4192_v16  ;;  %v6978_v6 = vpack.c.bf16 %v5300_v51, %v5299_v21  ;;  %v14623_v4 = vld [vmem:[#allocation49_spill] sm:$0xff] }
 0x24c   : > { %v4959_v30 = vmul.f32 %v4703_v32, %v9563_v59  ;;  %v4705_v7 = vmul.f32 %v8959_v25, %v4534_v14  ;;  %6947 = vmatprep.subr.bf16.mxu0 %v6946_v9  ;;  %v6948_v1 = vpack.c.bf16 %v5252_v39, %v5251_v20  ;;  %v6980_v35 = vpack.c.bf16 %v5284_v54, %v5283_v31  ;;  %v14620_v14 = vld [vmem:[#allocation48_spill] sm:$0xff]  ;;  %v14624_v31 = vld [vmem:[#allocation51_spill] sm:$0xff] }
 0x24d   : > { %5540 = vmatprep.mubr.f32.mxu1 %v5090_v46  ;;  %v3719_v13 = vmul.f32 %v3185_v10, %v2783_v33  ;;  %v4833_v5 = vmul.f32 %v4363_v28, %v9570_v61  ;;  %6979 = vmatprep.subr.bf16.mxu1 %v6978_v6  ;;  %vm680_vm12 = vcmp.ge.f32.partialorder %v9644_v2, %v8380_v43  ;;  %v14621_v20 = vld [vmem:[#allocation44_spill] sm:$0xff]  ;;  %v14626_v6 = vld [vmem:[#allocation54_spill] sm:$0xff] }
 0x24e   : > { %v4961_v38 = vmul.f32 %v4705_v7, %v4010_v40  ;;  %6949 = vmatpush3.bf16.msra.mxu0 %v6948_v1  ;;  %6981 = vmatpush3.bf16.msra.mxu1 %v6980_v35  ;;  %vm681_vm13 = vcmp.ge.f32.partialorder %v9644_v2, %v8384_v44  ;;  %vm682_vm14 = vcmp.ge.f32.partialorder %v9644_v2, %v8388_v45  ;;  %v14625_v54 = vld [vmem:[#allocation52_spill] sm:$0xff] }
 0x24f   : > { %v4007_v59 = vadd.f32 %v3863_v42, %v3719_v13  ;;  %vm683_vm15 = vcmp.ge.f32.partialorder %v9644_v2, %v8394_v47  ;;  %vm915_vm0 = vcmp.lt.f32.partialorder %v9644_v2, %v8398_v48  ;;  %vm916_vm1 = vcmp.lt.f32.partialorder %v9644_v2, %v8402_v49  ;;  %v14627_v13 = vld [vmem:[#allocation53_spill] sm:$0xff] }
 0x250   : > { %v5089_v19 = vadd.f32 %v4961_v38, %v4833_v5  ;;  %vm917_vm2 = vcmp.lt.f32.partialorder %v9644_v2, %v8406_v50  ;;  %vm918_vm3 = vcmp.lt.f32.partialorder %v9644_v2, %v8418_v52  ;;  %vm1091_vm4 = vmand %vm680_vm12, %vm915_vm0  ;;  %v1669_v1 = vsub.f32 %v9644_v2, %v8437_v55 }
 0x251   : > { %v4831_v22 = vmul.f32 %v4361_v57, %v4007_v59  ;;  %vm1092_vm5 = vmand %vm681_vm13, %vm916_vm1  ;;  %v9669_v32 = vsel %vm1091_vm4, 1.0, %v14403_v18  ;;  %v1670_v7 = vsub.f32 %v9644_v2, %v8441_v56  ;;  %v1671_v61 = vsub.f32 %v9644_v2, %v8451_v60 }
 0x252   : > { %5541 = vmatmul.mubr.f32.gmra.mrb[8].mxu1 %v5089_v19  ;;  %vm1093_vm6 = vmand %vm682_vm14, %vm917_vm2  ;;  %v6339_v9 = vsel %vm1092_vm5, 1.0, %v14403_v18  ;;  %v1884_v27 = vmul.f32 %v14535_v62, %v1669_v1  ;;  %v2099_v57 = vsub.f32 %v14533_v15, %v9644_v2  ;;  %v2100_v10 = vsub.f32 %v14620_v14, %v9644_v2  ;;  %v14628_v19 = vld [vmem:[#allocation55_spill] sm:$0xff] }
 0x253   : > { %v5087_v40 = vadd.f32 %v4959_v30, %v4831_v22  ;;  %vm1094_vm7 = vmand %vm683_vm15, %vm918_vm3  ;;  %v6340_v16 = vsel %vm1093_vm6, 1.0, %v14403_v18  ;;  %v1885_v29 = vmul.f32 %v14621_v20, %v1670_v7  ;;  %v1886_v21 = vmul.f32 %v14622_v37, %v1671_v61  ;;  %v14629_v22 = vld [vmem:[#allocation56_spill] sm:$0xff]  ;;  %v14630_v61 = vld [vmem:[#allocation58_spill] sm:$0xff] }
 0x254   : > { %v6341_v51 = vsel %vm1094_vm7, 1.0, %v14403_v18  ;;  %v2101_v39 = vsub.f32 %v14623_v4, %v9644_v2  ;;  %v2314_v30 = vmul.f32 %v14624_v31, %v2099_v57  ;;  %v2315_v42 = vmul.f32 %v14625_v54, %v2100_v10  ;;  %v14631_v10 = vld [vmem:[#allocation59_spill] sm:$0xff] }
 0x255   : > { %5396 = vmatmul.mubr.f32.gmra.mrb[8].mxu0 %v5087_v40  ;;  %v2474_v46 = vmul.f32 %v9669_v32, %v1884_v27  ;;  %v2475_v33 = vmul.f32 %v6339_v9, %v1885_v29  ;;  %v2476_v28 = vmul.f32 %v6340_v16, %v1886_v21  ;;  %v3000_v35 = vsub.f32 %v9644_v2, %v14626_v6 }
 0x256   : > { %v2316_v5 = vmul.f32 %v14627_v13, %v2101_v39  ;;  %v2634_v38 = vmul.f32 %v6339_v9, %v2314_v30  ;;  %v2635_v59 = vmul.f32 %v6340_v16, %v2315_v42  ;;  %v3001_v1 = vsub.f32 %v9644_v2, %v14628_v19  ;;  %v14632_v30 = vld [vmem:[#allocation61_spill] sm:$0xff] }
 0x257   : > { %v3195_v7 = vmul.f32 %v14629_v22, %v3000_v35  ;;  %v3390_v57 = vsub.f32 %v14630_v61, %v9644_v2  ;;  %v3391_v27 = vsub.f32 %v14631_v10, %v9644_v2  ;;  %v4199_v40 = vsub.f32 %v9644_v2, %v14546_v26  ;;  %v14633_v35 = vld [vmem:[#allocation63_spill] sm:$0xff]  ;;  %v14634_v61 = vld [vmem:[#allocation64_spill] sm:$0xff]  ;;  %v14635_v26 = vld [vmem:[#allocation66_spill] sm:$0xff] }
 0x258   : > { %v2636_v29 = vmul.f32 %v6341_v51, %v2316_v5  ;;  %v9711_v21 = vadd.f32 %v2634_v38, %v2474_v46  ;;  %v2795_v39 = vadd.f32 %v2635_v59, %v2475_v33  ;;  %v3196_v9 = vmul.f32 %v14502_v17, %v3001_v1  ;;  %v14636_v33 = vld [vmem:[#allocation65_spill] sm:$0xff]  ;;  %v14637_v38 = vld [vmem:[#allocation67_spill] sm:$0xff] }
 0x259   : > { %v3585_v16 = vmul.f32 %v14589_v0, %v3390_v57  ;;  %v3586_v42 = vmul.f32 %v14632_v30, %v3391_v27  ;;  %v4370_v22 = vmul.f32 %v14633_v35, %v4199_v40  ;;  %v4541_v19 = vsub.f32 %v14634_v61, %v9644_v2  ;;  %v14638_v59 = vld [vmem:[#allocation69_spill] sm:$0xff]  ;;  %v14639_v57 = vld [vmem:[#allocation70_spill] sm:$0xff] }
 0x25a   : > { %v2796_v6 = vadd.f32 %v2636_v29, %v2476_v28  ;;  %v3729_v10 = vmul.f32 %v3195_v7, %v9711_v21  ;;  %v3730_v13 = vmul.f32 %v3196_v9, %v2795_v39  ;;  %vm684_vm8 = vcmp.ge.f32.partialorder %v9644_v2, %v14635_v26  ;;  %v14640_v28 = vld [vmem:[#allocation72_spill] sm:$0xff]  ;;  %v14641_v27 = vld [vmem:[#allocation73_spill] sm:$0xff] }
 0x25b   : > { %v3873_v46 = vmul.f32 %v3585_v16, %v2795_v39  ;;  %v4712_v5 = vmul.f32 %v14636_v33, %v4541_v19  ;;  %vm685_vm9 = vcmp.ge.f32.partialorder %v9644_v2, %v14637_v38  ;;  %vm919_vm10 = vcmp.lt.f32.partialorder %v9644_v2, %v14638_v59  ;;  %v14642_v39 = vld [vmem:[#allocation79_spill] sm:$0xff]  ;;  %v14643_v16 = vld [vmem:[#allocation80_spill] sm:$0xff]  ;;  %v14645_v38 = vld [vmem:[#allocation85_spill] sm:$0xff] }
 0x25c   : > { %v3874_v1 = vmul.f32 %v3586_v42, %v2796_v6  ;;  %vm920_vm11 = vcmp.lt.f32.partialorder %v9644_v2, %v14639_v57  ;;  %vm1095_vm12 = vmand %vm684_vm8, %vm919_vm10  ;;  %v1672_v7 = vsub.f32 %v9644_v2, %v14640_v28  ;;  %v1673_v40 = vsub.f32 %v9644_v2, %v14641_v27 }
 0x25d   : > { %v9733_v29 = vadd.f32 %v3873_v46, %v3729_v10  ;;  %vm1096_vm13 = vmand %vm685_vm9, %vm920_vm11  ;;  %v6342_v19 = vsel %vm1095_vm12, 1.0, %v14403_v18  ;;  %v2102_v9 = vsub.f32 %v14642_v39, %v9644_v2  ;;  %v2103_v42 = vsub.f32 %v14643_v16, %v9644_v2 }
 0x25e   : > { %v9740_v33 = vadd.f32 %v3874_v1, %v3730_v13  ;;  %v9743_v57 = vsel %vm1096_vm13, 1.0, %v14403_v18  ;;  %v1887_v28 = vmul.f32 %v14473_v3, %v1672_v7  ;;  %v1888_v27 = vmul.f32 %v14561_v11, %v1673_v40 }
 0x25f   : > { %14644 = vst [vmem:[#allocation48_spill] sm:$0xff] %v9743_v57  ;;  %v4840_v10 = vmul.f32 %v4370_v22, %v9733_v29  ;;  %v2317_v46 = vmul.f32 %v14562_v58, %v2102_v9  ;;  %v2318_v59 = vmul.f32 %v14603_v34, %v2103_v42  ;;  %v3002_v39 = vsub.f32 %v9644_v2, %v14645_v38  ;;  %v14646_v42 = vld [vmem:[#allocation89_spill] sm:$0xff] }
 0x260   : > { %v4968_v16 = vmul.f32 %v4712_v5, %v9740_v33  ;;  %v2477_v13 = vmul.f32 %v6341_v51, %v1887_v28  ;;  %v2478_v1 = vmul.f32 %v6342_v19, %v1888_v27  ;;  %v3003_v26 = vsub.f32 %v9644_v2, %v14476_v63  ;;  %v14647_v38 = vld [vmem:[#allocation93_spill] sm:$0xff]  ;;  %v14648_v5 = vld [vmem:[#allocation98_spill] sm:$0xff] }
 0x261   : > { %v2637_v61 = vmul.f32 %v6342_v19, %v2317_v46  ;;  %v2638_v7 = vmul.f32 %v9743_v57, %v2318_v59  ;;  %v3197_v40 = vmul.f32 %v8765_v8, %v3002_v39  ;;  %v3392_v22 = vsub.f32 %v14477_v53, %v9644_v2  ;;  %v14650_v46 = vld [vmem:[#allocation100_spill] sm:$0xff] }
 0x262   : > { %v5096_v9 = vadd.f32 %v4968_v16, %v4840_v10  ;;  %v3198_v34 = vmul.f32 %v14646_v42, %v3003_v26  ;;  %v3393_v58 = vsub.f32 %v14647_v38, %v9644_v2  ;;  %v4201_v51 = vsub.f32 %v9644_v2, %v14648_v5  ;;  %v14651_v16 = vld [vmem:[#allocation102_spill] sm:$0xff]  ;;  %v14652_v10 = vld [vmem:[#allocation107_spill] sm:$0xff]  ;;  %v14653_v5 = vld [vmem:[#allocation108_spill] sm:$0xff] }
 0x263   : > { %v2797_v28 = vadd.f32 %v2637_v61, %v2477_v13  ;;  %v9764_v27 = vadd.f32 %v2638_v7, %v2478_v1  ;;  %v3587_v19 = vmul.f32 %v14481_v36, %v3392_v22  ;;  %v3731_v59 = vmul.f32 %v3197_v40, %v2796_v6  ;;  %v14654_v61 = vld [vmem:[#allocation109_spill] sm:$0xff]  ;;  %v14656_v7 = vld [vmem:[#allocation46_spill] sm:$0xff]  ;;  %v14657_v22 = vld [vmem:[#allocation111_spill] sm:$0xff] }
 0x264   : > { %5400 = vmatprep.mubr.f32.mxu0 %v5096_v9  ;;  %v3588_v39 = vmul.f32 %v14606_v12, %v3393_v58  ;;  %v4372_v57 = vmul.f32 %v14650_v46, %v4201_v51  ;;  %v4543_v26 = vsub.f32 %v14651_v16, %v9644_v2  ;;  %vm679_vm14 = vcmp.ge.f32.partialorder %v9644_v2, %v14652_v10  ;;  %v14655_v58 = vld [vmem:[#allocation104_spill] sm:$0xff]  ;;  %v9794_v10 = vld [vmem:[%s8213_s17 + $0x30] sm:$0xff] }
 0x265   : > { %14649 = vst [vmem:[#allocation44_spill] sm:$0xff] %v9764_v27  ;;  %v3732_v38 = vmul.f32 %v3198_v34, %v2797_v28  ;;  %v3875_v53 = vmul.f32 %v3587_v19, %v2797_v28  ;;  %vm914_vm15 = vcmp.lt.f32.partialorder %v9644_v2, %v14653_v5  ;;  %v1668_v6 = vsub.f32 %v9644_v2, %v14654_v61  ;;  %v14658_v28 = vld [vmem:[#allocation110_spill] sm:$0xff]  ;;  %v14659_v5 = vld [vmem:[#allocation113_spill] sm:$0xff]  ;;  %v14663_v12 = vld [vmem:[#allocation116_spill] sm:$0xff] }
 0x266   : > { %v3876_v13 = vmul.f32 %v3588_v39, %v9764_v27  ;;  %v4714_v1 = vmul.f32 %v14655_v58, %v4543_v26  ;;  %vm1090_vm0 = vmand %vm679_vm14, %vm914_vm15  ;;  %v2098_v40 = vsub.f32 %v14656_v7, %v9644_v2  ;;  %v2999_v9 = vsub.f32 %v9644_v2, %v14657_v22  ;;  %v14661_v39 = vld [vmem:[#allocation50_spill] sm:$0xff]  ;;  %v14662_v26 = vld [vmem:[#allocation112_spill] sm:$0xff] }
 0x267   : > { %v4019_v34 = vadd.f32 %v3875_v53, %v3731_v59  ;;  %v6337_v51 = vsel %vm1090_vm0, 1.0, %v14403_v18  ;;  %v1883_v19 = vmul.f32 %v14658_v28, %v1668_v6  ;;  %v3389_v46 = vsub.f32 %v14659_v5, %v9644_v2  ;;  %v14664_v59 = vld [vmem:[#allocation114_spill] sm:$0xff] }
 0x268   : > { %v9787_v61 = vadd.f32 %v3876_v13, %v3732_v38  ;;  %v2313_v27 = vmul.f32 %v14661_v39, %v2098_v40  ;;  %v3194_v58 = vmul.f32 %v14662_v26, %v2999_v9  ;;  %v4198_v7 = vsub.f32 %v9644_v2, %v14663_v12  ;;  %v14665_v6 = vld [vmem:[#allocation118_spill] sm:$0xff]  ;;  %v14666_v13 = vld [vmem:[#allocation117_spill] sm:$0xff]  ;;  %v14667_v39 = vld [vmem:[#allocation119_spill] sm:$0xff] }
 0x269   : > { %v4842_v22 = vmul.f32 %v4372_v57, %v4019_v34  ;;  %v2473_v53 = vmul.f32 %v6337_v51, %v1883_v19  ;;  %v3584_v16 = vmul.f32 %v14664_v59, %v3389_v46  ;;  %v4540_v28 = vsub.f32 %v14665_v6, %v9644_v2 }
 0x26a   : > { %14660 = vst [vmem:[#allocation45_spill] sm:$0xff] %v9787_v61  ;;  %v4970_v5 = vmul.f32 %v4714_v1, %v9787_v61  ;;  %v2633_v38 = vmul.f32 %v9669_v32, %v2313_v27  ;;  %v4369_v40 = vmul.f32 %v14666_v13, %v4198_v7  ;;  %v4200_v9 = vsub.f32 %v9644_v2, %v14667_v39 }
 0x26b   : > { %v3872_v26 = vmul.f32 %v3584_v16, %v9711_v21  ;;  %v4711_v12 = vmul.f32 %v8933_v41, %v4540_v28  ;;  %v4542_v57 = vsub.f32 %v8955_v24, %v9644_v2  ;;  %vm691_vm1 = vcmp.ge.f32.partialorder %v9794_v10, %v8380_v43 }
 0x26c   : > { %v5098_v46 = vadd.f32 %v4970_v5, %v4842_v22  ;;  %v2793_v51 = vadd.f32 %v2633_v38, %v2473_v53  ;;  %v4371_v1 = vmul.f32 %v8951_v23, %v4200_v9  ;;  %vm692_vm2 = vcmp.ge.f32.partialorder %v9794_v10, %v8384_v44 }
 0x26d   : > { %v4967_v32 = vmul.f32 %v4711_v12, %v9733_v29  ;;  %v4713_v27 = vmul.f32 %v8959_v25, %v4542_v57  ;;  %vm693_vm3 = vcmp.ge.f32.partialorder %v9794_v10, %v8388_v45  ;;  %vm694_vm4 = vcmp.ge.f32.partialorder %v9794_v10, %v8394_v47 }
 0x26e   : > { %5545 = vmatprep.mubr.f32.mxu1 %v5098_v46  ;;  %v3728_v2 = vmul.f32 %v3194_v58, %v2793_v51  ;;  %v4841_v21 = vmul.f32 %v4371_v1, %v9740_v33  ;;  %vm926_vm5 = vcmp.lt.f32.partialorder %v9794_v10, %v8398_v48  ;;  %vm927_vm6 = vcmp.lt.f32.partialorder %v9794_v10, %v8402_v49 }
 0x26f   : > { %v4969_v5 = vmul.f32 %v4713_v27, %v4019_v34  ;;  %vm928_vm7 = vcmp.lt.f32.partialorder %v9794_v10, %v8406_v50  ;;  %vm929_vm8 = vcmp.lt.f32.partialorder %v9794_v10, %v8418_v52  ;;  %vm1102_vm9 = vmand %vm691_vm1, %vm926_vm5  ;;  %v1679_v12 = vsub.f32 %v9794_v10, %v8437_v55 }
 0x270   : > { %v4016_v33 = vadd.f32 %v3872_v26, %v3728_v2  ;;  %vm1103_vm10 = vmand %vm692_vm2, %vm927_vm6  ;;  %v9837_v29 = vsel %vm1102_vm9, 1.0, %v14403_v18  ;;  %v1680_v16 = vsub.f32 %v9794_v10, %v8441_v56  ;;  %v1681_v58 = vsub.f32 %v9794_v10, %v8451_v60 }
 0x271   : > { %v5097_v7 = vadd.f32 %v4969_v5, %v4841_v21  ;;  %vm1104_vm11 = vmand %vm693_vm3, %vm928_vm7  ;;  %v6350_v22 = vsel %vm1103_vm10, 1.0, %v14403_v18  ;;  %v1894_v34 = vmul.f32 %v14535_v62, %v1679_v12  ;;  %v2109_v28 = vsub.f32 %v14533_v15, %v9794_v10  ;;  %v14668_v5 = vld [vmem:[#allocation53_spill] sm:$0xff] }
 0x272   : > { %v4839_v19 = vmul.f32 %v4369_v40, %v4016_v33  ;;  %vm1105_vm12 = vmand %vm694_vm4, %vm929_vm8  ;;  %v6351_v26 = vsel %vm1104_vm11, 1.0, %v14403_v18  ;;  %v1895_v53 = vmul.f32 %v14621_v20, %v1680_v16  ;;  %v1896_v38 = vmul.f32 %v14622_v37, %v1681_v58  ;;  %v14669_v16 = vld [vmem:[#allocation54_spill] sm:$0xff] }
 0x273   : > { %5546 = vmatmul.mubr.f32.gmra.mrb[10].mxu1 %v5097_v7  ;;  %v6352_v9 = vsel %vm1105_vm12, 1.0, %v14403_v18  ;;  %v2110_v57 = vsub.f32 %v14620_v14, %v9794_v10  ;;  %v2111_v46 = vsub.f32 %v14623_v4, %v9794_v10  ;;  %v2324_v40 = vmul.f32 %v14624_v31, %v2109_v28  ;;  %v14670_v7 = vld [vmem:[#allocation55_spill] sm:$0xff]  ;;  %v14671_v4 = vld [vmem:[#allocation58_spill] sm:$0xff] }
 0x274   : > { %v5095_v51 = vadd.f32 %v4967_v32, %v4839_v19  ;;  %v2484_v1 = vmul.f32 %v9837_v29, %v1894_v34  ;;  %v2485_v27 = vmul.f32 %v6350_v22, %v1895_v53  ;;  %v2486_v2 = vmul.f32 %v6351_v26, %v1896_v38  ;;  %v14672_v32 = vld [vmem:[#allocation59_spill] sm:$0xff]  ;;  %v14673_v19 = vld [vmem:[#allocation62_spill] sm:$0xff] }
 0x275   : > { %v2325_v21 = vmul.f32 %v14625_v54, %v2110_v57  ;;  %v2326_v12 = vmul.f32 %v14668_v5, %v2111_v46  ;;  %v2644_v33 = vmul.f32 %v6350_v22, %v2324_v40  ;;  %v3009_v58 = vsub.f32 %v9794_v10, %v14669_v16  ;;  %v14674_v22 = vld [vmem:[#allocation56_spill] sm:$0xff] }
 0x276   : > { %5401 = vmatmul.mubr.f32.gmra.mrb[10].mxu0 %v5095_v51  ;;  %v3010_v61 = vsub.f32 %v9794_v10, %v14670_v7  ;;  %v3399_v28 = vsub.f32 %v14671_v4, %v9794_v10  ;;  %v3400_v34 = vsub.f32 %v14672_v32, %v9794_v10  ;;  %v4207_v53 = vsub.f32 %v9794_v10, %v14673_v19  ;;  %v14675_v19 = vld [vmem:[#allocation64_spill] sm:$0xff] }
 0x277   : > { %v2645_v38 = vmul.f32 %v6351_v26, %v2325_v21  ;;  %v2646_v57 = vmul.f32 %v6352_v9, %v2326_v12  ;;  %v9875_v46 = vadd.f32 %v2644_v33, %v2484_v1  ;;  %v3204_v40 = vmul.f32 %v14674_v22, %v3009_v58  ;;  %v14676_v21 = vld [vmem:[#allocation66_spill] sm:$0xff]  ;;  %v14677_v1 = vld [vmem:[#allocation67_spill] sm:$0xff]  ;;  %v14680_v58 = vld [vmem:[#allocation65_spill] sm:$0xff] }
 0x278   : > { %v3205_v51 = vmul.f32 %v14502_v17, %v3010_v61  ;;  %v3594_v16 = vmul.f32 %v14589_v0, %v3399_v28  ;;  %v3595_v7 = vmul.f32 %v14632_v30, %v3400_v34  ;;  %v4378_v4 = vmul.f32 %v14633_v35, %v4207_v53  ;;  %v14678_v61 = vld [vmem:[#allocation69_spill] sm:$0xff]  ;;  %v14679_v12 = vld [vmem:[#allocation70_spill] sm:$0xff]  ;;  %v14681_v53 = vld [vmem:[#allocation72_spill] sm:$0xff] }
 0x279   : > { %v2805_v5 = vadd.f32 %v2645_v38, %v2485_v27  ;;  %v2806_v54 = vadd.f32 %v2646_v57, %v2486_v2  ;;  %v3738_v32 = vmul.f32 %v3204_v40, %v9875_v46  ;;  %v4549_v26 = vsub.f32 %v14675_v19, %v9794_v10  ;;  %v14682_v57 = vld [vmem:[#allocation73_spill] sm:$0xff] }
 0x27a   : > { %vm695_vm13 = vcmp.ge.f32.partialorder %v9794_v10, %v14676_v21  ;;  %vm696_vm14 = vcmp.ge.f32.partialorder %v9794_v10, %v14677_v1  ;;  %vm930_vm15 = vcmp.lt.f32.partialorder %v9794_v10, %v14678_v61  ;;  %vm931_vm0 = vcmp.lt.f32.partialorder %v9794_v10, %v14679_v12  ;;  %v14683_v61 = vld [vmem:[#allocation79_spill] sm:$0xff]  ;;  %v14686_v12 = vld [vmem:[#allocation82_spill] sm:$0xff] }
 0x27b   : > { %v3739_v33 = vmul.f32 %v3205_v51, %v2805_v5  ;;  %v3882_v27 = vmul.f32 %v3594_v16, %v2805_v5  ;;  %v3883_v2 = vmul.f32 %v3595_v7, %v2806_v54  ;;  %v4720_v28 = vmul.f32 %v14680_v58, %v4549_v26  ;;  %vm1106_vm1 = vmand %vm695_vm13, %vm930_vm15  ;;  %v14685_v16 = vld [vmem:[#allocation80_spill] sm:$0xff] }
 0x27c   : > { %vm1107_vm2 = vmand %vm696_vm14, %vm931_vm0  ;;  %v6353_v34 = vsel %vm1106_vm1, 1.0, %v14403_v18  ;;  %v1682_v38 = vsub.f32 %v9794_v10, %v14681_v53  ;;  %v1683_v40 = vsub.f32 %v9794_v10, %v14682_v57  ;;  %v2112_v1 = vsub.f32 %v14683_v61, %v9794_v10  ;;  %v14687_v57 = vld [vmem:[#allocation85_spill] sm:$0xff] }
 0x27d   : > { %v9901_v21 = vadd.f32 %v3882_v27, %v3738_v32  ;;  %v9903_v51 = vadd.f32 %v3883_v2, %v3739_v33  ;;  %v9906_v5 = vsel %vm1107_vm2, 1.0, %v14403_v18  ;;  %v2113_v7 = vsub.f32 %v14685_v16, %v9794_v10  ;;  %v14688_v27 = vld [vmem:[#allocation83_spill] sm:$0xff] }
 0x27e   : > { %14684 = vst [vmem:[#allocation130_spill] sm:$0xff] %v9906_v5  ;;  %v1897_v26 = vmul.f32 %v14473_v3, %v1682_v38  ;;  %v1898_v53 = vmul.f32 %v14561_v11, %v1683_v40  ;;  %v2327_v58 = vmul.f32 %v14686_v12, %v2112_v1  ;;  %v3011_v19 = vsub.f32 %v9794_v10, %v14687_v57  ;;  %v14689_v11 = vld [vmem:[#allocation91_spill] sm:$0xff]  ;;  %v14691_v57 = vld [vmem:[#allocation98_spill] sm:$0xff] }
 0x27f   : > { %v4848_v32 = vmul.f32 %v4378_v4, %v9901_v21  ;;  %v4976_v33 = vmul.f32 %v4720_v28, %v9903_v51  ;;  %v2328_v2 = vmul.f32 %v14688_v27, %v2113_v7  ;;  %v3012_v61 = vsub.f32 %v9794_v10, %v14476_v63  ;;  %v14690_v28 = vld [vmem:[#allocation93_spill] sm:$0xff] }
 0x280   : > { %v2487_v35 = vmul.f32 %v6352_v9, %v1897_v26  ;;  %v2488_v16 = vmul.f32 %v6353_v34, %v1898_v53  ;;  %v2647_v30 = vmul.f32 %v6353_v34, %v2327_v58  ;;  %v3206_v38 = vmul.f32 %v8765_v8, %v3011_v19  ;;  %v14693_v34 = vld [vmem:[#allocation102_spill] sm:$0xff]  ;;  %v14695_v26 = vld [vmem:[#allocation96_spill] sm:$0xff] }
 0x281   : > { %v5104_v40 = vadd.f32 %v4976_v33, %v4848_v32  ;;  %v2648_v1 = vmul.f32 %v9906_v5, %v2328_v2  ;;  %v3207_v12 = vmul.f32 %v14646_v42, %v3012_v61  ;;  %v3401_v4 = vsub.f32 %v14689_v11, %v9794_v10  ;;  %v14694_v61 = vld [vmem:[#allocation107_spill] sm:$0xff]  ;;  %v14696_v32 = vld [vmem:[#allocation100_spill] sm:$0xff] }
 0x282   : > { %v2807_v3 = vadd.f32 %v2647_v30, %v2487_v35  ;;  %v3402_v7 = vsub.f32 %v14690_v28, %v9794_v10  ;;  %v3740_v27 = vmul.f32 %v3206_v38, %v2806_v54  ;;  %v4209_v9 = vsub.f32 %v9794_v10, %v14691_v57  ;;  %v14697_v33 = vld [vmem:[#allocation108_spill] sm:$0xff] }
 0x283   : > { %5405 = vmatprep.mubr.f32.mxu0 %v5104_v40  ;;  %v9929_v58 = vadd.f32 %v2648_v1, %v2488_v16  ;;  %v3596_v19 = vmul.f32 %v14481_v36, %v3401_v4  ;;  %v4551_v53 = vsub.f32 %v14693_v34, %v9794_v10  ;;  %vm690_vm3 = vcmp.ge.f32.partialorder %v9794_v10, %v14694_v61  ;;  %v14698_v16 = vld [vmem:[#allocation104_spill] sm:$0xff]  ;;  %v14699_v40 = vld [vmem:[#allocation109_spill] sm:$0xff]  ;;  %v14700_v4 = vld [vmem:[#allocation46_spill] sm:$0xff] }
 0x284   : > { %v3597_v30 = vmul.f32 %v14695_v26, %v3402_v7  ;;  %v3741_v35 = vmul.f32 %v3207_v12, %v2807_v3  ;;  %v4380_v54 = vmul.f32 %v14696_v32, %v4209_v9  ;;  %vm925_vm4 = vcmp.lt.f32.partialorder %v9794_v10, %v14697_v33  ;;  %v14701_v9 = vld [vmem:[#allocation111_spill] sm:$0xff]  ;;  %v14705_v61 = vld [vmem:[#allocation116_spill] sm:$0xff] }
 0x285   : > { %14692 = vst [vmem:[#allocation131_spill] sm:$0xff] %v9929_v58  ;;  %v3884_v2 = vmul.f32 %v3596_v19, %v2807_v3  ;;  %v4722_v38 = vmul.f32 %v14698_v16, %v4551_v53  ;;  %vm1101_vm5 = vmand %vm690_vm3, %vm925_vm4  ;;  %v1678_v1 = vsub.f32 %v9794_v10, %v14699_v40  ;;  %v2108_v5 = vsub.f32 %v14700_v4, %v9794_v10  ;;  %v14702_v3 = vld [vmem:[#allocation113_spill] sm:$0xff]  ;;  %v14703_v16 = vld [vmem:[#allocation110_spill] sm:$0xff] }
 0x286   : > { %v3885_v12 = vmul.f32 %v3597_v30, %v9929_v58  ;;  %v6348_v7 = vsel %vm1101_vm5, 1.0, %v14403_v18  ;;  %v3008_v33 = vsub.f32 %v9794_v10, %v14701_v9  ;;  %v3398_v19 = vsub.f32 %v14702_v3, %v9794_v10  ;;  %v14704_v40 = vld [vmem:[#allocation50_spill] sm:$0xff]  ;;  %v5269_v34 = vld [vmem:[%s8239_s30 + $0x2b0] sm:$0xff]  ;;  %v14707_v58 = vld [vmem:[#allocation112_spill] sm:$0xff] }
 0x287   : > { %v4028_v53 = vadd.f32 %v3884_v2, %v3740_v27  ;;  %v1893_v32 = vmul.f32 %v14703_v16, %v1678_v1  ;;  %v2323_v26 = vmul.f32 %v14704_v40, %v2108_v5  ;;  %v4206_v4 = vsub.f32 %v9794_v10, %v14705_v61  ;;  %v5270_v2 = vld [vmem:[%s8239_s30 + $0x2b8] sm:$0xff]  ;;  %v5301_v1 = vld [vmem:[%s8239_s30 + $0x3b0] sm:$0xff] }
 0x288   : > { %v9956_v30 = vadd.f32 %v3885_v12, %v3741_v35  ;;  %v3203_v57 = vmul.f32 %v14707_v58, %v3008_v33  ;;  %v3593_v9 = vmul.f32 %v14664_v59, %v3398_v19  ;;  %v4548_v27 = vsub.f32 %v14665_v6, %v9794_v10  ;;  %v5302_v3 = vld [vmem:[%s8239_s30 + $0x3b8] sm:$0xff]  ;;  %v5253_v12 = vld [vmem:[%s8239_s30 + $0x230] sm:$0xff] }
 0x289   : > { %v4850_v16 = vmul.f32 %v4380_v54, %v4028_v53  ;;  %v2483_v5 = vmul.f32 %v6348_v7, %v1893_v32  ;;  %v2643_v61 = vmul.f32 %v9837_v29, %v2323_v26  ;;  %v4377_v35 = vmul.f32 %v14666_v13, %v4206_v4  ;;  %v5254_v40 = vld [vmem:[%s8239_s30 + $0x238] sm:$0xff]  ;;  %v5285_v58 = vld [vmem:[%s8239_s30 + $0x330] sm:$0xff] }
 0x28a   : > { %14706 = vst [vmem:[#allocation132_spill] sm:$0xff] %v9956_v30  ;;  %v4978_v33 = vmul.f32 %v4722_v38, %v9956_v30  ;;  %v3881_v19 = vmul.f32 %v3593_v9, %v9875_v46  ;;  %v4719_v59 = vmul.f32 %v8933_v41, %v4548_v27  ;;  %v4208_v6 = vsub.f32 %v9794_v10, %v14667_v39  ;;  %v5286_v36 = vld [vmem:[%s8239_s30 + $0x338] sm:$0xff]  ;;  %v9979_v4 = vld [vmem:[%s8213_s17 + $0x38] sm:$0xff] }
 0x28b   : > { %v2803_v54 = vadd.f32 %v2643_v61, %v2483_v5  ;;  %v4550_v32 = vsub.f32 %v8955_v24, %v9794_v10  ;;  %v6950_v29 = vpack.c.bf16 %v5270_v2, %v5269_v34  ;;  %v6982_v26 = vpack.c.bf16 %v5302_v3, %v5301_v1  ;;  %v14708_v1 = vld [vmem:[#allocation49_spill] sm:$0xff] }
 0x28c   : > { %v5106_v7 = vadd.f32 %v4978_v33, %v4850_v16  ;;  %v4975_v38 = vmul.f32 %v4719_v59, %v9901_v21  ;;  %v4379_v46 = vmul.f32 %v8951_v23, %v4208_v6  ;;  %v6952_v9 = vpack.c.bf16 %v5254_v40, %v5253_v12  ;;  %v14709_v33 = vld [vmem:[#allocation52_spill] sm:$0xff] }
 0x28d   : > { %v3737_v27 = vmul.f32 %v3203_v57, %v2803_v54  ;;  %v4721_v30 = vmul.f32 %v8959_v25, %v4550_v32  ;;  %6951 = vmatprep.subr.bf16.mxu0 %v6950_v29  ;;  %6983 = vmatprep.subr.bf16.mxu1 %v6982_v26  ;;  %v6984_v39 = vpack.c.bf16 %v5286_v36, %v5285_v58  ;;  %v14710_v29 = vld [vmem:[#allocation53_spill] sm:$0xff] }
 0x28e   : > { %5550 = vmatprep.mubr.f32.mxu1 %v5106_v7  ;;  %v4849_v61 = vmul.f32 %v4379_v46, %v9903_v51  ;;  %6953 = vmatpush3.bf16.msra.mxu0 %v6952_v9  ;;  %vm702_vm6 = vcmp.ge.f32.partialorder %v9979_v4, %v8380_v43  ;;  %vm703_vm7 = vcmp.ge.f32.partialorder %v9979_v4, %v8384_v44  ;;  %v14711_v46 = vld [vmem:[#allocation54_spill] sm:$0xff] }
 0x28f   : > { %v4025_v10 = vadd.f32 %v3881_v19, %v3737_v27  ;;  %v4977_v59 = vmul.f32 %v4721_v30, %v4028_v53  ;;  %6985 = vmatpush3.bf16.msra.mxu1 %v6984_v39  ;;  %vm704_vm8 = vcmp.ge.f32.partialorder %v9979_v4, %v8388_v45  ;;  %vm705_vm9 = vcmp.ge.f32.partialorder %v9979_v4, %v8394_v47 }
 0x290   : > { %vm937_vm10 = vcmp.lt.f32.partialorder %v9979_v4, %v8398_v48  ;;  %vm938_vm11 = vcmp.lt.f32.partialorder %v9979_v4, %v8402_v49  ;;  %vm939_vm12 = vcmp.lt.f32.partialorder %v9979_v4, %v8406_v50  ;;  %vm940_vm13 = vcmp.lt.f32.partialorder %v9979_v4, %v8418_v52 }
 0x291   : > { %v4847_v36 = vmul.f32 %v4377_v35, %v4025_v10  ;;  %v5105_v39 = vadd.f32 %v4977_v59, %v4849_v61  ;;  %vm1113_vm14 = vmand %vm702_vm6, %vm937_vm10  ;;  %v1689_v6 = vsub.f32 %v9979_v4, %v8437_v55  ;;  %v1690_v21 = vsub.f32 %v9979_v4, %v8441_v56  ;;  %v14712_v61 = vld [vmem:[#allocation55_spill] sm:$0xff]  ;;  %v14713_v59 = vld [vmem:[#allocation58_spill] sm:$0xff] }
 0x292   : > { %vm1114_vm15 = vmand %vm703_vm7, %vm938_vm11  ;;  %v10009_v57 = vsel %vm1113_vm14, 1.0, %v14403_v18  ;;  %v1691_v51 = vsub.f32 %v9979_v4, %v8451_v60  ;;  %v2119_v58 = vsub.f32 %v14533_v15, %v9979_v4  ;;  %v2120_v34 = vsub.f32 %v14620_v14, %v9979_v4 }
 0x293   : > { %v5103_v16 = vadd.f32 %v4975_v38, %v4847_v36  ;;  %5551 = vmatmul.mubr.f32.gmra.mrb[12].mxu1 %v5105_v39  ;;  %vm1115_vm0 = vmand %vm704_vm8, %vm939_vm12  ;;  %v6361_v40 = vsel %vm1114_vm15, 1.0, %v14403_v18  ;;  %v1904_v3 = vmul.f32 %v14535_v62, %v1689_v6  ;;  %v1905_v53 = vmul.f32 %v14621_v20, %v1690_v21  ;;  %v14714_v39 = vld [vmem:[#allocation59_spill] sm:$0xff] }
 0x294   : > { %vm1116_vm1 = vmand %vm705_vm9, %vm940_vm13  ;;  %v6362_v30 = vsel %vm1115_vm0, 1.0, %v14403_v18  ;;  %v1906_v2 = vmul.f32 %v14622_v37, %v1691_v51  ;;  %v2121_v5 = vsub.f32 %v14708_v1, %v9979_v4  ;;  %v2334_v35 = vmul.f32 %v14624_v31, %v2119_v58 }
 0x295   : > { %5406 = vmatmul.mubr.f32.gmra.mrb[12].mxu0 %v5103_v16  ;;  %v6363_v12 = vsel %vm1116_vm1, 1.0, %v14403_v18  ;;  %v2335_v19 = vmul.f32 %v14709_v33, %v2120_v34  ;;  %v2494_v54 = vmul.f32 %v10009_v57, %v1904_v3  ;;  %v2495_v32 = vmul.f32 %v6361_v40, %v1905_v53  ;;  %v14715_v34 = vld [vmem:[#allocation62_spill] sm:$0xff] }
 0x296   : > { %v2336_v26 = vmul.f32 %v14710_v29, %v2121_v5  ;;  %v2496_v7 = vmul.f32 %v6362_v30, %v1906_v2  ;;  %v2654_v38 = vmul.f32 %v6361_v40, %v2334_v35  ;;  %v3018_v9 = vsub.f32 %v9979_v4, %v14711_v46 }
 0x297   : > { %v2655_v27 = vmul.f32 %v6362_v30, %v2335_v19  ;;  %v3019_v10 = vsub.f32 %v9979_v4, %v14712_v61  ;;  %v3408_v36 = vsub.f32 %v14713_v59, %v9979_v4  ;;  %v3409_v6 = vsub.f32 %v14714_v39, %v9979_v4  ;;  %v14716_v30 = vld [vmem:[#allocation61_spill] sm:$0xff]  ;;  %v14717_v19 = vld [vmem:[#allocation63_spill] sm:$0xff] }
 0x298   : > { %v2656_v21 = vmul.f32 %v6363_v12, %v2336_v26  ;;  %v10046_v51 = vadd.f32 %v2654_v38, %v2494_v54  ;;  %v3213_v58 = vmul.f32 %v14674_v22, %v3018_v9  ;;  %v4215_v16 = vsub.f32 %v9979_v4, %v14715_v34  ;;  %v14718_v54 = vld [vmem:[#allocation64_spill] sm:$0xff]  ;;  %v14719_v22 = vld [vmem:[#allocation66_spill] sm:$0xff] }
 0x299   : > { %v2815_v40 = vadd.f32 %v2655_v27, %v2495_v32  ;;  %v3214_v3 = vmul.f32 %v14502_v17, %v3019_v10  ;;  %v3603_v53 = vmul.f32 %v14589_v0, %v3408_v36  ;;  %v3604_v2 = vmul.f32 %v14716_v30, %v3409_v6  ;;  %v14720_v32 = vld [vmem:[#allocation67_spill] sm:$0xff]  ;;  %v14721_v10 = vld [vmem:[#allocation65_spill] sm:$0xff] }
 0x29a   : > { %v2816_v5 = vadd.f32 %v2656_v21, %v2496_v7  ;;  %v3747_v35 = vmul.f32 %v3213_v58, %v10046_v51  ;;  %v4386_v39 = vmul.f32 %v14717_v19, %v4215_v16  ;;  %v4557_v26 = vsub.f32 %v14718_v54, %v9979_v4  ;;  %v14722_v6 = vld [vmem:[#allocation69_spill] sm:$0xff]  ;;  %v14723_v7 = vld [vmem:[#allocation70_spill] sm:$0xff]  ;;  %v14724_v58 = vld [vmem:[#allocation72_spill] sm:$0xff] }
 0x29b   : > { %v3748_v38 = vmul.f32 %v3214_v3, %v2815_v40  ;;  %v3891_v9 = vmul.f32 %v3603_v53, %v2815_v40  ;;  %vm706_vm2 = vcmp.ge.f32.partialorder %v9979_v4, %v14719_v22  ;;  %vm707_vm3 = vcmp.ge.f32.partialorder %v9979_v4, %v14720_v32  ;;  %v14725_v40 = vld [vmem:[#allocation73_spill] sm:$0xff]  ;;  %v14726_v53 = vld [vmem:[#allocation79_spill] sm:$0xff]  ;;  %v14731_v54 = vld [vmem:[#allocation76_spill] sm:$0xff] }
 0x29c   : > { %v3892_v27 = vmul.f32 %v3604_v2, %v2816_v5  ;;  %v4728_v36 = vmul.f32 %v14721_v10, %v4557_v26  ;;  %vm941_vm4 = vcmp.lt.f32.partialorder %v9979_v4, %v14722_v6  ;;  %vm942_vm5 = vcmp.lt.f32.partialorder %v9979_v4, %v14723_v7  ;;  %v14727_v6 = vld [vmem:[#allocation80_spill] sm:$0xff]  ;;  %v14733_v30 = vld [vmem:[#allocation83_spill] sm:$0xff] }
 0x29d   : > { %v10067_v21 = vadd.f32 %v3891_v9, %v3747_v35  ;;  %vm1117_vm6 = vmand %vm706_vm2, %vm941_vm4  ;;  %v1692_v16 = vsub.f32 %v9979_v4, %v14724_v58  ;;  %v1693_v3 = vsub.f32 %v9979_v4, %v14725_v40  ;;  %v2122_v2 = vsub.f32 %v14726_v53, %v9979_v4  ;;  %v14728_v35 = vld [vmem:[#allocation85_spill] sm:$0xff]  ;;  %v14730_v40 = vld [vmem:[#allocation75_spill] sm:$0xff] }
 0x29e   : > { %v10075_v32 = vadd.f32 %v3892_v27, %v3748_v38  ;;  %vm1118_vm7 = vmand %vm707_vm3, %vm942_vm5  ;;  %v6364_v26 = vsel %vm1117_vm6, 1.0, %v14403_v18  ;;  %v2123_v7 = vsub.f32 %v14727_v6, %v9979_v4  ;;  %v3020_v9 = vsub.f32 %v9979_v4, %v14728_v35  ;;  %v14732_v27 = vld [vmem:[#allocation82_spill] sm:$0xff] }
 0x29f   : > { %v4856_v10 = vmul.f32 %v4386_v39, %v10067_v21  ;;  %v10084_v58 = vsel %vm1118_vm7, 1.0, %v14403_v18  ;;  %v1907_v22 = vmul.f32 %v14730_v40, %v1692_v16  ;;  %v1908_v53 = vmul.f32 %v14731_v54, %v1693_v3 }
 0x2a0   : > { %14729 = vst [vmem:[#allocation49_spill] sm:$0xff] %v10084_v58  ;;  %v4984_v38 = vmul.f32 %v4728_v36, %v10075_v32  ;;  %v2337_v19 = vmul.f32 %v14732_v27, %v2122_v2  ;;  %v2338_v0 = vmul.f32 %v14733_v30, %v2123_v7  ;;  %v3021_v6 = vsub.f32 %v9979_v4, %v14476_v63  ;;  %v14734_v7 = vld [vmem:[#allocation95_spill] sm:$0xff]  ;;  %v14735_v63 = vld [vmem:[#allocation98_spill] sm:$0xff] }
 0x2a1   : > { %v2497_v17 = vmul.f32 %v6363_v12, %v1907_v22  ;;  %v2498_v35 = vmul.f32 %v6364_v26, %v1908_v53  ;;  %v3215_v39 = vmul.f32 %v8765_v8, %v3020_v9  ;;  %v3410_v34 = vsub.f32 %v14689_v11, %v9979_v4  ;;  %v14740_v9 = vld [vmem:[#allocation100_spill] sm:$0xff] }
 0x2a2   : > { %v5112_v59 = vadd.f32 %v4984_v38, %v4856_v10  ;;  %v2657_v16 = vmul.f32 %v6364_v26, %v2337_v19  ;;  %v2658_v3 = vmul.f32 %v10084_v58, %v2338_v0  ;;  %v3216_v36 = vmul.f32 %v14646_v42, %v3021_v6  ;;  %v14737_v10 = vld [vmem:[#allocation102_spill] sm:$0xff]  ;;  %v14738_v26 = vld [vmem:[#allocation107_spill] sm:$0xff]  ;;  %v14739_v0 = vld [vmem:[#allocation96_spill] sm:$0xff] }
 0x2a3   : > { %v3411_v2 = vsub.f32 %v14690_v28, %v9979_v4  ;;  %v3605_v30 = vmul.f32 %v14734_v7, %v3410_v34  ;;  %v3749_v27 = vmul.f32 %v3215_v39, %v2816_v5  ;;  %v4217_v22 = vsub.f32 %v9979_v4, %v14735_v63  ;;  %v14741_v58 = vld [vmem:[#allocation108_spill] sm:$0xff]  ;;  %v14742_v34 = vld [vmem:[#allocation109_spill] sm:$0xff]  ;;  %v14752_v63 = vld [vmem:[#allocation118_spill] sm:$0xff] }
 0x2a4   : > { %5410 = vmatprep.mubr.f32.mxu0 %v5112_v59  ;;  %v2817_v12 = vadd.f32 %v2657_v16, %v2497_v17  ;;  %v10103_v53 = vadd.f32 %v2658_v3, %v2498_v35  ;;  %v4559_v19 = vsub.f32 %v14737_v10, %v9979_v4  ;;  %vm701_vm8 = vcmp.ge.f32.partialorder %v9979_v4, %v14738_v26  ;;  %v14743_v35 = vld [vmem:[#allocation104_spill] sm:$0xff]  ;;  %v14744_v16 = vld [vmem:[#allocation46_spill] sm:$0xff] }
 0x2a5   : > { %v3606_v6 = vmul.f32 %v14739_v0, %v3411_v2  ;;  %v4388_v38 = vmul.f32 %v14740_v9, %v4217_v22  ;;  %vm936_vm9 = vcmp.lt.f32.partialorder %v9979_v4, %v14741_v58  ;;  %v1688_v5 = vsub.f32 %v9979_v4, %v14742_v34  ;;  %v14745_v22 = vld [vmem:[#allocation110_spill] sm:$0xff]  ;;  %v14746_v9 = vld [vmem:[#allocation111_spill] sm:$0xff] }
 0x2a6   : > { %14736 = vst [vmem:[#allocation133_spill] sm:$0xff] %v10103_v53  ;;  %v3750_v59 = vmul.f32 %v3216_v36, %v2817_v12  ;;  %v3893_v17 = vmul.f32 %v3605_v30, %v2817_v12  ;;  %v4730_v39 = vmul.f32 %v14743_v35, %v4559_v19  ;;  %vm1112_vm10 = vmand %vm701_vm8, %vm936_vm9  ;;  %v2118_v3 = vsub.f32 %v14744_v16, %v9979_v4  ;;  %v14747_v34 = vld [vmem:[#allocation50_spill] sm:$0xff]  ;;  %v14748_v30 = vld [vmem:[#allocation113_spill] sm:$0xff] }
 0x2a7   : > { %v3894_v26 = vmul.f32 %v3606_v6, %v10103_v53  ;;  %v6359_v2 = vsel %vm1112_vm10, 1.0, %v14403_v18  ;;  %v1903_v10 = vmul.f32 %v14745_v22, %v1688_v5  ;;  %v3017_v58 = vsub.f32 %v9979_v4, %v14746_v9  ;;  %v14749_v19 = vld [vmem:[#allocation116_spill] sm:$0xff] }
 0x2a8   : > { %v4037_v0 = vadd.f32 %v3893_v17, %v3749_v27  ;;  %v2333_v36 = vmul.f32 %v14747_v34, %v2118_v3  ;;  %v3407_v12 = vsub.f32 %v14748_v30, %v9979_v4  ;;  %v4214_v35 = vsub.f32 %v9979_v4, %v14749_v19  ;;  %v14751_v6 = vld [vmem:[#allocation112_spill] sm:$0xff]  ;;  %v14753_v17 = vld [vmem:[#allocation114_spill] sm:$0xff] }
 0x2a9   : > { %v10128_v7 = vadd.f32 %v3894_v26, %v3750_v59  ;;  %v2493_v16 = vmul.f32 %v6359_v2, %v1903_v10  ;;  %v3212_v53 = vmul.f32 %v14751_v6, %v3017_v58  ;;  %v4556_v5 = vsub.f32 %v14752_v63, %v9979_v4  ;;  %v10134_v22 = vld [vmem:[%s8213_s17 + $0x40] sm:$0xff]  ;;  %v14754_v59 = vld [vmem:[#allocation119_spill] sm:$0xff] }
 0x2aa   : > { %v4858_v9 = vmul.f32 %v4388_v38, %v4037_v0  ;;  %v2653_v27 = vmul.f32 %v10009_v57, %v2333_v36  ;;  %v3602_v3 = vmul.f32 %v14753_v17, %v3407_v12  ;;  %v4385_v34 = vmul.f32 %v14666_v13, %v4214_v35 }
 0x2ab   : > { %14750 = vst [vmem:[#allocation134_spill] sm:$0xff] %v10128_v7  ;;  %v4986_v30 = vmul.f32 %v4730_v39, %v10128_v7  ;;  %v4727_v26 = vmul.f32 %v8933_v41, %v4556_v5  ;;  %v4216_v10 = vsub.f32 %v9979_v4, %v14754_v59  ;;  %v4558_v58 = vsub.f32 %v8955_v24, %v9979_v4 }
 0x2ac   : > { %v2813_v2 = vadd.f32 %v2653_v27, %v2493_v16  ;;  %v3890_v63 = vmul.f32 %v3602_v3, %v10046_v51  ;;  %vm713_vm11 = vcmp.ge.f32.partialorder %v10134_v22, %v8380_v43  ;;  %vm714_vm12 = vcmp.ge.f32.partialorder %v10134_v22, %v8384_v44 }
 0x2ad   : > { %v5114_v57 = vadd.f32 %v4986_v30, %v4858_v9  ;;  %v4983_v38 = vmul.f32 %v4727_v26, %v10067_v21  ;;  %v4387_v35 = vmul.f32 %v8951_v23, %v4216_v10  ;;  %v4729_v39 = vmul.f32 %v8959_v25, %v4558_v58 }
 0x2ae   : > { %v3746_v36 = vmul.f32 %v3212_v53, %v2813_v2  ;;  %vm715_vm13 = vcmp.ge.f32.partialorder %v10134_v22, %v8388_v45  ;;  %vm716_vm14 = vcmp.ge.f32.partialorder %v10134_v22, %v8394_v47  ;;  %vm948_vm15 = vcmp.lt.f32.partialorder %v10134_v22, %v8398_v48 }
 0x2af   : > { %5555 = vmatprep.mubr.f32.mxu1 %v5114_v57  ;;  %v4857_v4 = vmul.f32 %v4387_v35, %v10075_v32  ;;  %v4985_v51 = vmul.f32 %v4729_v39, %v4037_v0  ;;  %vm949_vm0 = vcmp.lt.f32.partialorder %v10134_v22, %v8402_v49  ;;  %vm950_vm1 = vcmp.lt.f32.partialorder %v10134_v22, %v8406_v50  ;;  %vm1124_vm2 = vmand %vm713_vm11, %vm948_vm15 }
 0x2b0   : > { %v4034_v21 = vadd.f32 %v3890_v63, %v3746_v36  ;;  %vm951_vm3 = vcmp.lt.f32.partialorder %v10134_v22, %v8418_v52  ;;  %vm1125_vm4 = vmand %vm714_vm12, %vm949_vm0  ;;  %v10173_v32 = vsel %vm1124_vm2, 1.0, %v14403_v18  ;;  %v1699_v53 = vsub.f32 %v10134_v22, %v8437_v55 }
 0x2b1   : > { %v5113_v0 = vadd.f32 %v4985_v51, %v4857_v4  ;;  %vm1126_vm5 = vmand %vm715_vm13, %vm950_vm1  ;;  %v6372_v63 = vsel %vm1125_vm4, 1.0, %v14403_v18  ;;  %v1700_v9 = vsub.f32 %v10134_v22, %v8441_v56  ;;  %v1701_v16 = vsub.f32 %v10134_v22, %v8451_v60 }
 0x2b2   : > { %v4855_v30 = vmul.f32 %v4385_v34, %v4034_v21  ;;  %vm1127_vm6 = vmand %vm716_vm14, %vm951_vm3  ;;  %v6373_v12 = vsel %vm1126_vm5, 1.0, %v14403_v18  ;;  %v1914_v5 = vmul.f32 %v14535_v62, %v1699_v53  ;;  %v2129_v27 = vsub.f32 %v14533_v15, %v10134_v22 }
 0x2b3   : > { %5556 = vmatmul.mubr.f32.gmra.mrb[14].mxu1 %v5113_v0  ;;  %v6374_v3 = vsel %vm1127_vm6, 1.0, %v14403_v18  ;;  %v1915_v26 = vmul.f32 %v14621_v20, %v1700_v9  ;;  %v1916_v10 = vmul.f32 %v14622_v37, %v1701_v16  ;;  %v2130_v34 = vsub.f32 %v14620_v14, %v10134_v22  ;;  %v14755_v0 = vld [vmem:[#allocation58_spill] sm:$0xff] }
 0x2b4   : > { %v5111_v58 = vadd.f32 %v4983_v38, %v4855_v30  ;;  %v2131_v2 = vsub.f32 %v14708_v1, %v10134_v22  ;;  %v2344_v57 = vmul.f32 %v14624_v31, %v2129_v27  ;;  %v2504_v35 = vmul.f32 %v10173_v32, %v1914_v5  ;;  %v14756_v30 = vld [vmem:[#allocation56_spill] sm:$0xff]  ;;  %v14757_v27 = vld [vmem:[#allocation59_spill] sm:$0xff]  ;;  %v14764_v31 = vld [vmem:[#allocation66_spill] sm:$0xff] }
 0x2b5   : > { %v2345_v39 = vmul.f32 %v14709_v33, %v2130_v34  ;;  %v2505_v36 = vmul.f32 %v6372_v63, %v1915_v26  ;;  %v2506_v4 = vmul.f32 %v6373_v12, %v1916_v10  ;;  %v3027_v51 = vsub.f32 %v10134_v22, %v14711_v46  ;;  %v14758_v10 = vld [vmem:[#allocation62_spill] sm:$0xff]  ;;  %v14761_v46 = vld [vmem:[#allocation61_spill] sm:$0xff] }
 0x2b6   : > { %5411 = vmatmul.mubr.f32.gmra.mrb[14].mxu0 %v5111_v58  ;;  %v2346_v21 = vmul.f32 %v14710_v29, %v2131_v2  ;;  %v2664_v53 = vmul.f32 %v6372_v63, %v2344_v57  ;;  %v3028_v38 = vsub.f32 %v10134_v22, %v14712_v61  ;;  %v3417_v9 = vsub.f32 %v14755_v0, %v10134_v22  ;;  %v14759_v2 = vld [vmem:[#allocation57_spill] sm:$0xff]  ;;  %v14760_v57 = vld [vmem:[#allocation60_spill] sm:$0xff]  ;;  %v14762_v0 = vld [vmem:[#allocation63_spill] sm:$0xff] }
 0x2b7   : > { %v2665_v16 = vmul.f32 %v6373_v12, %v2345_v39  ;;  %v3222_v5 = vmul.f32 %v14756_v30, %v3027_v51  ;;  %v3418_v26 = vsub.f32 %v14757_v27, %v10134_v22  ;;  %v4223_v34 = vsub.f32 %v10134_v22, %v14758_v10  ;;  %v14763_v39 = vld [vmem:[#allocation64_spill] sm:$0xff] }
 0x2b8   : > { %v2666_v7 = vmul.f32 %v6374_v3, %v2346_v21  ;;  %v10214_v58 = vadd.f32 %v2664_v53, %v2504_v35  ;;  %v3223_v63 = vmul.f32 %v14759_v2, %v3028_v38  ;;  %v3612_v29 = vmul.f32 %v14760_v57, %v3417_v9  ;;  %v14765_v35 = vld [vmem:[#allocation67_spill] sm:$0xff]  ;;  %v14766_v38 = vld [vmem:[#allocation65_spill] sm:$0xff] }
 0x2b9   : > { %v2825_v61 = vadd.f32 %v2665_v16, %v2505_v36  ;;  %v3613_v33 = vmul.f32 %v14761_v46, %v3418_v26  ;;  %v4394_v12 = vmul.f32 %v14762_v0, %v4223_v34  ;;  %v4565_v51 = vsub.f32 %v14763_v39, %v10134_v22  ;;  %v14767_v9 = vld [vmem:[#allocation69_spill] sm:$0xff]  ;;  %v14768_v26 = vld [vmem:[#allocation70_spill] sm:$0xff] }
 0x2ba   : > { %v2826_v30 = vadd.f32 %v2666_v7, %v2506_v4  ;;  %v3756_v27 = vmul.f32 %v3222_v5, %v10214_v58  ;;  %vm717_vm7 = vcmp.ge.f32.partialorder %v10134_v22, %v14764_v31  ;;  %vm718_vm8 = vcmp.ge.f32.partialorder %v10134_v22, %v14765_v35  ;;  %v14769_v7 = vld [vmem:[#allocation72_spill] sm:$0xff]  ;;  %v14770_v5 = vld [vmem:[#allocation73_spill] sm:$0xff]  ;;  %v14777_v46 = vld [vmem:[#allocation86_spill] sm:$0xff] }
 0x2bb   : > { %v3757_v21 = vmul.f32 %v3223_v63, %v2825_v61  ;;  %v3900_v53 = vmul.f32 %v3612_v29, %v2825_v61  ;;  %v4736_v36 = vmul.f32 %v14766_v38, %v4565_v51  ;;  %vm952_vm9 = vcmp.lt.f32.partialorder %v10134_v22, %v14767_v9  ;;  %v14771_v61 = vld [vmem:[#allocation79_spill] sm:$0xff]  ;;  %v14776_v0 = vld [vmem:[#allocation85_spill] sm:$0xff] }
 0x2bc   : > { %v3901_v16 = vmul.f32 %v3613_v33, %v2826_v30  ;;  %vm953_vm10 = vcmp.lt.f32.partialorder %v10134_v22, %v14768_v26  ;;  %vm1128_vm11 = vmand %vm717_vm7, %vm952_vm9  ;;  %v1702_v4 = vsub.f32 %v10134_v22, %v14769_v7  ;;  %v1703_v34 = vsub.f32 %v10134_v22, %v14770_v5  ;;  %v14772_v33 = vld [vmem:[#allocation80_spill] sm:$0xff]  ;;  %v14775_v38 = vld [vmem:[#allocation83_spill] sm:$0xff] }
 0x2bd   : > { %v10236_v31 = vadd.f32 %v3900_v53, %v3756_v27  ;;  %vm1129_vm12 = vmand %vm718_vm8, %vm953_vm10  ;;  %v6375_v29 = vsel %vm1128_vm11, 1.0, %v14403_v18  ;;  %v2132_v63 = vsub.f32 %v14771_v61, %v10134_v22  ;;  %v2133_v51 = vsub.f32 %v14772_v33, %v10134_v22  ;;  %v14774_v53 = vld [vmem:[#allocation82_spill] sm:$0xff] }
 0x2be   : > { %v10243_v9 = vadd.f32 %v3901_v16, %v3757_v21  ;;  %v10246_v26 = vsel %vm1129_vm12, 1.0, %v14403_v18  ;;  %v1917_v7 = vmul.f32 %v14730_v40, %v1702_v4  ;;  %v1918_v5 = vmul.f32 %v14731_v54, %v1703_v34 }
 0x2bf   : > { %14773 = vst [vmem:[#allocation135_spill] sm:$0xff] %v10246_v26  ;;  %v4864_v27 = vmul.f32 %v4394_v12, %v10236_v31  ;;  %v2347_v35 = vmul.f32 %v14774_v53, %v2132_v63  ;;  %v2348_v39 = vmul.f32 %v14775_v38, %v2133_v51  ;;  %v3029_v61 = vsub.f32 %v10134_v22, %v14776_v0 }
 0x2c0   : > { %v4992_v33 = vmul.f32 %v4736_v36, %v10243_v9  ;;  %v2507_v21 = vmul.f32 %v6374_v3, %v1917_v7  ;;  %v2508_v16 = vmul.f32 %v6375_v29, %v1918_v5  ;;  %v3030_v57 = vsub.f32 %v10134_v22, %v14777_v46  ;;  %v14778_v36 = vld [vmem:[#allocation98_spill] sm:$0xff] }
 0x2c1   : > { %v2667_v2 = vmul.f32 %v6375_v29, %v2347_v35  ;;  %v2668_v4 = vmul.f32 %v10246_v26, %v2348_v39  ;;  %v3224_v34 = vmul.f32 %v8765_v8, %v3029_v61  ;;  %v3419_v12 = vsub.f32 %v14689_v11, %v10134_v22  ;;  %v14780_v35 = vld [vmem:[#allocation95_spill] sm:$0xff]  ;;  %v14781_v61 = vld [vmem:[#allocation96_spill] sm:$0xff] }
 0x2c2   : > { %v5120_v63 = vadd.f32 %v4992_v33, %v4864_v27  ;;  %v3225_v51 = vmul.f32 %v14646_v42, %v3030_v57  ;;  %v3420_v0 = vsub.f32 %v14690_v28, %v10134_v22  ;;  %v4225_v3 = vsub.f32 %v10134_v22, %v14778_v36  ;;  %v14782_v8 = vld [vmem:[#allocation100_spill] sm:$0xff]  ;;  %v14783_v33 = vld [vmem:[#allocation102_spill] sm:$0xff]  ;;  %v14784_v27 = vld [vmem:[#allocation107_spill] sm:$0xff] }
 0x2c3   : > { %v2827_v7 = vadd.f32 %v2667_v2, %v2507_v21  ;;  %v10267_v5 = vadd.f32 %v2668_v4, %v2508_v16  ;;  %v3614_v29 = vmul.f32 %v14780_v35, %v3419_v12  ;;  %v3758_v39 = vmul.f32 %v3224_v34, %v2826_v30  ;;  %v14785_v36 = vld [vmem:[#allocation108_spill] sm:$0xff]  ;;  %v14786_v2 = vld [vmem:[#allocation109_spill] sm:$0xff]  ;;  %v14788_v4 = vld [vmem:[#allocation46_spill] sm:$0xff] }
 0x2c4   : > { %5415 = vmatprep.mubr.f32.mxu0 %v5120_v63  ;;  %v3615_v26 = vmul.f32 %v14781_v61, %v3420_v0  ;;  %v4396_v11 = vmul.f32 %v14782_v8, %v4225_v3  ;;  %v4567_v57 = vsub.f32 %v14783_v33, %v10134_v22  ;;  %vm712_vm13 = vcmp.ge.f32.partialorder %v10134_v22, %v14784_v27  ;;  %v14787_v21 = vld [vmem:[#allocation104_spill] sm:$0xff]  ;;  %v14789_v12 = vld [vmem:[#allocation111_spill] sm:$0xff]  ;;  %v10317_v8 = vld [vmem:[%s8213_s17 + $0x48] sm:$0xff] }
 0x2c5   : > { %14779 = vst [vmem:[#allocation136_spill] sm:$0xff] %v10267_v5  ;;  %v3759_v28 = vmul.f32 %v3225_v51, %v2827_v7  ;;  %v3902_v42 = vmul.f32 %v3614_v29, %v2827_v7  ;;  %vm947_vm14 = vcmp.lt.f32.partialorder %v10134_v22, %v14785_v36  ;;  %v1698_v30 = vsub.f32 %v10134_v22, %v14786_v2  ;;  %v14790_v7 = vld [vmem:[#allocation110_spill] sm:$0xff]  ;;  %v14791_v2 = vld [vmem:[#allocation113_spill] sm:$0xff] }
 0x2c6   : > { %v3903_v0 = vmul.f32 %v3615_v26, %v10267_v5  ;;  %v4738_v16 = vmul.f32 %v14787_v21, %v4567_v57  ;;  %vm1123_vm15 = vmand %vm712_vm13, %vm947_vm14  ;;  %v2128_v34 = vsub.f32 %v14788_v4, %v10134_v22  ;;  %v3026_v63 = vsub.f32 %v10134_v22, %v14789_v12  ;;  %v14793_v57 = vld [vmem:[#allocation50_spill] sm:$0xff] }
 0x2c7   : > { %v4046_v51 = vadd.f32 %v3902_v42, %v3758_v39  ;;  %v6370_v3 = vsel %vm1123_vm15, 1.0, %v14403_v18  ;;  %v1913_v29 = vmul.f32 %v14790_v7, %v1698_v30  ;;  %v3416_v26 = vsub.f32 %v14791_v2, %v10134_v22  ;;  %v5271_v42 = vld [vmem:[%s8239_s30 + $0x2c0] sm:$0xff]  ;;  %v5272_v39 = vld [vmem:[%s8239_s30 + $0x2c8] sm:$0xff] }
 0x2c8   : > { %v10290_v5 = vadd.f32 %v3903_v0, %v3759_v28  ;;  %v2343_v21 = vmul.f32 %v14793_v57, %v2128_v34  ;;  %v3221_v4 = vmul.f32 %v14751_v6, %v3026_v63  ;;  %v4222_v12 = vsub.f32 %v10134_v22, %v14749_v19  ;;  %v14794_v2 = vld [vmem:[#allocation118_spill] sm:$0xff]  ;;  %v5303_v0 = vld [vmem:[%s8239_s30 + $0x3c0] sm:$0xff] }
 0x2c9   : > { %v4866_v36 = vmul.f32 %v4396_v11, %v4046_v51  ;;  %v2503_v27 = vmul.f32 %v6370_v3, %v1913_v29  ;;  %v3611_v30 = vmul.f32 %v14753_v17, %v3416_v26  ;;  %v4564_v28 = vsub.f32 %v14794_v2, %v10134_v22  ;;  %v5304_v34 = vld [vmem:[%s8239_s30 + $0x3c8] sm:$0xff]  ;;  %v5255_v57 = vld [vmem:[%s8239_s30 + $0x240] sm:$0xff] }
 0x2ca   : > { %14792 = vst [vmem:[#allocation137_spill] sm:$0xff] %v10290_v5  ;;  %v4994_v63 = vmul.f32 %v4738_v16, %v10290_v5  ;;  %v2663_v6 = vmul.f32 %v10173_v32, %v2343_v21  ;;  %v4393_v19 = vmul.f32 %v14666_v13, %v4222_v12  ;;  %v4224_v7 = vsub.f32 %v10134_v22, %v14754_v59  ;;  %v5256_v11 = vld [vmem:[%s8239_s30 + $0x248] sm:$0xff]  ;;  %v5287_v3 = vld [vmem:[%s8239_s30 + $0x340] sm:$0xff] }
 0x2cb   : > { %v5288_v29 = vld [vmem:[%s8239_s30 + $0x348] sm:$0xff]  ;;  %v3899_v26 = vmul.f32 %v3611_v30, %v10214_v58  ;;  %v4735_v17 = vmul.f32 %v8933_v41, %v4564_v28  ;;  %v4566_v2 = vsub.f32 %v8955_v24, %v10134_v22  ;;  %v6954_v33 = vpack.c.bf16 %v5272_v39, %v5271_v42 }
 0x2cc   : > { %v5122_v16 = vadd.f32 %v4994_v63, %v4866_v36  ;;  %v2823_v32 = vadd.f32 %v2663_v6, %v2503_v27  ;;  %v4395_v21 = vmul.f32 %v8951_v23, %v4224_v7  ;;  %v6986_v12 = vpack.c.bf16 %v5304_v34, %v5303_v0  ;;  %v14795_v0 = vld [vmem:[#allocation51_spill] sm:$0xff]  ;;  %v14796_v34 = vld [vmem:[#allocation52_spill] sm:$0xff] }
 0x2cd   : > { %v4991_v5 = vmul.f32 %v4735_v17, %v10236_v31  ;;  %v4737_v59 = vmul.f32 %v8959_v25, %v4566_v2  ;;  %6955 = vmatprep.subr.bf16.mxu0 %v6954_v33  ;;  %v6956_v13 = vpack.c.bf16 %v5256_v11, %v5255_v57  ;;  %v6988_v58 = vpack.c.bf16 %v5288_v29, %v5287_v3 }
 0x2ce   : > { %5560 = vmatprep.mubr.f32.mxu1 %v5122_v16  ;;  %v3755_v30 = vmul.f32 %v3221_v4, %v2823_v32  ;;  %v4865_v28 = vmul.f32 %v4395_v21, %v10243_v9  ;;  %6987 = vmatprep.subr.bf16.mxu1 %v6986_v12  ;;  %vm724_vm0 = vcmp.ge.f32.partialorder %v10317_v8, %v8380_v43  ;;  %v14798_v32 = vld [vmem:[#allocation53_spill] sm:$0xff] }
 0x2cf   : > { %v4993_v22 = vmul.f32 %v4737_v59, %v4046_v51  ;;  %6957 = vmatpush3.bf16.msra.mxu0 %v6956_v13  ;;  %6989 = vmatpush3.bf16.msra.mxu1 %v6988_v58  ;;  %vm725_vm1 = vcmp.ge.f32.partialorder %v10317_v8, %v8384_v44  ;;  %vm726_vm2 = vcmp.ge.f32.partialorder %v10317_v8, %v8388_v45 }
 0x2d0   : > { %v4043_v31 = vadd.f32 %v3899_v26, %v3755_v30  ;;  %vm727_vm3 = vcmp.ge.f32.partialorder %v10317_v8, %v8394_v47  ;;  %vm959_vm4 = vcmp.lt.f32.partialorder %v10317_v8, %v8398_v48  ;;  %vm960_vm5 = vcmp.lt.f32.partialorder %v10317_v8, %v8402_v49  ;;  %v14797_v26 = vld [vmem:[#allocation54_spill] sm:$0xff]  ;;  %v14799_v30 = vld [vmem:[#allocation55_spill] sm:$0xff] }
 0x2d1   : > { %v5121_v6 = vadd.f32 %v4993_v22, %v4865_v28  ;;  %vm961_vm6 = vcmp.lt.f32.partialorder %v10317_v8, %v8406_v50  ;;  %vm962_vm7 = vcmp.lt.f32.partialorder %v10317_v8, %v8418_v52  ;;  %vm1135_vm8 = vmand %vm724_vm0, %vm959_vm4  ;;  %v1709_v13 = vsub.f32 %v10317_v8, %v8437_v55  ;;  %v14800_v22 = vld [vmem:[#allocation56_spill] sm:$0xff] }
 0x2d2   : > { %v4863_v17 = vmul.f32 %v4393_v19, %v4043_v31  ;;  %vm1136_vm9 = vmand %vm725_vm1, %vm960_vm5  ;;  %v10342_v59 = vsel %vm1135_vm8, 1.0, %v14403_v18  ;;  %v1710_v9 = vsub.f32 %v10317_v8, %v8441_v56  ;;  %v1711_v36 = vsub.f32 %v10317_v8, %v8451_v60 }
 0x2d3   : > { %5561 = vmatmul.mubr.f32.gmra.mrb[16].mxu1 %v5121_v6  ;;  %vm1137_vm10 = vmand %vm726_vm2, %vm961_vm6  ;;  %v6383_v33 = vsel %vm1136_vm9, 1.0, %v14403_v18  ;;  %v1924_v27 = vmul.f32 %v14535_v62, %v1709_v13  ;;  %v2139_v19 = vsub.f32 %v14533_v15, %v10317_v8  ;;  %v2140_v2 = vsub.f32 %v14620_v14, %v10317_v8  ;;  %v14801_v6 = vld [vmem:[#allocation58_spill] sm:$0xff] }
 0x2d4   : > { %v5119_v4 = vadd.f32 %v4991_v5, %v4863_v17  ;;  %vm1138_vm11 = vmand %vm727_vm3, %vm962_vm7  ;;  %v6384_v51 = vsel %vm1137_vm10, 1.0, %v14403_v18  ;;  %v1925_v7 = vmul.f32 %v14621_v20, %v1710_v9  ;;  %v1926_v57 = vmul.f32 %v14622_v37, %v1711_v36  ;;  %v14802_v17 = vld [vmem:[#allocation59_spill] sm:$0xff] }
 0x2d5   : > { %v6385_v42 = vsel %vm1138_vm11, 1.0, %v14403_v18  ;;  %v2141_v39 = vsub.f32 %v14708_v1, %v10317_v8  ;;  %v2354_v5 = vmul.f32 %v14795_v0, %v2139_v19  ;;  %v2355_v63 = vmul.f32 %v14796_v34, %v2140_v2 }
 0x2d6   : > { %5416 = vmatmul.mubr.f32.gmra.mrb[16].mxu0 %v5119_v4  ;;  %v2514_v11 = vmul.f32 %v10342_v59, %v1924_v27  ;;  %v2515_v3 = vmul.f32 %v6383_v33, %v1925_v7  ;;  %v2516_v29 = vmul.f32 %v6384_v51, %v1926_v57  ;;  %v3036_v16 = vsub.f32 %v10317_v8, %v14797_v26  ;;  %v14805_v57 = vld [vmem:[#allocation61_spill] sm:$0xff] }
 0x2d7   : > { %v2356_v21 = vmul.f32 %v14798_v32, %v2141_v39  ;;  %v2674_v12 = vmul.f32 %v6383_v33, %v2354_v5  ;;  %v2675_v58 = vmul.f32 %v6384_v51, %v2355_v63  ;;  %v3037_v28 = vsub.f32 %v10317_v8, %v14799_v30  ;;  %v14803_v33 = vld [vmem:[#allocation57_spill] sm:$0xff]  ;;  %v14804_v51 = vld [vmem:[#allocation60_spill] sm:$0xff]  ;;  %v14806_v5 = vld [vmem:[#allocation63_spill] sm:$0xff] }
 0x2d8   : > { %v3231_v31 = vmul.f32 %v14800_v22, %v3036_v16  ;;  %v3426_v13 = vsub.f32 %v14801_v6, %v10317_v8  ;;  %v3427_v9 = vsub.f32 %v14802_v17, %v10317_v8  ;;  %v4231_v36 = vsub.f32 %v10317_v8, %v14758_v10  ;;  %v14807_v16 = vld [vmem:[#allocation64_spill] sm:$0xff]  ;;  %v14808_v10 = vld [vmem:[#allocation66_spill] sm:$0xff] }
 0x2d9   : > { %v2676_v27 = vmul.f32 %v6385_v42, %v2356_v21  ;;  %v10384_v19 = vadd.f32 %v2674_v12, %v2514_v11  ;;  %v2835_v2 = vadd.f32 %v2675_v58, %v2515_v3  ;;  %v3232_v4 = vmul.f32 %v14803_v33, %v3037_v28  ;;  %v14809_v3 = vld [vmem:[#allocation65_spill] sm:$0xff]  ;;  %v14810_v12 = vld [vmem:[#allocation67_spill] sm:$0xff] }
 0x2da   : > { %v3621_v7 = vmul.f32 %v14804_v51, %v3426_v13  ;;  %v3622_v39 = vmul.f32 %v14805_v57, %v3427_v9  ;;  %v4402_v63 = vmul.f32 %v14806_v5, %v4231_v36  ;;  %v4573_v22 = vsub.f32 %v14807_v16, %v10317_v8  ;;  %v14811_v58 = vld [vmem:[#allocation69_spill] sm:$0xff]  ;;  %v14812_v13 = vld [vmem:[#allocation70_spill] sm:$0xff] }
 0x2db   : > { %v2836_v6 = vadd.f32 %v2676_v27, %v2516_v29  ;;  %v3765_v17 = vmul.f32 %v3231_v31, %v10384_v19  ;;  %v3766_v30 = vmul.f32 %v3232_v4, %v2835_v2  ;;  %vm728_vm12 = vcmp.ge.f32.partialorder %v10317_v8, %v14808_v10  ;;  %v14813_v29 = vld [vmem:[#allocation72_spill] sm:$0xff]  ;;  %v14814_v9 = vld [vmem:[#allocation73_spill] sm:$0xff] }
 0x2dc   : > { %v3909_v11 = vmul.f32 %v3621_v7, %v2835_v2  ;;  %v4744_v21 = vmul.f32 %v14809_v3, %v4573_v22  ;;  %vm729_vm13 = vcmp.ge.f32.partialorder %v10317_v8, %v14810_v12  ;;  %vm963_vm14 = vcmp.lt.f32.partialorder %v10317_v8, %v14811_v58  ;;  %v14815_v2 = vld [vmem:[#allocation79_spill] sm:$0xff]  ;;  %v14816_v7 = vld [vmem:[#allocation80_spill] sm:$0xff]  ;;  %v14818_v12 = vld [vmem:[#allocation85_spill] sm:$0xff] }
 0x2dd   : > { %v3910_v28 = vmul.f32 %v3622_v39, %v2836_v6  ;;  %vm964_vm15 = vcmp.lt.f32.partialorder %v10317_v8, %v14812_v13  ;;  %vm1139_vm0 = vmand %vm728_vm12, %vm963_vm14  ;;  %v1712_v31 = vsub.f32 %v10317_v8, %v14813_v29  ;;  %v1713_v36 = vsub.f32 %v10317_v8, %v14814_v9 }
 0x2de   : > { %v10406_v27 = vadd.f32 %v3909_v11, %v3765_v17  ;;  %vm1140_vm1 = vmand %vm729_vm13, %vm964_vm15  ;;  %v6386_v22 = vsel %vm1139_vm0, 1.0, %v14403_v18  ;;  %v2142_v4 = vsub.f32 %v14815_v2, %v10317_v8  ;;  %v2143_v39 = vsub.f32 %v14816_v7, %v10317_v8 }
 0x2df   : > { %v10413_v3 = vadd.f32 %v3910_v28, %v3766_v30  ;;  %v10416_v13 = vsel %vm1140_vm1, 1.0, %v14403_v18  ;;  %v1927_v29 = vmul.f32 %v14730_v40, %v1712_v31  ;;  %v1928_v9 = vmul.f32 %v14731_v54, %v1713_v36  ;;  %v14819_v36 = vld [vmem:[#allocation88_spill] sm:$0xff] }
 0x2e0   : > { %14817 = vst [vmem:[#allocation138_spill] sm:$0xff] %v10416_v13  ;;  %v4872_v17 = vmul.f32 %v4402_v63, %v10406_v27  ;;  %v2357_v11 = vmul.f32 %v14774_v53, %v2142_v4  ;;  %v2358_v58 = vmul.f32 %v14775_v38, %v2143_v39  ;;  %v3038_v2 = vsub.f32 %v10317_v8, %v14818_v12  ;;  %v14820_v63 = vld [vmem:[#allocation91_spill] sm:$0xff]  ;;  %v14821_v39 = vld [vmem:[#allocation89_spill] sm:$0xff] }
 0x2e1   : > { %v5000_v7 = vmul.f32 %v4744_v21, %v10413_v3  ;;  %v2517_v30 = vmul.f32 %v6385_v42, %v1927_v29  ;;  %v2518_v28 = vmul.f32 %v6386_v22, %v1928_v9  ;;  %v3039_v10 = vsub.f32 %v10317_v8, %v14777_v46  ;;  %v14822_v12 = vld [vmem:[#allocation93_spill] sm:$0xff]  ;;  %v14823_v21 = vld [vmem:[#allocation98_spill] sm:$0xff] }
 0x2e2   : > { %v2677_v16 = vmul.f32 %v6386_v22, %v2357_v11  ;;  %v2678_v31 = vmul.f32 %v10416_v13, %v2358_v58  ;;  %v3233_v54 = vmul.f32 %v14819_v36, %v3038_v2  ;;  %v3428_v4 = vsub.f32 %v14820_v63, %v10317_v8  ;;  %v14825_v11 = vld [vmem:[#allocation100_spill] sm:$0xff] }
 0x2e3   : > { %v5128_v53 = vadd.f32 %v5000_v7, %v4872_v17  ;;  %v3234_v38 = vmul.f32 %v14821_v39, %v3039_v10  ;;  %v3429_v40 = vsub.f32 %v14822_v12, %v10317_v8  ;;  %v4233_v42 = vsub.f32 %v10317_v8, %v14823_v21  ;;  %v14826_v7 = vld [vmem:[#allocation102_spill] sm:$0xff]  ;;  %v14827_v17 = vld [vmem:[#allocation107_spill] sm:$0xff]  ;;  %v14828_v21 = vld [vmem:[#allocation108_spill] sm:$0xff] }
 0x2e4   : > { %v2837_v29 = vadd.f32 %v2677_v16, %v2517_v30  ;;  %v10437_v9 = vadd.f32 %v2678_v31, %v2518_v28  ;;  %v3623_v22 = vmul.f32 %v14780_v35, %v3428_v4  ;;  %v3767_v58 = vmul.f32 %v3233_v54, %v2836_v6  ;;  %v14829_v16 = vld [vmem:[#allocation109_spill] sm:$0xff]  ;;  %v14831_v30 = vld [vmem:[#allocation46_spill] sm:$0xff]  ;;  %v14832_v31 = vld [vmem:[#allocation111_spill] sm:$0xff] }
 0x2e5   : > { %5420 = vmatprep.mubr.f32.mxu0 %v5128_v53  ;;  %v3624_v2 = vmul.f32 %v14781_v61, %v3429_v40  ;;  %v4404_v13 = vmul.f32 %v14825_v11, %v4233_v42  ;;  %v4575_v10 = vsub.f32 %v14826_v7, %v10317_v8  ;;  %vm723_vm2 = vcmp.ge.f32.partialorder %v10317_v8, %v14827_v17  ;;  %v14830_v40 = vld [vmem:[#allocation104_spill] sm:$0xff]  ;;  %v10467_v17 = vld [vmem:[%s8213_s17 + $0x50] sm:$0xff] }
 0x2e6   : > { %14824 = vst [vmem:[#allocation139_spill] sm:$0xff] %v10437_v9  ;;  %v3768_v12 = vmul.f32 %v3234_v38, %v2837_v29  ;;  %v3911_v63 = vmul.f32 %v3623_v22, %v2837_v29  ;;  %vm958_vm3 = vcmp.lt.f32.partialorder %v10317_v8, %v14828_v21  ;;  %v1708_v54 = vsub.f32 %v10317_v8, %v14829_v16  ;;  %v14833_v29 = vld [vmem:[#allocation110_spill] sm:$0xff]  ;;  %v14834_v21 = vld [vmem:[#allocation113_spill] sm:$0xff]  ;;  %v14838_v61 = vld [vmem:[#allocation116_spill] sm:$0xff] }
 0x2e7   : > { %v3912_v53 = vmul.f32 %v3624_v2, %v10437_v9  ;;  %v4746_v6 = vmul.f32 %v14830_v40, %v4575_v10  ;;  %vm1134_vm4 = vmand %vm723_vm2, %vm958_vm3  ;;  %v2138_v28 = vsub.f32 %v14831_v30, %v10317_v8  ;;  %v3035_v4 = vsub.f32 %v10317_v8, %v14832_v31  ;;  %v14836_v2 = vld [vmem:[#allocation50_spill] sm:$0xff]  ;;  %v14837_v10 = vld [vmem:[#allocation112_spill] sm:$0xff] }
 0x2e8   : > { %v4055_v38 = vadd.f32 %v3911_v63, %v3767_v58  ;;  %v6381_v42 = vsel %vm1134_vm4, 1.0, %v14403_v18  ;;  %v1923_v22 = vmul.f32 %v14833_v29, %v1708_v54  ;;  %v3425_v11 = vsub.f32 %v14834_v21, %v10317_v8  ;;  %v14839_v58 = vld [vmem:[#allocation114_spill] sm:$0xff] }
 0x2e9   : > { %v10460_v16 = vadd.f32 %v3912_v53, %v3768_v12  ;;  %v2353_v9 = vmul.f32 %v14836_v2, %v2138_v28  ;;  %v3230_v40 = vmul.f32 %v14837_v10, %v3035_v4  ;;  %v4230_v30 = vsub.f32 %v10317_v8, %v14838_v61  ;;  %v14840_v54 = vld [vmem:[#allocation118_spill] sm:$0xff]  ;;  %v14841_v53 = vld [vmem:[#allocation117_spill] sm:$0xff]  ;;  %v14842_v2 = vld [vmem:[#allocation119_spill] sm:$0xff] }
 0x2ea   : > { %v4874_v31 = vmul.f32 %v4404_v13, %v4055_v38  ;;  %v2513_v63 = vmul.f32 %v6381_v42, %v1923_v22  ;;  %v3620_v7 = vmul.f32 %v14839_v58, %v3425_v11  ;;  %v4572_v29 = vsub.f32 %v14840_v54, %v10317_v8 }
 0x2eb   : > { %14835 = vst [vmem:[#allocation140_spill] sm:$0xff] %v10460_v16  ;;  %v5002_v21 = vmul.f32 %v4746_v6, %v10460_v16  ;;  %v2673_v12 = vmul.f32 %v10342_v59, %v2353_v9  ;;  %v4401_v28 = vmul.f32 %v14841_v53, %v4230_v30  ;;  %v4232_v4 = vsub.f32 %v10317_v8, %v14842_v2 }
 0x2ec   : > { %v3908_v10 = vmul.f32 %v3620_v7, %v10384_v19  ;;  %v4743_v61 = vmul.f32 %v8933_v41, %v4572_v29  ;;  %v4574_v13 = vsub.f32 %v8955_v24, %v10317_v8  ;;  %vm735_vm5 = vcmp.ge.f32.partialorder %v10467_v17, %v8380_v43 }
 0x2ed   : > { %v5130_v11 = vadd.f32 %v5002_v21, %v4874_v31  ;;  %v2833_v42 = vadd.f32 %v2673_v12, %v2513_v63  ;;  %v4403_v6 = vmul.f32 %v8951_v23, %v4232_v4  ;;  %vm736_vm6 = vcmp.ge.f32.partialorder %v10467_v17, %v8384_v44 }
 0x2ee   : > { %v4999_v59 = vmul.f32 %v4743_v61, %v10406_v27  ;;  %v4745_v9 = vmul.f32 %v8959_v25, %v4574_v13  ;;  %vm737_vm7 = vcmp.ge.f32.partialorder %v10467_v17, %v8388_v45  ;;  %vm738_vm8 = vcmp.ge.f32.partialorder %v10467_v17, %v8394_v47 }
 0x2ef   : > { %5565 = vmatprep.mubr.f32.mxu1 %v5130_v11  ;;  %v3764_v8 = vmul.f32 %v3230_v40, %v2833_v42  ;;  %v4873_v19 = vmul.f32 %v4403_v6, %v10413_v3  ;;  %vm970_vm9 = vcmp.lt.f32.partialorder %v10467_v17, %v8398_v48  ;;  %vm971_vm10 = vcmp.lt.f32.partialorder %v10467_v17, %v8402_v49 }
 0x2f0   : > { %v5001_v21 = vmul.f32 %v4745_v9, %v4055_v38  ;;  %vm972_vm11 = vcmp.lt.f32.partialorder %v10467_v17, %v8406_v50  ;;  %vm973_vm12 = vcmp.lt.f32.partialorder %v10467_v17, %v8418_v52  ;;  %vm1146_vm13 = vmand %vm735_vm5, %vm970_vm9  ;;  %v1719_v61 = vsub.f32 %v10467_v17, %v8437_v55 }
 0x2f1   : > { %v4052_v3 = vadd.f32 %v3908_v10, %v3764_v8  ;;  %vm1147_vm14 = vmand %vm736_vm6, %vm971_vm10  ;;  %v10510_v27 = vsel %vm1146_vm13, 1.0, %v14403_v18  ;;  %v1720_v7 = vsub.f32 %v10467_v17, %v8441_v56  ;;  %v1721_v40 = vsub.f32 %v10467_v17, %v8451_v60 }
 0x2f2   : > { %v5129_v30 = vadd.f32 %v5001_v21, %v4873_v19  ;;  %vm1148_vm15 = vmand %vm737_vm7, %vm972_vm11  ;;  %v6394_v31 = vsel %vm1147_vm14, 1.0, %v14403_v18  ;;  %v1934_v38 = vmul.f32 %v14535_v62, %v1719_v61  ;;  %v2149_v29 = vsub.f32 %v14533_v15, %v10467_v17 }
 0x2f3   : > { %v4871_v22 = vmul.f32 %v4401_v28, %v4052_v3  ;;  %vm1149_vm0 = vmand %vm738_vm8, %vm973_vm12  ;;  %v6395_v10 = vsel %vm1148_vm15, 1.0, %v14403_v18  ;;  %v1935_v63 = vmul.f32 %v14621_v20, %v1720_v7  ;;  %v1936_v12 = vmul.f32 %v14622_v37, %v1721_v40  ;;  %v14843_v7 = vld [vmem:[#allocation55_spill] sm:$0xff] }
 0x2f4   : > { %5566 = vmatmul.mubr.f32.gmra.mrb[18].mxu1 %v5129_v30  ;;  %v6396_v4 = vsel %vm1149_vm0, 1.0, %v14403_v18  ;;  %v2150_v13 = vsub.f32 %v14620_v14, %v10467_v17  ;;  %v2151_v11 = vsub.f32 %v14708_v1, %v10467_v17  ;;  %v2364_v28 = vmul.f32 %v14795_v0, %v2149_v29  ;;  %v14844_v30 = vld [vmem:[#allocation58_spill] sm:$0xff] }
 0x2f5   : > { %v5127_v42 = vadd.f32 %v4999_v59, %v4871_v22  ;;  %v2524_v6 = vmul.f32 %v10510_v27, %v1934_v38  ;;  %v2525_v9 = vmul.f32 %v6394_v31, %v1935_v63  ;;  %v2526_v8 = vmul.f32 %v6395_v10, %v1936_v12  ;;  %v14845_v59 = vld [vmem:[#allocation59_spill] sm:$0xff]  ;;  %v14846_v22 = vld [vmem:[#allocation62_spill] sm:$0xff] }
 0x2f6   : > { %v2365_v19 = vmul.f32 %v14796_v34, %v2150_v13  ;;  %v2366_v21 = vmul.f32 %v14798_v32, %v2151_v11  ;;  %v2684_v61 = vmul.f32 %v6394_v31, %v2364_v28  ;;  %v3045_v3 = vsub.f32 %v10467_v17, %v14797_v26  ;;  %v14847_v31 = vld [vmem:[#allocation56_spill] sm:$0xff] }
 0x2f7   : > { %5421 = vmatmul.mubr.f32.gmra.mrb[18].mxu0 %v5127_v42  ;;  %v3046_v40 = vsub.f32 %v10467_v17, %v14843_v7  ;;  %v3435_v29 = vsub.f32 %v14844_v30, %v10467_v17  ;;  %v3436_v38 = vsub.f32 %v14845_v59, %v10467_v17  ;;  %v4239_v63 = vsub.f32 %v10467_v17, %v14846_v22  ;;  %v14848_v22 = vld [vmem:[#allocation64_spill] sm:$0xff] }
 0x2f8   : > { %v2685_v12 = vmul.f32 %v6395_v10, %v2365_v19  ;;  %v2686_v13 = vmul.f32 %v6396_v4, %v2366_v21  ;;  %v10548_v11 = vadd.f32 %v2684_v61, %v2524_v6  ;;  %v3240_v28 = vmul.f32 %v14847_v31, %v3045_v3  ;;  %v14849_v19 = vld [vmem:[#allocation66_spill] sm:$0xff]  ;;  %v14850_v6 = vld [vmem:[#allocation67_spill] sm:$0xff]  ;;  %v14851_v21 = vld [vmem:[#allocation69_spill] sm:$0xff] }
 0x2f9   : > { %v3241_v42 = vmul.f32 %v14803_v33, %v3046_v40  ;;  %v3630_v16 = vmul.f32 %v14804_v51, %v3435_v29  ;;  %v3631_v7 = vmul.f32 %v14805_v57, %v3436_v38  ;;  %v4410_v30 = vmul.f32 %v14806_v5, %v4239_v63  ;;  %v14852_v61 = vld [vmem:[#allocation70_spill] sm:$0xff]  ;;  %v14853_v40 = vld [vmem:[#allocation65_spill] sm:$0xff]  ;;  %v14854_v63 = vld [vmem:[#allocation72_spill] sm:$0xff] }
 0x2fa   : > { %v2845_v26 = vadd.f32 %v2685_v12, %v2525_v9  ;;  %v2846_v32 = vadd.f32 %v2686_v13, %v2526_v8  ;;  %v3774_v59 = vmul.f32 %v3240_v28, %v10548_v11  ;;  %v4581_v10 = vsub.f32 %v14848_v22, %v10467_v17  ;;  %v14855_v13 = vld [vmem:[#allocation73_spill] sm:$0xff]  ;;  %v14861_v22 = vld [vmem:[#allocation82_spill] sm:$0xff] }
 0x2fb   : > { %vm739_vm1 = vcmp.ge.f32.partialorder %v10467_v17, %v14849_v19  ;;  %vm740_vm2 = vcmp.ge.f32.partialorder %v10467_v17, %v14850_v6  ;;  %vm974_vm3 = vcmp.lt.f32.partialorder %v10467_v17, %v14851_v21  ;;  %vm975_vm4 = vcmp.lt.f32.partialorder %v10467_v17, %v14852_v61  ;;  %v14856_v21 = vld [vmem:[#allocation79_spill] sm:$0xff] }
 0x2fc   : > { %v3775_v3 = vmul.f32 %v3241_v42, %v2845_v26  ;;  %v3918_v9 = vmul.f32 %v3630_v16, %v2845_v26  ;;  %v3919_v8 = vmul.f32 %v3631_v7, %v2846_v32  ;;  %v4752_v29 = vmul.f32 %v14853_v40, %v4581_v10  ;;  %vm1150_vm5 = vmand %vm739_vm1, %vm974_vm3  ;;  %v14858_v16 = vld [vmem:[#allocation80_spill] sm:$0xff]  ;;  %v14859_v10 = vld [vmem:[#allocation75_spill] sm:$0xff] }
 0x2fd   : > { %vm1151_vm6 = vmand %vm740_vm2, %vm975_vm4  ;;  %v6397_v38 = vsel %vm1150_vm5, 1.0, %v14403_v18  ;;  %v1722_v12 = vsub.f32 %v10467_v17, %v14854_v63  ;;  %v1723_v28 = vsub.f32 %v10467_v17, %v14855_v13  ;;  %v2152_v6 = vsub.f32 %v14856_v21, %v10467_v17  ;;  %v14860_v40 = vld [vmem:[#allocation76_spill] sm:$0xff]  ;;  %v14862_v13 = vld [vmem:[#allocation85_spill] sm:$0xff] }
 0x2fe   : > { %v10574_v19 = vadd.f32 %v3918_v9, %v3774_v59  ;;  %v10576_v42 = vadd.f32 %v3919_v8, %v3775_v3  ;;  %v10579_v26 = vsel %vm1151_vm6, 1.0, %v14403_v18  ;;  %v2153_v7 = vsub.f32 %v14858_v16, %v10467_v17  ;;  %v14863_v9 = vld [vmem:[#allocation83_spill] sm:$0xff] }
 0x2ff   : > { %14857 = vst [vmem:[#allocation141_spill] sm:$0xff] %v10579_v26  ;;  %v1937_v61 = vmul.f32 %v14859_v10, %v1722_v12  ;;  %v1938_v63 = vmul.f32 %v14860_v40, %v1723_v28  ;;  %v2367_v5 = vmul.f32 %v14861_v22, %v2152_v6  ;;  %v3047_v57 = vsub.f32 %v10467_v17, %v14862_v13  ;;  %v14864_v40 = vld [vmem:[#allocation91_spill] sm:$0xff]  ;;  %v14866_v13 = vld [vmem:[#allocation98_spill] sm:$0xff] }
 0x300   : > { %v4880_v59 = vmul.f32 %v4410_v30, %v10574_v19  ;;  %v5008_v3 = vmul.f32 %v4752_v29, %v10576_v42  ;;  %v2368_v8 = vmul.f32 %v14863_v9, %v2153_v7  ;;  %v3048_v21 = vsub.f32 %v10467_v17, %v14777_v46  ;;  %v14865_v29 = vld [vmem:[#allocation93_spill] sm:$0xff] }
 0x301   : > { %v2527_v51 = vmul.f32 %v6396_v4, %v1937_v61  ;;  %v2528_v16 = vmul.f32 %v6397_v38, %v1938_v63  ;;  %v2687_v33 = vmul.f32 %v6397_v38, %v2367_v5  ;;  %v3242_v12 = vmul.f32 %v14819_v36, %v3047_v57  ;;  %v14868_v61 = vld [vmem:[#allocation102_spill] sm:$0xff]  ;;  %v14870_v63 = vld [vmem:[#allocation96_spill] sm:$0xff] }
 0x302   : > { %v5136_v28 = vadd.f32 %v5008_v3, %v4880_v59  ;;  %v2688_v6 = vmul.f32 %v10579_v26, %v2368_v8  ;;  %v3243_v22 = vmul.f32 %v14821_v39, %v3048_v21  ;;  %v3437_v30 = vsub.f32 %v14864_v40, %v10467_v17  ;;  %v14869_v21 = vld [vmem:[#allocation107_spill] sm:$0xff]  ;;  %v14871_v59 = vld [vmem:[#allocation100_spill] sm:$0xff] }
 0x303   : > { %v2847_v10 = vadd.f32 %v2687_v33, %v2527_v51  ;;  %v3438_v7 = vsub.f32 %v14865_v29, %v10467_v17  ;;  %v3776_v9 = vmul.f32 %v3242_v12, %v2846_v32  ;;  %v4241_v4 = vsub.f32 %v10467_v17, %v14866_v13  ;;  %v14872_v3 = vld [vmem:[#allocation108_spill] sm:$0xff] }
 0x304   : > { %5425 = vmatprep.mubr.f32.mxu0 %v5136_v28  ;;  %v10602_v5 = vadd.f32 %v2688_v6, %v2528_v16  ;;  %v3632_v57 = vmul.f32 %v14780_v35, %v3437_v30  ;;  %v4583_v38 = vsub.f32 %v14868_v61, %v10467_v17  ;;  %vm734_vm7 = vcmp.ge.f32.partialorder %v10467_v17, %v14869_v21  ;;  %v14873_v16 = vld [vmem:[#allocation104_spill] sm:$0xff]  ;;  %v14874_v28 = vld [vmem:[#allocation109_spill] sm:$0xff]  ;;  %v14875_v30 = vld [vmem:[#allocation46_spill] sm:$0xff] }
 0x305   : > { %v3633_v33 = vmul.f32 %v14870_v63, %v3438_v7  ;;  %v3777_v51 = vmul.f32 %v3243_v22, %v2847_v10  ;;  %v4412_v32 = vmul.f32 %v14871_v59, %v4241_v4  ;;  %vm969_vm8 = vcmp.lt.f32.partialorder %v10467_v17, %v14872_v3  ;;  %v14876_v4 = vld [vmem:[#allocation111_spill] sm:$0xff]  ;;  %v14880_v21 = vld [vmem:[#allocation116_spill] sm:$0xff] }
 0x306   : > { %14867 = vst [vmem:[#allocation142_spill] sm:$0xff] %v10602_v5  ;;  %v3920_v8 = vmul.f32 %v3632_v57, %v2847_v10  ;;  %v4754_v12 = vmul.f32 %v14873_v16, %v4583_v38  ;;  %vm1145_vm9 = vmand %vm734_vm7, %vm969_vm8  ;;  %v1718_v6 = vsub.f32 %v10467_v17, %v14874_v28  ;;  %v2148_v26 = vsub.f32 %v14875_v30, %v10467_v17  ;;  %v14877_v10 = vld [vmem:[#allocation113_spill] sm:$0xff]  ;;  %v14878_v16 = vld [vmem:[#allocation110_spill] sm:$0xff] }
 0x307   : > { %v3921_v22 = vmul.f32 %v3633_v33, %v10602_v5  ;;  %v6392_v7 = vsel %vm1145_vm9, 1.0, %v14403_v18  ;;  %v3044_v3 = vsub.f32 %v10467_v17, %v14876_v4  ;;  %v3434_v57 = vsub.f32 %v14877_v10, %v10467_v17  ;;  %v14879_v28 = vld [vmem:[#allocation50_spill] sm:$0xff]  ;;  %v5273_v61 = vld [vmem:[%s8239_s30 + $0x2d0] sm:$0xff]  ;;  %v14882_v5 = vld [vmem:[#allocation112_spill] sm:$0xff] }
 0x308   : > { %v4064_v38 = vadd.f32 %v3920_v8, %v3776_v9  ;;  %v1933_v59 = vmul.f32 %v14878_v16, %v1718_v6  ;;  %v2363_v63 = vmul.f32 %v14879_v28, %v2148_v26  ;;  %v4238_v30 = vsub.f32 %v10467_v17, %v14880_v21  ;;  %v5274_v8 = vld [vmem:[%s8239_s30 + $0x2d8] sm:$0xff]  ;;  %v5305_v6 = vld [vmem:[%s8239_s30 + $0x3d0] sm:$0xff] }
 0x309   : > { %v10629_v33 = vadd.f32 %v3921_v22, %v3777_v51  ;;  %v3239_v13 = vmul.f32 %v14882_v5, %v3044_v3  ;;  %v3629_v4 = vmul.f32 %v14839_v58, %v3434_v57  ;;  %v4580_v9 = vsub.f32 %v14840_v54, %v10467_v17  ;;  %v5306_v10 = vld [vmem:[%s8239_s30 + $0x3d8] sm:$0xff]  ;;  %v5257_v22 = vld [vmem:[%s8239_s30 + $0x250] sm:$0xff] }
 0x30a   : > { %v4882_v16 = vmul.f32 %v4412_v32, %v4064_v38  ;;  %v2523_v26 = vmul.f32 %v6392_v7, %v1933_v59  ;;  %v2683_v21 = vmul.f32 %v10510_v27, %v2363_v63  ;;  %v4409_v51 = vmul.f32 %v14841_v53, %v4238_v30  ;;  %v5258_v28 = vld [vmem:[%s8239_s30 + $0x258] sm:$0xff]  ;;  %v5289_v5 = vld [vmem:[%s8239_s30 + $0x350] sm:$0xff] }
 0x30b   : > { %14881 = vst [vmem:[#allocation143_spill] sm:$0xff] %v10629_v33  ;;  %v5010_v3 = vmul.f32 %v4754_v12, %v10629_v33  ;;  %v3917_v57 = vmul.f32 %v3629_v4, %v10548_v11  ;;  %v4751_v58 = vmul.f32 %v8933_v41, %v4580_v9  ;;  %v4240_v54 = vsub.f32 %v10467_v17, %v14842_v2  ;;  %v5290_v35 = vld [vmem:[%s8239_s30 + $0x358] sm:$0xff]  ;;  %v10652_v30 = vld [vmem:[%s8213_s17 + $0x58] sm:$0xff] }
 0x30c   : > { %v2843_v32 = vadd.f32 %v2683_v21, %v2523_v26  ;;  %v4582_v59 = vsub.f32 %v8955_v24, %v10467_v17  ;;  %v6958_v27 = vpack.c.bf16 %v5274_v8, %v5273_v61  ;;  %v6990_v63 = vpack.c.bf16 %v5306_v10, %v5305_v6 }
 0x30d   : > { %v5138_v7 = vadd.f32 %v5010_v3, %v4882_v16  ;;  %v5007_v12 = vmul.f32 %v4751_v58, %v10574_v19  ;;  %v4411_v11 = vmul.f32 %v8951_v23, %v4240_v54  ;;  %v6960_v4 = vpack.c.bf16 %v5258_v28, %v5257_v22 }
 0x30e   : > { %v3773_v9 = vmul.f32 %v3239_v13, %v2843_v32  ;;  %v4753_v33 = vmul.f32 %v8959_v25, %v4582_v59  ;;  %6959 = vmatprep.subr.bf16.mxu0 %v6958_v27  ;;  %6991 = vmatprep.subr.bf16.mxu1 %v6990_v63  ;;  %v6992_v2 = vpack.c.bf16 %v5290_v35, %v5289_v5  ;;  %v14883_v32 = vld [vmem:[#allocation53_spill] sm:$0xff] }
 0x30f   : > { %5570 = vmatprep.mubr.f32.mxu1 %v5138_v7  ;;  %v4881_v21 = vmul.f32 %v4411_v11, %v10576_v42  ;;  %6961 = vmatpush3.bf16.msra.mxu0 %v6960_v4  ;;  %vm746_vm10 = vcmp.ge.f32.partialorder %v10652_v30, %v8380_v43  ;;  %vm747_vm11 = vcmp.ge.f32.partialorder %v10652_v30, %v8384_v44  ;;  %v14884_v7 = vld [vmem:[#allocation54_spill] sm:$0xff]  ;;  %v14885_v4 = vld [vmem:[#allocation55_spill] sm:$0xff] }
 0x310   : > { %v4061_v17 = vadd.f32 %v3917_v57, %v3773_v9  ;;  %v5009_v58 = vmul.f32 %v4753_v33, %v4064_v38  ;;  %6993 = vmatpush3.bf16.msra.mxu1 %v6992_v2  ;;  %vm748_vm12 = vcmp.ge.f32.partialorder %v10652_v30, %v8388_v45  ;;  %vm749_vm13 = vcmp.ge.f32.partialorder %v10652_v30, %v8394_v47 }
 0x311   : > { %vm981_vm14 = vcmp.lt.f32.partialorder %v10652_v30, %v8398_v48  ;;  %vm982_vm15 = vcmp.lt.f32.partialorder %v10652_v30, %v8402_v49  ;;  %vm983_vm0 = vcmp.lt.f32.partialorder %v10652_v30, %v8406_v50  ;;  %vm984_vm1 = vcmp.lt.f32.partialorder %v10652_v30, %v8418_v52 }
 0x312   : > { %v4879_v35 = vmul.f32 %v4409_v51, %v4061_v17  ;;  %v5137_v2 = vadd.f32 %v5009_v58, %v4881_v21  ;;  %vm1157_vm2 = vmand %vm746_vm10, %vm981_vm14  ;;  %v1729_v54 = vsub.f32 %v10652_v30, %v8437_v55  ;;  %v1730_v19 = vsub.f32 %v10652_v30, %v8441_v56  ;;  %v14886_v21 = vld [vmem:[#allocation58_spill] sm:$0xff]  ;;  %v14887_v58 = vld [vmem:[#allocation59_spill] sm:$0xff] }
 0x313   : > { %vm1158_vm3 = vmand %vm747_vm11, %vm982_vm15  ;;  %v10682_v13 = vsel %vm1157_vm2, 1.0, %v14403_v18  ;;  %v1731_v42 = vsub.f32 %v10652_v30, %v8451_v60  ;;  %v2159_v5 = vsub.f32 %v14533_v15, %v10652_v30  ;;  %v2160_v61 = vsub.f32 %v14620_v14, %v10652_v30 }
 0x314   : > { %v5135_v16 = vadd.f32 %v5007_v12, %v4879_v35  ;;  %5571 = vmatmul.mubr.f32.gmra.mrb[20].mxu1 %v5137_v2  ;;  %vm1159_vm4 = vmand %vm748_vm12, %vm983_vm0  ;;  %v6405_v28 = vsel %vm1158_vm3, 1.0, %v14403_v18  ;;  %v1944_v10 = vmul.f32 %v14535_v62, %v1729_v54  ;;  %v1945_v38 = vmul.f32 %v14621_v20, %v1730_v19 }
 0x315   : > { %vm1160_vm5 = vmand %vm749_vm13, %vm984_vm1  ;;  %v6406_v33 = vsel %vm1159_vm4, 1.0, %v14403_v18  ;;  %v1946_v8 = vmul.f32 %v14622_v37, %v1731_v42  ;;  %v2161_v6 = vsub.f32 %v14708_v1, %v10652_v30  ;;  %v2374_v26 = vmul.f32 %v14795_v0, %v2159_v5  ;;  %v14888_v42 = vld [vmem:[#allocation62_spill] sm:$0xff] }
 0x316   : > { %5426 = vmatmul.mubr.f32.gmra.mrb[20].mxu0 %v5135_v16  ;;  %v6407_v51 = vsel %vm1160_vm5, 1.0, %v14403_v18  ;;  %v2375_v22 = vmul.f32 %v14796_v34, %v2160_v61  ;;  %v2534_v3 = vmul.f32 %v10682_v13, %v1944_v10  ;;  %v2535_v57 = vmul.f32 %v6405_v28, %v1945_v38  ;;  %v14889_v16 = vld [vmem:[#allocation57_spill] sm:$0xff]  ;;  %v14890_v10 = vld [vmem:[#allocation60_spill] sm:$0xff] }
 0x317   : > { %v2376_v59 = vmul.f32 %v14883_v32, %v2161_v6  ;;  %v2536_v27 = vmul.f32 %v6406_v33, %v1946_v8  ;;  %v2694_v63 = vmul.f32 %v6405_v28, %v2374_v26  ;;  %v3054_v12 = vsub.f32 %v10652_v30, %v14884_v7 }
 0x318   : > { %v2695_v11 = vmul.f32 %v6406_v33, %v2375_v22  ;;  %v3055_v9 = vsub.f32 %v10652_v30, %v14885_v4  ;;  %v3444_v17 = vsub.f32 %v14886_v21, %v10652_v30  ;;  %v3445_v35 = vsub.f32 %v14887_v58, %v10652_v30  ;;  %v14891_v33 = vld [vmem:[#allocation61_spill] sm:$0xff]  ;;  %v14892_v22 = vld [vmem:[#allocation63_spill] sm:$0xff] }
 0x319   : > { %v2696_v2 = vmul.f32 %v6407_v51, %v2376_v59  ;;  %v10719_v54 = vadd.f32 %v2694_v63, %v2534_v3  ;;  %v3249_v19 = vmul.f32 %v14847_v31, %v3054_v12  ;;  %v4247_v5 = vsub.f32 %v10652_v30, %v14888_v42  ;;  %v14893_v3 = vld [vmem:[#allocation64_spill] sm:$0xff]  ;;  %v14894_v31 = vld [vmem:[#allocation66_spill] sm:$0xff] }
 0x31a   : > { %v2855_v61 = vadd.f32 %v2695_v11, %v2535_v57  ;;  %v3250_v28 = vmul.f32 %v14889_v16, %v3055_v9  ;;  %v3639_v38 = vmul.f32 %v14890_v10, %v3444_v17  ;;  %v3640_v8 = vmul.f32 %v14891_v33, %v3445_v35  ;;  %v14895_v57 = vld [vmem:[#allocation67_spill] sm:$0xff]  ;;  %v14896_v9 = vld [vmem:[#allocation65_spill] sm:$0xff] }
 0x31b   : > { %v2856_v6 = vadd.f32 %v2696_v2, %v2536_v27  ;;  %v3783_v26 = vmul.f32 %v3249_v19, %v10719_v54  ;;  %v4418_v58 = vmul.f32 %v14892_v22, %v4247_v5  ;;  %v4589_v59 = vsub.f32 %v14893_v3, %v10652_v30  ;;  %v14897_v35 = vld [vmem:[#allocation69_spill] sm:$0xff]  ;;  %v14898_v27 = vld [vmem:[#allocation70_spill] sm:$0xff]  ;;  %v14899_v19 = vld [vmem:[#allocation72_spill] sm:$0xff] }
 0x31c   : > { %v3784_v63 = vmul.f32 %v3250_v28, %v2855_v61  ;;  %v3927_v12 = vmul.f32 %v3639_v38, %v2855_v61  ;;  %vm750_vm6 = vcmp.ge.f32.partialorder %v10652_v30, %v14894_v31  ;;  %vm751_vm7 = vcmp.ge.f32.partialorder %v10652_v30, %v14895_v57  ;;  %v14900_v61 = vld [vmem:[#allocation73_spill] sm:$0xff]  ;;  %v14901_v38 = vld [vmem:[#allocation79_spill] sm:$0xff]  ;;  %v14906_v3 = vld [vmem:[#allocation76_spill] sm:$0xff] }
 0x31d   : > { %v3928_v11 = vmul.f32 %v3640_v8, %v2856_v6  ;;  %v4760_v17 = vmul.f32 %v14896_v9, %v4589_v59  ;;  %vm985_vm8 = vcmp.lt.f32.partialorder %v10652_v30, %v14897_v35  ;;  %vm986_vm9 = vcmp.lt.f32.partialorder %v10652_v30, %v14898_v27  ;;  %v14902_v35 = vld [vmem:[#allocation80_spill] sm:$0xff]  ;;  %v14908_v33 = vld [vmem:[#allocation83_spill] sm:$0xff] }
 0x31e   : > { %v10740_v2 = vadd.f32 %v3927_v12, %v3783_v26  ;;  %vm1161_vm10 = vmand %vm750_vm6, %vm985_vm8  ;;  %v1732_v5 = vsub.f32 %v10652_v30, %v14899_v19  ;;  %v1733_v28 = vsub.f32 %v10652_v30, %v14900_v61  ;;  %v2162_v8 = vsub.f32 %v14901_v38, %v10652_v30  ;;  %v14903_v26 = vld [vmem:[#allocation85_spill] sm:$0xff]  ;;  %v14905_v61 = vld [vmem:[#allocation75_spill] sm:$0xff] }
 0x31f   : > { %v10748_v57 = vadd.f32 %v3928_v11, %v3784_v63  ;;  %vm1162_vm11 = vmand %vm751_vm7, %vm986_vm9  ;;  %v6408_v59 = vsel %vm1161_vm10, 1.0, %v14403_v18  ;;  %v2163_v27 = vsub.f32 %v14902_v35, %v10652_v30  ;;  %v3056_v12 = vsub.f32 %v10652_v30, %v14903_v26  ;;  %v14907_v11 = vld [vmem:[#allocation82_spill] sm:$0xff] }
 0x320   : > { %v4888_v9 = vmul.f32 %v4418_v58, %v10740_v2  ;;  %v10757_v19 = vsel %vm1162_vm11, 1.0, %v14403_v18  ;;  %v1947_v31 = vmul.f32 %v14905_v61, %v1732_v5  ;;  %v1948_v38 = vmul.f32 %v14906_v3, %v1733_v28 }
 0x321   : > { %14904 = vst [vmem:[#allocation144_spill] sm:$0xff] %v10757_v19  ;;  %v5016_v63 = vmul.f32 %v4760_v17, %v10748_v57  ;;  %v2377_v22 = vmul.f32 %v14907_v11, %v2162_v8  ;;  %v2378_v10 = vmul.f32 %v14908_v33, %v2163_v27  ;;  %v3057_v35 = vsub.f32 %v10652_v30, %v14777_v46  ;;  %v14909_v27 = vld [vmem:[#allocation95_spill] sm:$0xff]  ;;  %v14910_v46 = vld [vmem:[#allocation98_spill] sm:$0xff] }
 0x322   : > { %v2537_v16 = vmul.f32 %v6407_v51, %v1947_v31  ;;  %v2538_v26 = vmul.f32 %v6408_v59, %v1948_v38  ;;  %v3251_v58 = vmul.f32 %v14819_v36, %v3056_v12  ;;  %v3446_v42 = vsub.f32 %v14864_v40, %v10652_v30  ;;  %v14915_v12 = vld [vmem:[#allocation100_spill] sm:$0xff] }
 0x323   : > { %v5144_v21 = vadd.f32 %v5016_v63, %v4888_v9  ;;  %v2697_v5 = vmul.f32 %v6408_v59, %v2377_v22  ;;  %v2698_v28 = vmul.f32 %v10757_v19, %v2378_v10  ;;  %v3252_v17 = vmul.f32 %v14821_v39, %v3057_v35  ;;  %v14912_v9 = vld [vmem:[#allocation102_spill] sm:$0xff]  ;;  %v14913_v59 = vld [vmem:[#allocation107_spill] sm:$0xff]  ;;  %v14914_v10 = vld [vmem:[#allocation96_spill] sm:$0xff] }
 0x324   : > { %v3447_v8 = vsub.f32 %v14865_v29, %v10652_v30  ;;  %v3641_v33 = vmul.f32 %v14909_v27, %v3446_v42  ;;  %v3785_v11 = vmul.f32 %v3251_v58, %v2856_v6  ;;  %v4249_v31 = vsub.f32 %v10652_v30, %v14910_v46  ;;  %v14916_v19 = vld [vmem:[#allocation108_spill] sm:$0xff]  ;;  %v14917_v42 = vld [vmem:[#allocation109_spill] sm:$0xff]  ;;  %v14927_v46 = vld [vmem:[#allocation118_spill] sm:$0xff] }
 0x325   : > { %5430 = vmatprep.mubr.f32.mxu0 %v5144_v21  ;;  %v2857_v51 = vadd.f32 %v2697_v5, %v2537_v16  ;;  %v10776_v38 = vadd.f32 %v2698_v28, %v2538_v26  ;;  %v4591_v22 = vsub.f32 %v14912_v9, %v10652_v30  ;;  %vm745_vm12 = vcmp.ge.f32.partialorder %v10652_v30, %v14913_v59  ;;  %v14918_v26 = vld [vmem:[#allocation104_spill] sm:$0xff]  ;;  %v14919_v5 = vld [vmem:[#allocation46_spill] sm:$0xff] }
 0x326   : > { %v3642_v35 = vmul.f32 %v14914_v10, %v3447_v8  ;;  %v4420_v63 = vmul.f32 %v14915_v12, %v4249_v31  ;;  %vm980_vm13 = vcmp.lt.f32.partialorder %v10652_v30, %v14916_v19  ;;  %v1728_v6 = vsub.f32 %v10652_v30, %v14917_v42  ;;  %v14920_v31 = vld [vmem:[#allocation110_spill] sm:$0xff]  ;;  %v14921_v12 = vld [vmem:[#allocation111_spill] sm:$0xff] }
 0x327   : > { %14911 = vst [vmem:[#allocation145_spill] sm:$0xff] %v10776_v38  ;;  %v3786_v21 = vmul.f32 %v3252_v17, %v2857_v51  ;;  %v3929_v16 = vmul.f32 %v3641_v33, %v2857_v51  ;;  %v4762_v58 = vmul.f32 %v14918_v26, %v4591_v22  ;;  %vm1156_vm14 = vmand %vm745_vm12, %vm980_vm13  ;;  %v2158_v28 = vsub.f32 %v14919_v5, %v10652_v30  ;;  %v14922_v42 = vld [vmem:[#allocation50_spill] sm:$0xff]  ;;  %v14923_v33 = vld [vmem:[#allocation113_spill] sm:$0xff] }
 0x328   : > { %v3930_v59 = vmul.f32 %v3642_v35, %v10776_v38  ;;  %v6403_v8 = vsel %vm1156_vm14, 1.0, %v14403_v18  ;;  %v1943_v9 = vmul.f32 %v14920_v31, %v1728_v6  ;;  %v3053_v19 = vsub.f32 %v10652_v30, %v14921_v12  ;;  %v14924_v22 = vld [vmem:[#allocation116_spill] sm:$0xff] }
 0x329   : > { %v4073_v10 = vadd.f32 %v3929_v16, %v3785_v11  ;;  %v2373_v17 = vmul.f32 %v14922_v42, %v2158_v28  ;;  %v3443_v51 = vsub.f32 %v14923_v33, %v10652_v30  ;;  %v4246_v26 = vsub.f32 %v10652_v30, %v14924_v22  ;;  %v14926_v35 = vld [vmem:[#allocation112_spill] sm:$0xff]  ;;  %v14928_v16 = vld [vmem:[#allocation114_spill] sm:$0xff] }
 0x32a   : > { %v10801_v27 = vadd.f32 %v3930_v59, %v3786_v21  ;;  %v2533_v5 = vmul.f32 %v6403_v8, %v1943_v9  ;;  %v3248_v38 = vmul.f32 %v14926_v35, %v3053_v19  ;;  %v4588_v6 = vsub.f32 %v14927_v46, %v10652_v30  ;;  %v10807_v31 = vld [vmem:[%s8213_s17 + $0x60] sm:$0xff]  ;;  %v14929_v21 = vld [vmem:[#allocation119_spill] sm:$0xff] }
 0x32b   : > { %v4890_v12 = vmul.f32 %v4420_v63, %v4073_v10  ;;  %v2693_v11 = vmul.f32 %v10682_v13, %v2373_v17  ;;  %v3638_v28 = vmul.f32 %v14928_v16, %v3443_v51  ;;  %v4417_v42 = vmul.f32 %v14841_v53, %v4246_v26 }
 0x32c   : > { %14925 = vst [vmem:[#allocation146_spill] sm:$0xff] %v10801_v27  ;;  %v5018_v33 = vmul.f32 %v4762_v58, %v10801_v27  ;;  %v4759_v59 = vmul.f32 %v8933_v41, %v4588_v6  ;;  %v4248_v9 = vsub.f32 %v10652_v30, %v14929_v21  ;;  %v4590_v19 = vsub.f32 %v8955_v24, %v10652_v30 }
 0x32d   : > { %v2853_v8 = vadd.f32 %v2693_v11, %v2533_v5  ;;  %v3926_v46 = vmul.f32 %v3638_v28, %v10719_v54  ;;  %vm757_vm15 = vcmp.ge.f32.partialorder %v10807_v31, %v8380_v43  ;;  %vm758_vm0 = vcmp.ge.f32.partialorder %v10807_v31, %v8384_v44 }
 0x32e   : > { %v5146_v13 = vadd.f32 %v5018_v33, %v4890_v12  ;;  %v5015_v63 = vmul.f32 %v4759_v59, %v10740_v2  ;;  %v4419_v26 = vmul.f32 %v8951_v23, %v4248_v9  ;;  %v4761_v58 = vmul.f32 %v8959_v25, %v4590_v19 }
 0x32f   : > { %v3782_v17 = vmul.f32 %v3248_v38, %v2853_v8  ;;  %vm759_vm1 = vcmp.ge.f32.partialorder %v10807_v31, %v8388_v45  ;;  %vm760_vm2 = vcmp.ge.f32.partialorder %v10807_v31, %v8394_v47  ;;  %vm992_vm3 = vcmp.lt.f32.partialorder %v10807_v31, %v8398_v48 }
 0x330   : > { %5575 = vmatprep.mubr.f32.mxu1 %v5146_v13  ;;  %v4889_v30 = vmul.f32 %v4419_v26, %v10748_v57  ;;  %v5017_v54 = vmul.f32 %v4761_v58, %v4073_v10  ;;  %vm993_vm4 = vcmp.lt.f32.partialorder %v10807_v31, %v8402_v49  ;;  %vm994_vm5 = vcmp.lt.f32.partialorder %v10807_v31, %v8406_v50  ;;  %vm1168_vm6 = vmand %vm757_vm15, %vm992_vm3 }
 0x331   : > { %v4070_v2 = vadd.f32 %v3926_v46, %v3782_v17  ;;  %vm995_vm7 = vcmp.lt.f32.partialorder %v10807_v31, %v8418_v52  ;;  %vm1169_vm8 = vmand %vm758_vm0, %vm993_vm4  ;;  %v10846_v57 = vsel %vm1168_vm6, 1.0, %v14403_v18  ;;  %v1739_v38 = vsub.f32 %v10807_v31, %v8437_v55 }
 0x332   : > { %v5145_v10 = vadd.f32 %v5017_v54, %v4889_v30  ;;  %vm1170_vm9 = vmand %vm759_vm1, %vm994_vm5  ;;  %v6416_v46 = vsel %vm1169_vm8, 1.0, %v14403_v18  ;;  %v1740_v12 = vsub.f32 %v10807_v31, %v8441_v56  ;;  %v1741_v5 = vsub.f32 %v10807_v31, %v8451_v60 }
 0x333   : > { %v4887_v33 = vmul.f32 %v4417_v42, %v4070_v2  ;;  %vm1171_vm10 = vmand %vm760_vm2, %vm995_vm7  ;;  %v6417_v51 = vsel %vm1170_vm9, 1.0, %v14403_v18  ;;  %v1954_v6 = vmul.f32 %v14535_v62, %v1739_v38  ;;  %v2169_v11 = vsub.f32 %v14533_v15, %v10807_v31 }
 0x334   : > { %5576 = vmatmul.mubr.f32.gmra.mrb[22].mxu1 %v5145_v10  ;;  %v6418_v28 = vsel %vm1171_vm10, 1.0, %v14403_v18  ;;  %v1955_v59 = vmul.f32 %v14621_v20, %v1740_v12  ;;  %v1956_v9 = vmul.f32 %v14622_v37, %v1741_v5  ;;  %v2170_v42 = vsub.f32 %v14620_v14, %v10807_v31  ;;  %v14930_v10 = vld [vmem:[#allocation58_spill] sm:$0xff] }
 0x335   : > { %v5143_v19 = vadd.f32 %v5015_v63, %v4887_v33  ;;  %v2171_v8 = vsub.f32 %v14708_v1, %v10807_v31  ;;  %v2384_v13 = vmul.f32 %v14795_v0, %v2169_v11  ;;  %v2544_v26 = vmul.f32 %v10846_v57, %v1954_v6  ;;  %v14931_v33 = vld [vmem:[#allocation56_spill] sm:$0xff]  ;;  %v14932_v11 = vld [vmem:[#allocation59_spill] sm:$0xff]  ;;  %v14939_v0 = vld [vmem:[#allocation66_spill] sm:$0xff] }
 0x336   : > { %v2385_v58 = vmul.f32 %v14796_v34, %v2170_v42  ;;  %v2545_v17 = vmul.f32 %v6416_v46, %v1955_v59  ;;  %v2546_v30 = vmul.f32 %v6417_v51, %v1956_v9  ;;  %v3063_v54 = vsub.f32 %v10807_v31, %v14884_v7  ;;  %v14933_v9 = vld [vmem:[#allocation62_spill] sm:$0xff]  ;;  %v14936_v7 = vld [vmem:[#allocation61_spill] sm:$0xff] }
 0x337   : > { %5431 = vmatmul.mubr.f32.gmra.mrb[22].mxu0 %v5143_v19  ;;  %v2386_v2 = vmul.f32 %v14883_v32, %v2171_v8  ;;  %v2704_v38 = vmul.f32 %v6416_v46, %v2384_v13  ;;  %v3064_v63 = vsub.f32 %v10807_v31, %v14885_v4  ;;  %v3453_v12 = vsub.f32 %v14930_v10, %v10807_v31  ;;  %v14934_v8 = vld [vmem:[#allocation57_spill] sm:$0xff]  ;;  %v14935_v13 = vld [vmem:[#allocation60_spill] sm:$0xff]  ;;  %v14937_v10 = vld [vmem:[#allocation63_spill] sm:$0xff] }
 0x338   : > { %v2705_v5 = vmul.f32 %v6417_v51, %v2385_v58  ;;  %v3258_v6 = vmul.f32 %v14931_v33, %v3063_v54  ;;  %v3454_v59 = vsub.f32 %v14932_v11, %v10807_v31  ;;  %v4255_v42 = vsub.f32 %v10807_v31, %v14933_v9  ;;  %v14938_v58 = vld [vmem:[#allocation64_spill] sm:$0xff] }
 0x339   : > { %v2706_v27 = vmul.f32 %v6418_v28, %v2386_v2  ;;  %v10887_v19 = vadd.f32 %v2704_v38, %v2544_v26  ;;  %v3259_v46 = vmul.f32 %v14934_v8, %v3064_v63  ;;  %v3648_v32 = vmul.f32 %v14935_v13, %v3453_v12  ;;  %v14940_v26 = vld [vmem:[#allocation67_spill] sm:$0xff]  ;;  %v14941_v63 = vld [vmem:[#allocation65_spill] sm:$0xff] }
 0x33a   : > { %v2865_v4 = vadd.f32 %v2705_v5, %v2545_v17  ;;  %v3649_v34 = vmul.f32 %v14936_v7, %v3454_v59  ;;  %v4426_v51 = vmul.f32 %v14937_v10, %v4255_v42  ;;  %v4597_v54 = vsub.f32 %v14938_v58, %v10807_v31  ;;  %v14942_v12 = vld [vmem:[#allocation69_spill] sm:$0xff]  ;;  %v14943_v59 = vld [vmem:[#allocation70_spill] sm:$0xff] }
 0x33b   : > { %v2866_v33 = vadd.f32 %v2706_v27, %v2546_v30  ;;  %v3792_v11 = vmul.f32 %v3258_v6, %v10887_v19  ;;  %vm761_vm11 = vcmp.ge.f32.partialorder %v10807_v31, %v14939_v0  ;;  %vm762_vm12 = vcmp.ge.f32.partialorder %v10807_v31, %v14940_v26  ;;  %v14944_v27 = vld [vmem:[#allocation72_spill] sm:$0xff]  ;;  %v14945_v6 = vld [vmem:[#allocation73_spill] sm:$0xff]  ;;  %v14952_v7 = vld [vmem:[#allocation86_spill] sm:$0xff] }
 0x33c   : > { %v3793_v2 = vmul.f32 %v3259_v46, %v2865_v4  ;;  %v3936_v38 = vmul.f32 %v3648_v32, %v2865_v4  ;;  %v4768_v17 = vmul.f32 %v14941_v63, %v4597_v54  ;;  %vm996_vm13 = vcmp.lt.f32.partialorder %v10807_v31, %v14942_v12  ;;  %v14946_v4 = vld [vmem:[#allocation79_spill] sm:$0xff]  ;;  %v14951_v10 = vld [vmem:[#allocation85_spill] sm:$0xff] }
 0x33d   : > { %v3937_v5 = vmul.f32 %v3649_v34, %v2866_v33  ;;  %vm997_vm14 = vcmp.lt.f32.partialorder %v10807_v31, %v14943_v59  ;;  %vm1172_vm15 = vmand %vm761_vm11, %vm996_vm13  ;;  %v1742_v30 = vsub.f32 %v10807_v31, %v14944_v27  ;;  %v1743_v42 = vsub.f32 %v10807_v31, %v14945_v6  ;;  %v14947_v34 = vld [vmem:[#allocation80_spill] sm:$0xff]  ;;  %v14950_v63 = vld [vmem:[#allocation83_spill] sm:$0xff] }
 0x33e   : > { %v10909_v0 = vadd.f32 %v3936_v38, %v3792_v11  ;;  %vm1173_vm0 = vmand %vm762_vm12, %vm997_vm14  ;;  %v6419_v32 = vsel %vm1172_vm15, 1.0, %v14403_v18  ;;  %v2172_v46 = vsub.f32 %v14946_v4, %v10807_v31  ;;  %v2173_v54 = vsub.f32 %v14947_v34, %v10807_v31  ;;  %v14949_v38 = vld [vmem:[#allocation82_spill] sm:$0xff] }
 0x33f   : > { %v10916_v12 = vadd.f32 %v3937_v5, %v3793_v2  ;;  %v10919_v59 = vsel %vm1173_vm0, 1.0, %v14403_v18  ;;  %v1957_v27 = vmul.f32 %v14905_v61, %v1742_v30  ;;  %v1958_v6 = vmul.f32 %v14906_v3, %v1743_v42 }
 0x340   : > { %14948 = vst [vmem:[#allocation147_spill] sm:$0xff] %v10919_v59  ;;  %v4896_v11 = vmul.f32 %v4426_v51, %v10909_v0  ;;  %v2387_v26 = vmul.f32 %v14949_v38, %v2172_v46  ;;  %v2388_v58 = vmul.f32 %v14950_v63, %v2173_v54  ;;  %v3065_v4 = vsub.f32 %v10807_v31, %v14951_v10 }
 0x341   : > { %v5024_v34 = vmul.f32 %v4768_v17, %v10916_v12  ;;  %v2547_v2 = vmul.f32 %v6418_v28, %v1957_v27  ;;  %v2548_v5 = vmul.f32 %v6419_v32, %v1958_v6  ;;  %v3066_v13 = vsub.f32 %v10807_v31, %v14952_v7  ;;  %v14953_v17 = vld [vmem:[#allocation98_spill] sm:$0xff] }
 0x342   : > { %v2707_v8 = vmul.f32 %v6419_v32, %v2387_v26  ;;  %v2708_v30 = vmul.f32 %v10919_v59, %v2388_v58  ;;  %v3260_v42 = vmul.f32 %v14819_v36, %v3065_v4  ;;  %v3455_v51 = vsub.f32 %v14864_v40, %v10807_v31  ;;  %v14955_v26 = vld [vmem:[#allocation95_spill] sm:$0xff]  ;;  %v14956_v4 = vld [vmem:[#allocation96_spill] sm:$0xff] }
 0x343   : > { %v5152_v46 = vadd.f32 %v5024_v34, %v4896_v11  ;;  %v3261_v54 = vmul.f32 %v14821_v39, %v3066_v13  ;;  %v3456_v10 = vsub.f32 %v14865_v29, %v10807_v31  ;;  %v4257_v28 = vsub.f32 %v10807_v31, %v14953_v17  ;;  %v14957_v36 = vld [vmem:[#allocation100_spill] sm:$0xff]  ;;  %v14958_v34 = vld [vmem:[#allocation102_spill] sm:$0xff]  ;;  %v14959_v11 = vld [vmem:[#allocation107_spill] sm:$0xff] }
 0x344   : > { %v2867_v27 = vadd.f32 %v2707_v8, %v2547_v2  ;;  %v10940_v6 = vadd.f32 %v2708_v30, %v2548_v5  ;;  %v3650_v32 = vmul.f32 %v14955_v26, %v3455_v51  ;;  %v3794_v58 = vmul.f32 %v3260_v42, %v2866_v33  ;;  %v14960_v17 = vld [vmem:[#allocation108_spill] sm:$0xff]  ;;  %v14961_v8 = vld [vmem:[#allocation109_spill] sm:$0xff]  ;;  %v14963_v30 = vld [vmem:[#allocation46_spill] sm:$0xff] }
 0x345   : > { %5435 = vmatprep.mubr.f32.mxu0 %v5152_v46  ;;  %v3651_v59 = vmul.f32 %v14956_v4, %v3456_v10  ;;  %v4428_v40 = vmul.f32 %v14957_v36, %v4257_v28  ;;  %v4599_v13 = vsub.f32 %v14958_v34, %v10807_v31  ;;  %vm756_vm1 = vcmp.ge.f32.partialorder %v10807_v31, %v14959_v11  ;;  %v14962_v2 = vld [vmem:[#allocation104_spill] sm:$0xff]  ;;  %v14964_v51 = vld [vmem:[#allocation111_spill] sm:$0xff]  ;;  %v10990_v36 = vld [vmem:[%s8213_s17 + $0x68] sm:$0xff] }
 0x346   : > { %14954 = vst [vmem:[#allocation86_spill] sm:$0xff] %v10940_v6  ;;  %v3795_v29 = vmul.f32 %v3261_v54, %v2867_v27  ;;  %v3938_v39 = vmul.f32 %v3650_v32, %v2867_v27  ;;  %vm991_vm2 = vcmp.lt.f32.partialorder %v10807_v31, %v14960_v17  ;;  %v1738_v33 = vsub.f32 %v10807_v31, %v14961_v8  ;;  %v14965_v27 = vld [vmem:[#allocation110_spill] sm:$0xff]  ;;  %v14966_v8 = vld [vmem:[#allocation113_spill] sm:$0xff] }
 0x347   : > { %v3939_v10 = vmul.f32 %v3651_v59, %v10940_v6  ;;  %v4770_v5 = vmul.f32 %v14962_v2, %v4599_v13  ;;  %vm1167_vm3 = vmand %vm756_vm1, %vm991_vm2  ;;  %v2168_v42 = vsub.f32 %v14963_v30, %v10807_v31  ;;  %v3062_v46 = vsub.f32 %v10807_v31, %v14964_v51  ;;  %v14968_v13 = vld [vmem:[#allocation50_spill] sm:$0xff] }
 0x348   : > { %v4082_v54 = vadd.f32 %v3938_v39, %v3794_v58  ;;  %v6414_v28 = vsel %vm1167_vm3, 1.0, %v14403_v18  ;;  %v1953_v32 = vmul.f32 %v14965_v27, %v1738_v33  ;;  %v3452_v59 = vsub.f32 %v14966_v8, %v10807_v31  ;;  %v5275_v39 = vld [vmem:[%s8239_s30 + $0x2e0] sm:$0xff]  ;;  %v5276_v58 = vld [vmem:[%s8239_s30 + $0x2e8] sm:$0xff] }
 0x349   : > { %v10963_v6 = vadd.f32 %v3939_v10, %v3795_v29  ;;  %v2383_v2 = vmul.f32 %v14968_v13, %v2168_v42  ;;  %v3257_v30 = vmul.f32 %v14926_v35, %v3062_v46  ;;  %v4254_v51 = vsub.f32 %v10807_v31, %v14924_v22  ;;  %v14969_v8 = vld [vmem:[#allocation118_spill] sm:$0xff]  ;;  %v5307_v10 = vld [vmem:[%s8239_s30 + $0x3e0] sm:$0xff] }
 0x34a   : > { %v4898_v17 = vmul.f32 %v4428_v40, %v4082_v54  ;;  %v2543_v11 = vmul.f32 %v6414_v28, %v1953_v32  ;;  %v3647_v33 = vmul.f32 %v14928_v16, %v3452_v59  ;;  %v4596_v29 = vsub.f32 %v14969_v8, %v10807_v31  ;;  %v5308_v42 = vld [vmem:[%s8239_s30 + $0x3e8] sm:$0xff]  ;;  %v5259_v13 = vld [vmem:[%s8239_s30 + $0x260] sm:$0xff] }
 0x34b   : > { %14967 = vst [vmem:[#allocation148_spill] sm:$0xff] %v10963_v6  ;;  %v5026_v46 = vmul.f32 %v4770_v5, %v10963_v6  ;;  %v2703_v35 = vmul.f32 %v10846_v57, %v2383_v2  ;;  %v4425_v22 = vmul.f32 %v14841_v53, %v4254_v51  ;;  %v4256_v27 = vsub.f32 %v10807_v31, %v14929_v21  ;;  %v5260_v40 = vld [vmem:[%s8239_s30 + $0x268] sm:$0xff]  ;;  %v5291_v28 = vld [vmem:[%s8239_s30 + $0x360] sm:$0xff] }
 0x34c   : > { %v5292_v32 = vld [vmem:[%s8239_s30 + $0x368] sm:$0xff]  ;;  %v3935_v59 = vmul.f32 %v3647_v33, %v10887_v19  ;;  %v4767_v16 = vmul.f32 %v8933_v41, %v4596_v29  ;;  %v4598_v8 = vsub.f32 %v8955_v24, %v10807_v31  ;;  %v6962_v34 = vpack.c.bf16 %v5276_v58, %v5275_v39 }
 0x34d   : > { %v5154_v5 = vadd.f32 %v5026_v46, %v4898_v17  ;;  %v2863_v57 = vadd.f32 %v2703_v35, %v2543_v11  ;;  %v4427_v2 = vmul.f32 %v8951_v23, %v4256_v27  ;;  %v6994_v51 = vpack.c.bf16 %v5308_v42, %v5307_v10  ;;  %v14970_v10 = vld [vmem:[#allocation51_spill] sm:$0xff]  ;;  %v14971_v42 = vld [vmem:[#allocation52_spill] sm:$0xff] }
 0x34e   : > { %v5023_v6 = vmul.f32 %v4767_v16, %v10909_v0  ;;  %v4769_v21 = vmul.f32 %v8959_v25, %v4598_v8  ;;  %6963 = vmatprep.subr.bf16.mxu0 %v6962_v34  ;;  %v6964_v53 = vpack.c.bf16 %v5260_v40, %v5259_v13  ;;  %v6996_v19 = vpack.c.bf16 %v5292_v32, %v5291_v28 }
 0x34f   : > { %5580 = vmatprep.mubr.f32.mxu1 %v5154_v5  ;;  %v3791_v33 = vmul.f32 %v3257_v30, %v2863_v57  ;;  %v4897_v29 = vmul.f32 %v4427_v2, %v10916_v12  ;;  %6995 = vmatprep.subr.bf16.mxu1 %v6994_v51  ;;  %vm768_vm4 = vcmp.ge.f32.partialorder %v10990_v36, %v8380_v43  ;;  %v14973_v57 = vld [vmem:[#allocation53_spill] sm:$0xff] }
 0x350   : > { %v5025_v31 = vmul.f32 %v4769_v21, %v4082_v54  ;;  %6965 = vmatpush3.bf16.msra.mxu0 %v6964_v53  ;;  %6997 = vmatpush3.bf16.msra.mxu1 %v6996_v19  ;;  %vm769_vm5 = vcmp.ge.f32.partialorder %v10990_v36, %v8384_v44  ;;  %vm770_vm6 = vcmp.ge.f32.partialorder %v10990_v36, %v8388_v45 }
 0x351   : > { %v4079_v0 = vadd.f32 %v3935_v59, %v3791_v33  ;;  %vm771_vm7 = vcmp.ge.f32.partialorder %v10990_v36, %v8394_v47  ;;  %vm1003_vm8 = vcmp.lt.f32.partialorder %v10990_v36, %v8398_v48  ;;  %vm1004_vm9 = vcmp.lt.f32.partialorder %v10990_v36, %v8402_v49  ;;  %v14972_v59 = vld [vmem:[#allocation54_spill] sm:$0xff]  ;;  %v14974_v33 = vld [vmem:[#allocation55_spill] sm:$0xff] }
 0x352   : > { %v5153_v35 = vadd.f32 %v5025_v31, %v4897_v29  ;;  %vm1005_vm10 = vcmp.lt.f32.partialorder %v10990_v36, %v8406_v50  ;;  %vm1006_vm11 = vcmp.lt.f32.partialorder %v10990_v36, %v8418_v52  ;;  %vm1179_vm12 = vmand %vm768_vm4, %vm1003_vm8  ;;  %v1749_v53 = vsub.f32 %v10990_v36, %v8437_v55  ;;  %v14975_v31 = vld [vmem:[#allocation56_spill] sm:$0xff] }
 0x353   : > { %v4895_v16 = vmul.f32 %v4425_v22, %v4079_v0  ;;  %vm1180_vm13 = vmand %vm769_vm5, %vm1004_vm9  ;;  %v11015_v21 = vsel %vm1179_vm12, 1.0, %v14403_v18  ;;  %v1750_v12 = vsub.f32 %v10990_v36, %v8441_v56  ;;  %v1751_v17 = vsub.f32 %v10990_v36, %v8451_v60 }
 0x354   : > { %5581 = vmatmul.mubr.f32.gmra.mrb[24].mxu1 %v5153_v35  ;;  %vm1181_vm14 = vmand %vm770_vm6, %vm1005_vm10  ;;  %v6427_v34 = vsel %vm1180_vm13, 1.0, %v14403_v18  ;;  %v1964_v11 = vmul.f32 %v14535_v62, %v1749_v53  ;;  %v2179_v22 = vsub.f32 %v14533_v15, %v10990_v36  ;;  %v2180_v8 = vsub.f32 %v14620_v14, %v10990_v36  ;;  %v14976_v35 = vld [vmem:[#allocation58_spill] sm:$0xff] }
 0x355   : > { %v5151_v30 = vadd.f32 %v5023_v6, %v4895_v16  ;;  %vm1182_vm15 = vmand %vm771_vm7, %vm1006_vm11  ;;  %v6428_v54 = vsel %vm1181_vm14, 1.0, %v14403_v18  ;;  %v1965_v27 = vmul.f32 %v14621_v20, %v1750_v12  ;;  %v1966_v13 = vmul.f32 %v14622_v37, %v1751_v17  ;;  %v14977_v16 = vld [vmem:[#allocation59_spill] sm:$0xff] }
 0x356   : > { %v6429_v39 = vsel %vm1182_vm15, 1.0, %v14403_v18  ;;  %v2181_v58 = vsub.f32 %v14708_v1, %v10990_v36  ;;  %v2394_v6 = vmul.f32 %v14970_v10, %v2179_v22  ;;  %v2395_v46 = vmul.f32 %v14971_v42, %v2180_v8 }
 0x357   : > { %5436 = vmatmul.mubr.f32.gmra.mrb[24].mxu0 %v5151_v30  ;;  %v2554_v40 = vmul.f32 %v11015_v21, %v1964_v11  ;;  %v2555_v28 = vmul.f32 %v6427_v34, %v1965_v27  ;;  %v2556_v32 = vmul.f32 %v6428_v54, %v1966_v13  ;;  %v3072_v5 = vsub.f32 %v10990_v36, %v14972_v59  ;;  %v14980_v13 = vld [vmem:[#allocation61_spill] sm:$0xff] }
 0x358   : > { %v2396_v2 = vmul.f32 %v14973_v57, %v2181_v58  ;;  %v2714_v51 = vmul.f32 %v6427_v34, %v2394_v6  ;;  %v2715_v19 = vmul.f32 %v6428_v54, %v2395_v46  ;;  %v3073_v29 = vsub.f32 %v10990_v36, %v14974_v33  ;;  %v14978_v34 = vld [vmem:[#allocation57_spill] sm:$0xff]  ;;  %v14979_v54 = vld [vmem:[#allocation60_spill] sm:$0xff]  ;;  %v14981_v6 = vld [vmem:[#allocation63_spill] sm:$0xff] }
 0x359   : > { %v3267_v0 = vmul.f32 %v14975_v31, %v3072_v5  ;;  %v3462_v53 = vsub.f32 %v14976_v35, %v10990_v36  ;;  %v3463_v12 = vsub.f32 %v14977_v16, %v10990_v36  ;;  %v4263_v17 = vsub.f32 %v10990_v36, %v14933_v9  ;;  %v14982_v5 = vld [vmem:[#allocation64_spill] sm:$0xff]  ;;  %v14983_v9 = vld [vmem:[#allocation66_spill] sm:$0xff] }
 0x35a   : > { %v2716_v11 = vmul.f32 %v6429_v39, %v2396_v2  ;;  %v11057_v22 = vadd.f32 %v2714_v51, %v2554_v40  ;;  %v2875_v8 = vadd.f32 %v2715_v19, %v2555_v28  ;;  %v3268_v30 = vmul.f32 %v14978_v34, %v3073_v29  ;;  %v14984_v28 = vld [vmem:[#allocation65_spill] sm:$0xff]  ;;  %v14985_v51 = vld [vmem:[#allocation67_spill] sm:$0xff] }
 0x35b   : > { %v3657_v27 = vmul.f32 %v14979_v54, %v3462_v53  ;;  %v3658_v58 = vmul.f32 %v14980_v13, %v3463_v12  ;;  %v4434_v46 = vmul.f32 %v14981_v6, %v4263_v17  ;;  %v4605_v31 = vsub.f32 %v14982_v5, %v10990_v36  ;;  %v14986_v19 = vld [vmem:[#allocation69_spill] sm:$0xff]  ;;  %v14987_v53 = vld [vmem:[#allocation70_spill] sm:$0xff] }
 0x35c   : > { %v2876_v35 = vadd.f32 %v2716_v11, %v2556_v32  ;;  %v3801_v16 = vmul.f32 %v3267_v0, %v11057_v22  ;;  %v3802_v33 = vmul.f32 %v3268_v30, %v2875_v8  ;;  %vm772_vm0 = vcmp.ge.f32.partialorder %v10990_v36, %v14983_v9  ;;  %v14988_v32 = vld [vmem:[#allocation72_spill] sm:$0xff]  ;;  %v14989_v12 = vld [vmem:[#allocation73_spill] sm:$0xff] }
 0x35d   : > { %v3945_v40 = vmul.f32 %v3657_v27, %v2875_v8  ;;  %v4776_v2 = vmul.f32 %v14984_v28, %v4605_v31  ;;  %vm773_vm1 = vcmp.ge.f32.partialorder %v10990_v36, %v14985_v51  ;;  %vm1007_vm2 = vcmp.lt.f32.partialorder %v10990_v36, %v14986_v19  ;;  %v14990_v8 = vld [vmem:[#allocation79_spill] sm:$0xff]  ;;  %v14991_v27 = vld [vmem:[#allocation80_spill] sm:$0xff]  ;;  %v14993_v51 = vld [vmem:[#allocation85_spill] sm:$0xff] }
 0x35e   : > { %v3946_v29 = vmul.f32 %v3658_v58, %v2876_v35  ;;  %vm1008_vm3 = vcmp.lt.f32.partialorder %v10990_v36, %v14987_v53  ;;  %vm1183_vm4 = vmand %vm772_vm0, %vm1007_vm2  ;;  %v1752_v0 = vsub.f32 %v10990_v36, %v14988_v32  ;;  %v1753_v17 = vsub.f32 %v10990_v36, %v14989_v12 }
 0x35f   : > { %v11079_v11 = vadd.f32 %v3945_v40, %v3801_v16  ;;  %vm1184_vm5 = vmand %vm773_vm1, %vm1008_vm3  ;;  %v6430_v31 = vsel %vm1183_vm4, 1.0, %v14403_v18  ;;  %v2182_v30 = vsub.f32 %v14990_v8, %v10990_v36  ;;  %v2183_v58 = vsub.f32 %v14991_v27, %v10990_v36 }
 0x360   : > { %v11086_v28 = vadd.f32 %v3946_v29, %v3802_v33  ;;  %v11089_v53 = vsel %vm1184_vm5, 1.0, %v14403_v18  ;;  %v1967_v32 = vmul.f32 %v14905_v61, %v1752_v0  ;;  %v1968_v12 = vmul.f32 %v14906_v3, %v1753_v17  ;;  %v14994_v17 = vld [vmem:[#allocation88_spill] sm:$0xff] }
 0x361   : > { %14992 = vst [vmem:[#allocation51_spill] sm:$0xff] %v11089_v53  ;;  %v4904_v16 = vmul.f32 %v4434_v46, %v11079_v11  ;;  %v2397_v40 = vmul.f32 %v14949_v38, %v2182_v30  ;;  %v2398_v19 = vmul.f32 %v14950_v63, %v2183_v58  ;;  %v3074_v8 = vsub.f32 %v10990_v36, %v14993_v51  ;;  %v14995_v46 = vld [vmem:[#allocation91_spill] sm:$0xff]  ;;  %v14996_v58 = vld [vmem:[#allocation89_spill] sm:$0xff] }
 0x362   : > { %v5032_v27 = vmul.f32 %v4776_v2, %v11086_v28  ;;  %v2557_v33 = vmul.f32 %v6429_v39, %v1967_v32  ;;  %v2558_v29 = vmul.f32 %v6430_v31, %v1968_v12  ;;  %v3075_v9 = vsub.f32 %v10990_v36, %v14952_v7  ;;  %v14997_v51 = vld [vmem:[#allocation93_spill] sm:$0xff]  ;;  %v14998_v2 = vld [vmem:[#allocation98_spill] sm:$0xff] }
 0x363   : > { %v2717_v5 = vmul.f32 %v6430_v31, %v2397_v40  ;;  %v2718_v0 = vmul.f32 %v11089_v53, %v2398_v19  ;;  %v3269_v3 = vmul.f32 %v14994_v17, %v3074_v8  ;;  %v3464_v30 = vsub.f32 %v14995_v46, %v10990_v36  ;;  %v15000_v40 = vld [vmem:[#allocation100_spill] sm:$0xff] }
 0x364   : > { %v5160_v38 = vadd.f32 %v5032_v27, %v4904_v16  ;;  %v3270_v63 = vmul.f32 %v14996_v58, %v3075_v9  ;;  %v3465_v61 = vsub.f32 %v14997_v51, %v10990_v36  ;;  %v4265_v39 = vsub.f32 %v10990_v36, %v14998_v2  ;;  %v15001_v27 = vld [vmem:[#allocation102_spill] sm:$0xff]  ;;  %v15002_v16 = vld [vmem:[#allocation107_spill] sm:$0xff]  ;;  %v15003_v2 = vld [vmem:[#allocation108_spill] sm:$0xff] }
 0x365   : > { %v2877_v32 = vadd.f32 %v2717_v5, %v2557_v33  ;;  %v11110_v12 = vadd.f32 %v2718_v0, %v2558_v29  ;;  %v3659_v31 = vmul.f32 %v14955_v26, %v3464_v30  ;;  %v3803_v19 = vmul.f32 %v3269_v3, %v2876_v35  ;;  %v15004_v5 = vld [vmem:[#allocation109_spill] sm:$0xff]  ;;  %v15006_v33 = vld [vmem:[#allocation46_spill] sm:$0xff]  ;;  %v15007_v0 = vld [vmem:[#allocation111_spill] sm:$0xff] }
 0x366   : > { %5440 = vmatprep.mubr.f32.mxu0 %v5160_v38  ;;  %v3660_v8 = vmul.f32 %v14956_v4, %v3465_v61  ;;  %v4436_v53 = vmul.f32 %v15000_v40, %v4265_v39  ;;  %v4607_v9 = vsub.f32 %v15001_v27, %v10990_v36  ;;  %vm767_vm6 = vcmp.ge.f32.partialorder %v10990_v36, %v15002_v16  ;;  %v15005_v61 = vld [vmem:[#allocation104_spill] sm:$0xff]  ;;  %v11140_v16 = vld [vmem:[%s8213_s17 + $0x70] sm:$0xff] }
 0x367   : > { %14999 = vst [vmem:[#allocation52_spill] sm:$0xff] %v11110_v12  ;;  %v3804_v51 = vmul.f32 %v3270_v63, %v2877_v32  ;;  %v3947_v46 = vmul.f32 %v3659_v31, %v2877_v32  ;;  %vm1002_vm7 = vcmp.lt.f32.partialorder %v10990_v36, %v15003_v2  ;;  %v1748_v3 = vsub.f32 %v10990_v36, %v15004_v5  ;;  %v15008_v32 = vld [vmem:[#allocation110_spill] sm:$0xff]  ;;  %v15009_v2 = vld [vmem:[#allocation113_spill] sm:$0xff]  ;;  %v15013_v4 = vld [vmem:[#allocation116_spill] sm:$0xff] }
 0x368   : > { %v3948_v38 = vmul.f32 %v3660_v8, %v11110_v12  ;;  %v4778_v35 = vmul.f32 %v15005_v61, %v4607_v9  ;;  %vm1178_vm8 = vmand %vm767_vm6, %vm1002_vm7  ;;  %v2178_v29 = vsub.f32 %v15006_v33, %v10990_v36  ;;  %v3071_v30 = vsub.f32 %v10990_v36, %v15007_v0  ;;  %v15011_v8 = vld [vmem:[#allocation50_spill] sm:$0xff]  ;;  %v15012_v9 = vld [vmem:[#allocation112_spill] sm:$0xff] }
 0x369   : > { %v4091_v63 = vadd.f32 %v3947_v46, %v3803_v19  ;;  %v6425_v39 = vsel %vm1178_vm8, 1.0, %v14403_v18  ;;  %v1963_v31 = vmul.f32 %v15008_v32, %v1748_v3  ;;  %v3461_v40 = vsub.f32 %v15009_v2, %v10990_v36  ;;  %v15014_v19 = vld [vmem:[#allocation114_spill] sm:$0xff] }
 0x36a   : > { %v11133_v5 = vadd.f32 %v3948_v38, %v3804_v51  ;;  %v2393_v12 = vmul.f32 %v15011_v8, %v2178_v29  ;;  %v3266_v61 = vmul.f32 %v15012_v9, %v3071_v30  ;;  %v4262_v33 = vsub.f32 %v10990_v36, %v15013_v4  ;;  %v15015_v3 = vld [vmem:[#allocation118_spill] sm:$0xff]  ;;  %v15016_v38 = vld [vmem:[#allocation117_spill] sm:$0xff]  ;;  %v15017_v8 = vld [vmem:[#allocation119_spill] sm:$0xff] }
 0x36b   : > { %v4906_v0 = vmul.f32 %v4436_v53, %v4091_v63  ;;  %v2553_v46 = vmul.f32 %v6425_v39, %v1963_v31  ;;  %v3656_v27 = vmul.f32 %v15014_v19, %v3461_v40  ;;  %v4604_v32 = vsub.f32 %v15015_v3, %v10990_v36 }
 0x36c   : > { %15010 = vst [vmem:[#allocation88_spill] sm:$0xff] %v11133_v5  ;;  %v5034_v2 = vmul.f32 %v4778_v35, %v11133_v5  ;;  %v2713_v51 = vmul.f32 %v11015_v21, %v2393_v12  ;;  %v4433_v29 = vmul.f32 %v15016_v38, %v4262_v33  ;;  %v4264_v30 = vsub.f32 %v10990_v36, %v15017_v8 }
 0x36d   : > { %v3944_v9 = vmul.f32 %v3656_v27, %v11057_v22  ;;  %v4775_v4 = vmul.f32 %v8933_v41, %v4604_v32  ;;  %v4606_v53 = vsub.f32 %v8955_v24, %v10990_v36  ;;  %vm779_vm9 = vcmp.ge.f32.partialorder %v11140_v16, %v8380_v43 }
 0x36e   : > { %v5162_v40 = vadd.f32 %v5034_v2, %v4906_v0  ;;  %v2873_v39 = vadd.f32 %v2713_v51, %v2553_v46  ;;  %v4435_v35 = vmul.f32 %v8951_v23, %v4264_v30  ;;  %vm780_vm10 = vcmp.ge.f32.partialorder %v11140_v16, %v8384_v44 }
 0x36f   : > { %v5031_v21 = vmul.f32 %v4775_v4, %v11079_v11  ;;  %v4777_v12 = vmul.f32 %v8959_v25, %v4606_v53  ;;  %vm781_vm11 = vcmp.ge.f32.partialorder %v11140_v16, %v8388_v45  ;;  %vm782_vm12 = vcmp.ge.f32.partialorder %v11140_v16, %v8394_v47 }
 0x370   : > { %5585 = vmatprep.mubr.f32.mxu1 %v5162_v40  ;;  %v3800_v36 = vmul.f32 %v3266_v61, %v2873_v39  ;;  %v4905_v22 = vmul.f32 %v4435_v35, %v11086_v28  ;;  %vm1014_vm13 = vcmp.lt.f32.partialorder %v11140_v16, %v8398_v48  ;;  %vm1015_vm14 = vcmp.lt.f32.partialorder %v11140_v16, %v8402_v49 }
 0x371   : > { %v5033_v2 = vmul.f32 %v4777_v12, %v4091_v63  ;;  %vm1016_vm15 = vcmp.lt.f32.partialorder %v11140_v16, %v8406_v50  ;;  %vm1017_vm0 = vcmp.lt.f32.partialorder %v11140_v16, %v8418_v52  ;;  %vm1190_vm1 = vmand %vm779_vm9, %vm1014_vm13  ;;  %v1759_v4 = vsub.f32 %v11140_v16, %v8437_v55 }
 0x372   : > { %v4088_v28 = vadd.f32 %v3944_v9, %v3800_v36  ;;  %vm1191_vm2 = vmand %vm780_vm10, %vm1015_vm14  ;;  %v11183_v11 = vsel %vm1190_vm1, 1.0, %v14403_v18  ;;  %v1760_v27 = vsub.f32 %v11140_v16, %v8441_v56  ;;  %v1761_v61 = vsub.f32 %v11140_v16, %v8451_v60 }
 0x373   : > { %v5161_v33 = vadd.f32 %v5033_v2, %v4905_v22  ;;  %vm1192_vm3 = vmand %vm781_vm11, %vm1016_vm15  ;;  %v6438_v0 = vsel %vm1191_vm2, 1.0, %v14403_v18  ;;  %v1974_v63 = vmul.f32 %v14535_v62, %v1759_v4  ;;  %v2189_v32 = vsub.f32 %v14533_v15, %v11140_v16 }
 0x374   : > { %v4903_v31 = vmul.f32 %v4433_v29, %v4088_v28  ;;  %vm1193_vm4 = vmand %vm782_vm12, %vm1017_vm0  ;;  %v6439_v9 = vsel %vm1192_vm3, 1.0, %v14403_v18  ;;  %v1975_v46 = vmul.f32 %v14621_v20, %v1760_v27  ;;  %v1976_v51 = vmul.f32 %v14622_v37, %v1761_v61  ;;  %v15018_v27 = vld [vmem:[#allocation55_spill] sm:$0xff] }
 0x375   : > { %5586 = vmatmul.mubr.f32.gmra.mrb[26].mxu1 %v5161_v33  ;;  %v6440_v30 = vsel %vm1193_vm4, 1.0, %v14403_v18  ;;  %v2190_v53 = vsub.f32 %v14620_v14, %v11140_v16  ;;  %v2191_v40 = vsub.f32 %v14708_v1, %v11140_v16  ;;  %v2404_v29 = vmul.f32 %v14970_v10, %v2189_v32  ;;  %v15019_v33 = vld [vmem:[#allocation58_spill] sm:$0xff] }
 0x376   : > { %v5159_v39 = vadd.f32 %v5031_v21, %v4903_v31  ;;  %v2564_v35 = vmul.f32 %v11183_v11, %v1974_v63  ;;  %v2565_v12 = vmul.f32 %v6438_v0, %v1975_v46  ;;  %v2566_v36 = vmul.f32 %v6439_v9, %v1976_v51  ;;  %v15020_v21 = vld [vmem:[#allocation59_spill] sm:$0xff]  ;;  %v15021_v31 = vld [vmem:[#allocation62_spill] sm:$0xff] }
 0x377   : > { %v2405_v22 = vmul.f32 %v14971_v42, %v2190_v53  ;;  %v2406_v2 = vmul.f32 %v14973_v57, %v2191_v40  ;;  %v2724_v4 = vmul.f32 %v6438_v0, %v2404_v29  ;;  %v3081_v28 = vsub.f32 %v11140_v16, %v14972_v59  ;;  %v15022_v0 = vld [vmem:[#allocation56_spill] sm:$0xff] }
 0x378   : > { %5441 = vmatmul.mubr.f32.gmra.mrb[26].mxu0 %v5159_v39  ;;  %v3082_v61 = vsub.f32 %v11140_v16, %v15018_v27  ;;  %v3471_v32 = vsub.f32 %v15019_v33, %v11140_v16  ;;  %v3472_v63 = vsub.f32 %v15020_v21, %v11140_v16  ;;  %v4271_v46 = vsub.f32 %v11140_v16, %v15021_v31  ;;  %v15023_v31 = vld [vmem:[#allocation64_spill] sm:$0xff] }
 0x379   : > { %v2725_v51 = vmul.f32 %v6439_v9, %v2405_v22  ;;  %v2726_v53 = vmul.f32 %v6440_v30, %v2406_v2  ;;  %v11221_v40 = vadd.f32 %v2724_v4, %v2564_v35  ;;  %v3276_v29 = vmul.f32 %v15022_v0, %v3081_v28  ;;  %v15024_v22 = vld [vmem:[#allocation66_spill] sm:$0xff]  ;;  %v15025_v35 = vld [vmem:[#allocation67_spill] sm:$0xff]  ;;  %v15026_v2 = vld [vmem:[#allocation69_spill] sm:$0xff] }
 0x37a   : > { %v3277_v39 = vmul.f32 %v14978_v34, %v3082_v61  ;;  %v3666_v5 = vmul.f32 %v14979_v54, %v3471_v32  ;;  %v3667_v27 = vmul.f32 %v14980_v13, %v3472_v63  ;;  %v4442_v33 = vmul.f32 %v14981_v6, %v4271_v46  ;;  %v15027_v4 = vld [vmem:[#allocation70_spill] sm:$0xff]  ;;  %v15028_v61 = vld [vmem:[#allocation65_spill] sm:$0xff]  ;;  %v15029_v46 = vld [vmem:[#allocation72_spill] sm:$0xff] }
 0x37b   : > { %v2885_v59 = vadd.f32 %v2725_v51, %v2565_v12  ;;  %v2886_v57 = vadd.f32 %v2726_v53, %v2566_v36  ;;  %v3810_v21 = vmul.f32 %v3276_v29, %v11221_v40  ;;  %v4613_v9 = vsub.f32 %v15023_v31, %v11140_v16  ;;  %v15030_v53 = vld [vmem:[#allocation73_spill] sm:$0xff]  ;;  %v15036_v31 = vld [vmem:[#allocation82_spill] sm:$0xff] }
 0x37c   : > { %vm783_vm5 = vcmp.ge.f32.partialorder %v11140_v16, %v15024_v22  ;;  %vm784_vm6 = vcmp.ge.f32.partialorder %v11140_v16, %v15025_v35  ;;  %vm1018_vm7 = vcmp.lt.f32.partialorder %v11140_v16, %v15026_v2  ;;  %vm1019_vm8 = vcmp.lt.f32.partialorder %v11140_v16, %v15027_v4  ;;  %v15031_v2 = vld [vmem:[#allocation79_spill] sm:$0xff] }
 0x37d   : > { %v3811_v28 = vmul.f32 %v3277_v39, %v2885_v59  ;;  %v3954_v12 = vmul.f32 %v3666_v5, %v2885_v59  ;;  %v3955_v36 = vmul.f32 %v3667_v27, %v2886_v57  ;;  %v4784_v32 = vmul.f32 %v15028_v61, %v4613_v9  ;;  %vm1194_vm9 = vmand %vm783_vm5, %vm1018_vm7  ;;  %v15033_v5 = vld [vmem:[#allocation80_spill] sm:$0xff]  ;;  %v15034_v9 = vld [vmem:[#allocation75_spill] sm:$0xff] }
 0x37e   : > { %vm1195_vm10 = vmand %vm784_vm6, %vm1019_vm8  ;;  %v6441_v63 = vsel %vm1194_vm9, 1.0, %v14403_v18  ;;  %v1762_v51 = vsub.f32 %v11140_v16, %v15029_v46  ;;  %v1763_v29 = vsub.f32 %v11140_v16, %v15030_v53  ;;  %v2192_v35 = vsub.f32 %v15031_v2, %v11140_v16  ;;  %v15035_v61 = vld [vmem:[#allocation76_spill] sm:$0xff]  ;;  %v15037_v53 = vld [vmem:[#allocation85_spill] sm:$0xff] }
 0x37f   : > { %v11247_v22 = vadd.f32 %v3954_v12, %v3810_v21  ;;  %v11249_v39 = vadd.f32 %v3955_v36, %v3811_v28  ;;  %v11252_v59 = vsel %vm1195_vm10, 1.0, %v14403_v18  ;;  %v2193_v27 = vsub.f32 %v15033_v5, %v11140_v16  ;;  %v15038_v12 = vld [vmem:[#allocation83_spill] sm:$0xff] }
 0x380   : > { %15032 = vst [vmem:[#allocation89_spill] sm:$0xff] %v11252_v59  ;;  %v1977_v4 = vmul.f32 %v15034_v9, %v1762_v51  ;;  %v1978_v46 = vmul.f32 %v15035_v61, %v1763_v29  ;;  %v2407_v6 = vmul.f32 %v15036_v31, %v2192_v35  ;;  %v3083_v13 = vsub.f32 %v11140_v16, %v15037_v53  ;;  %v15039_v61 = vld [vmem:[#allocation91_spill] sm:$0xff]  ;;  %v15041_v53 = vld [vmem:[#allocation98_spill] sm:$0xff] }
 0x381   : > { %v4912_v21 = vmul.f32 %v4442_v33, %v11247_v22  ;;  %v5040_v28 = vmul.f32 %v4784_v32, %v11249_v39  ;;  %v2408_v36 = vmul.f32 %v15038_v12, %v2193_v27  ;;  %v3084_v2 = vsub.f32 %v11140_v16, %v14952_v7  ;;  %v15040_v32 = vld [vmem:[#allocation93_spill] sm:$0xff] }
 0x382   : > { %v2567_v54 = vmul.f32 %v6440_v30, %v1977_v4  ;;  %v2568_v5 = vmul.f32 %v6441_v63, %v1978_v46  ;;  %v2727_v34 = vmul.f32 %v6441_v63, %v2407_v6  ;;  %v3278_v51 = vmul.f32 %v14994_v17, %v3083_v13  ;;  %v15043_v4 = vld [vmem:[#allocation102_spill] sm:$0xff]  ;;  %v15045_v46 = vld [vmem:[#allocation96_spill] sm:$0xff] }
 0x383   : > { %v5168_v29 = vadd.f32 %v5040_v28, %v4912_v21  ;;  %v2728_v35 = vmul.f32 %v11252_v59, %v2408_v36  ;;  %v3279_v31 = vmul.f32 %v14996_v58, %v3084_v2  ;;  %v3473_v33 = vsub.f32 %v15039_v61, %v11140_v16  ;;  %v15044_v2 = vld [vmem:[#allocation107_spill] sm:$0xff]  ;;  %v15046_v21 = vld [vmem:[#allocation100_spill] sm:$0xff] }
 0x384   : > { %v2887_v9 = vadd.f32 %v2727_v34, %v2567_v54  ;;  %v3474_v27 = vsub.f32 %v15040_v32, %v11140_v16  ;;  %v3812_v12 = vmul.f32 %v3278_v51, %v2886_v57  ;;  %v4273_v30 = vsub.f32 %v11140_v16, %v15041_v53  ;;  %v15047_v28 = vld [vmem:[#allocation108_spill] sm:$0xff] }
 0x385   : > { %5445 = vmatprep.mubr.f32.mxu0 %v5168_v29  ;;  %v11275_v6 = vadd.f32 %v2728_v35, %v2568_v5  ;;  %v3668_v13 = vmul.f32 %v14955_v26, %v3473_v33  ;;  %v4615_v63 = vsub.f32 %v15043_v4, %v11140_v16  ;;  %vm778_vm11 = vcmp.ge.f32.partialorder %v11140_v16, %v15044_v2  ;;  %v15048_v5 = vld [vmem:[#allocation104_spill] sm:$0xff]  ;;  %v15049_v29 = vld [vmem:[#allocation109_spill] sm:$0xff]  ;;  %v15050_v33 = vld [vmem:[#allocation46_spill] sm:$0xff] }
 0x386   : > { %v3669_v34 = vmul.f32 %v15045_v46, %v3474_v27  ;;  %v3813_v54 = vmul.f32 %v3279_v31, %v2887_v9  ;;  %v4444_v57 = vmul.f32 %v15046_v21, %v4273_v30  ;;  %vm1013_vm12 = vcmp.lt.f32.partialorder %v11140_v16, %v15047_v28  ;;  %v15051_v30 = vld [vmem:[#allocation111_spill] sm:$0xff]  ;;  %v15055_v2 = vld [vmem:[#allocation116_spill] sm:$0xff] }
 0x387   : > { %15042 = vst [vmem:[#allocation117_spill] sm:$0xff] %v11275_v6  ;;  %v3956_v36 = vmul.f32 %v3668_v13, %v2887_v9  ;;  %v4786_v51 = vmul.f32 %v15048_v5, %v4615_v63  ;;  %vm1189_vm13 = vmand %vm778_vm11, %vm1013_vm12  ;;  %v1758_v35 = vsub.f32 %v11140_v16, %v15049_v29  ;;  %v2188_v59 = vsub.f32 %v15050_v33, %v11140_v16  ;;  %v15052_v9 = vld [vmem:[#allocation113_spill] sm:$0xff]  ;;  %v15053_v5 = vld [vmem:[#allocation110_spill] sm:$0xff] }
 0x388   : > { %v3957_v31 = vmul.f32 %v3669_v34, %v11275_v6  ;;  %v6436_v27 = vsel %vm1189_vm13, 1.0, %v14403_v18  ;;  %v3080_v28 = vsub.f32 %v11140_v16, %v15051_v30  ;;  %v3470_v13 = vsub.f32 %v15052_v9, %v11140_v16  ;;  %v15054_v29 = vld [vmem:[#allocation50_spill] sm:$0xff]  ;;  %v5277_v4 = vld [vmem:[%s8239_s30 + $0x2f0] sm:$0xff]  ;;  %v15057_v6 = vld [vmem:[#allocation112_spill] sm:$0xff] }
 0x389   : > { %v4100_v63 = vadd.f32 %v3956_v36, %v3812_v12  ;;  %v1973_v21 = vmul.f32 %v15053_v5, %v1758_v35  ;;  %v2403_v46 = vmul.f32 %v15054_v29, %v2188_v59  ;;  %v4270_v33 = vsub.f32 %v11140_v16, %v15055_v2  ;;  %v5278_v36 = vld [vmem:[%s8239_s30 + $0x2f8] sm:$0xff]  ;;  %v5309_v35 = vld [vmem:[%s8239_s30 + $0x3f0] sm:$0xff] }
 0x38a   : > { %v11302_v34 = vadd.f32 %v3957_v31, %v3813_v54  ;;  %v3275_v53 = vmul.f32 %v15057_v6, %v3080_v28  ;;  %v3665_v30 = vmul.f32 %v15014_v19, %v3470_v13  ;;  %v4612_v12 = vsub.f32 %v15015_v3, %v11140_v16  ;;  %v5310_v9 = vld [vmem:[%s8239_s30 + $0x3f8] sm:$0xff]  ;;  %v5261_v31 = vld [vmem:[%s8239_s30 + $0x270] sm:$0xff] }
 0x38b   : > { %v4914_v5 = vmul.f32 %v4444_v57, %v4100_v63  ;;  %v2563_v59 = vmul.f32 %v6436_v27, %v1973_v21  ;;  %v2723_v2 = vmul.f32 %v11183_v11, %v2403_v46  ;;  %v4441_v54 = vmul.f32 %v15016_v38, %v4270_v33  ;;  %v5262_v29 = vld [vmem:[%s8239_s30 + $0x278] sm:$0xff]  ;;  %v5293_v6 = vld [vmem:[%s8239_s30 + $0x370] sm:$0xff] }
 0x38c   : > { %15056 = vst [vmem:[#allocation56_spill] sm:$0xff] %v11302_v34  ;;  %v5042_v28 = vmul.f32 %v4786_v51, %v11302_v34  ;;  %v3953_v13 = vmul.f32 %v3665_v30, %v11221_v40  ;;  %v4783_v19 = vmul.f32 %v8933_v41, %v4612_v12  ;;  %v4272_v3 = vsub.f32 %v11140_v16, %v15017_v8  ;;  %v5294_v26 = vld [vmem:[%s8239_s30 + $0x378] sm:$0xff]  ;;  %v11325_v33 = vld [vmem:[%s8213_s17 + $0x78] sm:$0xff]  ;;  %s7557_s30 = sshll.u32 %s7730_s26, 4  ;;  %s7558_s30 = int_to_ptr.vmem [resolvable:$false] %s7557_s30 }
 0x38d   : > { %v2883_v57 = vadd.f32 %v2723_v2, %v2563_v59  ;;  %v4614_v21 = vsub.f32 %v8955_v24, %v11140_v16  ;;  %v6966_v11 = vpack.c.bf16 %v5278_v36, %v5277_v4  ;;  %v6998_v46 = vpack.c.bf16 %v5310_v9, %v5309_v35  ;;  %v15062_v36 = vld [vmem:[#allocation59_spill] sm:$0xff]  ;;  %s7559_s3 = scalar_lea.vmem %s7558_s30, 4096  ;;  %p7560_p5 = scmp.lt.s32.totalorder %s13721_s5, %s7558_s30 }
 0x38e   : > { %v5170_v27 = vadd.f32 %v5042_v28, %v4914_v5  ;;  %v5039_v51 = vmul.f32 %v4783_v19, %v11247_v22  ;;  %v4443_v40 = vmul.f32 %v8951_v23, %v4272_v3  ;;  %v6968_v30 = vpack.c.bf16 %v5262_v29, %v5261_v31  ;;  %v15059_v29 = vld [vmem:[#allocation54_spill] sm:$0xff] }
 0x38f   : > { %v3809_v12 = vmul.f32 %v3275_v53, %v2883_v57  ;;  %v4785_v34 = vmul.f32 %v8959_v25, %v4614_v21  ;;  %6967 = vmatprep.subr.bf16.mxu0 %v6966_v11  ;;  %6999 = vmatprep.subr.bf16.mxu1 %v6998_v46  ;;  %v7000_v8 = vpack.c.bf16 %v5294_v26, %v5293_v6  ;;  %v15058_v6 = vld [vmem:[#allocation53_spill] sm:$0xff]  ;;  %v15063_v31 = vld [vmem:[#allocation62_spill] sm:$0xff]  ;;  %v15065_v11 = vld [vmem:[#allocation60_spill] sm:$0xff] }
 0x390   : > { %5590 = vmatprep.mubr.f32.mxu1 %v5170_v27  ;;  %v4913_v2 = vmul.f32 %v4443_v40, %v11249_v39  ;;  %6969 = vmatpush3.bf16.msra.mxu0 %v6968_v30  ;;  %vm790_vm14 = vcmp.ge.f32.partialorder %v11325_v33, %v8380_v43  ;;  %vm791_vm15 = vcmp.ge.f32.partialorder %v11325_v33, %v8384_v44  ;;  %v15064_v57 = vld [vmem:[#allocation57_spill] sm:$0xff] }
 0x391   : > { %v4097_v16 = vadd.f32 %v3953_v13, %v3809_v12  ;;  %v5041_v19 = vmul.f32 %v4785_v34, %v4100_v63  ;;  %7001 = vmatpush3.bf16.msra.mxu1 %v7000_v8  ;;  %vm792_vm0 = vcmp.ge.f32.partialorder %v11325_v33, %v8388_v45  ;;  %vm793_vm1 = vcmp.ge.f32.partialorder %v11325_v33, %v8394_v47  ;;  %v15060_v63 = vld [vmem:[#allocation55_spill] sm:$0xff]  ;;  %v15066_v27 = vld [vmem:[#allocation61_spill] sm:$0xff] }
 0x392   : > { %vm1025_vm2 = vcmp.lt.f32.partialorder %v11325_v33, %v8398_v48  ;;  %vm1026_vm3 = vcmp.lt.f32.partialorder %v11325_v33, %v8402_v49  ;;  %vm1027_vm4 = vcmp.lt.f32.partialorder %v11325_v33, %v8406_v50  ;;  %vm1028_vm5 = vcmp.lt.f32.partialorder %v11325_v33, %v8418_v52  ;;  %v15067_v12 = vld [vmem:[#allocation63_spill] sm:$0xff] }
 0x393   : > { %v4911_v43 = vmul.f32 %v4441_v54, %v4097_v16  ;;  %v5169_v26 = vadd.f32 %v5041_v19, %v4913_v2  ;;  %vm1201_vm6 = vmand %vm790_vm14, %vm1025_vm2  ;;  %v1769_v8 = vsub.f32 %v11325_v33, %v8437_v55  ;;  %v1770_v3 = vsub.f32 %v11325_v33, %v8441_v56  ;;  %v15068_v16 = vld [vmem:[#allocation64_spill] sm:$0xff] }
 0x394   : > { %vm1202_vm7 = vmand %vm791_vm15, %vm1026_vm3  ;;  %v11355_v48 = vsel %vm1201_vm6, 1.0, %v14403_v18  ;;  %v1771_v49 = vsub.f32 %v11325_v33, %v8451_v60  ;;  %v2199_v50 = vsub.f32 %v14533_v15, %v11325_v33  ;;  %v2200_v22 = vsub.f32 %v14620_v14, %v11325_v33 }
 0x395   : > { %v5167_v55 = vadd.f32 %v5039_v51, %v4911_v43  ;;  %5591 = vmatmul.mubr.f32.gmra.mrb[28].mxu1 %v5169_v26  ;;  %vm1203_vm8 = vmand %vm792_vm0, %vm1027_vm4  ;;  %v6449_v44 = vsel %vm1202_vm7, 1.0, %v14403_v18  ;;  %v1984_v56 = vmul.f32 %v14535_v62, %v1769_v8  ;;  %v1985_v53 = vmul.f32 %v14621_v20, %v1770_v3  ;;  %v15069_v26 = vld [vmem:[#allocation66_spill] sm:$0xff]  ;;  %v15070_v8 = vld [vmem:[#allocation67_spill] sm:$0xff] }
 0x396   : > { %vm1204_vm9 = vmand %vm793_vm1, %vm1028_vm5  ;;  %v6450_v60 = vsel %vm1203_vm8, 1.0, %v14403_v18  ;;  %v1986_v15 = vmul.f32 %v14622_v37, %v1771_v49  ;;  %v2201_v45 = vsub.f32 %v14708_v1, %v11325_v33  ;;  %v2414_v14 = vmul.f32 %v14970_v10, %v2199_v50  ;;  %v15061_v10 = vld [vmem:[#allocation58_spill] sm:$0xff]  ;;  %v15071_v49 = vld [vmem:[#allocation65_spill] sm:$0xff] }
 0x397   : > { %5446 = vmatmul.mubr.f32.gmra.mrb[28].mxu0 %v5167_v55  ;;  %v6451_v62 = vsel %vm1204_vm9, 1.0, %v14403_v18  ;;  %v2415_v20 = vmul.f32 %v14971_v42, %v2200_v22  ;;  %v2574_v52 = vmul.f32 %v11355_v48, %v1984_v56  ;;  %v2575_v39 = vmul.f32 %v6449_v44, %v1985_v53  ;;  %v15072_v22 = vld [vmem:[#allocation69_spill] sm:$0xff]  ;;  %v15073_v55 = vld [vmem:[#allocation70_spill] sm:$0xff]  ;;  %v15074_v56 = vld [vmem:[#allocation72_spill] sm:$0xff] }
 0x398   : > { %v2416_v47 = vmul.f32 %v15058_v6, %v2201_v45  ;;  %v2576_v4 = vmul.f32 %v6450_v60, %v1986_v15  ;;  %v2734_v5 = vmul.f32 %v6449_v44, %v2414_v14  ;;  %v3090_v37 = vsub.f32 %v11325_v33, %v15059_v29  ;;  %v15076_v45 = vld [vmem:[#allocation79_spill] sm:$0xff] }
 0x399   : > { %v2735_v9 = vmul.f32 %v6450_v60, %v2415_v20  ;;  %v3091_v1 = vsub.f32 %v11325_v33, %v15060_v63  ;;  %v3480_v34 = vsub.f32 %v15061_v10, %v11325_v33  ;;  %v3481_v42 = vsub.f32 %v15062_v36, %v11325_v33  ;;  %v15075_v60 = vld [vmem:[#allocation73_spill] sm:$0xff]  ;;  %v15081_v63 = vld [vmem:[#allocation76_spill] sm:$0xff] }
 0x39a   : > { %v2736_v35 = vmul.f32 %v6451_v62, %v2416_v47  ;;  %v11392_v59 = vadd.f32 %v2734_v5, %v2574_v52  ;;  %v3285_v54 = vmul.f32 %v15022_v0, %v3090_v37  ;;  %v4279_v28 = vsub.f32 %v11325_v33, %v15063_v31  ;;  %v15078_v47 = vld [vmem:[#allocation85_spill] sm:$0xff]  ;;  %v15080_v37 = vld [vmem:[#allocation75_spill] sm:$0xff] }
 0x39b   : > { %v2895_v13 = vadd.f32 %v2735_v9, %v2575_v39  ;;  %v3286_v21 = vmul.f32 %v15064_v57, %v3091_v1  ;;  %v3675_v46 = vmul.f32 %v15065_v11, %v3480_v34  ;;  %v3676_v51 = vmul.f32 %v15066_v27, %v3481_v42  ;;  %v15077_v39 = vld [vmem:[#allocation80_spill] sm:$0xff]  ;;  %v15082_v34 = vld [vmem:[#allocation82_spill] sm:$0xff]  ;;  %v15083_v42 = vld [vmem:[#allocation83_spill] sm:$0xff] }
 0x39c   : > { %v2896_v40 = vadd.f32 %v2736_v35, %v2576_v4  ;;  %v3819_v30 = vmul.f32 %v3285_v54, %v11392_v59  ;;  %v4450_v2 = vmul.f32 %v15067_v12, %v4279_v28  ;;  %v4621_v19 = vsub.f32 %v15068_v16, %v11325_v33 }
 0x39d   : > { %v3820_v43 = vmul.f32 %v3286_v21, %v2895_v13  ;;  %v3963_v0 = vmul.f32 %v3675_v46, %v2895_v13  ;;  %vm794_vm10 = vcmp.ge.f32.partialorder %v11325_v33, %v15069_v26  ;;  %vm795_vm11 = vcmp.ge.f32.partialorder %v11325_v33, %v15070_v8  ;;  %v15090_v26 = vld [vmem:[#allocation100_spill] sm:$0xff] }
 0x39e   : > { %v3964_v3 = vmul.f32 %v3676_v51, %v2896_v40  ;;  %v4792_v50 = vmul.f32 %v15071_v49, %v4621_v19  ;;  %vm1029_vm12 = vcmp.lt.f32.partialorder %v11325_v33, %v15072_v22  ;;  %vm1030_vm13 = vcmp.lt.f32.partialorder %v11325_v33, %v15073_v55  ;;  %v15091_v8 = vld [vmem:[#allocation108_spill] sm:$0xff] }
 0x39f   : > { %v11413_v44 = vadd.f32 %v3963_v0, %v3819_v30  ;;  %vm1205_vm14 = vmand %vm794_vm10, %vm1029_vm12  ;;  %v1772_v53 = vsub.f32 %v11325_v33, %v15074_v56  ;;  %v1773_v15 = vsub.f32 %v11325_v33, %v15075_v60  ;;  %v2202_v14 = vsub.f32 %v15076_v45, %v11325_v33  ;;  %v15084_v30 = vld [vmem:[#allocation95_spill] sm:$0xff]  ;;  %v15093_v22 = vld [vmem:[#allocation104_spill] sm:$0xff] }
 0x3a0   : > { %v11421_v20 = vadd.f32 %v3964_v3, %v3820_v43  ;;  %vm1206_vm15 = vmand %vm795_vm11, %vm1030_vm13  ;;  %v6452_v52 = vsel %vm1205_vm14, 1.0, %v14403_v18  ;;  %v2203_v6 = vsub.f32 %v15077_v39, %v11325_v33  ;;  %v3092_v4 = vsub.f32 %v11325_v33, %v15078_v47  ;;  %v15088_v43 = vld [vmem:[#allocation107_spill] sm:$0xff]  ;;  %v15094_v56 = vld [vmem:[#allocation46_spill] sm:$0xff] }
 0x3a1   : > { %v4920_v5 = vmul.f32 %v4450_v2, %v11413_v44  ;;  %v11430_v29 = vsel %vm1206_vm15, 1.0, %v14403_v18  ;;  %v1987_v9 = vmul.f32 %v15080_v37, %v1772_v53  ;;  %v1988_v1 = vmul.f32 %v15081_v63, %v1773_v15  ;;  %v15095_v45 = vld [vmem:[#allocation110_spill] sm:$0xff] }
 0x3a2   : > { %15079 = vst [vmem:[#allocation91_spill] sm:$0xff] %v11430_v29  ;;  %v5048_v10 = vmul.f32 %v4792_v50, %v11421_v20  ;;  %v2417_v36 = vmul.f32 %v15082_v34, %v2202_v14  ;;  %v2418_v35 = vmul.f32 %v15083_v42, %v2203_v6  ;;  %v3093_v54 = vsub.f32 %v11325_v33, %v14952_v7  ;;  %v15085_v7 = vld [vmem:[#allocation98_spill] sm:$0xff]  ;;  %v15101_v34 = vld [vmem:[#allocation112_spill] sm:$0xff] }
 0x3a3   : > { %v2577_v31 = vmul.f32 %v6451_v62, %v1987_v9  ;;  %v2578_v28 = vmul.f32 %v6452_v52, %v1988_v1  ;;  %v3287_v13 = vmul.f32 %v14994_v17, %v3092_v4  ;;  %v3482_v57 = vsub.f32 %v15039_v61, %v11325_v33  ;;  %v15087_v61 = vld [vmem:[#allocation102_spill] sm:$0xff]  ;;  %v15099_v9 = vld [vmem:[#allocation116_spill] sm:$0xff] }
 0x3a4   : > { %v5176_v21 = vadd.f32 %v5048_v10, %v4920_v5  ;;  %v2737_v11 = vmul.f32 %v6452_v52, %v2417_v36  ;;  %v2738_v46 = vmul.f32 %v11430_v29, %v2418_v35  ;;  %v3288_v27 = vmul.f32 %v14996_v58, %v3093_v54  ;;  %v15089_v58 = vld [vmem:[#allocation96_spill] sm:$0xff]  ;;  %v15096_v52 = vld [vmem:[#allocation111_spill] sm:$0xff]  ;;  %v15097_v47 = vld [vmem:[#allocation50_spill] sm:$0xff] }
 0x3a5   : > { %v3483_v51 = vsub.f32 %v15040_v32, %v11325_v33  ;;  %v3677_v12 = vmul.f32 %v15084_v30, %v3482_v57  ;;  %v3821_v2 = vmul.f32 %v3287_v13, %v2896_v40  ;;  %v4281_v62 = vsub.f32 %v11325_v33, %v15085_v7  ;;  %v15092_v40 = vld [vmem:[#allocation109_spill] sm:$0xff]  ;;  %v15102_v42 = vld [vmem:[#allocation118_spill] sm:$0xff] }
 0x3a6   : > { %5450 = vmatprep.mubr.f32.mxu0 %v5176_v21  ;;  %v2897_v17 = vadd.f32 %v2737_v11, %v2577_v31  ;;  %v11449_v16 = vadd.f32 %v2738_v46, %v2578_v28  ;;  %v4623_v19 = vsub.f32 %v15087_v61, %v11325_v33  ;;  %vm789_vm0 = vcmp.ge.f32.partialorder %v11325_v33, %v15088_v43  ;;  %v15098_v5 = vld [vmem:[#allocation113_spill] sm:$0xff]  ;;  %v11481_v31 = vld [vmem:[#allocation7 + $0x8] sm:$0x7] }
 0x3a7   : > { %v3678_v0 = vmul.f32 %v15089_v58, %v3483_v51  ;;  %v4452_v32 = vmul.f32 %v15090_v26, %v4281_v62  ;;  %vm1024_vm1 = vcmp.lt.f32.partialorder %v11325_v33, %v15091_v8  ;;  %v1768_v3 = vsub.f32 %v11325_v33, %v15092_v40  ;;  %v11479_v54 = vld [vmem:[#allocation5 + $0x8] sm:$0x7]  ;;  %v15103_v57 = vld [vmem:[#allocation114_spill] sm:$0xff]  ;;  %v15104_v51 = vld [vmem:[#allocation119_spill] sm:$0xff] }
 0x3a8   : > { %15086 = vst [vmem:[#allocation93_spill] sm:$0xff] %v11449_v16  ;;  %v3822_v49 = vmul.f32 %v3288_v27, %v2897_v17  ;;  %v3965_v50 = vmul.f32 %v3677_v12, %v2897_v17  ;;  %v4794_v55 = vmul.f32 %v15093_v22, %v4623_v19  ;;  %vm1200_vm2 = vmand %vm789_vm0, %vm1024_vm1  ;;  %v2198_v53 = vsub.f32 %v15094_v56, %v11325_v33  ;;  %v15105_v62 = vld [vmem:[#allocation37_spill] sm:$0xff] }
 0x3a9   : > { %v3966_v60 = vmul.f32 %v3678_v0, %v11449_v16  ;;  %v6447_v15 = vsel %vm1200_vm2, 1.0, %v14403_v18  ;;  %v1983_v14 = vmul.f32 %v15095_v45, %v1768_v3  ;;  %v3089_v39 = vsub.f32 %v11325_v33, %v15096_v52  ;;  %v7257_v26 = vld [vmem:[#allocation11] ss:$4 sm:$0xff]  ;;  %v11544_v52 = vld [vmem:[#allocation11 + $0x1] ss:$4 sm:$0xff] }
 0x3aa   : > { %v4109_v6 = vadd.f32 %v3965_v50, %v3821_v2  ;;  %v2413_v4 = vmul.f32 %v15097_v47, %v2198_v53  ;;  %v3479_v37 = vsub.f32 %v15098_v5, %v11325_v33  ;;  %v4278_v63 = vsub.f32 %v11325_v33, %v15099_v9  ;;  %v15113_v56 = vld [vmem:[#allocation41_spill] sm:$0xff]  ;;  %v15118_v9 = vld [vmem:[#allocation40_spill] sm:$0xff] }
 0x3ab   : > { %v11474_v1 = vadd.f32 %v3966_v60, %v3822_v49  ;;  %v2573_v10 = vmul.f32 %v6447_v15, %v1983_v14  ;;  %v3284_v36 = vmul.f32 %v15101_v34, %v3089_v39  ;;  %v4620_v35 = vsub.f32 %v15102_v42, %v11325_v33  ;;  %v7258_v49 = vld [vmem:[#allocation13] ss:$4 sm:$0xff]  ;;  %v11537_v60 = vld [vmem:[#allocation10 + $0x1] ss:$4 sm:$0xff] }
 0x3ac   : > { %v4922_v28 = vmul.f32 %v4452_v32, %v4109_v6  ;;  %v2733_v13 = vmul.f32 %v11355_v48, %v2413_v4  ;;  %v3674_v21 = vmul.f32 %v15103_v57, %v3479_v37  ;;  %v4449_v11 = vmul.f32 %v15016_v38, %v4278_v63  ;;  %v11559_v37 = vld [vmem:[#allocation8 + $0x2] ss:$4 sm:$0xff] }
 0x3ad   : > { %15100 = vst [vmem:[#allocation53_spill] sm:$0xff] %v11474_v1  ;;  %v5050_v46 = vmul.f32 %v4794_v55, %v11474_v1  ;;  %v4791_v27 = vmul.f32 %v8933_v41, %v4620_v35  ;;  %v4280_v30 = vsub.f32 %v11325_v33, %v15104_v51  ;;  %v4622_v12 = vsub.f32 %v8955_v24, %v11325_v33  ;;  %v11505_v24 = vld [vmem:[%s8213_s17] sm:$0xff]  ;;  %v11752_v29 = vld [vmem:[%s8213_s17 + $0x8] sm:$0xff] }
 0x3ae   : > { %v2893_v2 = vadd.f32 %v2733_v13, %v2573_v10  ;;  %v3962_v7 = vmul.f32 %v3674_v21, %v11392_v59  ;;  %v11495_v48 = vrot.slane %v11479_v54, %v15105_v62  ;;  %v11499_v38 = vrot.slane %v11481_v31, %v15105_v62  ;;  %v7255_v33 = vld [vmem:[#allocation8] ss:$4 sm:$0xff]  ;;  %v11531_v55 = vld [vmem:[#allocation8 + $0x1] ss:$4 sm:$0xff] }
 0x3af   : > { %v5178_v17 = vadd.f32 %v5050_v46, %v4922_v28  ;;  %v5047_v41 = vmul.f32 %v4791_v27, %v11413_v44  ;;  %v4451_v61 = vmul.f32 %v8951_v23, %v4280_v30  ;;  %v4793_v19 = vmul.f32 %v8959_v25, %v4622_v12  ;;  %v15108_v59 = vld [vmem:[#allocation42_spill] sm:$0xff] }
 0x3b0   : > { %15106 = vst [vmem:[#allocation54_spill] sm:$0xff] %v11495_v48  ;;  %15107 = vst [vmem:[#allocation55_spill] sm:$0xff] %v11499_v38  ;;  %v3818_v43 = vmul.f32 %v3284_v36, %v2893_v2  ;;  %vm632_vm3 = vcmp.ge.f32.partialorder %v11505_v24, %v11495_v48  ;;  %vm867_vm4 = vcmp.lt.f32.partialorder %v11505_v24, %v11499_v38  ;;  %v7256_v23 = vld [vmem:[#allocation10] ss:$4 sm:$0xff]  ;;  %v11572_v28 = vld [vmem:[#allocation10 + $0x2] ss:$4 sm:$0xff] }
 0x3b1   : > { %v11512_v58 = vrot.slane %v7255_v33, %v15108_v59  ;;  %5595 = vmatprep.mubr.f32.mxu1 %v5178_v17  ;;  %v4921_v44 = vmul.f32 %v4451_v61, %v11421_v20  ;;  %v5049_v0 = vmul.f32 %v4793_v19, %v4109_v6  ;;  %vm1043_vm5 = vmand %vm632_vm3, %vm867_vm4  ;;  %v11516_v25 = vrot.slane %v7256_v23, %v15108_v59  ;;  %v11550_v6 = vld [vmem:[#allocation13 + $0x1] ss:$4 sm:$0xff]  ;;  %v11589_v30 = vld [vmem:[#allocation11 + $0x2] ss:$4 sm:$0xff] }
 0x3b2   : > { %v11519_v32 = vrot.slane %v7257_v26, %v15108_v59  ;;  %v4106_v8 = vadd.f32 %v3962_v7, %v3818_v43  ;;  %v11522_v40 = vsel %vm1043_vm5, 1.0, %v14403_v18  ;;  %v11527_v20 = vrot.slane %v7258_v49, %v15108_v59  ;;  %v15121_v36 = vld [vmem:[#allocation78_spill] sm:$0xff]  ;;  %v15129_v26 = vld [vmem:[#allocation39_spill] sm:$0xff]  ;;  %v1780_v49 = vld [vmem:[#allocation10 + $0x20] ss:$4 sm:$0x3] }
 0x3b3   : > { %15109 = vst [vmem:[#allocation58_spill] sm:$0xff] %v11512_v58  ;;  %15110 = vst [vmem:[#allocation59_spill] sm:$0xff] %v11516_v25  ;;  %v1625_v3 = vsub.f32 %v11505_v24, %v11512_v58  ;;  %v5177_v50 = vadd.f32 %v5049_v0, %v4921_v44  ;;  %v11535_v53 = vrot.slane %v11531_v55, %v15113_v56  ;;  %v11595_v2 = vld [vmem:[#allocation13 + $0x2] ss:$4 sm:$0xff] }
 0x3b4   : > { %15111 = vst [vmem:[#allocation62_spill] sm:$0xff] %v11519_v32  ;;  %15112 = vst [vmem:[#allocation57_spill] sm:$0xff] %v11527_v20  ;;  %v2055_v22 = vsub.f32 %v11519_v32, %v11505_v24  ;;  %v11541_v15 = vrot.slane %v11537_v60, %v15113_v56  ;;  %v4919_v45 = vmul.f32 %v4449_v11, %v4106_v8  ;;  %v15127_v43 = vld [vmem:[#allocation38_spill] sm:$0xff]  ;;  %v1565_v44 = vld [vmem:[#allocation8 + $0x20] ss:$4 sm:$0x3] }
 0x3b5   : > { %15114 = vst [vmem:[#allocation60_spill] sm:$0xff] %v11535_v53  ;;  %v1840_v14 = vmul.f32 %v11516_v25, %v1625_v3  ;;  %v11548_v39 = vrot.slane %v11544_v52, %v15113_v56  ;;  %v11554_v47 = vrot.slane %v11550_v6, %v15113_v56  ;;  %5596 = vmatmul.mubr.f32.gmra.mrb[30].mxu1 %v5177_v50 }
 0x3b6   : > { %15115 = vst [vmem:[#allocation61_spill] sm:$0xff] %v11541_v15  ;;  %v2270_v4 = vmul.f32 %v11527_v20, %v2055_v22  ;;  %v2960_v5 = vsub.f32 %v11505_v24, %v11535_v53  ;;  %v11563_v63 = vrot.slane %v11559_v37, %v15118_v9  ;;  %v11567_v10 = vrot.slane %v11559_v37, %v15113_v56  ;;  %v15132_v22 = vld [vmem:[#allocation105_spill] sm:$0xff] }
 0x3b7   : > { %15116 = vst [vmem:[#allocation63_spill] sm:$0xff] %v11548_v39  ;;  %15117 = vst [vmem:[#allocation64_spill] sm:$0xff] %v11554_v47  ;;  %v5175_v34 = vadd.f32 %v5047_v41, %v4919_v45  ;;  %v2430_v42 = vmul.f32 %v15121_v36, %v1840_v14  ;;  %v3350_v35 = vsub.f32 %v11548_v39, %v11505_v24  ;;  %v15126_v41 = vld [vmem:[#allocation92_spill] sm:$0xff] }
 0x3b8   : > { %15119 = vst [vmem:[#allocation66_spill] sm:$0xff] %v11563_v63  ;;  %15120 = vst [vmem:[#allocation67_spill] sm:$0xff] %v11567_v10  ;;  %v11576_v13 = vrot.slane %v11572_v28, %v15118_v9  ;;  %v2590_v57 = vmul.f32 %v11522_v40, %v2270_v4  ;;  %v3155_v21 = vmul.f32 %v11541_v15, %v2960_v5  ;;  %v1995_v4 = vld [vmem:[#allocation11 + $0x20] ss:$4 sm:$0x3] }
 0x3b9   : > { %v4163_v11 = vsub.f32 %v11505_v24, %v11563_v63  ;;  %v4164_v46 = vsub.f32 %v11505_v24, %v11567_v10  ;;  %5451 = vmatmul.mubr.f32.gmra.mrb[30].mxu0 %v5175_v34  ;;  %v3545_v27 = vmul.f32 %v11554_v47, %v3350_v35  ;;  %v11587_v51 = vrot.slane %v11572_v28, %v15113_v56  ;;  %v2210_v36 = vld [vmem:[#allocation13 + $0x20] ss:$4 sm:$0x3] }
 0x3ba   : > { %15122 = vst [vmem:[#allocation65_spill] sm:$0xff] %v11576_v13  ;;  %v11593_v12 = vrot.slane %v11589_v30, %v15118_v9  ;;  %v11599_v7 = vrot.slane %v11595_v2, %v15118_v9  ;;  %v11601_v17 = vadd.f32 %v2590_v57, %v2430_v42  ;;  %v3689_v61 = vmul.f32 %v3155_v21, %v15126_v41 }
 0x3bb   : > { %15123 = vst [vmem:[#allocation69_spill] sm:$0xff] %v11587_v51  ;;  %v4334_v19 = vmul.f32 %v11576_v13, %v4163_v11  ;;  %v11607_v33 = vrot.slane %v11479_v54, %v15127_v43  ;;  %v4335_v0 = vmul.f32 %v11587_v51, %v4164_v46  ;;  %v11614_v8 = vrot.slane %v11479_v54, %v15129_v26  ;;  %v15155_v51 = vld [vmem:[#allocation68_spill] sm:$0xff] }
 0x3bc   : > { %15124 = vst [vmem:[#allocation70_spill] sm:$0xff] %v11593_v12  ;;  %15125 = vst [vmem:[#allocation72_spill] sm:$0xff] %v11599_v7  ;;  %v4505_v23 = vsub.f32 %v11593_v12, %v11505_v24  ;;  %v11618_v3 = vrot.slane %v11481_v31, %v15127_v43  ;;  %v3833_v50 = vmul.f32 %v3545_v27, %v11601_v17 }
 0x3bd   : > { %15128 = vst [vmem:[#allocation73_spill] sm:$0xff] %v11607_v33  ;;  %15130 = vst [vmem:[#allocation79_spill] sm:$0xff] %v11614_v8  ;;  %v4804_v45 = vmul.f32 %v4334_v19, %v15132_v22  ;;  %vm633_vm6 = vcmp.ge.f32.partialorder %v11505_v24, %v11607_v33  ;;  %v11626_v14 = vrot.slane %v11481_v31, %v15129_v26 }
 0x3be   : > { %15131 = vst [vmem:[#allocation80_spill] sm:$0xff] %v11618_v3  ;;  %v4676_v54 = vmul.f32 %v11599_v7, %v4505_v23  ;;  %vm634_vm7 = vcmp.ge.f32.partialorder %v11505_v24, %v11614_v8  ;;  %vm868_vm8 = vcmp.lt.f32.partialorder %v11505_v24, %v11618_v3  ;;  %v11634_v5 = vrot.slane %v1565_v44, %v15105_v62 }
 0x3bf   : > { %15133 = vst [vmem:[#allocation85_spill] sm:$0xff] %v11626_v14  ;;  %v3977_v9 = vadd.f32 %v3833_v50, %v3689_v61  ;;  %vm869_vm9 = vcmp.lt.f32.partialorder %v11505_v24, %v11626_v14  ;;  %vm1044_vm10 = vmand %vm633_vm6, %vm868_vm8  ;;  %v11639_v31 = vrot.slane %v1565_v44, %v15127_v43  ;;  %v11642_v34 = vrot.slane %v1780_v49, %v15105_v62  ;;  %v2906_v61 = vld [vmem:[#allocation8 + $0x21] ss:$4 sm:$0x1] }
 0x3c0   : > { %15134 = vst [vmem:[#allocation75_spill] sm:$0xff] %v11634_v5  ;;  %vm1045_vm11 = vmand %vm634_vm7, %vm869_vm9  ;;  %v6291_v42 = vsel %vm1044_vm10, 1.0, %v14403_v18  ;;  %v1626_v35 = vsub.f32 %v11505_v24, %v11634_v5  ;;  %v11648_v57 = vrot.slane %v1780_v49, %v15127_v43  ;;  %v11651_v21 = vrot.slane %v1995_v4, %v15105_v62 }
 0x3c1   : > { %15135 = vst [vmem:[#allocation76_spill] sm:$0xff] %v11639_v31  ;;  %15136 = vst [vmem:[#allocation82_spill] sm:$0xff] %v11642_v34  ;;  %v11653_v11 = vmul.f32 %v4335_v0, %v3977_v9  ;;  %v4932_v46 = vmul.f32 %v4676_v54, %v3977_v9  ;;  %v6292_v27 = vsel %vm1045_vm11, 1.0, %v14403_v18  ;;  %v1627_v41 = vsub.f32 %v11505_v24, %v11639_v31  ;;  %v3101_v0 = vld [vmem:[#allocation10 + $0x21] ss:$4 sm:$0x1] }
 0x3c2   : > { %15137 = vst [vmem:[#allocation83_spill] sm:$0xff] %v11648_v57  ;;  %15138 = vst [vmem:[#allocation95_spill] sm:$0xff] %v11651_v21  ;;  %v1841_v19 = vmul.f32 %v11642_v34, %v1626_v35  ;;  %v11660_v44 = vrot.slane %v1995_v4, %v15127_v43  ;;  %v2056_v23 = vsub.f32 %v11651_v21, %v11505_v24 }
 0x3c3   : > { %v11665_v26 = vrot.slane %v2210_v36, %v15105_v62  ;;  %v5060_v49 = vadd.f32 %v4932_v46, %v4804_v45  ;;  %v1842_v50 = vmul.f32 %v11648_v57, %v1627_v41  ;;  %v11669_v22 = vrot.slane %v2210_v36, %v15127_v43  ;;  %v3296_v45 = vld [vmem:[#allocation11 + $0x21] ss:$4 sm:$0x1]  ;;  %v3491_v46 = vld [vmem:[#allocation13 + $0x21] ss:$4 sm:$0x1] }
 0x3c4   : > { %15139 = vst [vmem:[#allocation98_spill] sm:$0xff] %v11660_v44  ;;  %v11673_v54 = vrot.slane %v11531_v55, %v15108_v59  ;;  %v2057_v4 = vsub.f32 %v11660_v44, %v11505_v24  ;;  %v2431_v35 = vmul.f32 %v11522_v40, %v1841_v19  ;;  %v11680_v1 = vrot.slane %v2906_v61, %v15105_v62 }
 0x3c5   : > { %15140 = vst [vmem:[#allocation102_spill] sm:$0xff] %v11665_v26  ;;  %15141 = vst [vmem:[#allocation107_spill] sm:$0xff] %v11669_v22  ;;  %v2271_v9 = vmul.f32 %v11665_v26, %v2056_v23  ;;  %5665 = vmatprep.mubr.f32.mxu0 %v5060_v49  ;;  %v2432_v41 = vmul.f32 %v6291_v42, %v1842_v50  ;;  %v11686_v55 = vrot.slane %v11537_v60, %v15108_v59  ;;  %v15145_v49 = vld [vmem:[#allocation115_spill] sm:$0xff] }
 0x3c6   : > { %15142 = vst [vmem:[#allocation96_spill] sm:$0xff] %v11673_v54  ;;  %15143 = vst [vmem:[#allocation100_spill] sm:$0xff] %v11680_v1  ;;  %v2961_v43 = vsub.f32 %v11505_v24, %v11673_v54  ;;  %v11689_v36 = vrot.slane %v3101_v0, %v15105_v62  ;;  %v2272_v23 = vmul.f32 %v11669_v22, %v2057_v4  ;;  %5666 = vmatmul.mubr.f32.vlgmr.msra.gmra.mrb[32].mxu0 %v15145_v49 }
 0x3c7   : > { %v2591_v40 = vmul.f32 %v6291_v42, %v2271_v9  ;;  %v2962_v61 = vsub.f32 %v11505_v24, %v11680_v1  ;;  %v11696_v19 = vrot.slane %v11544_v52, %v15108_v59  ;;  %v11701_v50 = vrot.slane %v3296_v45, %v15105_v62 }
 0x3c8   : > { %v3156_v60 = vmul.f32 %v11686_v55, %v2961_v43  ;;  %v11705_v0 = vrot.slane %v11550_v6, %v15108_v59  ;;  %v11708_v42 = vrot.slane %v3491_v46, %v15105_v62  ;;  %v2592_v4 = vmul.f32 %v6292_v27, %v2272_v23  ;;  %v549_v6 = vld [vmem:[%s8233_s6] sm:$0xff]  ;;  %v550_v27 = vld [vmem:[%s8233_s6 + $0x8] sm:$0xff] }
 0x3c9   : > { %15144 = vst [vmem:[#allocation108_spill] sm:$0xff] %v11696_v19  ;;  %15146 = vst [vmem:[#allocation109_spill] sm:$0xff] %v11701_v50  ;;  %v2751_v9 = vadd.f32 %v2591_v40, %v2431_v35  ;;  %v3157_v16 = vmul.f32 %v11689_v36, %v2962_v61  ;;  %v3351_v52 = vsub.f32 %v11696_v19, %v11505_v24 }
 0x3ca   : > { %15147 = vst [vmem:[#allocation104_spill] sm:$0xff] %v11705_v0  ;;  %15148 = vst [vmem:[#allocation46_spill] sm:$0xff] %v11708_v42  ;;  %v3352_v43 = vsub.f32 %v11701_v50, %v11505_v24  ;;  %v3690_v45 = vmul.f32 %v3156_v60, %v11601_v17  ;;  %v11718_v49 = vrot.slane %v11559_v37, %v15108_v59 }
 0x3cb   : > { %v11722_v62 = vrot.slane %v11572_v28, %v15108_v59  ;;  %v2752_v35 = vadd.f32 %v2592_v4, %v2432_v41  ;;  %v3546_v46 = vmul.f32 %v11705_v0, %v3351_v52  ;;  %v3691_v23 = vmul.f32 %v3157_v16, %v2751_v9 }
 0x3cc   : > { %15149 = vst [vmem:[#allocation110_spill] sm:$0xff] %v11718_v49  ;;  %v11729_v40 = vrot.slane %v11589_v30, %v15113_v56  ;;  %v3547_v17 = vmul.f32 %v11708_v42, %v3352_v43  ;;  %v4165_v37 = vsub.f32 %v11505_v24, %v11718_v49  ;;  %v11736_v28 = vrot.slane %v11589_v30, %v15108_v59 }
 0x3cd   : > { %15150 = vst [vmem:[#allocation111_spill] sm:$0xff] %v11722_v62  ;;  %v11740_v61 = vrot.slane %v11595_v2, %v15113_v56  ;;  %v3834_v41 = vmul.f32 %v3546_v46, %v2751_v9  ;;  %v11746_v60 = vrot.slane %v11595_v2, %v15108_v59  ;;  %v7002_v4 = vpack.c.bf16 %v550_v27, %v549_v6  ;;  %v15156_v6 = vld [vmem:[#allocation71_spill] sm:$0xff] }
 0x3ce   : > { %15151 = vst [vmem:[#allocation50_spill] sm:$0xff] %v11729_v40  ;;  %15152 = vst [vmem:[#allocation113_spill] sm:$0xff] %v11736_v28  ;;  %v4506_v16 = vsub.f32 %v11729_v40, %v11505_v24  ;;  %v3835_v52 = vmul.f32 %v3547_v17, %v2752_v35  ;;  %v4336_v43 = vmul.f32 %v11722_v62, %v4165_v37  ;;  %v15158_v37 = vld [vmem:[#allocation81_spill] sm:$0xff] }
 0x3cf   : > { %15153 = vst [vmem:[#allocation116_spill] sm:$0xff] %v11740_v61  ;;  %15154 = vst [vmem:[#allocation112_spill] sm:$0xff] %v11746_v60  ;;  %v4507_v30 = vsub.f32 %v11736_v28, %v11505_v24  ;;  %vm642_vm12 = vcmp.ge.f32.partialorder %v11752_v29, %v15155_v51  ;;  %v3978_v56 = vadd.f32 %v3834_v41, %v3690_v45  ;;  %7003 = vmatprep.subr.bf16.mxu0 %v7002_v4  ;;  %v15157_v45 = vld [vmem:[#allocation74_spill] sm:$0xff] }
 0x3d0   : > { %v4677_v9 = vmul.f32 %v11740_v61, %v4506_v16  ;;  %7034 = vmatprep.subr.bf16.mxu1 %v7002_v4  ;;  %vm643_vm13 = vcmp.ge.f32.partialorder %v11752_v29, %v11495_v48  ;;  %v3979_v59 = vadd.f32 %v3835_v52, %v3691_v23  ;;  %7005 = vmatpush3.bf16.msra.mxu0 %v7002_v4 }
 0x3d1   : > { %v4678_v2 = vmul.f32 %v11746_v60, %v4507_v30  ;;  %vm877_vm14 = vcmp.lt.f32.partialorder %v11752_v29, %v15156_v6  ;;  %vm878_vm15 = vcmp.lt.f32.partialorder %v11752_v29, %v11499_v38  ;;  %v4806_v24 = vmul.f32 %v4336_v43, %v3978_v56  ;;  %v15159_v30 = vld [vmem:[#allocation77_spill] sm:$0xff]  ;;  %v15161_v38 = vld [vmem:[#allocation87_spill] sm:$0xff] }
 0x3d2   : > { %v4933_v27 = vmul.f32 %v4677_v9, %v3978_v56  ;;  %vm1053_vm0 = vmand %vm642_vm12, %vm877_vm14  ;;  %v1634_v35 = vsub.f32 %v11752_v29, %v15157_v45  ;;  %v1635_v46 = vsub.f32 %v11752_v29, %v11512_v58  ;;  %v2064_v41 = vsub.f32 %v15158_v37, %v11752_v29  ;;  %v15160_v58 = vld [vmem:[#allocation84_spill] sm:$0xff] }
 0x3d3   : > { %v4934_v17 = vmul.f32 %v4678_v2, %v3979_v59  ;;  %vm1054_vm1 = vmand %vm643_vm13, %vm878_vm15  ;;  %v6300_v23 = vsel %vm1053_vm0, 1.0, %v14403_v18  ;;  %v2065_v16 = vsub.f32 %v11519_v32, %v11752_v29  ;;  %v2968_v6 = vsub.f32 %v11752_v29, %v15161_v38  ;;  %v15162_v37 = vld [vmem:[#allocation120_spill] sm:$0xff] }
 0x3d4   : > { %v5061_v52 = vadd.f32 %v4933_v27, %v11653_v11  ;;  %v6301_v43 = vsel %vm1054_vm1, 1.0, %v14403_v18  ;;  %v1849_v56 = vmul.f32 %v15159_v30, %v1634_v35  ;;  %v1850_v9 = vmul.f32 %v11516_v25, %v1635_v46  ;;  %v15163_v27 = vld [vmem:[#allocation94_spill] sm:$0xff] }
 0x3d5   : > { %v5062_v45 = vadd.f32 %v4934_v17, %v4806_v24  ;;  %v2279_v59 = vmul.f32 %v15160_v58, %v2064_v41  ;;  %v2280_v2 = vmul.f32 %v11527_v20, %v2065_v16  ;;  %v2969_v11 = vsub.f32 %v11752_v29, %v11535_v53  ;;  %v15164_v24 = vld [vmem:[#allocation90_spill] sm:$0xff]  ;;  %v15165_v20 = vld [vmem:[#allocation97_spill] sm:$0xff] }
 0x3d6   : > { %v2439_v61 = vmul.f32 %v15162_v37, %v1849_v56  ;;  %v2440_v48 = vmul.f32 %v6300_v23, %v1850_v9  ;;  %v3358_v32 = vsub.f32 %v15163_v27, %v11752_v29  ;;  %v3163_v17 = vmul.f32 %v15164_v24, %v2968_v6  ;;  %v15166_v6 = vld [vmem:[#allocation121_spill] sm:$0xff] }
 0x3d7   : > { %5810 = vmatprep.mubr.f32.mxu1 %v5062_v45  ;;  %v2599_v35 = vmul.f32 %v6300_v23, %v2279_v59  ;;  %v2600_v46 = vmul.f32 %v6301_v43, %v2280_v2  ;;  %v3359_v41 = vsub.f32 %v11548_v39, %v11752_v29  ;;  %v3164_v16 = vmul.f32 %v11541_v15, %v2969_v11 }
 0x3d8   : > { %5811 = vmatmul.mubr.f32.vlgmr.msra.gmra.mrb[32].mxu1 %v5061_v52  ;;  %v3553_v37 = vmul.f32 %v15165_v20, %v3358_v32  ;;  %v4171_v56 = vsub.f32 %v11752_v29, %v11563_v63  ;;  %v4513_v9 = vsub.f32 %v11593_v12, %v11752_v29  ;;  %v3697_v2 = vmul.f32 %v3163_v17, %v15166_v6 }
 0x3d9   : > { %7042 = vmatpush3.bf16.msra.mxu1 %v7002_v4  ;;  %v2759_v45 = vadd.f32 %v2599_v35, %v2439_v61  ;;  %v2760_v23 = vadd.f32 %v2600_v46, %v2440_v48  ;;  %v3554_v59 = vmul.f32 %v11554_v47, %v3359_v41  ;;  %vm644_vm2 = vcmp.ge.f32.partialorder %v11752_v29, %v11607_v33 }
 0x3da   : > { %v4342_v24 = vmul.f32 %v11576_v13, %v4171_v56  ;;  %v4684_v52 = vmul.f32 %v11599_v7, %v4513_v9  ;;  %vm645_vm3 = vcmp.ge.f32.partialorder %v11752_v29, %v11614_v8  ;;  %vm879_vm4 = vcmp.lt.f32.partialorder %v11752_v29, %v11618_v3 }
 0x3db   : > { %v3698_v32 = vmul.f32 %v3164_v16, %v2759_v45  ;;  %v3841_v11 = vmul.f32 %v3553_v37, %v2759_v45  ;;  %v3842_v12 = vmul.f32 %v3554_v59, %v2760_v23  ;;  %vm880_vm5 = vcmp.lt.f32.partialorder %v11752_v29, %v11626_v14  ;;  %vm1055_vm6 = vmand %vm644_vm2, %vm879_vm4 }
 0x3dc   : > { %v1636_v48 = vsub.f32 %v11752_v29, %v11634_v5  ;;  %v1637_v61 = vsub.f32 %v11752_v29, %v11639_v31  ;;  %v2066_v4 = vsub.f32 %v11651_v21, %v11752_v29  ;;  %vm1056_vm7 = vmand %vm645_vm3, %vm880_vm5  ;;  %v6302_v17 = vsel %vm1055_vm6, 1.0, %v14403_v18 }
 0x3dd   : > { %v3985_v35 = vadd.f32 %v3841_v11, %v3697_v2  ;;  %v3986_v46 = vadd.f32 %v3842_v12, %v3698_v32  ;;  %v2067_v41 = vsub.f32 %v11660_v44, %v11752_v29  ;;  %v6303_v16 = vsel %vm1056_vm7, 1.0, %v14403_v18 }
 0x3de   : > { %v1851_v37 = vmul.f32 %v11642_v34, %v1636_v48  ;;  %v1852_v56 = vmul.f32 %v11648_v57, %v1637_v61  ;;  %v2281_v9 = vmul.f32 %v11665_v26, %v2066_v4  ;;  %v2970_v12 = vsub.f32 %v11752_v29, %v11673_v54 }
 0x3df   : > { %v4812_v45 = vmul.f32 %v4342_v24, %v3985_v35  ;;  %v4940_v59 = vmul.f32 %v4684_v52, %v3986_v46  ;;  %v2282_v6 = vmul.f32 %v11669_v22, %v2067_v41  ;;  %v2971_v44 = vsub.f32 %v11752_v29, %v11680_v1 }
 0x3e0   : > { %v2441_v2 = vmul.f32 %v6301_v43, %v1851_v37  ;;  %v2442_v32 = vmul.f32 %v6302_v17, %v1852_v56  ;;  %v2601_v11 = vmul.f32 %v6302_v17, %v2281_v9  ;;  %v3165_v48 = vmul.f32 %v11686_v55, %v2970_v12 }
 0x3e1   : > { %v5068_v21 = vadd.f32 %v4940_v59, %v4812_v45  ;;  %v2602_v31 = vmul.f32 %v6303_v16, %v2282_v6  ;;  %v3360_v61 = vsub.f32 %v11696_v19, %v11752_v29  ;;  %v3166_v52 = vmul.f32 %v11689_v36, %v2971_v44  ;;  %v15167_v45 = vld [vmem:[#allocation99_spill] sm:$0xff] }
 0x3e2   : > { %v2761_v24 = vadd.f32 %v2601_v11, %v2441_v2  ;;  %v3361_v4 = vsub.f32 %v11701_v50, %v11752_v29  ;;  %v4173_v43 = vsub.f32 %v11752_v29, %v11718_v49  ;;  %v3699_v16 = vmul.f32 %v3165_v48, %v2760_v23 }
 0x3e3   : > { %5670 = vmatprep.mubr.f32.mxu0 %v5068_v21  ;;  %v2762_v17 = vadd.f32 %v2602_v31, %v2442_v32  ;;  %v3555_v41 = vmul.f32 %v11705_v0, %v3360_v61  ;;  %v4515_v37 = vsub.f32 %v11736_v28, %v11752_v29  ;;  %v4170_v59 = vsub.f32 %v11752_v29, %v15167_v45  ;;  %v15168_v21 = vld [vmem:[#allocation103_spill] sm:$0xff]  ;;  %v15169_v32 = vld [vmem:[#allocation101_spill] sm:$0xff]  ;;  %v11849_v61 = vld [vmem:[%s8213_s17 + $0x10] sm:$0xff] }
 0x3e4   : > { %v3556_v56 = vmul.f32 %v11708_v42, %v3361_v4  ;;  %v3700_v9 = vmul.f32 %v3166_v52, %v2761_v24  ;;  %v4344_v44 = vmul.f32 %v11722_v62, %v4173_v43  ;;  %v4512_v31 = vsub.f32 %v15168_v21, %v11752_v29  ;;  %v15170_v52 = vld [vmem:[#allocation106_spill] sm:$0xff]  ;;  %v15171_v43 = vld [vmem:[#allocation69_spill] sm:$0xff] }
 0x3e5   : > { %v3843_v6 = vmul.f32 %v3555_v41, %v2761_v24  ;;  %v4686_v12 = vmul.f32 %v11746_v60, %v4515_v37  ;;  %v4172_v23 = vsub.f32 %v11752_v29, %v11567_v10  ;;  %v4341_v11 = vmul.f32 %v15169_v32, %v4170_v59  ;;  %v15172_v37 = vld [vmem:[#allocation54_spill] sm:$0xff]  ;;  %v15174_v59 = vld [vmem:[#allocation116_spill] sm:$0xff]  ;;  %v15175_v60 = vld [vmem:[#allocation71_spill] sm:$0xff] }
 0x3e6   : > { %v3844_v2 = vmul.f32 %v3556_v56, %v2762_v17  ;;  %v4514_v48 = vsub.f32 %v11729_v40, %v11752_v29  ;;  %vm653_vm8 = vcmp.ge.f32.partialorder %v11849_v61, %v15155_v51  ;;  %v4683_v4 = vmul.f32 %v15170_v52, %v4512_v31  ;;  %v15173_v17 = vld [vmem:[#allocation122_spill] sm:$0xff]  ;;  %v15176_v51 = vld [vmem:[#allocation55_spill] sm:$0xff] }
 0x3e7   : > { %v3987_v24 = vadd.f32 %v3843_v6, %v3699_v16  ;;  %v4343_v41 = vmul.f32 %v15171_v43, %v4172_v23  ;;  %vm654_vm9 = vcmp.ge.f32.partialorder %v11849_v61, %v15172_v37  ;;  %v4811_v56 = vmul.f32 %v4341_v11, %v15173_v17 }
 0x3e8   : > { %v3988_v10 = vadd.f32 %v3844_v2, %v3700_v9  ;;  %v4685_v32 = vmul.f32 %v15174_v59, %v4514_v48  ;;  %vm888_vm10 = vcmp.lt.f32.partialorder %v11849_v61, %v15175_v60  ;;  %v4939_v40 = vmul.f32 %v4683_v4, %v3985_v35  ;;  %v15177_v9 = vld [vmem:[#allocation74_spill] sm:$0xff]  ;;  %v15179_v35 = vld [vmem:[#allocation81_spill] sm:$0xff] }
 0x3e9   : > { %v4814_v29 = vmul.f32 %v4344_v44, %v3987_v24  ;;  %v4813_v21 = vmul.f32 %v4343_v41, %v3986_v46  ;;  %vm889_vm11 = vcmp.lt.f32.partialorder %v11849_v61, %v15176_v51  ;;  %vm1064_vm12 = vmand %vm653_vm8, %vm888_vm10  ;;  %v1644_v23 = vsub.f32 %v11849_v61, %v15177_v9  ;;  %v15178_v48 = vld [vmem:[#allocation58_spill] sm:$0xff] }
 0x3ea   : > { %v4942_v16 = vmul.f32 %v4686_v12, %v3988_v10  ;;  %v4941_v6 = vmul.f32 %v4685_v32, %v3987_v24  ;;  %vm1065_vm13 = vmand %vm654_vm9, %vm889_vm11  ;;  %v6311_v31 = vsel %vm1064_vm12, 1.0, %v14403_v18  ;;  %v5067_v2 = vadd.f32 %v4939_v40, %v4811_v56  ;;  %v15180_v12 = vld [vmem:[#allocation62_spill] sm:$0xff] }
 0x3eb   : > { %v6312_v11 = vsel %vm1065_vm13, 1.0, %v14403_v18  ;;  %v1645_v44 = vsub.f32 %v11849_v61, %v15178_v48  ;;  %v2074_v46 = vsub.f32 %v15179_v35, %v11849_v61  ;;  %v1859_v10 = vmul.f32 %v15159_v30, %v1644_v23  ;;  %v15181_v35 = vld [vmem:[#allocation57_spill] sm:$0xff] }
 0x3ec   : > { %v5070_v4 = vadd.f32 %v4942_v16, %v4814_v29  ;;  %v5069_v41 = vadd.f32 %v4941_v6, %v4813_v21  ;;  %v2075_v32 = vsub.f32 %v15180_v12, %v11849_v61  ;;  %5671 = vmatmul.mubr.f32.gmra.mrb[34].mxu0 %v5067_v2  ;;  %v2977_v17 = vsub.f32 %v11849_v61, %v15161_v38  ;;  %v15182_v21 = vld [vmem:[#allocation123_spill] sm:$0xff] }
 0x3ed   : > { %v1860_v24 = vmul.f32 %v11516_v25, %v1645_v44  ;;  %v2289_v40 = vmul.f32 %v15160_v58, %v2074_v46  ;;  %v2978_v56 = vsub.f32 %v11849_v61, %v11535_v53  ;;  %v2449_v16 = vmul.f32 %v15182_v21, %v1859_v10  ;;  %v15183_v46 = vld [vmem:[#allocation90_spill] sm:$0xff] }
 0x3ee   : > { %5815 = vmatprep.mubr.f32.mxu1 %v5070_v4  ;;  %v2290_v29 = vmul.f32 %v15181_v35, %v2075_v32  ;;  %v3367_v6 = vsub.f32 %v15163_v27, %v11849_v61  ;;  %v3368_v23 = vsub.f32 %v11548_v39, %v11849_v61  ;;  %v3172_v58 = vmul.f32 %v15183_v46, %v2977_v17  ;;  %v15184_v27 = vld [vmem:[#allocation124_spill] sm:$0xff]  ;;  %v15185_v39 = vld [vmem:[#allocation70_spill] sm:$0xff] }
 0x3ef   : > { %5816 = vmatmul.mubr.f32.gmra.mrb[34].mxu1 %v5069_v41  ;;  %v2450_v2 = vmul.f32 %v6311_v31, %v1860_v24  ;;  %v2609_v44 = vmul.f32 %v6311_v31, %v2289_v40  ;;  %v3173_v38 = vmul.f32 %v11541_v15, %v2978_v56  ;;  %v4179_v10 = vsub.f32 %v11849_v61, %v11563_v63 }
 0x3f0   : > { %v2610_v25 = vmul.f32 %v6312_v11, %v2290_v29  ;;  %v3562_v4 = vmul.f32 %v15165_v20, %v3367_v6  ;;  %v3563_v32 = vmul.f32 %v11554_v47, %v3368_v23  ;;  %v3706_v53 = vmul.f32 %v3172_v58, %v15184_v27  ;;  %v15186_v29 = vld [vmem:[#allocation76_spill] sm:$0xff]  ;;  %v15187_v23 = vld [vmem:[#allocation95_spill] sm:$0xff] }
 0x3f1   : > { %v2769_v21 = vadd.f32 %v2609_v44, %v2449_v16  ;;  %v4521_v41 = vsub.f32 %v15185_v39, %v11849_v61  ;;  %vm655_vm14 = vcmp.ge.f32.partialorder %v11849_v61, %v11607_v33  ;;  %v4350_v24 = vmul.f32 %v11576_v13, %v4179_v10  ;;  %v15188_v44 = vld [vmem:[#allocation98_spill] sm:$0xff] }
 0x3f2   : > { %v2770_v31 = vadd.f32 %v2610_v25, %v2450_v2  ;;  %vm656_vm15 = vcmp.ge.f32.partialorder %v11849_v61, %v11614_v8  ;;  %vm890_vm0 = vcmp.lt.f32.partialorder %v11849_v61, %v11618_v3  ;;  %vm891_vm1 = vcmp.lt.f32.partialorder %v11849_v61, %v11626_v14 }
 0x3f3   : > { %v3707_v40 = vmul.f32 %v3173_v38, %v2769_v21  ;;  %v3850_v17 = vmul.f32 %v3562_v4, %v2769_v21  ;;  %v4692_v56 = vmul.f32 %v11599_v7, %v4521_v41  ;;  %vm1066_vm2 = vmand %vm655_vm14, %vm890_vm0  ;;  %v1646_v27 = vsub.f32 %v11849_v61, %v11634_v5 }
 0x3f4   : > { %v3851_v58 = vmul.f32 %v3563_v32, %v2770_v31  ;;  %vm1067_vm3 = vmand %vm656_vm15, %vm891_vm1  ;;  %v6313_v25 = vsel %vm1066_vm2, 1.0, %v14403_v18  ;;  %v1647_v16 = vsub.f32 %v11849_v61, %v15186_v29  ;;  %v2076_v2 = vsub.f32 %v15187_v23, %v11849_v61 }
 0x3f5   : > { %v3994_v6 = vadd.f32 %v3850_v17, %v3706_v53  ;;  %v6314_v38 = vsel %vm1067_vm3, 1.0, %v14403_v18  ;;  %v2077_v4 = vsub.f32 %v15188_v44, %v11849_v61  ;;  %v1861_v32 = vmul.f32 %v11642_v34, %v1646_v27 }
 0x3f6   : > { %v3995_v10 = vadd.f32 %v3851_v58, %v3707_v40  ;;  %v1862_v21 = vmul.f32 %v11648_v57, %v1647_v16  ;;  %v2979_v41 = vsub.f32 %v11849_v61, %v11673_v54  ;;  %v2291_v29 = vmul.f32 %v11665_v26, %v2076_v2 }
 0x3f7   : > { %v4820_v5 = vmul.f32 %v4350_v24, %v3994_v6  ;;  %v2292_v53 = vmul.f32 %v11669_v22, %v2077_v4  ;;  %v2980_v17 = vsub.f32 %v11849_v61, %v11680_v1  ;;  %v2451_v14 = vmul.f32 %v6312_v11, %v1861_v32 }
 0x3f8   : > { %v4948_v23 = vmul.f32 %v4692_v56, %v3995_v10  ;;  %v2452_v3 = vmul.f32 %v6313_v25, %v1862_v21  ;;  %v3174_v40 = vmul.f32 %v11686_v55, %v2979_v41  ;;  %v2611_v58 = vmul.f32 %v6313_v25, %v2291_v29  ;;  %v551_v41 = vld [vmem:[%s8233_s6 + $0x10] sm:$0xff] }
 0x3f9   : > { %v2612_v27 = vmul.f32 %v6314_v38, %v2292_v53  ;;  %v3175_v16 = vmul.f32 %v11689_v36, %v2980_v17  ;;  %v3369_v24 = vsub.f32 %v11696_v19, %v11849_v61  ;;  %v3370_v4 = vsub.f32 %v11701_v50, %v11849_v61  ;;  %v15190_v17 = vld [vmem:[#allocation112_spill] sm:$0xff] }
 0x3fa   : > { %v5076_v2 = vadd.f32 %v4948_v23, %v4820_v5  ;;  %v3708_v22 = vmul.f32 %v3174_v40, %v2770_v31  ;;  %v4181_v11 = vsub.f32 %v11849_v61, %v11718_v49  ;;  %v2771_v56 = vadd.f32 %v2611_v58, %v2451_v14  ;;  %v15189_v31 = vld [vmem:[#allocation103_spill] sm:$0xff]  ;;  %v552_v14 = vld [vmem:[%s8233_s6 + $0x18] sm:$0xff] }
 0x3fb   : > { %v2772_v32 = vadd.f32 %v2612_v27, %v2452_v3  ;;  %v3564_v25 = vmul.f32 %v11705_v0, %v3369_v24  ;;  %v4523_v29 = vsub.f32 %v11736_v28, %v11849_v61  ;;  %v3565_v38 = vmul.f32 %v11708_v42, %v3370_v4  ;;  %v15191_v58 = vld [vmem:[#allocation67_spill] sm:$0xff] }
 0x3fc   : > { %5675 = vmatprep.mubr.f32.mxu0 %v5076_v2  ;;  %v4352_v21 = vmul.f32 %v11722_v62, %v4181_v11  ;;  %v4178_v5 = vsub.f32 %v11849_v61, %v15167_v45  ;;  %v4520_v23 = vsub.f32 %v15189_v31, %v11849_v61  ;;  %v3709_v3 = vmul.f32 %v3175_v16, %v2771_v56  ;;  %v15192_v2 = vld [vmem:[#allocation101_spill] sm:$0xff]  ;;  %v15193_v62 = vld [vmem:[#allocation50_spill] sm:$0xff]  ;;  %v11951_v0 = vld [vmem:[%s8213_s17 + $0x18] sm:$0xff] }
 0x3fd   : > { %v3852_v53 = vmul.f32 %v3564_v25, %v2771_v56  ;;  %v4694_v40 = vmul.f32 %v15190_v17, %v4523_v29  ;;  %v4180_v27 = vsub.f32 %v11849_v61, %v15191_v58  ;;  %v3853_v24 = vmul.f32 %v3565_v38, %v2772_v32  ;;  %v15194_v16 = vld [vmem:[#allocation68_spill] sm:$0xff]  ;;  %v15195_v25 = vld [vmem:[#allocation125_spill] sm:$0xff] }
 0x3fe   : > { %v4349_v4 = vmul.f32 %v15192_v2, %v4178_v5  ;;  %v4691_v11 = vmul.f32 %v15170_v52, %v4520_v23  ;;  %v4522_v42 = vsub.f32 %v15193_v62, %v11849_v61  ;;  %v7006_v28 = vpack.c.bf16 %v552_v14, %v551_v41 }
 0x3ff   : > { %v3996_v45 = vadd.f32 %v3852_v53, %v3708_v22  ;;  %v4351_v31 = vmul.f32 %v15171_v43, %v4180_v27  ;;  %vm664_vm4 = vcmp.ge.f32.partialorder %v11951_v0, %v15194_v16  ;;  %v3997_v56 = vadd.f32 %v3853_v24, %v3709_v3  ;;  %v15197_v53 = vld [vmem:[#allocation59_spill] sm:$0xff] }
 0x400   : > { %v4819_v29 = vmul.f32 %v4349_v4, %v15195_v25  ;;  %v4947_v32 = vmul.f32 %v4691_v11, %v3994_v6  ;;  %v4693_v38 = vmul.f32 %v15174_v59, %v4522_v42  ;;  %7007 = vmatprep.subr.bf16.mxu0 %v7006_v28  ;;  %7035 = vmatprep.subr.bf16.mxu1 %v7006_v28  ;;  %v15198_v27 = vld [vmem:[#allocation87_spill] sm:$0xff]  ;;  %v15199_v11 = vld [vmem:[#allocation84_spill] sm:$0xff] }
 0x401   : > { %v4822_v5 = vmul.f32 %v4352_v21, %v3996_v45  ;;  %v4821_v23 = vmul.f32 %v4351_v31, %v3995_v10  ;;  %vm665_vm5 = vcmp.ge.f32.partialorder %v11951_v0, %v15172_v37  ;;  %v4950_v22 = vmul.f32 %v4694_v40, %v3997_v56  ;;  %7009 = vmatpush3.bf16.msra.mxu0 %v7006_v28 }
 0x402   : > { %v5075_v61 = vadd.f32 %v4947_v32, %v4819_v29  ;;  %v4949_v41 = vmul.f32 %v4693_v38, %v3996_v45  ;;  %7043 = vmatpush3.bf16.msra.mxu1 %v7006_v28  ;;  %vm899_vm6 = vcmp.lt.f32.partialorder %v11951_v0, %v15175_v60  ;;  %vm900_vm7 = vcmp.lt.f32.partialorder %v11951_v0, %v15176_v51  ;;  %v15196_v28 = vld [vmem:[#allocation81_spill] sm:$0xff]  ;;  %v15200_v29 = vld [vmem:[#allocation60_spill] sm:$0xff]  ;;  %v15201_v38 = vld [vmem:[#allocation47_spill] sm:$0xff] }
 0x403   : > { %v1654_v42 = vsub.f32 %v11951_v0, %v15177_v9  ;;  %v1655_v6 = vsub.f32 %v11951_v0, %v15178_v48  ;;  %v5078_v10 = vadd.f32 %v4950_v22, %v4822_v5  ;;  %vm1075_vm8 = vmand %vm664_vm4, %vm899_vm6  ;;  %v2084_v45 = vsub.f32 %v15196_v28, %v11951_v0 }
 0x404   : > { %5676 = vmatmul.mubr.f32.gmra.mrb[36].mxu0 %v5075_v61  ;;  %v5077_v21 = vadd.f32 %v4949_v41, %v4821_v23  ;;  %v2085_v31 = vsub.f32 %v15180_v12, %v11951_v0  ;;  %vm1076_vm9 = vmand %vm665_vm5, %vm900_vm7  ;;  %v6322_v14 = vsel %vm1075_vm8, 1.0, %v14403_v18  ;;  %v2986_v24 = vsub.f32 %v11951_v0, %v15198_v27  ;;  %v15202_v61 = vld [vmem:[#allocation94_spill] sm:$0xff] }
 0x405   : > { %v1869_v3 = vmul.f32 %v15159_v30, %v1654_v42  ;;  %v1870_v40 = vmul.f32 %v15197_v53, %v1655_v6  ;;  %5820 = vmatprep.mubr.f32.mxu1 %v5078_v10  ;;  %v6323_v4 = vsel %vm1076_vm9, 1.0, %v14403_v18  ;;  %v2299_v56 = vmul.f32 %v15199_v11, %v2084_v45  ;;  %v15203_v45 = vld [vmem:[#allocation63_spill] sm:$0xff] }
 0x406   : > { %v2300_v25 = vmul.f32 %v15181_v35, %v2085_v31  ;;  %v2987_v32 = vsub.f32 %v11951_v0, %v15200_v29  ;;  %5821 = vmatmul.mubr.f32.gmra.mrb[36].mxu1 %v5077_v21  ;;  %v3181_v22 = vmul.f32 %v15183_v46, %v2986_v24  ;;  %v3376_v41 = vsub.f32 %v15202_v61, %v11951_v0  ;;  %v15204_v35 = vld [vmem:[#allocation43_spill] sm:$0xff] }
 0x407   : > { %v2459_v5 = vmul.f32 %v15201_v38, %v1869_v3  ;;  %v2460_v23 = vmul.f32 %v6322_v14, %v1870_v40  ;;  %v2619_v42 = vmul.f32 %v6322_v14, %v2299_v56  ;;  %v3377_v11 = vsub.f32 %v15203_v45, %v11951_v0 }
 0x408   : > { %v2620_v6 = vmul.f32 %v6323_v4, %v2300_v25  ;;  %v3182_v10 = vmul.f32 %v11541_v15, %v2987_v32  ;;  %v3571_v31 = vmul.f32 %v15165_v20, %v3376_v41  ;;  %v3715_v29 = vmul.f32 %v3181_v22, %v15204_v35  ;;  %v15205_v35 = vld [vmem:[#allocation80_spill] sm:$0xff] }
 0x409   : > { %v4187_v21 = vsub.f32 %v11951_v0, %v11563_v63  ;;  %v4529_v3 = vsub.f32 %v15185_v39, %v11951_v0  ;;  %v2779_v40 = vadd.f32 %v2619_v42, %v2459_v5  ;;  %v3572_v14 = vmul.f32 %v11554_v47, %v3377_v11  ;;  %v15206_v5 = vld [vmem:[#allocation85_spill] sm:$0xff]  ;;  %v15208_v42 = vld [vmem:[#allocation76_spill] sm:$0xff] }
 0x40a   : > { %v2780_v24 = vadd.f32 %v2620_v6, %v2460_v23  ;;  %vm666_vm10 = vcmp.ge.f32.partialorder %v11951_v0, %v11607_v33  ;;  %vm667_vm11 = vcmp.ge.f32.partialorder %v11951_v0, %v11614_v8  ;;  %vm901_vm12 = vcmp.lt.f32.partialorder %v11951_v0, %v15205_v35  ;;  %v15207_v23 = vld [vmem:[#allocation75_spill] sm:$0xff] }
 0x40b   : > { %v4358_v56 = vmul.f32 %v11576_v13, %v4187_v21  ;;  %v4700_v25 = vmul.f32 %v11599_v7, %v4529_v3  ;;  %v3716_v32 = vmul.f32 %v3182_v10, %v2779_v40  ;;  %v3859_v38 = vmul.f32 %v3571_v31, %v2779_v40  ;;  %vm1077_vm14 = vmand %vm666_vm10, %vm901_vm12  ;;  %v15209_v21 = vld [vmem:[#allocation95_spill] sm:$0xff] }
 0x40c   : > { %v3860_v22 = vmul.f32 %v3572_v14, %v2780_v24  ;;  %vm902_vm13 = vcmp.lt.f32.partialorder %v11951_v0, %v15206_v5  ;;  %v6324_v11 = vsel %vm1077_vm14, 1.0, %v14403_v18  ;;  %v1656_v41 = vsub.f32 %v11951_v0, %v15207_v23  ;;  %v15210_v33 = vld [vmem:[#allocation107_spill] sm:$0xff] }
 0x40d   : > { %vm1078_vm15 = vmand %vm667_vm11, %vm902_vm13  ;;  %v1657_v6 = vsub.f32 %v11951_v0, %v15208_v42  ;;  %v2086_v3 = vsub.f32 %v15209_v21, %v11951_v0  ;;  %v4003_v7 = vadd.f32 %v3859_v38, %v3715_v29  ;;  %v2087_v40 = vsub.f32 %v15188_v44, %v11951_v0 }
 0x40e   : > { %v4004_v10 = vadd.f32 %v3860_v22, %v3716_v32  ;;  %v6325_v31 = vsel %vm1078_vm15, 1.0, %v14403_v18  ;;  %v1871_v14 = vmul.f32 %v11642_v34, %v1656_v41  ;;  %v2988_v23 = vsub.f32 %v11951_v0, %v11673_v54 }
 0x40f   : > { %v1872_v5 = vmul.f32 %v11648_v57, %v1657_v6  ;;  %v2301_v35 = vmul.f32 %v11665_v26, %v2086_v3  ;;  %v4828_v42 = vmul.f32 %v4358_v56, %v4003_v7  ;;  %v2302_v21 = vmul.f32 %v15210_v33, %v2087_v40 }
 0x410   : > { %v4956_v8 = vmul.f32 %v4700_v25, %v4004_v10  ;;  %v2989_v29 = vsub.f32 %v11951_v0, %v11680_v1  ;;  %v2461_v32 = vmul.f32 %v6323_v4, %v1871_v14  ;;  %v3183_v44 = vmul.f32 %v11686_v55, %v2988_v23  ;;  %v15213_v23 = vld [vmem:[#allocation99_spill] sm:$0xff] }
 0x411   : > { %v2462_v38 = vmul.f32 %v6324_v11, %v1872_v5  ;;  %v2621_v22 = vmul.f32 %v6324_v11, %v2301_v35  ;;  %v2622_v34 = vmul.f32 %v6325_v31, %v2302_v21  ;;  %v3378_v3 = vsub.f32 %v11696_v19, %v11951_v0  ;;  %v15211_v35 = vld [vmem:[#allocation104_spill] sm:$0xff]  ;;  %v15214_v21 = vld [vmem:[#allocation46_spill] sm:$0xff] }
 0x412   : > { %v5084_v41 = vadd.f32 %v4956_v8, %v4828_v42  ;;  %v3184_v6 = vmul.f32 %v11689_v36, %v2989_v29  ;;  %v3379_v56 = vsub.f32 %v11701_v50, %v11951_v0  ;;  %v3717_v25 = vmul.f32 %v3183_v44, %v2780_v24  ;;  %v15212_v8 = vld [vmem:[#allocation113_spill] sm:$0xff]  ;;  %v15215_v29 = vld [vmem:[#allocation111_spill] sm:$0xff] }
 0x413   : > { %v2781_v54 = vadd.f32 %v2621_v22, %v2461_v32  ;;  %v4189_v40 = vsub.f32 %v11951_v0, %v11718_v49  ;;  %v2782_v4 = vadd.f32 %v2622_v34, %v2462_v38  ;;  %v3573_v5 = vmul.f32 %v15211_v35, %v3378_v3  ;;  %v15216_v44 = vld [vmem:[#allocation103_spill] sm:$0xff] }
 0x414   : > { %5680 = vmatprep.mubr.f32.mxu0 %v5084_v41  ;;  %v4531_v11 = vsub.f32 %v15212_v8, %v11951_v0  ;;  %v4186_v42 = vsub.f32 %v11951_v0, %v15213_v23  ;;  %v3574_v31 = vmul.f32 %v15214_v21, %v3379_v56  ;;  %v4528_v24 = vsub.f32 %v15216_v44, %v11951_v0 }
 0x415   : > { %v3718_v14 = vmul.f32 %v3184_v6, %v2781_v54  ;;  %v4360_v32 = vmul.f32 %v15215_v29, %v4189_v40  ;;  %v3861_v22 = vmul.f32 %v3573_v5, %v2781_v54  ;;  %v4188_v38 = vsub.f32 %v11951_v0, %v15191_v58  ;;  %v12054_v6 = vld [vmem:[%s8213_s17 + $0x20] sm:$0xff]  ;;  %v15217_v54 = vld [vmem:[#allocation126_spill] sm:$0xff] }
 0x416   : > { %v4702_v41 = vmul.f32 %v15190_v17, %v4531_v11  ;;  %v4357_v34 = vmul.f32 %v15192_v2, %v4186_v42  ;;  %v3862_v3 = vmul.f32 %v3574_v31, %v2782_v4  ;;  %v4699_v8 = vmul.f32 %v15170_v52, %v4528_v24 }
 0x417   : > { %v4530_v56 = vsub.f32 %v15193_v62, %v11951_v0  ;;  %vm675_vm0 = vcmp.ge.f32.partialorder %v12054_v6, %v15194_v16  ;;  %v4005_v40 = vadd.f32 %v3861_v22, %v3717_v25  ;;  %v4359_v11 = vmul.f32 %v15171_v43, %v4188_v38 }
 0x418   : > { %v4827_v5 = vmul.f32 %v4357_v34, %v15217_v54  ;;  %vm676_vm1 = vcmp.ge.f32.partialorder %v12054_v6, %v15172_v37  ;;  %v4006_v42 = vadd.f32 %v3862_v3, %v3718_v14  ;;  %v4955_v4 = vmul.f32 %v4699_v8, %v4003_v7 }
 0x419   : > { %v4701_v31 = vmul.f32 %v15174_v59, %v4530_v56  ;;  %vm910_vm2 = vcmp.lt.f32.partialorder %v12054_v6, %v15175_v60  ;;  %v4830_v0 = vmul.f32 %v4360_v32, %v4005_v40  ;;  %v4829_v24 = vmul.f32 %v4359_v11, %v4004_v10 }
 0x41a   : > { %vm911_vm3 = vcmp.lt.f32.partialorder %v12054_v6, %v15176_v51  ;;  %vm1086_vm4 = vmand %vm675_vm0, %vm910_vm2  ;;  %v1664_v25 = vsub.f32 %v12054_v6, %v15177_v9  ;;  %v4958_v22 = vmul.f32 %v4702_v41, %v4006_v42  ;;  %v5083_v34 = vadd.f32 %v4955_v4, %v4827_v5  ;;  %v15218_v5 = vld [vmem:[#allocation84_spill] sm:$0xff]  ;;  %v15219_v42 = vld [vmem:[#allocation127_spill] sm:$0xff] }
 0x41b   : > { %v4957_v38 = vmul.f32 %v4701_v31, %v4005_v40  ;;  %vm1087_vm5 = vmand %vm676_vm1, %vm911_vm3  ;;  %v6333_v7 = vsel %vm1086_vm4, 1.0, %v14403_v18  ;;  %v1665_v14 = vsub.f32 %v12054_v6, %v15178_v48  ;;  %v2094_v32 = vsub.f32 %v15196_v28, %v12054_v6  ;;  %v15220_v31 = vld [vmem:[#allocation60_spill] sm:$0xff] }
 0x41c   : > { %v6334_v8 = vsel %vm1087_vm5, 1.0, %v14403_v18  ;;  %v1879_v10 = vmul.f32 %v15159_v30, %v1664_v25  ;;  %v5086_v3 = vadd.f32 %v4958_v22, %v4830_v0  ;;  %5681 = vmatmul.mubr.f32.gmra.mrb[38].mxu0 %v5083_v34  ;;  %v2095_v41 = vsub.f32 %v15180_v12, %v12054_v6  ;;  %v15221_v30 = vld [vmem:[#allocation57_spill] sm:$0xff] }
 0x41d   : > { %v5085_v56 = vadd.f32 %v4957_v38, %v4829_v24  ;;  %v2995_v40 = vsub.f32 %v12054_v6, %v15198_v27  ;;  %v1880_v54 = vmul.f32 %v15197_v53, %v1665_v14  ;;  %v2309_v11 = vmul.f32 %v15218_v5, %v2094_v32 }
 0x41e   : > { %v2469_v4 = vmul.f32 %v15219_v42, %v1879_v10  ;;  %v2996_v25 = vsub.f32 %v12054_v6, %v15220_v31  ;;  %5825 = vmatprep.mubr.f32.mxu1 %v5086_v3  ;;  %v2310_v0 = vmul.f32 %v15221_v30, %v2095_v41  ;;  %v3385_v22 = vsub.f32 %v15202_v61, %v12054_v6 }
 0x41f   : > { %v3190_v24 = vmul.f32 %v15183_v46, %v2995_v40  ;;  %v3386_v34 = vsub.f32 %v15203_v45, %v12054_v6  ;;  %5826 = vmatmul.mubr.f32.gmra.mrb[38].mxu1 %v5085_v56  ;;  %v2470_v38 = vmul.f32 %v6333_v7, %v1880_v54  ;;  %v2629_v14 = vmul.f32 %v6333_v7, %v2309_v11  ;;  %v15222_v40 = vld [vmem:[#allocation128_spill] sm:$0xff]  ;;  %v15223_v54 = vld [vmem:[#allocation73_spill] sm:$0xff]  ;;  %v15224_v11 = vld [vmem:[#allocation79_spill] sm:$0xff] }
 0x420   : > { %v3191_v32 = vmul.f32 %v11541_v15, %v2996_v25  ;;  %v4195_v10 = vsub.f32 %v12054_v6, %v11563_v63  ;;  %v2630_v42 = vmul.f32 %v6334_v8, %v2310_v0  ;;  %v3580_v3 = vmul.f32 %v15165_v20, %v3385_v22  ;;  %v15225_v25 = vld [vmem:[#allocation80_spill] sm:$0xff]  ;;  %v15226_v0 = vld [vmem:[#allocation85_spill] sm:$0xff] }
 0x421   : > { %v3581_v41 = vmul.f32 %v11554_v47, %v3386_v34  ;;  %v3724_v46 = vmul.f32 %v3190_v24, %v15222_v40  ;;  %v2789_v31 = vadd.f32 %v2629_v14, %v2469_v4  ;;  %v4537_v56 = vsub.f32 %v15185_v39, %v12054_v6  ;;  %v15227_v22 = vld [vmem:[#allocation72_spill] sm:$0xff]  ;;  %v15228_v14 = vld [vmem:[#allocation75_spill] sm:$0xff] }
 0x422   : > { %v4366_v61 = vmul.f32 %v11576_v13, %v4195_v10  ;;  %vm677_vm6 = vcmp.ge.f32.partialorder %v12054_v6, %v15223_v54  ;;  %v2790_v7 = vadd.f32 %v2630_v42, %v2470_v38  ;;  %vm678_vm7 = vcmp.ge.f32.partialorder %v12054_v6, %v15224_v11  ;;  %v15229_v42 = vld [vmem:[#allocation76_spill] sm:$0xff] }
 0x423   : > { %vm912_vm8 = vcmp.lt.f32.partialorder %v12054_v6, %v15225_v25  ;;  %vm913_vm9 = vcmp.lt.f32.partialorder %v12054_v6, %v15226_v0  ;;  %v3725_v24 = vmul.f32 %v3191_v32, %v2789_v31  ;;  %v3868_v4 = vmul.f32 %v3580_v3, %v2789_v31  ;;  %v15230_v25 = vld [vmem:[#allocation95_spill] sm:$0xff]  ;;  %v15231_v31 = vld [vmem:[#allocation82_spill] sm:$0xff]  ;;  %v15233_v39 = vld [vmem:[#allocation96_spill] sm:$0xff] }
 0x424   : > { %v4708_v34 = vmul.f32 %v15227_v22, %v4537_v56  ;;  %vm1088_vm10 = vmand %vm677_vm6, %vm912_vm8  ;;  %v1666_v10 = vsub.f32 %v12054_v6, %v15228_v14  ;;  %v3869_v40 = vmul.f32 %v3581_v41, %v2790_v7  ;;  %v1667_v13 = vsub.f32 %v12054_v6, %v15229_v42  ;;  %v15232_v56 = vld [vmem:[#allocation98_spill] sm:$0xff] }
 0x425   : > { %vm1089_vm11 = vmand %vm678_vm7, %vm913_vm9  ;;  %v6335_v38 = vsel %vm1088_vm10, 1.0, %v14403_v18  ;;  %v2096_v11 = vsub.f32 %v15230_v25, %v12054_v6  ;;  %v4012_v54 = vadd.f32 %v3868_v4, %v3724_v46  ;;  %v2097_v0 = vsub.f32 %v15232_v56, %v12054_v6 }
 0x426   : > { %v6336_v32 = vsel %vm1089_vm11, 1.0, %v14403_v18  ;;  %v1881_v3 = vmul.f32 %v15231_v31, %v1666_v10  ;;  %v4013_v22 = vadd.f32 %v3869_v40, %v3725_v24  ;;  %v1882_v41 = vmul.f32 %v11648_v57, %v1667_v13 }
 0x427   : > { %v2311_v14 = vmul.f32 %v11665_v26, %v2096_v11  ;;  %v2997_v63 = vsub.f32 %v12054_v6, %v15233_v39  ;;  %v4836_v42 = vmul.f32 %v4366_v61, %v4012_v54  ;;  %v2312_v47 = vmul.f32 %v15210_v33, %v2097_v0 }
 0x428   : > { %v2471_v25 = vmul.f32 %v6334_v8, %v1881_v3  ;;  %v2998_v46 = vsub.f32 %v12054_v6, %v11680_v1  ;;  %v4964_v4 = vmul.f32 %v4708_v34, %v4013_v22  ;;  %v2472_v10 = vmul.f32 %v6335_v38, %v1882_v41 }
 0x429   : > { %v2631_v31 = vmul.f32 %v6335_v38, %v2311_v14  ;;  %v3192_v24 = vmul.f32 %v11686_v55, %v2997_v63  ;;  %v2632_v13 = vmul.f32 %v6336_v32, %v2312_v47  ;;  %v3387_v40 = vsub.f32 %v11696_v19, %v12054_v6  ;;  %v15234_v47 = vld [vmem:[#allocation113_spill] sm:$0xff] }
 0x42a   : > { %v3193_v11 = vmul.f32 %v11689_v36, %v2998_v46  ;;  %v3388_v61 = vsub.f32 %v11701_v50, %v12054_v6  ;;  %v5092_v8 = vadd.f32 %v4964_v4, %v4836_v42  ;;  %v4197_v34 = vsub.f32 %v12054_v6, %v11718_v49  ;;  %v553_v32 = vld [vmem:[%s8233_s6 + $0x20] sm:$0xff]  ;;  %v554_v46 = vld [vmem:[%s8233_s6 + $0x28] sm:$0xff] }
 0x42b   : > { %v2791_v0 = vadd.f32 %v2631_v31, %v2471_v25  ;;  %v3726_v3 = vmul.f32 %v3192_v24, %v2790_v7  ;;  %v2792_v41 = vadd.f32 %v2632_v13, %v2472_v10  ;;  %v3582_v14 = vmul.f32 %v15211_v35, %v3387_v40 }
 0x42c   : > { %v3583_v63 = vmul.f32 %v15214_v21, %v3388_v61  ;;  %v4539_v38 = vsub.f32 %v15234_v47, %v12054_v6  ;;  %5685 = vmatprep.mubr.f32.mxu0 %v5092_v8  ;;  %v4368_v42 = vmul.f32 %v15215_v29, %v4197_v34  ;;  %v4194_v7 = vsub.f32 %v12054_v6, %v15213_v23 }
 0x42d   : > { %v3727_v19 = vmul.f32 %v3193_v11, %v2791_v0  ;;  %v4536_v25 = vsub.f32 %v15216_v44, %v12054_v6  ;;  %v3870_v31 = vmul.f32 %v3582_v14, %v2791_v0  ;;  %v4196_v24 = vsub.f32 %v12054_v6, %v15191_v58  ;;  %v12155_v44 = vld [vmem:[%s8213_s17 + $0x28] sm:$0xff] }
 0x42e   : > { %v3871_v4 = vmul.f32 %v3583_v63, %v2792_v41  ;;  %v4710_v10 = vmul.f32 %v15190_v17, %v4539_v38  ;;  %v4365_v13 = vmul.f32 %v15192_v2, %v4194_v7  ;;  %v4538_v11 = vsub.f32 %v15193_v62, %v12054_v6  ;;  %v15235_v0 = vld [vmem:[#allocation129_spill] sm:$0xff] }
 0x42f   : > { %v4707_v40 = vmul.f32 %v15170_v52, %v4536_v25  ;;  %v7010_v61 = vpack.c.bf16 %v554_v46, %v553_v32  ;;  %v4014_v8 = vadd.f32 %v3870_v31, %v3726_v3  ;;  %v4367_v29 = vmul.f32 %v15171_v43, %v4196_v24 }
 0x430   : > { %v4015_v34 = vadd.f32 %v3871_v4, %v3727_v19  ;;  %vm686_vm12 = vcmp.ge.f32.partialorder %v12155_v44, %v15194_v16  ;;  %v4835_v41 = vmul.f32 %v4365_v13, %v15235_v0  ;;  %v4709_v63 = vmul.f32 %v15174_v59, %v4538_v11  ;;  %v15236_v4 = vld [vmem:[#allocation77_spill] sm:$0xff] }
 0x431   : > { %v4963_v14 = vmul.f32 %v4707_v40, %v4012_v54  ;;  %7011 = vmatprep.subr.bf16.mxu0 %v7010_v61  ;;  %7036 = vmatprep.subr.bf16.mxu1 %v7010_v61  ;;  %v4838_v38 = vmul.f32 %v4368_v42, %v4014_v8  ;;  %v4837_v6 = vmul.f32 %v4367_v29, %v4013_v22 }
 0x432   : > { %v4966_v7 = vmul.f32 %v4710_v10, %v4015_v34  ;;  %7013 = vmatpush3.bf16.msra.mxu0 %v7010_v61  ;;  %7044 = vmatpush3.bf16.msra.mxu1 %v7010_v61  ;;  %v4965_v3 = vmul.f32 %v4709_v63, %v4014_v8  ;;  %vm687_vm13 = vcmp.ge.f32.partialorder %v12155_v44, %v15172_v37  ;;  %v15237_v61 = vld [vmem:[#allocation60_spill] sm:$0xff]  ;;  %v15238_v34 = vld [vmem:[#allocation94_spill] sm:$0xff] }
 0x433   : > { %v5091_v19 = vadd.f32 %v4963_v14, %v4835_v41  ;;  %vm921_vm14 = vcmp.lt.f32.partialorder %v12155_v44, %v15175_v60  ;;  %vm922_vm15 = vcmp.lt.f32.partialorder %v12155_v44, %v15176_v51  ;;  %v1674_v29 = vsub.f32 %v12155_v44, %v15177_v9  ;;  %v15239_v41 = vld [vmem:[#allocation48_spill] sm:$0xff] }
 0x434   : > { %v5094_v32 = vadd.f32 %v4966_v7, %v4838_v38  ;;  %vm1097_vm0 = vmand %vm686_vm12, %vm921_vm14  ;;  %v1675_v54 = vsub.f32 %v12155_v44, %v15178_v48  ;;  %v5093_v22 = vadd.f32 %v4965_v3, %v4837_v6  ;;  %v2104_v42 = vsub.f32 %v15196_v28, %v12155_v44  ;;  %v15240_v38 = vld [vmem:[#allocation90_spill] sm:$0xff] }
 0x435   : > { %5686 = vmatmul.mubr.f32.gmra.mrb[40].mxu0 %v5091_v19  ;;  %vm1098_vm1 = vmand %vm687_vm13, %vm922_vm15  ;;  %v6344_v46 = vsel %vm1097_vm0, 1.0, %v14403_v18  ;;  %v2105_v25 = vsub.f32 %v15180_v12, %v12155_v44  ;;  %v1889_v10 = vmul.f32 %v15236_v4, %v1674_v29  ;;  %v3004_v13 = vsub.f32 %v12155_v44, %v15198_v27 }
 0x436   : > { %5830 = vmatprep.mubr.f32.mxu1 %v5094_v32  ;;  %v6345_v31 = vsel %vm1098_vm1, 1.0, %v14403_v18  ;;  %v1890_v24 = vmul.f32 %v15197_v53, %v1675_v54  ;;  %v2319_v40 = vmul.f32 %v15218_v5, %v2104_v42  ;;  %v3005_v8 = vsub.f32 %v12155_v44, %v15237_v61  ;;  %v15241_v54 = vld [vmem:[#allocation64_spill] sm:$0xff] }
 0x437   : > { %5831 = vmatmul.mubr.f32.gmra.mrb[40].mxu1 %v5093_v22  ;;  %v2320_v11 = vmul.f32 %v15221_v30, %v2105_v25  ;;  %v3394_v0 = vsub.f32 %v15238_v34, %v12155_v44  ;;  %v2479_v14 = vmul.f32 %v15239_v41, %v1889_v10  ;;  %v3199_v7 = vmul.f32 %v15240_v38, %v3004_v13  ;;  %v15242_v42 = vld [vmem:[#allocation44_spill] sm:$0xff]  ;;  %v15243_v30 = vld [vmem:[#allocation66_spill] sm:$0xff]  ;;  %v15245_v38 = vld [vmem:[#allocation73_spill] sm:$0xff] }
 0x438   : > { %v2480_v63 = vmul.f32 %v6344_v46, %v1890_v24  ;;  %v3395_v6 = vsub.f32 %v15203_v45, %v12155_v44  ;;  %v2639_v19 = vmul.f32 %v6344_v46, %v2319_v40  ;;  %v3200_v32 = vmul.f32 %v11541_v15, %v3005_v8  ;;  %v15244_v10 = vld [vmem:[#allocation70_spill] sm:$0xff]  ;;  %v15246_v46 = vld [vmem:[#allocation79_spill] sm:$0xff]  ;;  %v15247_v40 = vld [vmem:[#allocation65_spill] sm:$0xff] }
 0x439   : > { %v2640_v3 = vmul.f32 %v6345_v31, %v2320_v11  ;;  %v3589_v29 = vmul.f32 %v15165_v20, %v3394_v0  ;;  %v3733_v25 = vmul.f32 %v3199_v7, %v15242_v42  ;;  %v4203_v34 = vsub.f32 %v12155_v44, %v15243_v30  ;;  %v15248_v8 = vld [vmem:[#allocation72_spill] sm:$0xff]  ;;  %v15250_v7 = vld [vmem:[#allocation85_spill] sm:$0xff] }
 0x43a   : > { %v3590_v22 = vmul.f32 %v15241_v54, %v3395_v6  ;;  %v4545_v24 = vsub.f32 %v15244_v10, %v12155_v44  ;;  %v2799_v13 = vadd.f32 %v2639_v19, %v2479_v14  ;;  %vm688_vm2 = vcmp.ge.f32.partialorder %v12155_v44, %v15245_v38  ;;  %v15249_v6 = vld [vmem:[#allocation80_spill] sm:$0xff] }
 0x43b   : > { %v2800_v41 = vadd.f32 %v2640_v3, %v2480_v63  ;;  %vm689_vm3 = vcmp.ge.f32.partialorder %v12155_v44, %v15246_v46  ;;  %v4374_v11 = vmul.f32 %v15247_v40, %v4203_v34  ;;  %vm923_vm4 = vcmp.lt.f32.partialorder %v12155_v44, %v15249_v6  ;;  %v15251_v63 = vld [vmem:[#allocation75_spill] sm:$0xff]  ;;  %v15252_v46 = vld [vmem:[#allocation76_spill] sm:$0xff] }
 0x43c   : > { %v4716_v0 = vmul.f32 %v15248_v8, %v4545_v24  ;;  %vm924_vm5 = vcmp.lt.f32.partialorder %v12155_v44, %v15250_v7  ;;  %v3734_v42 = vmul.f32 %v3200_v32, %v2799_v13  ;;  %v3877_v10 = vmul.f32 %v3589_v29, %v2799_v13  ;;  %vm1099_vm6 = vmand %vm688_vm2, %vm923_vm4  ;;  %v15253_v24 = vld [vmem:[#allocation95_spill] sm:$0xff] }
 0x43d   : > { %v3878_v14 = vmul.f32 %v3590_v22, %v2800_v41  ;;  %v1676_v19 = vsub.f32 %v12155_v44, %v15251_v63  ;;  %vm1100_vm7 = vmand %vm689_vm3, %vm924_vm5  ;;  %v6346_v3 = vsel %vm1099_vm6, 1.0, %v14403_v18  ;;  %v1677_v34 = vsub.f32 %v12155_v44, %v15252_v46  ;;  %v15254_v22 = vld [vmem:[#allocation82_spill] sm:$0xff] }
 0x43e   : > { %v2106_v8 = vsub.f32 %v15253_v24, %v12155_v44  ;;  %v2107_v6 = vsub.f32 %v15232_v56, %v12155_v44  ;;  %v4021_v7 = vadd.f32 %v3877_v10, %v3733_v25  ;;  %v6347_v29 = vsel %vm1100_vm7, 1.0, %v14403_v18 }
 0x43f   : > { %v4022_v32 = vadd.f32 %v3878_v14, %v3734_v42  ;;  %v1891_v13 = vmul.f32 %v15254_v22, %v1676_v19  ;;  %v1892_v63 = vmul.f32 %v11648_v57, %v1677_v34  ;;  %v3006_v46 = vsub.f32 %v12155_v44, %v15233_v39 }
 0x440   : > { %v2321_v38 = vmul.f32 %v11665_v26, %v2106_v8  ;;  %v2322_v40 = vmul.f32 %v15210_v33, %v2107_v6  ;;  %v4844_v54 = vmul.f32 %v4374_v11, %v4021_v7  ;;  %v3007_v25 = vsub.f32 %v12155_v44, %v11680_v1  ;;  %v15255_v8 = vld [vmem:[#allocation108_spill] sm:$0xff] }
 0x441   : > { %v4972_v24 = vmul.f32 %v4716_v0, %v4022_v32  ;;  %v2481_v30 = vmul.f32 %v6345_v31, %v1891_v13  ;;  %v2482_v10 = vmul.f32 %v6346_v3, %v1892_v63  ;;  %v3201_v19 = vmul.f32 %v11686_v55, %v3006_v46 }
 0x442   : > { %v2641_v42 = vmul.f32 %v6346_v3, %v2321_v38  ;;  %v2642_v14 = vmul.f32 %v6347_v29, %v2322_v40  ;;  %v3202_v34 = vmul.f32 %v11689_v36, %v3007_v25  ;;  %v3396_v6 = vsub.f32 %v15255_v8, %v12155_v44  ;;  %v15256_v3 = vld [vmem:[#allocation111_spill] sm:$0xff] }
 0x443   : > { %v5100_v22 = vadd.f32 %v4972_v24, %v4844_v54  ;;  %v3397_v39 = vsub.f32 %v11701_v50, %v12155_v44  ;;  %v3735_v31 = vmul.f32 %v3201_v19, %v2800_v41  ;;  %v4205_v13 = vsub.f32 %v12155_v44, %v11718_v49  ;;  %v15257_v41 = vld [vmem:[#allocation103_spill] sm:$0xff] }
 0x444   : > { %v2801_v11 = vadd.f32 %v2641_v42, %v2481_v30  ;;  %v2802_v0 = vadd.f32 %v2642_v14, %v2482_v10  ;;  %v3591_v38 = vmul.f32 %v15211_v35, %v3396_v6  ;;  %v4547_v46 = vsub.f32 %v15234_v47, %v12155_v44 }
 0x445   : > { %5690 = vmatprep.mubr.f32.mxu0 %v5100_v22  ;;  %v3592_v54 = vmul.f32 %v15214_v21, %v3397_v39  ;;  %v4202_v40 = vsub.f32 %v12155_v44, %v15213_v23  ;;  %v4376_v30 = vmul.f32 %v15256_v3, %v4205_v13  ;;  %v4544_v24 = vsub.f32 %v15257_v41, %v12155_v44 }
 0x446   : > { %v3736_v63 = vmul.f32 %v3202_v34, %v2801_v11  ;;  %v4204_v29 = vsub.f32 %v12155_v44, %v15191_v58  ;;  %v3879_v22 = vmul.f32 %v3591_v38, %v2801_v11  ;;  %v4718_v10 = vmul.f32 %v15190_v17, %v4547_v46  ;;  %v12256_v34 = vld [vmem:[%s8213_s17 + $0x30] sm:$0xff]  ;;  %v15258_v11 = vld [vmem:[#allocation45_spill] sm:$0xff] }
 0x447   : > { %v3880_v25 = vmul.f32 %v3592_v54, %v2802_v0  ;;  %v4373_v39 = vmul.f32 %v15192_v2, %v4202_v40  ;;  %v4715_v42 = vmul.f32 %v15170_v52, %v4544_v24  ;;  %v4546_v19 = vsub.f32 %v15193_v62, %v12155_v44 }
 0x448   : > { %v4375_v14 = vmul.f32 %v15171_v43, %v4204_v29  ;;  %vm697_vm8 = vcmp.ge.f32.partialorder %v12256_v34, %v15194_v16  ;;  %v4023_v6 = vadd.f32 %v3879_v22, %v3735_v31  ;;  %vm698_vm9 = vcmp.ge.f32.partialorder %v12256_v34, %v15172_v37 }
 0x449   : > { %v4024_v13 = vadd.f32 %v3880_v25, %v3736_v63  ;;  %v4843_v0 = vmul.f32 %v4373_v39, %v15258_v11  ;;  %v4971_v38 = vmul.f32 %v4715_v42, %v4021_v7  ;;  %v4717_v54 = vmul.f32 %v15174_v59, %v4546_v19 }
 0x44a   : > { %v4845_v46 = vmul.f32 %v4375_v14, %v4022_v32  ;;  %vm932_vm10 = vcmp.lt.f32.partialorder %v12256_v34, %v15175_v60  ;;  %v4846_v44 = vmul.f32 %v4376_v30, %v4023_v6  ;;  %vm933_vm11 = vcmp.lt.f32.partialorder %v12256_v34, %v15176_v51 }
 0x44b   : > { %v4974_v40 = vmul.f32 %v4718_v10, %v4024_v13  ;;  %vm1108_vm12 = vmand %vm697_vm8, %vm932_vm10  ;;  %v1684_v31 = vsub.f32 %v12256_v34, %v15177_v9  ;;  %v5099_v63 = vadd.f32 %v4971_v38, %v4843_v0  ;;  %v4973_v24 = vmul.f32 %v4717_v54, %v4023_v6  ;;  %v15259_v6 = vld [vmem:[#allocation130_spill] sm:$0xff]  ;;  %v15261_v54 = vld [vmem:[#allocation57_spill] sm:$0xff] }
 0x44c   : > { %vm1109_vm13 = vmand %vm698_vm9, %vm933_vm11  ;;  %v6355_v7 = vsel %vm1108_vm12, 1.0, %v14403_v18  ;;  %v1685_v32 = vsub.f32 %v12256_v34, %v15178_v48  ;;  %v2114_v25 = vsub.f32 %v15196_v28, %v12256_v34  ;;  %v2115_v42 = vsub.f32 %v15180_v12, %v12256_v34  ;;  %v15260_v0 = vld [vmem:[#allocation94_spill] sm:$0xff] }
 0x44d   : > { %v5102_v29 = vadd.f32 %v4974_v40, %v4846_v44  ;;  %v6356_v22 = vsel %vm1109_vm13, 1.0, %v14403_v18  ;;  %v1899_v30 = vmul.f32 %v15236_v4, %v1684_v31  ;;  %5691 = vmatmul.mubr.f32.gmra.mrb[42].mxu0 %v5099_v63  ;;  %v5101_v10 = vadd.f32 %v4973_v24, %v4845_v46  ;;  %v15262_v40 = vld [vmem:[#allocation90_spill] sm:$0xff] }
 0x44e   : > { %v1900_v39 = vmul.f32 %v15197_v53, %v1685_v32  ;;  %v3013_v14 = vsub.f32 %v12256_v34, %v15198_v27  ;;  %v2329_v19 = vmul.f32 %v15218_v5, %v2114_v25  ;;  %v3014_v11 = vsub.f32 %v12256_v34, %v15237_v61  ;;  %v15264_v5 = vld [vmem:[#allocation64_spill] sm:$0xff] }
 0x44f   : > { %5835 = vmatprep.mubr.f32.mxu1 %v5102_v29  ;;  %v2489_v13 = vmul.f32 %v15259_v6, %v1899_v30  ;;  %v3403_v38 = vsub.f32 %v15260_v0, %v12256_v34  ;;  %v2330_v46 = vmul.f32 %v15261_v54, %v2115_v42  ;;  %v3404_v63 = vsub.f32 %v15203_v45, %v12256_v34  ;;  %v15263_v30 = vld [vmem:[#allocation66_spill] sm:$0xff]  ;;  %v15268_v45 = vld [vmem:[#allocation73_spill] sm:$0xff] }
 0x450   : > { %5836 = vmatmul.mubr.f32.gmra.mrb[42].mxu1 %v5101_v10  ;;  %v2490_v44 = vmul.f32 %v6355_v7, %v1900_v39  ;;  %v3208_v31 = vmul.f32 %v15262_v40, %v3013_v14  ;;  %v2649_v24 = vmul.f32 %v6355_v7, %v2329_v19  ;;  %v3209_v32 = vmul.f32 %v11541_v15, %v3014_v11  ;;  %v15265_v10 = vld [vmem:[#allocation131_spill] sm:$0xff]  ;;  %v15266_v39 = vld [vmem:[#allocation70_spill] sm:$0xff]  ;;  %v15267_v40 = vld [vmem:[#allocation65_spill] sm:$0xff] }
 0x451   : > { %v3598_v29 = vmul.f32 %v15165_v20, %v3403_v38  ;;  %v4211_v25 = vsub.f32 %v12256_v34, %v15263_v30  ;;  %v2650_v6 = vmul.f32 %v6356_v22, %v2330_v46  ;;  %v3599_v0 = vmul.f32 %v15264_v5, %v3404_v63  ;;  %v15269_v7 = vld [vmem:[#allocation79_spill] sm:$0xff]  ;;  %v15270_v11 = vld [vmem:[#allocation72_spill] sm:$0xff]  ;;  %v15272_v63 = vld [vmem:[#allocation85_spill] sm:$0xff] }
 0x452   : > { %v3742_v61 = vmul.f32 %v3208_v31, %v15265_v10  ;;  %v4553_v42 = vsub.f32 %v15266_v39, %v12256_v34  ;;  %v2809_v14 = vadd.f32 %v2649_v24, %v2489_v13  ;;  %vm699_vm14 = vcmp.ge.f32.partialorder %v12256_v34, %v15268_v45  ;;  %v15271_v46 = vld [vmem:[#allocation80_spill] sm:$0xff]  ;;  %v15273_v13 = vld [vmem:[#allocation75_spill] sm:$0xff] }
 0x453   : > { %v4382_v54 = vmul.f32 %v15267_v40, %v4211_v25  ;;  %vm700_vm15 = vcmp.ge.f32.partialorder %v12256_v34, %v15269_v7  ;;  %v2810_v19 = vadd.f32 %v2650_v6, %v2490_v44  ;;  %vm934_vm0 = vcmp.lt.f32.partialorder %v12256_v34, %v15271_v46  ;;  %v15274_v25 = vld [vmem:[#allocation76_spill] sm:$0xff]  ;;  %v15275_v6 = vld [vmem:[#allocation95_spill] sm:$0xff] }
 0x454   : > { %v4724_v38 = vmul.f32 %v15270_v11, %v4553_v42  ;;  %vm935_vm1 = vcmp.lt.f32.partialorder %v12256_v34, %v15272_v63  ;;  %v3743_v31 = vmul.f32 %v3209_v32, %v2809_v14  ;;  %v3886_v10 = vmul.f32 %v3598_v29, %v2809_v14  ;;  %vm1110_vm2 = vmand %vm699_vm14, %vm934_vm0  ;;  %v15276_v29 = vld [vmem:[#allocation82_spill] sm:$0xff]  ;;  %v15277_v7 = vld [vmem:[#allocation96_spill] sm:$0xff] }
 0x455   : > { %v1686_v24 = vsub.f32 %v12256_v34, %v15273_v13  ;;  %v1687_v40 = vsub.f32 %v12256_v34, %v15274_v25  ;;  %v3887_v45 = vmul.f32 %v3599_v0, %v2810_v19  ;;  %vm1111_vm3 = vmand %vm700_vm15, %vm935_vm1  ;;  %v6357_v44 = vsel %vm1110_vm2, 1.0, %v14403_v18 }
 0x456   : > { %v2116_v42 = vsub.f32 %v15275_v6, %v12256_v34  ;;  %v2117_v11 = vsub.f32 %v15232_v56, %v12256_v34  ;;  %v4030_v63 = vadd.f32 %v3886_v10, %v3742_v61  ;;  %v6358_v32 = vsel %vm1111_vm3, 1.0, %v14403_v18 }
 0x457   : > { %v1901_v14 = vmul.f32 %v15276_v29, %v1686_v24  ;;  %v1902_v13 = vmul.f32 %v11648_v57, %v1687_v40  ;;  %v4031_v46 = vadd.f32 %v3887_v45, %v3743_v31  ;;  %v3015_v39 = vsub.f32 %v12256_v34, %v15277_v7 }
 0x458   : > { %v2331_v25 = vmul.f32 %v11665_v26, %v2116_v42  ;;  %v2332_v0 = vmul.f32 %v15210_v33, %v2117_v11  ;;  %v4852_v30 = vmul.f32 %v4382_v54, %v4030_v63  ;;  %v3016_v61 = vsub.f32 %v12256_v34, %v11680_v1 }
 0x459   : > { %v2491_v6 = vmul.f32 %v6356_v22, %v1901_v14  ;;  %v2492_v5 = vmul.f32 %v6357_v44, %v1902_v13  ;;  %v4980_v10 = vmul.f32 %v4724_v38, %v4031_v46  ;;  %v3210_v45 = vmul.f32 %v11686_v55, %v3015_v39  ;;  %v555_v14 = vld [vmem:[%s8233_s6 + $0x30] sm:$0xff] }
 0x45a   : > { %v2651_v56 = vmul.f32 %v6357_v44, %v2331_v25  ;;  %v2652_v24 = vmul.f32 %v6358_v32, %v2332_v0  ;;  %v3211_v40 = vmul.f32 %v11689_v36, %v3016_v61  ;;  %v3405_v11 = vsub.f32 %v15255_v8, %v12256_v34  ;;  %v556_v0 = vld [vmem:[%s8233_s6 + $0x38] sm:$0xff] }
 0x45b   : > { %v3406_v54 = vsub.f32 %v11701_v50, %v12256_v34  ;;  %v4213_v22 = vsub.f32 %v12256_v34, %v11718_v49  ;;  %v5108_v31 = vadd.f32 %v4980_v10, %v4852_v30  ;;  %v3744_v42 = vmul.f32 %v3210_v45, %v2810_v19 }
 0x45c   : > { %v2811_v13 = vadd.f32 %v2651_v56, %v2491_v6  ;;  %v2812_v38 = vadd.f32 %v2652_v24, %v2492_v5  ;;  %v3600_v25 = vmul.f32 %v15211_v35, %v3405_v11  ;;  %v4555_v32 = vsub.f32 %v15234_v47, %v12256_v34 }
 0x45d   : > { %v3601_v44 = vmul.f32 %v15214_v21, %v3406_v54  ;;  %v4384_v39 = vmul.f32 %v15256_v3, %v4213_v22  ;;  %5695 = vmatprep.mubr.f32.mxu0 %v5108_v31  ;;  %v4210_v30 = vsub.f32 %v12256_v34, %v15213_v23  ;;  %v4552_v5 = vsub.f32 %v15257_v41, %v12256_v34  ;;  %v12357_v41 = vld [vmem:[%s8213_s17 + $0x38] sm:$0xff] }
 0x45e   : > { %v3745_v61 = vmul.f32 %v3211_v40, %v2811_v13  ;;  %v4212_v56 = vsub.f32 %v12256_v34, %v15191_v58  ;;  %v3888_v19 = vmul.f32 %v3600_v25, %v2811_v13  ;;  %v4726_v10 = vmul.f32 %v15190_v17, %v4555_v32  ;;  %v15278_v13 = vld [vmem:[#allocation132_spill] sm:$0xff] }
 0x45f   : > { %v3889_v6 = vmul.f32 %v3601_v44, %v2812_v38  ;;  %v4554_v24 = vsub.f32 %v15193_v62, %v12256_v34  ;;  %v4381_v45 = vmul.f32 %v15192_v2, %v4210_v30  ;;  %v4723_v40 = vmul.f32 %v15170_v52, %v4552_v5 }
 0x460   : > { %v4383_v11 = vmul.f32 %v15171_v43, %v4212_v56  ;;  %v7014_v54 = vpack.c.bf16 %v556_v0, %v555_v14  ;;  %v4032_v22 = vadd.f32 %v3888_v19, %v3744_v42  ;;  %vm708_vm4 = vcmp.ge.f32.partialorder %v12357_v41, %v15194_v16 }
 0x461   : > { %v4033_v31 = vadd.f32 %v3889_v6, %v3745_v61  ;;  %v4725_v3 = vmul.f32 %v15174_v59, %v4554_v24  ;;  %v4851_v38 = vmul.f32 %v4381_v45, %v15278_v13  ;;  %v4979_v25 = vmul.f32 %v4723_v40, %v4030_v63  ;;  %v15280_v45 = vld [vmem:[#allocation84_spill] sm:$0xff]  ;;  %v15283_v13 = vld [vmem:[#allocation94_spill] sm:$0xff] }
 0x462   : > { %v4853_v34 = vmul.f32 %v4383_v11, %v4031_v46  ;;  %7015 = vmatprep.subr.bf16.mxu0 %v7014_v54  ;;  %7037 = vmatprep.subr.bf16.mxu1 %v7014_v54  ;;  %v4854_v44 = vmul.f32 %v4384_v39, %v4032_v22  ;;  %vm709_vm5 = vcmp.ge.f32.partialorder %v12357_v41, %v15172_v37  ;;  %v15281_v11 = vld [vmem:[#allocation57_spill] sm:$0xff] }
 0x463   : > { %v4982_v32 = vmul.f32 %v4726_v10, %v4033_v31  ;;  %v4981_v30 = vmul.f32 %v4725_v3, %v4032_v22  ;;  %7017 = vmatpush3.bf16.msra.mxu0 %v7014_v54  ;;  %7045 = vmatpush3.bf16.msra.mxu1 %v7014_v54  ;;  %v5107_v42 = vadd.f32 %v4979_v25, %v4851_v38  ;;  %v15279_v10 = vld [vmem:[#allocation60_spill] sm:$0xff]  ;;  %v15282_v22 = vld [vmem:[#allocation90_spill] sm:$0xff]  ;;  %v15284_v25 = vld [vmem:[#allocation49_spill] sm:$0xff] }
 0x464   : > { %vm943_vm6 = vcmp.lt.f32.partialorder %v12357_v41, %v15175_v60  ;;  %vm944_vm7 = vcmp.lt.f32.partialorder %v12357_v41, %v15176_v51  ;;  %v1694_v3 = vsub.f32 %v12357_v41, %v15177_v9  ;;  %v1695_v46 = vsub.f32 %v12357_v41, %v15178_v48 }
 0x465   : > { %v5110_v14 = vadd.f32 %v4982_v32, %v4854_v44  ;;  %v5109_v63 = vadd.f32 %v4981_v30, %v4853_v34  ;;  %vm1119_vm8 = vmand %vm708_vm4, %vm943_vm6  ;;  %5696 = vmatmul.mubr.f32.gmra.mrb[44].mxu0 %v5107_v42  ;;  %v2124_v0 = vsub.f32 %v15196_v28, %v12357_v41  ;;  %v2125_v61 = vsub.f32 %v15180_v12, %v12357_v41  ;;  %v15285_v30 = vld [vmem:[#allocation63_spill] sm:$0xff] }
 0x466   : > { %vm1120_vm9 = vmand %vm709_vm5, %vm944_vm7  ;;  %v6366_v39 = vsel %vm1119_vm8, 1.0, %v14403_v18  ;;  %v3022_v5 = vsub.f32 %v12357_v41, %v15198_v27  ;;  %v1909_v19 = vmul.f32 %v15236_v4, %v1694_v3  ;;  %v1910_v6 = vmul.f32 %v15197_v53, %v1695_v46  ;;  %v15286_v46 = vld [vmem:[#allocation133_spill] sm:$0xff] }
 0x467   : > { %5840 = vmatprep.mubr.f32.mxu1 %v5110_v14  ;;  %v6367_v56 = vsel %vm1120_vm9, 1.0, %v14403_v18  ;;  %v3023_v24 = vsub.f32 %v12357_v41, %v15279_v10  ;;  %v2339_v40 = vmul.f32 %v15280_v45, %v2124_v0  ;;  %v2340_v54 = vmul.f32 %v15281_v11, %v2125_v61  ;;  %v15287_v61 = vld [vmem:[#allocation64_spill] sm:$0xff] }
 0x468   : > { %5841 = vmatmul.mubr.f32.gmra.mrb[44].mxu1 %v5109_v63  ;;  %v3217_v31 = vmul.f32 %v15282_v22, %v3022_v5  ;;  %v3412_v38 = vsub.f32 %v15283_v13, %v12357_v41  ;;  %v2499_v34 = vmul.f32 %v15284_v25, %v1909_v19  ;;  %v2500_v44 = vmul.f32 %v6366_v39, %v1910_v6  ;;  %v15288_v5 = vld [vmem:[#allocation66_spill] sm:$0xff]  ;;  %v15290_v6 = vld [vmem:[#allocation73_spill] sm:$0xff] }
 0x469   : > { %v3218_v32 = vmul.f32 %v11541_v15, %v3023_v24  ;;  %v3413_v42 = vsub.f32 %v15285_v30, %v12357_v41  ;;  %v2659_v14 = vmul.f32 %v6366_v39, %v2339_v40  ;;  %v2660_v3 = vmul.f32 %v6367_v56, %v2340_v54  ;;  %v15289_v13 = vld [vmem:[#allocation70_spill] sm:$0xff]  ;;  %v15291_v15 = vld [vmem:[#allocation79_spill] sm:$0xff]  ;;  %v15292_v39 = vld [vmem:[#allocation80_spill] sm:$0xff] }
 0x46a   : > { %v3607_v63 = vmul.f32 %v15165_v20, %v3412_v38  ;;  %v3751_v0 = vmul.f32 %v3217_v31, %v15286_v46  ;;  %v4219_v22 = vsub.f32 %v12357_v41, %v15288_v5  ;;  %v4561_v19 = vsub.f32 %v15289_v13, %v12357_v41  ;;  %v15293_v40 = vld [vmem:[#allocation65_spill] sm:$0xff]  ;;  %v15294_v31 = vld [vmem:[#allocation72_spill] sm:$0xff]  ;;  %v15296_v46 = vld [vmem:[#allocation75_spill] sm:$0xff] }
 0x46b   : > { %v3608_v10 = vmul.f32 %v15287_v61, %v3413_v42  ;;  %vm710_vm10 = vcmp.ge.f32.partialorder %v12357_v41, %v15290_v6  ;;  %v2819_v24 = vadd.f32 %v2659_v14, %v2499_v34  ;;  %v2820_v25 = vadd.f32 %v2660_v3, %v2500_v44  ;;  %v15295_v42 = vld [vmem:[#allocation85_spill] sm:$0xff] }
 0x46c   : > { %vm711_vm11 = vcmp.ge.f32.partialorder %v12357_v41, %v15291_v15  ;;  %vm945_vm12 = vcmp.lt.f32.partialorder %v12357_v41, %v15292_v39  ;;  %v4390_v54 = vmul.f32 %v15293_v40, %v4219_v22  ;;  %v4732_v38 = vmul.f32 %v15294_v31, %v4561_v19  ;;  %v15297_v39 = vld [vmem:[#allocation76_spill] sm:$0xff]  ;;  %v15298_v31 = vld [vmem:[#allocation95_spill] sm:$0xff] }
 0x46d   : > { %vm946_vm13 = vcmp.lt.f32.partialorder %v12357_v41, %v15295_v42  ;;  %vm1121_vm14 = vmand %vm710_vm10, %vm945_vm12  ;;  %v1696_v13 = vsub.f32 %v12357_v41, %v15296_v46  ;;  %v3752_v6 = vmul.f32 %v3218_v32, %v2819_v24  ;;  %v3895_v34 = vmul.f32 %v3607_v63, %v2819_v24  ;;  %v15299_v46 = vld [vmem:[#allocation98_spill] sm:$0xff] }
 0x46e   : > { %v3896_v44 = vmul.f32 %v3608_v10, %v2820_v25  ;;  %vm1122_vm15 = vmand %vm711_vm11, %vm946_vm13  ;;  %v6368_v14 = vsel %vm1121_vm14, 1.0, %v14403_v18  ;;  %v1697_v22 = vsub.f32 %v12357_v41, %v15297_v39  ;;  %v2126_v42 = vsub.f32 %v15298_v31, %v12357_v41 }
 0x46f   : > { %v6369_v3 = vsel %vm1122_vm15, 1.0, %v14403_v18  ;;  %v1911_v19 = vmul.f32 %v15276_v29, %v1696_v13  ;;  %v4039_v15 = vadd.f32 %v3895_v34, %v3751_v0  ;;  %v2127_v32 = vsub.f32 %v15299_v46, %v12357_v41 }
 0x470   : > { %v4040_v40 = vadd.f32 %v3896_v44, %v3752_v6  ;;  %v3024_v10 = vsub.f32 %v12357_v41, %v15277_v7  ;;  %v1912_v63 = vmul.f32 %v11648_v57, %v1697_v22  ;;  %v2341_v24 = vmul.f32 %v11665_v26, %v2126_v42 }
 0x471   : > { %v2501_v61 = vmul.f32 %v6367_v56, %v1911_v19  ;;  %v3025_v39 = vsub.f32 %v12357_v41, %v11680_v1  ;;  %v4860_v13 = vmul.f32 %v4390_v54, %v4039_v15  ;;  %v2342_v31 = vmul.f32 %v15210_v33, %v2127_v32 }
 0x472   : > { %v4988_v29 = vmul.f32 %v4732_v38, %v4040_v40  ;;  %v3219_v0 = vmul.f32 %v11686_v55, %v3024_v10  ;;  %v2502_v6 = vmul.f32 %v6368_v14, %v1912_v63  ;;  %v2661_v34 = vmul.f32 %v6368_v14, %v2341_v24 }
 0x473   : > { %v3220_v44 = vmul.f32 %v11689_v36, %v3025_v39  ;;  %v3414_v7 = vsub.f32 %v15255_v8, %v12357_v41  ;;  %v2662_v57 = vmul.f32 %v6369_v3, %v2342_v31  ;;  %v3415_v56 = vsub.f32 %v11701_v50, %v12357_v41  ;;  %v15300_v31 = vld [vmem:[#allocation103_spill] sm:$0xff] }
 0x474   : > { %v5116_v22 = vadd.f32 %v4988_v29, %v4860_v13  ;;  %v3753_v42 = vmul.f32 %v3219_v0, %v2820_v25  ;;  %v2821_v19 = vadd.f32 %v2661_v34, %v2501_v61  ;;  %v4221_v38 = vsub.f32 %v12357_v41, %v11718_v49 }
 0x475   : > { %v3609_v54 = vmul.f32 %v15211_v35, %v3414_v7  ;;  %v4563_v14 = vsub.f32 %v15234_v47, %v12357_v41  ;;  %v2822_v39 = vadd.f32 %v2662_v57, %v2502_v6  ;;  %v3610_v32 = vmul.f32 %v15214_v21, %v3415_v56  ;;  %v15301_v7 = vld [vmem:[#allocation111_spill] sm:$0xff]  ;;  %v15302_v56 = vld [vmem:[#allocation134_spill] sm:$0xff] }
 0x476   : > { %5700 = vmatprep.mubr.f32.mxu0 %v5116_v22  ;;  %v4218_v29 = vsub.f32 %v12357_v41, %v15213_v23  ;;  %v4560_v25 = vsub.f32 %v15300_v31, %v12357_v41  ;;  %v3754_v61 = vmul.f32 %v3220_v44, %v2821_v19  ;;  %v4392_v10 = vmul.f32 %v15301_v7, %v4221_v38  ;;  %v12456_v22 = vld [vmem:[%s8213_s17 + $0x40] sm:$0xff] }
 0x477   : > { %v3897_v3 = vmul.f32 %v3609_v54, %v2821_v19  ;;  %v4734_v63 = vmul.f32 %v15190_v17, %v4563_v14  ;;  %v3898_v24 = vmul.f32 %v3610_v32, %v2822_v39  ;;  %v4220_v57 = vsub.f32 %v12357_v41, %v15191_v58 }
 0x478   : > { %v4389_v13 = vmul.f32 %v15192_v2, %v4218_v29  ;;  %v4731_v0 = vmul.f32 %v15170_v52, %v4560_v25  ;;  %v4562_v34 = vsub.f32 %v15193_v62, %v12357_v41  ;;  %vm719_vm0 = vcmp.ge.f32.partialorder %v12456_v22, %v15194_v16 }
 0x479   : > { %v4041_v6 = vadd.f32 %v3897_v3, %v3753_v42  ;;  %vm720_vm1 = vcmp.ge.f32.partialorder %v12456_v22, %v15172_v37  ;;  %v4042_v44 = vadd.f32 %v3898_v24, %v3754_v61  ;;  %v4391_v38 = vmul.f32 %v15171_v43, %v4220_v57 }
 0x47a   : > { %v4859_v19 = vmul.f32 %v4389_v13, %v15302_v56  ;;  %v4987_v54 = vmul.f32 %v4731_v0, %v4039_v15  ;;  %v4733_v42 = vmul.f32 %v15174_v59, %v4562_v34  ;;  %vm954_vm2 = vcmp.lt.f32.partialorder %v12456_v22, %v15175_v60 }
 0x47b   : > { %v4862_v14 = vmul.f32 %v4392_v10, %v4041_v6  ;;  %vm955_vm3 = vcmp.lt.f32.partialorder %v12456_v22, %v15176_v51  ;;  %v4990_v41 = vmul.f32 %v4734_v63, %v4042_v44  ;;  %v4861_v32 = vmul.f32 %v4391_v38, %v4040_v40  ;;  %vm1130_vm4 = vmand %vm719_vm0, %vm954_vm2  ;;  %v15303_v44 = vld [vmem:[#allocation135_spill] sm:$0xff]  ;;  %v15305_v38 = vld [vmem:[#allocation94_spill] sm:$0xff] }
 0x47c   : > { %v5115_v39 = vadd.f32 %v4987_v54, %v4859_v19  ;;  %v1704_v29 = vsub.f32 %v12456_v22, %v15177_v9  ;;  %v4989_v25 = vmul.f32 %v4733_v42, %v4041_v6  ;;  %vm1131_vm5 = vmand %vm720_vm1, %vm955_vm3  ;;  %v6377_v15 = vsel %vm1130_vm4, 1.0, %v14403_v18  ;;  %v15304_v19 = vld [vmem:[#allocation60_spill] sm:$0xff] }
 0x47d   : > { %v1705_v61 = vsub.f32 %v12456_v22, %v15178_v48  ;;  %v2134_v3 = vsub.f32 %v15196_v28, %v12456_v22  ;;  %v5118_v10 = vadd.f32 %v4990_v41, %v4862_v14  ;;  %v6378_v40 = vsel %vm1131_vm5, 1.0, %v14403_v18 }
 0x47e   : > { %5701 = vmatmul.mubr.f32.gmra.mrb[46].mxu0 %v5115_v39  ;;  %v1919_v63 = vmul.f32 %v15236_v4, %v1704_v29  ;;  %v2135_v24 = vsub.f32 %v15180_v12, %v12456_v22  ;;  %v5117_v13 = vadd.f32 %v4989_v25, %v4861_v32  ;;  %v3031_v6 = vsub.f32 %v12456_v22, %v15198_v27  ;;  %v15306_v39 = vld [vmem:[#allocation90_spill] sm:$0xff] }
 0x47f   : > { %v1920_v0 = vmul.f32 %v15197_v53, %v1705_v61  ;;  %v2349_v57 = vmul.f32 %v15280_v45, %v2134_v3  ;;  %5845 = vmatprep.mubr.f32.mxu1 %v5118_v10  ;;  %v3032_v54 = vsub.f32 %v12456_v22, %v15304_v19  ;;  %v3421_v14 = vsub.f32 %v15305_v38, %v12456_v22  ;;  %v15307_v61 = vld [vmem:[#allocation61_spill] sm:$0xff]  ;;  %v15309_v38 = vld [vmem:[#allocation136_spill] sm:$0xff] }
 0x480   : > { %v2350_v34 = vmul.f32 %v15281_v11, %v2135_v24  ;;  %v2509_v56 = vmul.f32 %v15303_v44, %v1919_v63  ;;  %5846 = vmatmul.mubr.f32.gmra.mrb[46].mxu1 %v5117_v13  ;;  %v3226_v32 = vmul.f32 %v15306_v39, %v3031_v6  ;;  %v3422_v29 = vsub.f32 %v15285_v30, %v12456_v22  ;;  %v15308_v44 = vld [vmem:[#allocation64_spill] sm:$0xff]  ;;  %v15311_v6 = vld [vmem:[#allocation65_spill] sm:$0xff] }
 0x481   : > { %v2510_v42 = vmul.f32 %v6377_v15, %v1920_v0  ;;  %v2669_v41 = vmul.f32 %v6377_v15, %v2349_v57  ;;  %v3227_v3 = vmul.f32 %v15307_v61, %v3032_v54  ;;  %v3616_v10 = vmul.f32 %v15165_v20, %v3421_v14  ;;  %v15310_v15 = vld [vmem:[#allocation70_spill] sm:$0xff]  ;;  %v15312_v30 = vld [vmem:[#allocation73_spill] sm:$0xff] }
 0x482   : > { %v2670_v25 = vmul.f32 %v6378_v40, %v2350_v34  ;;  %v4227_v63 = vsub.f32 %v12456_v22, %v15288_v5  ;;  %v3617_v11 = vmul.f32 %v15308_v44, %v3422_v29  ;;  %v3760_v13 = vmul.f32 %v3226_v32, %v15309_v38  ;;  %v15313_v34 = vld [vmem:[#allocation79_spill] sm:$0xff]  ;;  %v15314_v5 = vld [vmem:[#allocation72_spill] sm:$0xff]  ;;  %v15316_v32 = vld [vmem:[#allocation85_spill] sm:$0xff] }
 0x483   : > { %v2829_v24 = vadd.f32 %v2669_v41, %v2509_v56  ;;  %v4569_v0 = vsub.f32 %v15310_v15, %v12456_v22  ;;  %vm721_vm6 = vcmp.ge.f32.partialorder %v12456_v22, %v15312_v30  ;;  %vm722_vm7 = vcmp.ge.f32.partialorder %v12456_v22, %v15313_v34  ;;  %v15315_v41 = vld [vmem:[#allocation80_spill] sm:$0xff]  ;;  %v15321_v34 = vld [vmem:[#allocation83_spill] sm:$0xff] }
 0x484   : > { %v2830_v57 = vadd.f32 %v2670_v25, %v2510_v42  ;;  %v4398_v39 = vmul.f32 %v15311_v6, %v4227_v63  ;;  %vm956_vm8 = vcmp.lt.f32.partialorder %v12456_v22, %v15315_v41  ;;  %vm957_vm9 = vcmp.lt.f32.partialorder %v12456_v22, %v15316_v32  ;;  %v15317_v42 = vld [vmem:[#allocation75_spill] sm:$0xff]  ;;  %v15318_v25 = vld [vmem:[#allocation76_spill] sm:$0xff] }
 0x485   : > { %v3761_v54 = vmul.f32 %v3227_v3, %v2829_v24  ;;  %v3904_v14 = vmul.f32 %v3616_v10, %v2829_v24  ;;  %v4740_v56 = vmul.f32 %v15314_v5, %v4569_v0  ;;  %vm1132_vm10 = vmand %vm721_vm6, %vm956_vm8  ;;  %v1706_v29 = vsub.f32 %v12456_v22, %v15317_v42  ;;  %v15319_v10 = vld [vmem:[#allocation95_spill] sm:$0xff]  ;;  %v15320_v5 = vld [vmem:[#allocation82_spill] sm:$0xff] }
 0x486   : > { %v3905_v38 = vmul.f32 %v3617_v11, %v2830_v57  ;;  %v1707_v63 = vsub.f32 %v12456_v22, %v15318_v25  ;;  %vm1133_vm11 = vmand %vm722_vm7, %vm957_vm9  ;;  %v6379_v3 = vsel %vm1132_vm10, 1.0, %v14403_v18  ;;  %v2136_v24 = vsub.f32 %v15319_v10, %v12456_v22 }
 0x487   : > { %v4048_v6 = vadd.f32 %v3904_v14, %v3760_v13  ;;  %v2137_v11 = vsub.f32 %v15299_v46, %v12456_v22  ;;  %v6380_v32 = vsel %vm1133_vm11, 1.0, %v14403_v18  ;;  %v1921_v41 = vmul.f32 %v15320_v5, %v1706_v29  ;;  %v15322_v14 = vld [vmem:[#allocation96_spill] sm:$0xff] }
 0x488   : > { %v4049_v0 = vadd.f32 %v3905_v38, %v3761_v54  ;;  %v1922_v42 = vmul.f32 %v15321_v34, %v1707_v63  ;;  %v2351_v25 = vmul.f32 %v11665_v26, %v2136_v24  ;;  %v3033_v15 = vsub.f32 %v12456_v22, %v15322_v14 }
 0x489   : > { %v4868_v30 = vmul.f32 %v4398_v39, %v4048_v6  ;;  %v2352_v13 = vmul.f32 %v15210_v33, %v2137_v11  ;;  %v2511_v10 = vmul.f32 %v6378_v40, %v1921_v41  ;;  %v3034_v54 = vsub.f32 %v12456_v22, %v11680_v1  ;;  %v557_v11 = vld [vmem:[%s8233_s6 + $0x40] sm:$0xff] }
 0x48a   : > { %v4996_v44 = vmul.f32 %v4740_v56, %v4049_v0  ;;  %v2512_v20 = vmul.f32 %v6379_v3, %v1922_v42  ;;  %v2671_v38 = vmul.f32 %v6379_v3, %v2351_v25  ;;  %v3228_v29 = vmul.f32 %v11686_v55, %v3033_v15 }
 0x48b   : > { %v2672_v46 = vmul.f32 %v6380_v32, %v2352_v13  ;;  %v3423_v39 = vsub.f32 %v15255_v8, %v12456_v22  ;;  %v3229_v24 = vmul.f32 %v11689_v36, %v3034_v54  ;;  %v3424_v56 = vsub.f32 %v11701_v50, %v12456_v22  ;;  %v558_v13 = vld [vmem:[%s8233_s6 + $0x48] sm:$0xff] }
 0x48c   : > { %v5124_v63 = vadd.f32 %v4996_v44, %v4868_v30  ;;  %v4229_v40 = vsub.f32 %v12456_v22, %v11718_v49  ;;  %v2831_v41 = vadd.f32 %v2671_v38, %v2511_v10  ;;  %v3762_v25 = vmul.f32 %v3228_v29, %v2830_v57 }
 0x48d   : > { %v2832_v42 = vadd.f32 %v2672_v46, %v2512_v20  ;;  %v3618_v32 = vmul.f32 %v15211_v35, %v3423_v39  ;;  %v3619_v15 = vmul.f32 %v15214_v21, %v3424_v56  ;;  %v4571_v30 = vsub.f32 %v15234_v47, %v12456_v22 }
 0x48e   : > { %5705 = vmatprep.mubr.f32.mxu0 %v5124_v63  ;;  %v4400_v3 = vmul.f32 %v15301_v7, %v4229_v40  ;;  %v4226_v44 = vsub.f32 %v12456_v22, %v15213_v23  ;;  %v3763_v54 = vmul.f32 %v3229_v24, %v2831_v41  ;;  %v4568_v20 = vsub.f32 %v15300_v31, %v12456_v22 }
 0x48f   : > { %v3906_v10 = vmul.f32 %v3618_v32, %v2831_v41  ;;  %v4228_v46 = vsub.f32 %v12456_v22, %v15191_v58  ;;  %v3907_v57 = vmul.f32 %v3619_v15, %v2832_v42  ;;  %v4742_v38 = vmul.f32 %v15190_v17, %v4571_v30  ;;  %v15323_v32 = vld [vmem:[#allocation137_spill] sm:$0xff] }
 0x490   : > { %v4397_v29 = vmul.f32 %v15192_v2, %v4226_v44  ;;  %v4570_v39 = vsub.f32 %v15193_v62, %v12456_v22  ;;  %v4739_v56 = vmul.f32 %v15170_v52, %v4568_v20  ;;  %v7018_v40 = vpack.c.bf16 %v558_v13, %v557_v11  ;;  %v12562_v58 = vld [vmem:[%s8213_s17 + $0x48] sm:$0xff] }
 0x491   : > { %v4050_v63 = vadd.f32 %v3906_v10, %v3762_v25  ;;  %v4399_v24 = vmul.f32 %v15171_v43, %v4228_v46  ;;  %v4051_v41 = vadd.f32 %v3907_v57, %v3763_v54  ;;  %vm730_vm12 = vcmp.ge.f32.partialorder %v12562_v58, %v15194_v16 }
 0x492   : > { %v4867_v31 = vmul.f32 %v4397_v29, %v15323_v32  ;;  %v4741_v23 = vmul.f32 %v15174_v59, %v4570_v39  ;;  %v4995_v15 = vmul.f32 %v4739_v56, %v4048_v6  ;;  %7019 = vmatprep.subr.bf16.mxu0 %v7018_v40  ;;  %7038 = vmatprep.subr.bf16.mxu1 %v7018_v40  ;;  %v15324_v29 = vld [vmem:[#allocation57_spill] sm:$0xff] }
 0x493   : > { %v4870_v42 = vmul.f32 %v4400_v3, %v4050_v63  ;;  %v4869_v30 = vmul.f32 %v4399_v24, %v4049_v0  ;;  %v4998_v22 = vmul.f32 %v4742_v38, %v4051_v41  ;;  %7021 = vmatpush3.bf16.msra.mxu0 %v7018_v40  ;;  %7046 = vmatpush3.bf16.msra.mxu1 %v7018_v40  ;;  %v15326_v24 = vld [vmem:[#allocation90_spill] sm:$0xff] }
 0x494   : > { %v4997_v25 = vmul.f32 %v4741_v23, %v4050_v63  ;;  %vm731_vm13 = vcmp.ge.f32.partialorder %v12562_v58, %v15172_v37  ;;  %v5123_v44 = vadd.f32 %v4995_v15, %v4867_v31  ;;  %vm965_vm14 = vcmp.lt.f32.partialorder %v12562_v58, %v15175_v60  ;;  %v15325_v63 = vld [vmem:[#allocation138_spill] sm:$0xff] }
 0x495   : > { %vm966_vm15 = vcmp.lt.f32.partialorder %v12562_v58, %v15176_v51  ;;  %v1714_v6 = vsub.f32 %v12562_v58, %v15177_v9  ;;  %v5126_v0 = vadd.f32 %v4998_v22, %v4870_v42  ;;  %vm1141_vm0 = vmand %vm730_vm12, %vm965_vm14  ;;  %v1715_v23 = vsub.f32 %v12562_v58, %v15178_v48  ;;  %v15327_v41 = vld [vmem:[#allocation94_spill] sm:$0xff]  ;;  %v15328_v22 = vld [vmem:[#allocation63_spill] sm:$0xff] }
 0x496   : > { %v5125_v3 = vadd.f32 %v4997_v25, %v4869_v30  ;;  %v2144_v31 = vsub.f32 %v15196_v28, %v12562_v58  ;;  %5706 = vmatmul.mubr.f32.gmra.mrb[48].mxu0 %v5123_v44  ;;  %vm1142_vm1 = vmand %vm731_vm13, %vm966_vm15  ;;  %v6388_v11 = vsel %vm1141_vm0, 1.0, %v14403_v18  ;;  %v2145_v54 = vsub.f32 %v15180_v12, %v12562_v58 }
 0x497   : > { %v1929_v13 = vmul.f32 %v15236_v4, %v1714_v6  ;;  %v3040_v10 = vsub.f32 %v12562_v58, %v15198_v27  ;;  %5850 = vmatprep.mubr.f32.mxu1 %v5126_v0  ;;  %v6389_v20 = vsel %vm1142_vm1, 1.0, %v14403_v18  ;;  %v1930_v46 = vmul.f32 %v15197_v53, %v1715_v23  ;;  %v15329_v6 = vld [vmem:[#allocation97_spill] sm:$0xff] }
 0x498   : > { %v2359_v57 = vmul.f32 %v15280_v45, %v2144_v31  ;;  %v3041_v38 = vsub.f32 %v12562_v58, %v15304_v19  ;;  %5851 = vmatmul.mubr.f32.gmra.mrb[48].mxu1 %v5125_v3  ;;  %v2360_v39 = vmul.f32 %v15324_v29, %v2145_v54  ;;  %v3430_v32 = vsub.f32 %v15327_v41, %v12562_v58  ;;  %v15330_v3 = vld [vmem:[#allocation139_spill] sm:$0xff]  ;;  %v15331_v31 = vld [vmem:[#allocation66_spill] sm:$0xff] }
 0x499   : > { %v2519_v56 = vmul.f32 %v15325_v63, %v1929_v13  ;;  %v3235_v40 = vmul.f32 %v15326_v24, %v3040_v10  ;;  %v2520_v42 = vmul.f32 %v6388_v11, %v1930_v46  ;;  %v3431_v25 = vsub.f32 %v15328_v22, %v12562_v58  ;;  %v15332_v10 = vld [vmem:[#allocation64_spill] sm:$0xff]  ;;  %v15333_v24 = vld [vmem:[#allocation70_spill] sm:$0xff] }
 0x49a   : > { %v2679_v15 = vmul.f32 %v6388_v11, %v2359_v57  ;;  %v3236_v30 = vmul.f32 %v15307_v61, %v3041_v38  ;;  %v2680_v44 = vmul.f32 %v6389_v20, %v2360_v39  ;;  %v3625_v0 = vmul.f32 %v15329_v6, %v3430_v32  ;;  %v15334_v11 = vld [vmem:[#allocation73_spill] sm:$0xff]  ;;  %v15336_v39 = vld [vmem:[#allocation79_spill] sm:$0xff]  ;;  %v15337_v32 = vld [vmem:[#allocation80_spill] sm:$0xff] }
 0x49b   : > { %v3769_v23 = vmul.f32 %v3235_v40, %v15330_v3  ;;  %v4235_v13 = vsub.f32 %v12562_v58, %v15331_v31  ;;  %v3626_v63 = vmul.f32 %v15332_v10, %v3431_v25  ;;  %v4577_v46 = vsub.f32 %v15333_v24, %v12562_v58  ;;  %v15335_v38 = vld [vmem:[#allocation65_spill] sm:$0xff] }
 0x49c   : > { %v2839_v54 = vadd.f32 %v2679_v15, %v2519_v56  ;;  %vm732_vm2 = vcmp.ge.f32.partialorder %v12562_v58, %v15334_v11  ;;  %v2840_v57 = vadd.f32 %v2680_v44, %v2520_v42  ;;  %vm733_vm3 = vcmp.ge.f32.partialorder %v12562_v58, %v15336_v39  ;;  %v15338_v56 = vld [vmem:[#allocation72_spill] sm:$0xff]  ;;  %v15339_v25 = vld [vmem:[#allocation85_spill] sm:$0xff]  ;;  %v15340_v44 = vld [vmem:[#allocation75_spill] sm:$0xff] }
 0x49d   : > { %v4406_v61 = vmul.f32 %v15335_v38, %v4235_v13  ;;  %vm967_vm4 = vcmp.lt.f32.partialorder %v12562_v58, %v15337_v32  ;;  %v4748_v15 = vmul.f32 %v15338_v56, %v4577_v46  ;;  %vm968_vm5 = vcmp.lt.f32.partialorder %v12562_v58, %v15339_v25  ;;  %v15341_v11 = vld [vmem:[#allocation76_spill] sm:$0xff]  ;;  %v15343_v46 = vld [vmem:[#allocation98_spill] sm:$0xff] }
 0x49e   : > { %v3770_v40 = vmul.f32 %v3236_v30, %v2839_v54  ;;  %v3913_v3 = vmul.f32 %v3625_v0, %v2839_v54  ;;  %vm1143_vm6 = vmand %vm732_vm2, %vm967_vm4  ;;  %v3914_v24 = vmul.f32 %v3626_v63, %v2840_v57  ;;  %v1716_v13 = vsub.f32 %v12562_v58, %v15340_v44  ;;  %v15342_v0 = vld [vmem:[#allocation95_spill] sm:$0xff] }
 0x49f   : > { %vm1144_vm7 = vmand %vm733_vm3, %vm968_vm5  ;;  %v6390_v42 = vsel %vm1143_vm6, 1.0, %v14403_v18  ;;  %v1717_v39 = vsub.f32 %v12562_v58, %v15341_v11  ;;  %v2146_v54 = vsub.f32 %v15342_v0, %v12562_v58  ;;  %v2147_v25 = vsub.f32 %v15343_v46, %v12562_v58 }
 0x4a0   : > { %v4057_v38 = vadd.f32 %v3913_v3, %v3769_v23  ;;  %v6391_v30 = vsel %vm1144_vm7, 1.0, %v14403_v18  ;;  %v4058_v56 = vadd.f32 %v3914_v24, %v3770_v40  ;;  %v1931_v63 = vmul.f32 %v15320_v5, %v1716_v13 }
 0x4a1   : > { %v1932_v32 = vmul.f32 %v15321_v34, %v1717_v39  ;;  %v3042_v44 = vsub.f32 %v12562_v58, %v15322_v14  ;;  %v2361_v11 = vmul.f32 %v11665_v26, %v2146_v54  ;;  %v2362_v23 = vmul.f32 %v15210_v33, %v2147_v25 }
 0x4a2   : > { %v4876_v31 = vmul.f32 %v4406_v61, %v4057_v38  ;;  %v3043_v3 = vsub.f32 %v12562_v58, %v11680_v1  ;;  %v5004_v0 = vmul.f32 %v4748_v15, %v4058_v56  ;;  %v2521_v10 = vmul.f32 %v6389_v20, %v1931_v63 }
 0x4a3   : > { %v2522_v6 = vmul.f32 %v6390_v42, %v1932_v32  ;;  %v3237_v24 = vmul.f32 %v11686_v55, %v3042_v44  ;;  %v2681_v40 = vmul.f32 %v6390_v42, %v2361_v11  ;;  %v2682_v13 = vmul.f32 %v6391_v30, %v2362_v23  ;;  %v15344_v44 = vld [vmem:[#allocation99_spill] sm:$0xff] }
 0x4a4   : > { %v3238_v39 = vmul.f32 %v11689_v36, %v3043_v3  ;;  %v3432_v14 = vsub.f32 %v15255_v8, %v12562_v58  ;;  %v5132_v61 = vadd.f32 %v5004_v0, %v4876_v31  ;;  %v3433_v54 = vsub.f32 %v11701_v50, %v12562_v58 }
 0x4a5   : > { %v3771_v25 = vmul.f32 %v3237_v24, %v2840_v57  ;;  %v4237_v1 = vsub.f32 %v12562_v58, %v11718_v49  ;;  %v2841_v15 = vadd.f32 %v2681_v40, %v2521_v10  ;;  %v2842_v20 = vadd.f32 %v2682_v13, %v2522_v6  ;;  %v15345_v57 = vld [vmem:[#allocation103_spill] sm:$0xff] }
 0x4a6   : > { %v3627_v32 = vmul.f32 %v15211_v35, %v3432_v14  ;;  %v4579_v11 = vsub.f32 %v15234_v47, %v12562_v58  ;;  %5710 = vmatprep.mubr.f32.mxu0 %v5132_v61  ;;  %v3628_v42 = vmul.f32 %v15214_v21, %v3433_v54  ;;  %v4234_v30 = vsub.f32 %v12562_v58, %v15344_v44  ;;  %v15346_v14 = vld [vmem:[#allocation67_spill] sm:$0xff]  ;;  %v12661_v54 = vld [vmem:[%s8213_s17 + $0x50] sm:$0xff] }
 0x4a7   : > { %v4408_v31 = vmul.f32 %v15301_v7, %v4237_v1  ;;  %v4576_v0 = vsub.f32 %v15345_v57, %v12562_v58  ;;  %v3772_v63 = vmul.f32 %v3238_v39, %v2841_v15  ;;  %v4236_v23 = vsub.f32 %v12562_v58, %v15346_v14 }
 0x4a8   : > { %v3915_v10 = vmul.f32 %v3627_v32, %v2841_v15  ;;  %v4750_v6 = vmul.f32 %v15190_v17, %v4579_v11  ;;  %v3916_v3 = vmul.f32 %v3628_v42, %v2842_v20  ;;  %v4405_v24 = vmul.f32 %v15192_v2, %v4234_v30  ;;  %v15347_v15 = vld [vmem:[#allocation140_spill] sm:$0xff] }
 0x4a9   : > { %v4747_v40 = vmul.f32 %v15170_v52, %v4576_v0  ;;  %v4578_v1 = vsub.f32 %v15193_v62, %v12562_v58  ;;  %v4407_v61 = vmul.f32 %v15171_v43, %v4236_v23  ;;  %vm741_vm8 = vcmp.ge.f32.partialorder %v12661_v54, %v15194_v16 }
 0x4aa   : > { %v4059_v13 = vadd.f32 %v3915_v10, %v3771_v25  ;;  %vm742_vm9 = vcmp.ge.f32.partialorder %v12661_v54, %v15172_v37  ;;  %v4060_v39 = vadd.f32 %v3916_v3, %v3772_v63  ;;  %v4875_v20 = vmul.f32 %v4405_v24, %v15347_v15 }
 0x4ab   : > { %v5003_v32 = vmul.f32 %v4747_v40, %v4057_v38  ;;  %v4749_v11 = vmul.f32 %v15174_v59, %v4578_v1  ;;  %v4877_v30 = vmul.f32 %v4407_v61, %v4058_v56  ;;  %vm976_vm10 = vcmp.lt.f32.partialorder %v12661_v54, %v15175_v60 }
 0x4ac   : > { %v4878_v42 = vmul.f32 %v4408_v31, %v4059_v13  ;;  %vm977_vm11 = vcmp.lt.f32.partialorder %v12661_v54, %v15176_v51  ;;  %v5006_v58 = vmul.f32 %v4750_v6, %v4060_v39  ;;  %vm1152_vm12 = vmand %vm741_vm8, %vm976_vm10  ;;  %v1724_v63 = vsub.f32 %v12661_v54, %v15177_v9  ;;  %v15348_v39 = vld [vmem:[#allocation141_spill] sm:$0xff] }
 0x4ad   : > { %v5131_v25 = vadd.f32 %v5003_v32, %v4875_v20  ;;  %v5005_v0 = vmul.f32 %v4749_v11, %v4059_v13  ;;  %vm1153_vm13 = vmand %vm742_vm9, %vm977_vm11  ;;  %v6399_v38 = vsel %vm1152_vm12, 1.0, %v14403_v18  ;;  %v1725_v31 = vsub.f32 %v12661_v54, %v15178_v48 }
 0x4ae   : > { %v2154_v56 = vsub.f32 %v15196_v28, %v12661_v54  ;;  %v2155_v10 = vsub.f32 %v15180_v12, %v12661_v54  ;;  %v5134_v23 = vadd.f32 %v5006_v58, %v4878_v42  ;;  %v6400_v3 = vsel %vm1153_vm13, 1.0, %v14403_v18 }
 0x4af   : > { %5711 = vmatmul.mubr.f32.gmra.mrb[50].mxu0 %v5131_v25  ;;  %v5133_v6 = vadd.f32 %v5005_v0, %v4877_v30  ;;  %v1939_v24 = vmul.f32 %v15236_v4, %v1724_v63  ;;  %v1940_v40 = vmul.f32 %v15197_v53, %v1725_v31  ;;  %v3049_v61 = vsub.f32 %v12661_v54, %v15198_v27  ;;  %v15349_v25 = vld [vmem:[#allocation90_spill] sm:$0xff]  ;;  %v15350_v63 = vld [vmem:[#allocation61_spill] sm:$0xff] }
 0x4b0   : > { %v2369_v1 = vmul.f32 %v15280_v45, %v2154_v56  ;;  %v2370_v13 = vmul.f32 %v15324_v29, %v2155_v10  ;;  %5855 = vmatprep.mubr.f32.mxu1 %v5134_v23  ;;  %v3050_v20 = vsub.f32 %v12661_v54, %v15304_v19  ;;  %v3439_v32 = vsub.f32 %v15327_v41, %v12661_v54  ;;  %v15351_v56 = vld [vmem:[#allocation97_spill] sm:$0xff]  ;;  %v15352_v23 = vld [vmem:[#allocation64_spill] sm:$0xff]  ;;  %v15354_v45 = vld [vmem:[#allocation142_spill] sm:$0xff] }
 0x4b1   : > { %v2529_v15 = vmul.f32 %v15348_v39, %v1939_v24  ;;  %v3440_v11 = vsub.f32 %v15328_v22, %v12661_v54  ;;  %5856 = vmatmul.mubr.f32.gmra.mrb[50].mxu1 %v5133_v6  ;;  %v2530_v42 = vmul.f32 %v6399_v38, %v1940_v40  ;;  %v3244_v0 = vmul.f32 %v15349_v25, %v3049_v61  ;;  %v15353_v39 = vld [vmem:[#allocation66_spill] sm:$0xff]  ;;  %v15358_v61 = vld [vmem:[#allocation79_spill] sm:$0xff] }
 0x4b2   : > { %v2689_v30 = vmul.f32 %v6399_v38, %v2369_v1  ;;  %v2690_v58 = vmul.f32 %v6400_v3, %v2370_v13  ;;  %v3245_v31 = vmul.f32 %v15350_v63, %v3050_v20  ;;  %v3634_v10 = vmul.f32 %v15351_v56, %v3439_v32  ;;  %v15355_v6 = vld [vmem:[#allocation70_spill] sm:$0xff]  ;;  %v15356_v38 = vld [vmem:[#allocation65_spill] sm:$0xff]  ;;  %v15359_v20 = vld [vmem:[#allocation80_spill] sm:$0xff] }
 0x4b3   : > { %v3635_v24 = vmul.f32 %v15352_v23, %v3440_v11  ;;  %v4243_v19 = vsub.f32 %v12661_v54, %v15353_v39  ;;  %v3778_v27 = vmul.f32 %v3244_v0, %v15354_v45  ;;  %v4585_v40 = vsub.f32 %v15355_v6, %v12661_v54  ;;  %v15357_v13 = vld [vmem:[#allocation73_spill] sm:$0xff] }
 0x4b4   : > { %v2849_v29 = vadd.f32 %v2689_v30, %v2529_v15  ;;  %v2850_v41 = vadd.f32 %v2690_v58, %v2530_v42  ;;  %vm743_vm14 = vcmp.ge.f32.partialorder %v12661_v54, %v15357_v13  ;;  %vm744_vm15 = vcmp.ge.f32.partialorder %v12661_v54, %v15358_v61  ;;  %v15360_v42 = vld [vmem:[#allocation72_spill] sm:$0xff]  ;;  %v15361_v45 = vld [vmem:[#allocation85_spill] sm:$0xff]  ;;  %v15362_v58 = vld [vmem:[#allocation75_spill] sm:$0xff] }
 0x4b5   : > { %v4414_v1 = vmul.f32 %v15356_v38, %v4243_v19  ;;  %vm978_vm0 = vcmp.lt.f32.partialorder %v12661_v54, %v15359_v20  ;;  %v4756_v30 = vmul.f32 %v15360_v42, %v4585_v40  ;;  %vm979_vm2 = vcmp.lt.f32.partialorder %v12661_v54, %v15361_v45  ;;  %v15363_v38 = vld [vmem:[#allocation76_spill] sm:$0xff] }
 0x4b6   : > { %v3779_v32 = vmul.f32 %v3245_v31, %v2849_v29  ;;  %v3922_v11 = vmul.f32 %v3634_v10, %v2849_v29  ;;  %v3923_v15 = vmul.f32 %v3635_v24, %v2850_v41  ;;  %vm1154_vm1 = vmand %vm743_vm14, %vm978_vm0  ;;  %v1726_v0 = vsub.f32 %v12661_v54, %v15362_v58  ;;  %v15364_v29 = vld [vmem:[#allocation95_spill] sm:$0xff]  ;;  %v15365_v20 = vld [vmem:[#allocation96_spill] sm:$0xff] }
 0x4b7   : > { %v6401_v19 = vsel %vm1154_vm1, 1.0, %v14403_v18  ;;  %v1727_v61 = vsub.f32 %v12661_v54, %v15363_v38  ;;  %vm1155_vm3 = vmand %vm744_vm15, %vm979_vm2  ;;  %v2156_v31 = vsub.f32 %v15364_v29, %v12661_v54  ;;  %v2157_v10 = vsub.f32 %v15343_v46, %v12661_v54  ;;  %v15366_v29 = vld [vmem:[#allocation100_spill] sm:$0xff] }
 0x4b8   : > { %v4066_v13 = vadd.f32 %v3922_v11, %v3778_v27  ;;  %v4067_v23 = vadd.f32 %v3923_v15, %v3779_v32  ;;  %v6402_v24 = vsel %vm1155_vm3, 1.0, %v14403_v18  ;;  %v1941_v40 = vmul.f32 %v15320_v5, %v1726_v0 }
 0x4b9   : > { %v1942_v45 = vmul.f32 %v15321_v34, %v1727_v61  ;;  %v3051_v58 = vsub.f32 %v12661_v54, %v15365_v20  ;;  %v2371_v27 = vmul.f32 %v11665_v26, %v2156_v31  ;;  %v2372_v32 = vmul.f32 %v15210_v33, %v2157_v10 }
 0x4ba   : > { %v4884_v42 = vmul.f32 %v4414_v1, %v4066_v13  ;;  %v5012_v38 = vmul.f32 %v4756_v30, %v4067_v23  ;;  %v2531_v11 = vmul.f32 %v6400_v3, %v1941_v40  ;;  %v3052_v46 = vsub.f32 %v12661_v54, %v15366_v29 }
 0x4bb   : > { %v2532_v15 = vmul.f32 %v6401_v19, %v1942_v45  ;;  %v3246_v6 = vmul.f32 %v11686_v55, %v3051_v58  ;;  %v2691_v0 = vmul.f32 %v6401_v19, %v2371_v27  ;;  %v2692_v61 = vmul.f32 %v6402_v24, %v2372_v32 }
 0x4bc   : > { %v5140_v39 = vadd.f32 %v5012_v38, %v4884_v42  ;;  %v3441_v1 = vsub.f32 %v15255_v8, %v12661_v54  ;;  %v3247_v30 = vmul.f32 %v11689_v36, %v3052_v46  ;;  %v3442_v31 = vsub.f32 %v11701_v50, %v12661_v54 }
 0x4bd   : > { %v3780_v3 = vmul.f32 %v3246_v6, %v2850_v41  ;;  %v4245_v45 = vsub.f32 %v12661_v54, %v11718_v49  ;;  %v2851_v10 = vadd.f32 %v2691_v0, %v2531_v11  ;;  %v2852_v58 = vadd.f32 %v2692_v61, %v2532_v15  ;;  %v559_v6 = vld [vmem:[%s8233_s6 + $0x50] sm:$0xff] }
 0x4be   : > { %5715 = vmatprep.mubr.f32.mxu0 %v5140_v39  ;;  %v3636_v38 = vmul.f32 %v15211_v35, %v3441_v1  ;;  %v4587_v42 = vsub.f32 %v15234_v47, %v12661_v54  ;;  %v3637_v19 = vmul.f32 %v15214_v21, %v3442_v31  ;;  %v4242_v46 = vsub.f32 %v12661_v54, %v15344_v44  ;;  %v560_v39 = vld [vmem:[%s8233_s6 + $0x58] sm:$0xff] }
 0x4bf   : > { %v4416_v24 = vmul.f32 %v15301_v7, %v4245_v45  ;;  %v4584_v41 = vsub.f32 %v15345_v57, %v12661_v54  ;;  %v3781_v40 = vmul.f32 %v3247_v30, %v2851_v10  ;;  %v4244_v11 = vsub.f32 %v12661_v54, %v15346_v14  ;;  %v12761_v7 = vld [vmem:[%s8213_s17 + $0x58] sm:$0xff] }
 0x4c0   : > { %v3924_v27 = vmul.f32 %v3636_v38, %v2851_v10  ;;  %v4758_v32 = vmul.f32 %v15190_v17, %v4587_v42  ;;  %v3925_v15 = vmul.f32 %v3637_v19, %v2852_v58  ;;  %v4413_v0 = vmul.f32 %v15192_v2, %v4242_v46  ;;  %v15367_v10 = vld [vmem:[#allocation143_spill] sm:$0xff] }
 0x4c1   : > { %v4755_v61 = vmul.f32 %v15170_v52, %v4584_v41  ;;  %v4586_v1 = vsub.f32 %v15193_v62, %v12661_v54  ;;  %v4415_v45 = vmul.f32 %v15171_v43, %v4244_v11  ;;  %v7022_v57 = vpack.c.bf16 %v560_v39, %v559_v6  ;;  %v15368_v11 = vld [vmem:[#allocation87_spill] sm:$0xff] }
 0x4c2   : > { %v4068_v31 = vadd.f32 %v3924_v27, %v3780_v3  ;;  %vm752_vm4 = vcmp.ge.f32.partialorder %v12761_v7, %v15194_v16  ;;  %v4069_v30 = vadd.f32 %v3925_v15, %v3781_v40  ;;  %v4883_v38 = vmul.f32 %v4413_v0, %v15367_v10 }
 0x4c3   : > { %v5011_v58 = vmul.f32 %v4755_v61, %v4066_v13  ;;  %v4757_v42 = vmul.f32 %v15174_v59, %v4586_v1  ;;  %v4885_v46 = vmul.f32 %v4415_v45, %v4067_v23  ;;  %7023 = vmatprep.subr.bf16.mxu0 %v7022_v57  ;;  %7039 = vmatprep.subr.bf16.mxu1 %v7022_v57  ;;  %v15369_v61 = vld [vmem:[#allocation84_spill] sm:$0xff] }
 0x4c4   : > { %v4886_v19 = vmul.f32 %v4416_v24, %v4068_v31  ;;  %vm753_vm5 = vcmp.ge.f32.partialorder %v12761_v7, %v15172_v37  ;;  %v5014_v54 = vmul.f32 %v4758_v32, %v4069_v30  ;;  %7025 = vmatpush3.bf16.msra.mxu0 %v7022_v57  ;;  %7047 = vmatpush3.bf16.msra.mxu1 %v7022_v57  ;;  %v15371_v30 = vld [vmem:[#allocation60_spill] sm:$0xff] }
 0x4c5   : > { %v5139_v3 = vadd.f32 %v5011_v58, %v4883_v38  ;;  %v5013_v41 = vmul.f32 %v4757_v42, %v4068_v31  ;;  %vm987_vm6 = vcmp.lt.f32.partialorder %v12761_v7, %v15175_v60  ;;  %vm988_vm7 = vcmp.lt.f32.partialorder %v12761_v7, %v15176_v51  ;;  %v15370_v31 = vld [vmem:[#allocation57_spill] sm:$0xff]  ;;  %v15372_v38 = vld [vmem:[#allocation144_spill] sm:$0xff] }
 0x4c6   : > { %v1734_v13 = vsub.f32 %v12761_v7, %v15177_v9  ;;  %v1735_v23 = vsub.f32 %v12761_v7, %v15178_v48  ;;  %v5142_v24 = vadd.f32 %v5014_v54, %v4886_v19  ;;  %vm1163_vm8 = vmand %vm752_vm4, %vm987_vm6  ;;  %v2164_v57 = vsub.f32 %v15196_v28, %v12761_v7 }
 0x4c7   : > { %5716 = vmatmul.mubr.f32.gmra.mrb[52].mxu0 %v5139_v3  ;;  %v5141_v6 = vadd.f32 %v5013_v41, %v4885_v46  ;;  %v2165_v39 = vsub.f32 %v15180_v12, %v12761_v7  ;;  %vm1164_vm9 = vmand %vm753_vm5, %vm988_vm7  ;;  %v6410_v40 = vsel %vm1163_vm8, 1.0, %v14403_v18  ;;  %v3058_v15 = vsub.f32 %v12761_v7, %v15368_v11  ;;  %v15373_v46 = vld [vmem:[#allocation94_spill] sm:$0xff] }
 0x4c8   : > { %v1949_v27 = vmul.f32 %v15236_v4, %v1734_v13  ;;  %v1950_v32 = vmul.f32 %v15197_v53, %v1735_v23  ;;  %5860 = vmatprep.mubr.f32.mxu1 %v5142_v24  ;;  %v6411_v0 = vsel %vm1164_vm9, 1.0, %v14403_v18  ;;  %v2379_v1 = vmul.f32 %v15369_v61, %v2164_v57  ;;  %v15374_v57 = vld [vmem:[#allocation145_spill] sm:$0xff] }
 0x4c9   : > { %v2380_v45 = vmul.f32 %v15370_v31, %v2165_v39  ;;  %v3059_v10 = vsub.f32 %v12761_v7, %v15371_v30  ;;  %5861 = vmatmul.mubr.f32.gmra.mrb[52].mxu1 %v5141_v6  ;;  %v3253_v19 = vmul.f32 %v15349_v25, %v3058_v15  ;;  %v3448_v54 = vsub.f32 %v15373_v46, %v12761_v7  ;;  %v15375_v6 = vld [vmem:[#allocation66_spill] sm:$0xff]  ;;  %v15377_v46 = vld [vmem:[#allocation64_spill] sm:$0xff] }
 0x4ca   : > { %v2539_v58 = vmul.f32 %v15372_v38, %v1949_v27  ;;  %v2540_v42 = vmul.f32 %v6410_v40, %v1950_v32  ;;  %v2699_v3 = vmul.f32 %v6410_v40, %v2379_v1  ;;  %v3449_v23 = vsub.f32 %v15328_v22, %v12761_v7  ;;  %v15376_v32 = vld [vmem:[#allocation70_spill] sm:$0xff]  ;;  %v15378_v1 = vld [vmem:[#allocation73_spill] sm:$0xff] }
 0x4cb   : > { %v2700_v41 = vmul.f32 %v6411_v0, %v2380_v45  ;;  %v3254_v13 = vmul.f32 %v15350_v63, %v3059_v10  ;;  %v3643_v24 = vmul.f32 %v15351_v56, %v3448_v54  ;;  %v3787_v39 = vmul.f32 %v3253_v19, %v15374_v57  ;;  %v15379_v45 = vld [vmem:[#allocation65_spill] sm:$0xff]  ;;  %v15380_v63 = vld [vmem:[#allocation72_spill] sm:$0xff]  ;;  %v15381_v54 = vld [vmem:[#allocation79_spill] sm:$0xff] }
 0x4cc   : > { %v4251_v27 = vsub.f32 %v12761_v7, %v15375_v6  ;;  %v4593_v15 = vsub.f32 %v15376_v32, %v12761_v7  ;;  %v2859_v38 = vadd.f32 %v2699_v3, %v2539_v58  ;;  %v3644_v40 = vmul.f32 %v15377_v46, %v3449_v23  ;;  %v15382_v19 = vld [vmem:[#allocation80_spill] sm:$0xff]  ;;  %v15383_v58 = vld [vmem:[#allocation85_spill] sm:$0xff]  ;;  %v15384_v3 = vld [vmem:[#allocation75_spill] sm:$0xff] }
 0x4cd   : > { %v2860_v25 = vadd.f32 %v2700_v41, %v2540_v42  ;;  %vm754_vm10 = vcmp.ge.f32.partialorder %v12761_v7, %v15378_v1  ;;  %vm755_vm11 = vcmp.ge.f32.partialorder %v12761_v7, %v15381_v54  ;;  %vm989_vm12 = vcmp.lt.f32.partialorder %v12761_v7, %v15382_v19  ;;  %v15385_v23 = vld [vmem:[#allocation76_spill] sm:$0xff] }
 0x4ce   : > { %v4422_v10 = vmul.f32 %v15379_v45, %v4251_v27  ;;  %v4764_v22 = vmul.f32 %v15380_v63, %v4593_v15  ;;  %v3788_v57 = vmul.f32 %v3254_v13, %v2859_v38  ;;  %v3931_v56 = vmul.f32 %v3643_v24, %v2859_v38  ;;  %vm1165_vm14 = vmand %vm754_vm10, %vm989_vm12  ;;  %v15386_v15 = vld [vmem:[#allocation95_spill] sm:$0xff]  ;;  %v15387_v38 = vld [vmem:[#allocation98_spill] sm:$0xff] }
 0x4cf   : > { %v3932_v32 = vmul.f32 %v3644_v40, %v2860_v25  ;;  %vm990_vm13 = vcmp.lt.f32.partialorder %v12761_v7, %v15383_v58  ;;  %v6412_v42 = vsel %vm1165_vm14, 1.0, %v14403_v18  ;;  %v1736_v41 = vsub.f32 %v12761_v7, %v15384_v3 }
 0x4d0   : > { %vm1166_vm15 = vmand %vm755_vm11, %vm990_vm13  ;;  %v1737_v27 = vsub.f32 %v12761_v7, %v15385_v23  ;;  %v2166_v63 = vsub.f32 %v15386_v15, %v12761_v7  ;;  %v12828_v19 = vadd.f32 %v3931_v56, %v3787_v39  ;;  %v2167_v40 = vsub.f32 %v15387_v38, %v12761_v7 }
 0x4d1   : > { %v12830_v13 = vadd.f32 %v3932_v32, %v3788_v57  ;;  %v6413_v24 = vsel %vm1166_vm15, 1.0, %v14403_v18  ;;  %v1951_v58 = vmul.f32 %v15320_v5, %v1736_v41  ;;  %v3060_v23 = vsub.f32 %v12761_v7, %v15365_v20 }
 0x4d2   : > { %v1952_v54 = vmul.f32 %v15321_v34, %v1737_v27  ;;  %v2381_v3 = vmul.f32 %v11665_v26, %v2166_v63  ;;  %v4892_v15 = vmul.f32 %v4422_v10, %v12828_v19  ;;  %v2382_v39 = vmul.f32 %v15210_v33, %v2167_v40  ;;  %v12846_v27 = vpop.f32.mrb[0].mxu0  ;;  %v12848_v63 = vpop.f32.mrb[0].mxu1 }
 0x4d3   : > { %v5020_v56 = vmul.f32 %v4764_v22, %v12830_v13  ;;  %v3061_v32 = vsub.f32 %v12761_v7, %v15366_v29  ;;  %v2541_v57 = vmul.f32 %v6411_v0, %v1951_v58  ;;  %v3255_v41 = vmul.f32 %v11686_v55, %v3060_v23  ;;  %15388 = vst [vmem:[#allocation118_spill] sm:$0xff] %v12846_v27  ;;  %v12853_v40 = vpop.f32.mrb[1].mxu0  ;;  %v12855_v33 = vpop.f32.mrb[1].mxu1 }
 0x4d4   : > { %v2542_v38 = vmul.f32 %v6412_v42, %v1952_v54  ;;  %v2701_v1 = vmul.f32 %v6412_v42, %v2381_v3  ;;  %15389 = vst [vmem:[#allocation114_spill] sm:$0xff] %v12848_v63  ;;  %v2702_v20 = vmul.f32 %v6413_v24, %v2382_v39  ;;  %v3450_v22 = vsub.f32 %v15255_v8, %v12761_v7  ;;  %v12861_v3 = vpop.f32.mrb[2].mxu0  ;;  %v12863_v23 = vpop.f32.mrb[2].mxu1 }
 0x4d5   : > { %v5148_v26 = vadd.f32 %v5020_v56, %v4892_v15  ;;  %v3256_v10 = vmul.f32 %v11689_v36, %v3061_v32  ;;  %15390 = vst [vmem:[#allocation119_spill] sm:$0xff] %v12853_v40  ;;  %15391 = vst [vmem:[#allocation37_spill] sm:$0xff] %v12855_v33  ;;  %v3451_v54 = vsub.f32 %v11701_v50, %v12761_v7  ;;  %v12870_v39 = vpop.f32.mrb[3].mxu0  ;;  %v12894_v40 = vld [vmem:[%s8213_s17 + $0x60] sm:$0xff] }
 0x4d6   : > { %v2861_v0 = vadd.f32 %v2701_v1, %v2541_v57  ;;  %v3789_v58 = vmul.f32 %v3255_v41, %v2860_v25  ;;  %v4253_v42 = vsub.f32 %v12761_v7, %v11718_v49  ;;  %15392 = vst [vmem:[#allocation42_spill] sm:$0xff] %v12861_v3  ;;  %15393 = vst [vmem:[#allocation41_spill] sm:$0xff] %v12863_v23  ;;  %v12872_v25 = vpop.f32.mrb[3].mxu1  ;;  %v15396_v41 = vld [vmem:[#allocation111_spill] sm:$0xff] }
 0x4d7   : > { %5720 = vmatprep.mubr.f32.mxu0 %v5148_v26  ;;  %v2862_v15 = vadd.f32 %v2702_v20, %v2542_v38  ;;  %v3645_v24 = vmul.f32 %v15211_v35, %v3450_v22  ;;  %v4595_v56 = vsub.f32 %v15234_v47, %v12761_v7  ;;  %v4250_v1 = vsub.f32 %v12761_v7, %v15344_v44  ;;  %v15397_v26 = vld [vmem:[#allocation103_spill] sm:$0xff]  ;;  %v12878_v38 = vpop.f32.mrb[4].mxu0  ;;  %v12880_v22 = vpop.f32.mrb[4].mxu1 }
 0x4d8   : > { %15394 = vst [vmem:[#allocation40_spill] sm:$0xff] %v12870_v39  ;;  %15395 = vst [vmem:[#allocation78_spill] sm:$0xff] %v12872_v25  ;;  %v3646_v32 = vmul.f32 %v15214_v21, %v3451_v54  ;;  %v3790_v57 = vmul.f32 %v3256_v10, %v2861_v0  ;;  %v4424_v23 = vmul.f32 %v15396_v41, %v4253_v42  ;;  %v12886_v63 = vpop.f32.mrb[5].mxu0  ;;  %v12888_v10 = vpop.f32.mrb[5].mxu1 }
 0x4d9   : > { %v4592_v20 = vsub.f32 %v15397_v26, %v12761_v7  ;;  %15398 = vst [vmem:[#allocation92_spill] sm:$0xff] %v12878_v38  ;;  %15399 = vst [vmem:[#allocation38_spill] sm:$0xff] %v12880_v22  ;;  %v3933_v3 = vmul.f32 %v3645_v24, %v2861_v0  ;;  %v4766_v33 = vmul.f32 %v15190_v17, %v4595_v56  ;;  %v12898_v0 = vpop.f32.mrb[6].mxu0  ;;  %v12900_v24 = vpop.f32.mrb[6].mxu1 }
 0x4da   : > { %v4421_v39 = vmul.f32 %v15192_v2, %v4250_v1  ;;  %v4252_v25 = vsub.f32 %v12761_v7, %v15346_v14  ;;  %15400 = vst [vmem:[#allocation39_spill] sm:$0xff] %v12886_v63  ;;  %15401 = vst [vmem:[#allocation105_spill] sm:$0xff] %v12888_v10  ;;  %v3934_v54 = vmul.f32 %v3646_v32, %v2862_v15  ;;  %v15404_v1 = vld [vmem:[#allocation146_spill] sm:$0xff]  ;;  %v12906_v15 = vpop.f32.mrb[7].mxu0 }
 0x4db   : > { %v4763_v42 = vmul.f32 %v15170_v52, %v4592_v20  ;;  %v4594_v38 = vsub.f32 %v15193_v62, %v12761_v7  ;;  %vm763_vm0 = vcmp.ge.f32.partialorder %v12894_v40, %v15194_v16  ;;  %15402 = vst [vmem:[#allocation115_spill] sm:$0xff] %v12898_v0  ;;  %15403 = vst [vmem:[#allocation120_spill] sm:$0xff] %v12900_v24  ;;  %v12908_v7 = vpop.f32.mrb[7].mxu1  ;;  %v15425_v0 = vld [vmem:[#allocation61_spill] sm:$0xff] }
 0x4dc   : > { %v4077_v56 = vadd.f32 %v3933_v3, %v3789_v58  ;;  %v4891_v22 = vmul.f32 %v4421_v39, %v15404_v1  ;;  %v4423_v10 = vmul.f32 %v15171_v43, %v4252_v25  ;;  %vm764_vm1 = vcmp.ge.f32.partialorder %v12894_v40, %v15172_v37  ;;  %15405 = vst [vmem:[#allocation121_spill] sm:$0xff] %v12906_v15  ;;  %v12914_v58 = vpop.f32.mrb[8].mxu0  ;;  %v12916_v3 = vpop.f32.mrb[8].mxu1 }
 0x4dd   : > { %15406 = vst [vmem:[#allocation106_spill] sm:$0xff] %v12908_v7  ;;  %v4078_v32 = vadd.f32 %v3934_v54, %v3790_v57  ;;  %v5019_v20 = vmul.f32 %v4763_v42, %v12828_v19  ;;  %v4765_v63 = vmul.f32 %v15174_v59, %v4594_v38  ;;  %vm998_vm2 = vcmp.lt.f32.partialorder %v12894_v40, %v15175_v60  ;;  %v12926_v57 = vpop.f32.mrb[9].mxu0  ;;  %v12928_v38 = vpop.f32.mrb[9].mxu1 }
 0x4de   : > { %15407 = vst [vmem:[#allocation69_spill] sm:$0xff] %v12914_v58  ;;  %15408 = vst [vmem:[#allocation54_spill] sm:$0xff] %v12916_v3  ;;  %v4894_v39 = vmul.f32 %v4424_v23, %v4077_v56  ;;  %v4893_v25 = vmul.f32 %v4423_v10, %v12830_v13  ;;  %vm999_vm3 = vcmp.lt.f32.partialorder %v12894_v40, %v15176_v51  ;;  %v12934_v23 = vpop.f32.mrb[10].mxu0  ;;  %v12936_v10 = vpop.f32.mrb[10].mxu1 }
 0x4df   : > { %vm1174_vm4 = vmand %vm763_vm0, %vm998_vm2  ;;  %v1744_v19 = vsub.f32 %v12894_v40, %v15177_v9  ;;  %15409 = vst [vmem:[#allocation122_spill] sm:$0xff] %v12926_v57  ;;  %v5022_v54 = vmul.f32 %v4766_v33, %v4078_v32  ;;  %v5147_v42 = vadd.f32 %v5019_v20, %v4891_v22  ;;  %v5021_v1 = vmul.f32 %v4765_v63, %v4077_v56  ;;  %v12946_v22 = vpop.f32.mrb[11].mxu0  ;;  %v12948_v56 = vpop.f32.mrb[11].mxu1 }
 0x4e0   : > { %15410 = vst [vmem:[#allocation116_spill] sm:$0xff] %v12928_v38  ;;  %vm1175_vm5 = vmand %vm764_vm1, %vm999_vm3  ;;  %v6421_v13 = vsel %vm1174_vm4, 1.0, %v14403_v18  ;;  %v1745_v57 = vsub.f32 %v12894_v40, %v15178_v48  ;;  %v2174_v63 = vsub.f32 %v15196_v28, %v12894_v40  ;;  %v12954_v38 = vpop.f32.mrb[12].mxu0  ;;  %v12956_v58 = vpop.f32.mrb[12].mxu1 }
 0x4e1   : > { %15411 = vst [vmem:[#allocation71_spill] sm:$0xff] %v12934_v23  ;;  %15412 = vst [vmem:[#allocation55_spill] sm:$0xff] %v12936_v10  ;;  %v12939_v3 = vsel %vm1175_vm5, 1.0, %v14403_v18  ;;  %v1959_v33 = vmul.f32 %v15236_v4, %v1744_v19  ;;  %v5150_v32 = vadd.f32 %v5022_v54, %v4894_v39  ;;  %5721 = vmatmul.mubr.f32.gmra.mrb[54].mxu0 %v5147_v42  ;;  %v12965_v54 = vpop.f32.mrb[13].mxu1 }
 0x4e2   : > { %15413 = vst [vmem:[#allocation74_spill] sm:$0xff] %v12946_v22  ;;  %15414 = vst [vmem:[#allocation58_spill] sm:$0xff] %v12948_v56  ;;  %v5149_v20 = vadd.f32 %v5021_v1, %v4893_v25  ;;  %v2175_v10 = vsub.f32 %v15180_v12, %v12894_v40  ;;  %v3067_v23 = vsub.f32 %v12894_v40, %v15368_v11  ;;  %v15417_v22 = vld [vmem:[#allocation147_spill] sm:$0xff]  ;;  %v12963_v25 = vpop.f32.mrb[13].mxu0  ;;  %v15420_v1 = vld [vmem:[#allocation90_spill] sm:$0xff] }
 0x4e3   : > { %15415 = vst [vmem:[#allocation62_spill] sm:$0xff] %v12954_v38  ;;  %15416 = vst [vmem:[#allocation123_spill] sm:$0xff] %v12956_v58  ;;  %v1960_v19 = vmul.f32 %v15197_v53, %v1745_v57  ;;  %v2389_v7 = vmul.f32 %v15369_v61, %v2174_v63  ;;  %v2549_v24 = vmul.f32 %v15417_v22, %v1959_v33  ;;  %5865 = vmatprep.mubr.f32.mxu1 %v5150_v32  ;;  %v15421_v58 = vld [vmem:[#allocation94_spill] sm:$0xff]  ;;  %v15422_v57 = vld [vmem:[#allocation63_spill] sm:$0xff]  ;;  %v12973_v15 = vpop.f32.mrb[14].mxu0  ;;  %v12975_v33 = vpop.f32.mrb[14].mxu1 }
 0x4e4   : > { %v3068_v39 = vsub.f32 %v12894_v40, %v15371_v30  ;;  %15418 = vst [vmem:[#allocation124_spill] sm:$0xff] %v12963_v25  ;;  %15419 = vst [vmem:[#allocation112_spill] sm:$0xff] %v12965_v54  ;;  %v2390_v42 = vmul.f32 %v15370_v31, %v2175_v10  ;;  %v3262_v38 = vmul.f32 %v15420_v1, %v3067_v23  ;;  %5866 = vmatmul.mubr.f32.gmra.mrb[54].mxu1 %v5149_v20  ;;  %v12980_v32 = vpop.f32.mrb[15].mxu0  ;;  %v12982_v23 = vpop.f32.mrb[15].mxu1  ;;  %v15428_v1 = vld [vmem:[#allocation97_spill] sm:$0xff] }
 0x4e5   : > { %v3457_v56 = vsub.f32 %v15421_v58, %v12894_v40  ;;  %v3458_v63 = vsub.f32 %v15422_v57, %v12894_v40  ;;  %15423 = vst [vmem:[#allocation101_spill] sm:$0xff] %v12973_v15  ;;  %15424 = vst [vmem:[#allocation50_spill] sm:$0xff] %v12975_v33  ;;  %v2550_v22 = vmul.f32 %v6421_v13, %v1960_v19  ;;  %v15429_v58 = vld [vmem:[#allocation86_spill] sm:$0xff]  ;;  %v12988_v20 = vpop.f32.mrb[16].mxu0 }
 0x4e6   : > { %v2709_v25 = vmul.f32 %v6421_v13, %v2389_v7  ;;  %v3263_v54 = vmul.f32 %v15425_v0, %v3068_v39  ;;  %v4259_v10 = vsub.f32 %v12894_v40, %v15375_v6  ;;  %15426 = vst [vmem:[#allocation68_spill] sm:$0xff] %v12980_v32  ;;  %15427 = vst [vmem:[#allocation125_spill] sm:$0xff] %v12982_v23  ;;  %v12990_v7 = vpop.f32.mrb[16].mxu1  ;;  %v15432_v39 = vld [vmem:[#allocation70_spill] sm:$0xff]  ;;  %v15433_v6 = vld [vmem:[#allocation73_spill] sm:$0xff] }
 0x4e7   : > { %v2710_v27 = vmul.f32 %v12939_v3, %v2390_v42  ;;  %v3652_v57 = vmul.f32 %v15428_v1, %v3457_v56  ;;  %v3653_v15 = vmul.f32 %v15377_v46, %v3458_v63  ;;  %v3796_v33 = vmul.f32 %v3262_v38, %v15429_v58  ;;  %15430 = vst [vmem:[#allocation81_spill] sm:$0xff] %v12988_v20  ;;  %v12997_v42 = vpop.f32.mrb[17].mxu0  ;;  %v12999_v56 = vpop.f32.mrb[17].mxu1  ;;  %v15436_v23 = vld [vmem:[#allocation79_spill] sm:$0xff]  ;;  %v15437_v58 = vld [vmem:[#allocation80_spill] sm:$0xff] }
 0x4e8   : > { %15431 = vst [vmem:[#allocation59_spill] sm:$0xff] %v12990_v7  ;;  %v2869_v13 = vadd.f32 %v2709_v25, %v2549_v24  ;;  %v4430_v19 = vmul.f32 %v15379_v45, %v4259_v10  ;;  %v4601_v32 = vsub.f32 %v15432_v39, %v12894_v40  ;;  %vm765_vm6 = vcmp.ge.f32.partialorder %v12894_v40, %v15433_v6  ;;  %v15438_v24 = vld [vmem:[#allocation85_spill] sm:$0xff]  ;;  %v13007_v38 = vpop.f32.mrb[18].mxu0  ;;  %v13009_v25 = vpop.f32.mrb[18].mxu1  ;;  %v15441_v20 = vld [vmem:[#allocation72_spill] sm:$0xff] }
 0x4e9   : > { %15434 = vst [vmem:[#allocation47_spill] sm:$0xff] %v12997_v42  ;;  %15435 = vst [vmem:[#allocation43_spill] sm:$0xff] %v12999_v56  ;;  %v2870_v63 = vadd.f32 %v2710_v27, %v2550_v22  ;;  %vm766_vm7 = vcmp.ge.f32.partialorder %v12894_v40, %v15436_v23  ;;  %vm1000_vm8 = vcmp.lt.f32.partialorder %v12894_v40, %v15437_v58  ;;  %v15442_v56 = vld [vmem:[#allocation75_spill] sm:$0xff]  ;;  %v13014_v22 = vpop.f32.mrb[19].mxu0  ;;  %v13016_v45 = vpop.f32.mrb[19].mxu1  ;;  %v15445_v23 = vld [vmem:[#allocation76_spill] sm:$0xff] }
 0x4ea   : > { %vm1001_vm9 = vcmp.lt.f32.partialorder %v12894_v40, %v15438_v24  ;;  %15439 = vst [vmem:[#allocation104_spill] sm:$0xff] %v13007_v38  ;;  %15440 = vst [vmem:[#allocation46_spill] sm:$0xff] %v13009_v25  ;;  %v3797_v10 = vmul.f32 %v3263_v54, %v2869_v13  ;;  %v3940_v7 = vmul.f32 %v3652_v57, %v2869_v13  ;;  %v15446_v54 = vld [vmem:[#allocation95_spill] sm:$0xff]  ;;  %v13023_v13 = vpop.f32.mrb[20].mxu0 }
 0x4eb   : > { %v4772_v42 = vmul.f32 %v15441_v20, %v4601_v32  ;;  %vm1176_vm10 = vmand %vm765_vm6, %vm1000_vm8  ;;  %v1746_v27 = vsub.f32 %v12894_v40, %v15442_v56  ;;  %15443 = vst [vmem:[#allocation126_spill] sm:$0xff] %v13014_v22  ;;  %v3941_v58 = vmul.f32 %v3653_v15, %v2870_v63  ;;  %v1747_v38 = vsub.f32 %v12894_v40, %v15445_v23  ;;  %v13025_v32 = vpop.f32.mrb[20].mxu1  ;;  %v15449_v15 = vld [vmem:[#allocation98_spill] sm:$0xff]  ;;  %v13033_v20 = vpop.f32.mrb[21].mxu0 }
 0x4ec   : > { %15444 = vst [vmem:[#allocation127_spill] sm:$0xff] %v13016_v45  ;;  %vm1177_vm11 = vmand %vm766_vm7, %vm1001_vm9  ;;  %v6423_v24 = vsel %vm1176_vm10, 1.0, %v14403_v18  ;;  %v2176_v57 = vsub.f32 %v15446_v54, %v12894_v40  ;;  %v13027_v25 = vadd.f32 %v3940_v7, %v3796_v33  ;;  %v2177_v56 = vsub.f32 %v15449_v15, %v12894_v40  ;;  %v13035_v6 = vpop.f32.mrb[21].mxu1  ;;  %v13043_v7 = vpop.f32.mrb[22].mxu0 }
 0x4ed   : > { %15447 = vst [vmem:[#allocation128_spill] sm:$0xff] %v13023_v13  ;;  %15448 = vst [vmem:[#allocation113_spill] sm:$0xff] %v13025_v32  ;;  %v6424_v22 = vsel %vm1177_vm11, 1.0, %v14403_v18  ;;  %v1961_v45 = vmul.f32 %v15320_v5, %v1746_v27  ;;  %v13037_v23 = vadd.f32 %v3941_v58, %v3797_v10  ;;  %v1962_v54 = vmul.f32 %v15321_v34, %v1747_v38  ;;  %v15452_v13 = vld [vmem:[#allocation102_spill] sm:$0xff]  ;;  %v15453_v32 = vld [vmem:[#allocation96_spill] sm:$0xff]  ;;  %v13045_v46 = vpop.f32.mrb[22].mxu1 }
 0x4ee   : > { %15450 = vst [vmem:[#allocation129_spill] sm:$0xff] %v13033_v20  ;;  %15451 = vst [vmem:[#allocation77_spill] sm:$0xff] %v13035_v6  ;;  %v2391_v39 = vmul.f32 %v15452_v13, %v2176_v57  ;;  %v3069_v33 = vsub.f32 %v12894_v40, %v15453_v32  ;;  %v4900_v27 = vmul.f32 %v4430_v19, %v13027_v25  ;;  %v15456_v5 = vld [vmem:[#allocation107_spill] sm:$0xff]  ;;  %v13052_v10 = vpop.f32.mrb[23].mxu0  ;;  %v13054_v38 = vpop.f32.mrb[23].mxu1 }
 0x4ef   : > { %15454 = vst [vmem:[#allocation48_spill] sm:$0xff] %v13043_v7  ;;  %15455 = vst [vmem:[#allocation44_spill] sm:$0xff] %v13045_v46  ;;  %v2392_v15 = vmul.f32 %v15456_v5, %v2177_v56  ;;  %v2551_v20 = vmul.f32 %v12939_v3, %v1961_v45  ;;  %v3070_v58 = vsub.f32 %v12894_v40, %v15366_v29  ;;  %v13058_v46 = vpop.f32.mrb[24].mxu0  ;;  %v13060_v19 = vpop.f32.mrb[24].mxu1 }
 0x4f0   : > { %15457 = vst [vmem:[#allocation108_spill] sm:$0xff] %v13052_v10  ;;  %15458 = vst [vmem:[#allocation45_spill] sm:$0xff] %v13054_v38  ;;  %v5028_v57 = vmul.f32 %v4772_v42, %v13037_v23  ;;  %v2552_v6 = vmul.f32 %v6423_v24, %v1962_v54  ;;  %v2711_v32 = vmul.f32 %v6423_v24, %v2391_v39  ;;  %v13067_v42 = vpop.f32.mrb[25].mxu0  ;;  %v13069_v39 = vpop.f32.mrb[25].mxu1 }
 0x4f1   : > { %v3264_v7 = vmul.f32 %v11686_v55, %v3069_v33  ;;  %15459 = vst [vmem:[#allocation130_spill] sm:$0xff] %v13058_v46  ;;  %15460 = vst [vmem:[#allocation131_spill] sm:$0xff] %v13060_v19  ;;  %v2712_v56 = vmul.f32 %v6424_v22, %v2392_v15  ;;  %v3265_v45 = vmul.f32 %v11689_v36, %v3070_v58  ;;  %v13073_v15 = vpop.f32.mrb[26].mxu0  ;;  %v13075_v58 = vpop.f32.mrb[26].mxu1 }
 0x4f2   : > { %v3459_v3 = vsub.f32 %v15255_v8, %v12894_v40  ;;  %v3460_v38 = vsub.f32 %v11701_v50, %v12894_v40  ;;  %15461 = vst [vmem:[#allocation132_spill] sm:$0xff] %v13067_v42  ;;  %15462 = vst [vmem:[#allocation49_spill] sm:$0xff] %v13069_v39  ;;  %v5156_v24 = vadd.f32 %v5028_v57, %v4900_v27  ;;  %v561_v50 = vld [vmem:[%s8233_s6 + $0x60] sm:$0xff]  ;;  %v562_v39 = vld [vmem:[%s8233_s6 + $0x68] sm:$0xff]  ;;  %v13083_v27 = vpop.f32.mrb[27].mxu0 }
 0x4f3   : > { %v2871_v54 = vadd.f32 %v2711_v32, %v2551_v20  ;;  %v3798_v33 = vmul.f32 %v3264_v7, %v2870_v63  ;;  %v4261_v22 = vsub.f32 %v12894_v40, %v11718_v49  ;;  %15463 = vst [vmem:[#allocation133_spill] sm:$0xff] %v13073_v15  ;;  %15464 = vst [vmem:[#allocation134_spill] sm:$0xff] %v13075_v58  ;;  %v13085_v20 = vpop.f32.mrb[27].mxu1 }
 0x4f4   : > { %v2872_v19 = vadd.f32 %v2712_v56, %v2552_v6  ;;  %v3654_v46 = vmul.f32 %v15211_v35, %v3459_v3  ;;  %v3655_v10 = vmul.f32 %v15214_v21, %v3460_v38  ;;  %v4603_v42 = vsub.f32 %v15234_v47, %v12894_v40  ;;  %15465 = vst [vmem:[#allocation135_spill] sm:$0xff] %v13083_v27  ;;  %v13092_v38 = vpop.f32.mrb[28].mxu0  ;;  %v13094_v57 = vpop.f32.mrb[28].mxu1 }
 0x4f5   : > { %15466 = vst [vmem:[#allocation136_spill] sm:$0xff] %v13085_v20  ;;  %5725 = vmatprep.mubr.f32.mxu0 %v5156_v24  ;;  %v3799_v63 = vmul.f32 %v3265_v45, %v2871_v54  ;;  %v4432_v32 = vmul.f32 %v15396_v41, %v4261_v22  ;;  %v4258_v6 = vsub.f32 %v12894_v40, %v15344_v44  ;;  %15467 = vst [vmem:[#allocation83_spill] sm:$0xff] %v13092_v38  ;;  %v13099_v24 = vpop.f32.mrb[29].mxu0  ;;  %v13101_v22 = vpop.f32.mrb[29].mxu1 }
 0x4f6   : > { %v4600_v7 = vsub.f32 %v15397_v26, %v12894_v40  ;;  %15468 = vst [vmem:[#allocation137_spill] sm:$0xff] %v13094_v57  ;;  %v3942_v56 = vmul.f32 %v3654_v46, %v2871_v54  ;;  %v3943_v3 = vmul.f32 %v3655_v10, %v2872_v19  ;;  %v4774_v58 = vmul.f32 %v15190_v17, %v4603_v42  ;;  %v13107_v15 = vpop.f32.mrb[30].mxu0  ;;  %v13109_v46 = vpop.f32.mrb[30].mxu1  ;;  %v13113_v54 = vld [vmem:[%s8213_s17 + $0x68] sm:$0xff] }
 0x4f7   : > { %v4260_v45 = vsub.f32 %v12894_v40, %v15346_v14  ;;  %15469 = vst [vmem:[#allocation138_spill] sm:$0xff] %v13099_v24  ;;  %15470 = vst [vmem:[#allocation139_spill] sm:$0xff] %v13101_v22  ;;  %v4429_v20 = vmul.f32 %v15192_v2, %v4258_v6  ;;  %v4602_v38 = vsub.f32 %v15193_v62, %v12894_v40  ;;  %v13117_v6 = vpop.f32.mrb[31].mxu0  ;;  %v15476_v40 = vld [vmem:[#allocation148_spill] sm:$0xff] }
 0x4f8   : > { %v4771_v27 = vmul.f32 %v15170_v52, %v4600_v7  ;;  %v7026_v57 = vpack.c.bf16 %v562_v39, %v561_v50  ;;  %15471 = vst [vmem:[#allocation99_spill] sm:$0xff] %v13107_v15  ;;  %15472 = vst [vmem:[#allocation67_spill] sm:$0xff] %v13109_v46  ;;  %v4086_v10 = vadd.f32 %v3942_v56, %v3798_v33  ;;  %v13119_v7 = vpop.f32.mrb[31].mxu1  ;;  %v13124_v33 = vpop.f32.mrb[32].mxu0 }
 0x4f9   : > { %v4087_v19 = vadd.f32 %v3943_v3, %v3799_v63  ;;  %v4431_v42 = vmul.f32 %v15171_v43, %v4260_v45  ;;  %15473 = vst [vmem:[#allocation140_spill] sm:$0xff] %v13113_v54  ;;  %vm774_vm12 = vcmp.ge.f32.partialorder %v13113_v54, %v15194_v16  ;;  %15474 = vst [vmem:[#allocation141_spill] sm:$0xff] %v13117_v6  ;;  %v13126_v63 = vpop.f32.mrb[32].mxu1  ;;  %v13130_v6 = vld [vmem:[%s8213_s17] sm:$0xff] }
 0x4fa   : > { %15475 = vst [vmem:[#allocation142_spill] sm:$0xff] %v13119_v7  ;;  %v4899_v50 = vmul.f32 %v4429_v20, %v15476_v40  ;;  %v5027_v39 = vmul.f32 %v4771_v27, %v13027_v25  ;;  %v4773_v46 = vmul.f32 %v15174_v59, %v4602_v38  ;;  %7027 = vmatprep.subr.bf16.mxu0 %v7026_v57  ;;  %15477 = vst [vmem:[#allocation100_spill] sm:$0xff] %v13124_v33  ;;  %v13133_v40 = vpop.f32.mrb[33].mxu0  ;;  %v13135_v25 = vpop.f32.mrb[33].mxu1  ;;  %v15494_v33 = vld [vmem:[#allocation90_spill] sm:$0xff] }
 0x4fb   : > { %7040 = vmatprep.subr.bf16.mxu1 %v7026_v57  ;;  %15478 = vst [vmem:[#allocation143_spill] sm:$0xff] %v13126_v63  ;;  %v4902_v56 = vmul.f32 %v4432_v32, %v4086_v10  ;;  %v5030_v3 = vmul.f32 %v4774_v58, %v4087_v19  ;;  %v4901_v45 = vmul.f32 %v4431_v42, %v13037_v23  ;;  %15479 = vst [vmem:[#allocation87_spill] sm:$0xff] %v13130_v6  ;;  %v13141_v58 = vpop.f32.mrb[34].mxu0  ;;  %v13143_v23 = vpop.f32.mrb[34].mxu1  ;;  %v15493_v63 = vld [vmem:[#allocation51_spill] sm:$0xff]  ;;  %v15498_v6 = vld [vmem:[#allocation64_spill] sm:$0xff] }
 0x4fc   : > { %7029 = vmatpush3.bf16.msra.mxu0 %v7026_v57  ;;  %7048 = vmatpush3.bf16.msra.mxu1 %v7026_v57  ;;  %15480 = vst [vmem:[#allocation144_spill] sm:$0xff] %v13133_v40  ;;  %15481 = vst [vmem:[#allocation145_spill] sm:$0xff] %v13135_v25  ;;  %v5155_v27 = vadd.f32 %v5027_v39, %v4899_v50  ;;  %v5029_v38 = vmul.f32 %v4773_v46, %v4086_v10  ;;  %v13154_v10 = vpop.f32.mrb[35].mxu0  ;;  %v13156_v19 = vpop.f32.mrb[35].mxu1 }
 0x4fd   : > { %vm775_vm13 = vcmp.ge.f32.partialorder %v13113_v54, %v15172_v37  ;;  %vm1009_vm14 = vcmp.lt.f32.partialorder %v13113_v54, %v15175_v60  ;;  %15482 = vst [vmem:[#allocation111_spill] sm:$0xff] %v13141_v58  ;;  %15483 = vst [vmem:[#allocation103_spill] sm:$0xff] %v13143_v23  ;;  %v5158_v32 = vadd.f32 %v5030_v3, %v4902_v56  ;;  %v13163_v3 = vpop.f32.mrb[36].mxu0  ;;  %v13165_v20 = vpop.f32.mrb[36].mxu1 }
 0x4fe   : > { %vm1010_vm15 = vcmp.lt.f32.partialorder %v13113_v54, %v15176_v51  ;;  %vm1185_vm0 = vmand %vm774_vm12, %vm1009_vm14  ;;  %v1754_v57 = vsub.f32 %v13113_v54, %v15177_v9  ;;  %v1755_v46 = vsub.f32 %v13113_v54, %v15178_v48  ;;  %15484 = vst [vmem:[#allocation146_spill] sm:$0xff] %v13154_v10  ;;  %5726 = vmatmul.mubr.f32.gmra.mrb[56].mxu0 %v5155_v27  ;;  %v13174_v10 = vpop.f32.mrb[37].mxu1 }
 0x4ff   : > { %15485 = vst [vmem:[#allocation147_spill] sm:$0xff] %v13156_v19  ;;  %v5157_v42 = vadd.f32 %v5029_v38, %v4901_v45  ;;  %vm1186_vm1 = vmand %vm775_vm13, %vm1010_vm15  ;;  %v6432_v50 = vsel %vm1185_vm0, 1.0, %v14403_v18  ;;  %v2184_v39 = vsub.f32 %v15196_v28, %v13113_v54  ;;  %v2185_v56 = vsub.f32 %v15180_v12, %v13113_v54  ;;  %5870 = vmatprep.mubr.f32.mxu1 %v5158_v32  ;;  %v13172_v38 = vpop.f32.mrb[37].mxu0 }
 0x500   : > { %15486 = vst [vmem:[#allocation61_spill] sm:$0xff] %v13163_v3  ;;  %15487 = vst [vmem:[#allocation86_spill] sm:$0xff] %v13165_v20  ;;  %v6433_v23 = vsel %vm1186_vm1, 1.0, %v14403_v18  ;;  %v1969_v19 = vmul.f32 %v15236_v4, %v1754_v57  ;;  %v1970_v45 = vmul.f32 %v15197_v53, %v1755_v46  ;;  %v3076_v27 = vsub.f32 %v13113_v54, %v15368_v11  ;;  %v15490_v20 = vld [vmem:[#allocation94_spill] sm:$0xff]  ;;  %v13182_v25 = vpop.f32.mrb[38].mxu0  ;;  %v13184_v46 = vpop.f32.mrb[38].mxu1 }
 0x501   : > { %15488 = vst [vmem:[#allocation102_spill] sm:$0xff] %v13172_v38  ;;  %15489 = vst [vmem:[#allocation107_spill] sm:$0xff] %v13174_v10  ;;  %5871 = vmatmul.mubr.f32.gmra.mrb[56].mxu1 %v5157_v42  ;;  %v2399_v58 = vmul.f32 %v15369_v61, %v2184_v39  ;;  %v2400_v3 = vmul.f32 %v15370_v31, %v2185_v56  ;;  %v3077_v32 = vsub.f32 %v13113_v54, %v15371_v30  ;;  %v15495_v42 = vld [vmem:[#allocation63_spill] sm:$0xff]  ;;  %v13190_v7 = vpop.f32.mrb[39].mxu0  ;;  %v13192_v56 = vpop.f32.mrb[39].mxu1  ;;  %v15499_v31 = vld [vmem:[#allocation52_spill] sm:$0xff] }
 0x502   : > { %v3466_v57 = vsub.f32 %v15490_v20, %v13113_v54  ;;  %15491 = vst [vmem:[#allocation148_spill] sm:$0xff] %v13182_v25  ;;  %15492 = vst [vmem:[#allocation149_spill] sm:$0xff] %v13184_v46  ;;  %v2559_v40 = vmul.f32 %v15493_v63, %v1969_v19  ;;  %v2560_v38 = vmul.f32 %v6432_v50, %v1970_v45  ;;  %v15500_v19 = vld [vmem:[#allocation66_spill] sm:$0xff]  ;;  %v15502_v20 = vld [vmem:[#allocation73_spill] sm:$0xff] }
 0x503   : > { %v3271_v10 = vmul.f32 %v15494_v33, %v3076_v27  ;;  %v3467_v39 = vsub.f32 %v15495_v42, %v13113_v54  ;;  %15496 = vst [vmem:[#allocation51_spill] sm:$0xff] %v13190_v7  ;;  %15497 = vst [vmem:[#allocation150_spill] sm:$0xff] %v13192_v56  ;;  %v2719_v15 = vmul.f32 %v6432_v50, %v2399_v58  ;;  %v15501_v27 = vld [vmem:[#allocation70_spill] sm:$0xff]  ;;  %v15503_v58 = vld [vmem:[#allocation79_spill] sm:$0xff] }
 0x504   : > { %v2720_v22 = vmul.f32 %v6433_v23, %v2400_v3  ;;  %v3272_v24 = vmul.f32 %v15425_v0, %v3077_v32  ;;  %v3661_v25 = vmul.f32 %v15428_v1, %v3466_v57  ;;  %v4267_v45 = vsub.f32 %v13113_v54, %v15500_v19  ;;  %v15504_v50 = vld [vmem:[#allocation65_spill] sm:$0xff]  ;;  %v15505_v32 = vld [vmem:[#allocation72_spill] sm:$0xff] }
 0x505   : > { %v3662_v46 = vmul.f32 %v15498_v6, %v3467_v39  ;;  %v3805_v63 = vmul.f32 %v3271_v10, %v15499_v31  ;;  %v4609_v42 = vsub.f32 %v15501_v27, %v13113_v54  ;;  %v2879_v33 = vadd.f32 %v2719_v15, %v2559_v40  ;;  %v15506_v39 = vld [vmem:[#allocation80_spill] sm:$0xff]  ;;  %v15507_v31 = vld [vmem:[#allocation85_spill] sm:$0xff] }
 0x506   : > { %v2880_v7 = vadd.f32 %v2720_v22, %v2560_v38  ;;  %vm776_vm2 = vcmp.ge.f32.partialorder %v13113_v54, %v15502_v20  ;;  %vm777_vm3 = vcmp.ge.f32.partialorder %v13113_v54, %v15503_v58  ;;  %v4438_v3 = vmul.f32 %v15504_v50, %v4267_v45  ;;  %v15508_v22 = vld [vmem:[#allocation75_spill] sm:$0xff]  ;;  %v15509_v58 = vld [vmem:[#allocation76_spill] sm:$0xff] }
 0x507   : > { %v4780_v57 = vmul.f32 %v15505_v32, %v4609_v42  ;;  %vm1011_vm4 = vcmp.lt.f32.partialorder %v13113_v54, %v15506_v39  ;;  %vm1012_vm5 = vcmp.lt.f32.partialorder %v13113_v54, %v15507_v31  ;;  %v3806_v10 = vmul.f32 %v3272_v24, %v2879_v33  ;;  %v15510_v42 = vld [vmem:[#allocation95_spill] sm:$0xff]  ;;  %v15511_v39 = vld [vmem:[#allocation98_spill] sm:$0xff]  ;;  %v15513_v6 = vld [vmem:[#allocation96_spill] sm:$0xff] }
 0x508   : > { %v3949_v56 = vmul.f32 %v3661_v25, %v2879_v33  ;;  %v3950_v15 = vmul.f32 %v3662_v46, %v2880_v7  ;;  %vm1187_vm6 = vmand %vm776_vm2, %vm1011_vm4  ;;  %v1756_v40 = vsub.f32 %v13113_v54, %v15508_v22  ;;  %v1757_v45 = vsub.f32 %v13113_v54, %v15509_v58  ;;  %v15512_v25 = vld [vmem:[#allocation82_spill] sm:$0xff] }
 0x509   : > { %vm1188_vm7 = vmand %vm777_vm3, %vm1012_vm5  ;;  %v6434_v38 = vsel %vm1187_vm6, 1.0, %v14403_v18  ;;  %v2186_v32 = vsub.f32 %v15510_v42, %v13113_v54  ;;  %v2187_v20 = vsub.f32 %v15511_v39, %v13113_v54  ;;  %v3078_v58 = vsub.f32 %v13113_v54, %v15513_v6 }
 0x50a   : > { %v4093_v31 = vadd.f32 %v3949_v56, %v3805_v63  ;;  %v4094_v24 = vadd.f32 %v3950_v15, %v3806_v10  ;;  %v6435_v33 = vsel %vm1188_vm7, 1.0, %v14403_v18  ;;  %v1971_v46 = vmul.f32 %v15512_v25, %v1756_v40 }
 0x50b   : > { %v1972_v22 = vmul.f32 %v15321_v34, %v1757_v45  ;;  %v2401_v50 = vmul.f32 %v15452_v13, %v2186_v32  ;;  %v2402_v27 = vmul.f32 %v15456_v5, %v2187_v20  ;;  %v3079_v56 = vsub.f32 %v13113_v54, %v15366_v29  ;;  %v15514_v32 = vld [vmem:[#allocation109_spill] sm:$0xff] }
 0x50c   : > { %v4908_v19 = vmul.f32 %v4438_v3, %v4093_v31  ;;  %v5036_v42 = vmul.f32 %v4780_v57, %v4094_v24  ;;  %v2561_v1 = vmul.f32 %v6433_v23, %v1971_v46  ;;  %v3273_v40 = vmul.f32 %v11686_v55, %v3078_v58 }
 0x50d   : > { %v2562_v63 = vmul.f32 %v6434_v38, %v1972_v22  ;;  %v2721_v10 = vmul.f32 %v6434_v38, %v2401_v50  ;;  %v2722_v15 = vmul.f32 %v6435_v33, %v2402_v27  ;;  %v3274_v45 = vmul.f32 %v11689_v36, %v3079_v56  ;;  %v13244_v22 = vpop.f32.mrb[40].mxu0 }
 0x50e   : > { %v5164_v25 = vadd.f32 %v5036_v42, %v4908_v19  ;;  %v3468_v20 = vsub.f32 %v15255_v8, %v13113_v54  ;;  %v3469_v6 = vsub.f32 %v15514_v32, %v13113_v54  ;;  %v3807_v23 = vmul.f32 %v3273_v40, %v2880_v7  ;;  %15515 = vst [vmem:[#allocation52_spill] sm:$0xff] %v13244_v22  ;;  %v13251_v33 = vpop.f32.mrb[41].mxu0 }
 0x50f   : > { %v2881_v3 = vadd.f32 %v2721_v10, %v2561_v1  ;;  %v2882_v57 = vadd.f32 %v2722_v15, %v2562_v63  ;;  %v4269_v46 = vsub.f32 %v13113_v54, %v11718_v49  ;;  %v4611_v19 = vsub.f32 %v15234_v47, %v13113_v54  ;;  %15516 = vst [vmem:[#allocation109_spill] sm:$0xff] %v13251_v33  ;;  %v13255_v10 = vpop.f32.mrb[40].mxu1  ;;  %v15525_v33 = vld [vmem:[#allocation97_spill] sm:$0xff] }
 0x510   : > { %5730 = vmatprep.mubr.f32.mxu0 %v5164_v25  ;;  %v3663_v27 = vmul.f32 %v15211_v35, %v3468_v20  ;;  %v3664_v58 = vmul.f32 %v15214_v21, %v3469_v6  ;;  %v4266_v50 = vsub.f32 %v13113_v54, %v15344_v44  ;;  %v4608_v38 = vsub.f32 %v15397_v26, %v13113_v54  ;;  %v13262_v20 = vld [vmem:[%s8213_s17 + $0x70] sm:$0xff] }
 0x511   : > { %v3808_v1 = vmul.f32 %v3274_v45, %v2881_v3  ;;  %v4440_v7 = vmul.f32 %v15396_v41, %v4269_v46  ;;  %v4268_v42 = vsub.f32 %v13113_v54, %v15346_v14  ;;  %v4782_v56 = vmul.f32 %v15190_v17, %v4611_v19  ;;  %15517 = vst [vmem:[#allocation151_spill] sm:$0xff] %v13255_v10 }
 0x512   : > { %v3951_v6 = vmul.f32 %v3663_v27, %v2881_v3  ;;  %v3952_v25 = vmul.f32 %v3664_v58, %v2882_v57  ;;  %v4437_v63 = vmul.f32 %v15192_v2, %v4266_v50  ;;  %v4779_v15 = vmul.f32 %v15170_v52, %v4608_v38  ;;  %v13266_v3 = vpop.f32.mrb[41].mxu1  ;;  %v15519_v27 = vld [vmem:[#allocation88_spill] sm:$0xff] }
 0x513   : > { %v4439_v40 = vmul.f32 %v15171_v43, %v4268_v42  ;;  %v4610_v45 = vsub.f32 %v15193_v62, %v13113_v54  ;;  %vm785_vm8 = vcmp.ge.f32.partialorder %v13262_v20, %v15194_v16  ;;  %15518 = vst [vmem:[#allocation152_spill] sm:$0xff] %v13266_v3  ;;  %vm786_vm9 = vcmp.ge.f32.partialorder %v13262_v20, %v15172_v37 }
 0x514   : > { %v4095_v57 = vadd.f32 %v3951_v6, %v3807_v23  ;;  %v4096_v46 = vadd.f32 %v3952_v25, %v3808_v1  ;;  %v4907_v58 = vmul.f32 %v4437_v63, %v15519_v27  ;;  %v5035_v19 = vmul.f32 %v4779_v15, %v4093_v31 }
 0x515   : > { %v4781_v50 = vmul.f32 %v15174_v59, %v4610_v45  ;;  %v4909_v38 = vmul.f32 %v4439_v40, %v4094_v24  ;;  %vm1020_vm10 = vcmp.lt.f32.partialorder %v13262_v20, %v15175_v60  ;;  %vm1021_vm11 = vcmp.lt.f32.partialorder %v13262_v20, %v15176_v51 }
 0x516   : > { %v4910_v42 = vmul.f32 %v4440_v7, %v4095_v57  ;;  %v5038_v10 = vmul.f32 %v4782_v56, %v4096_v46  ;;  %vm1196_vm12 = vmand %vm785_vm8, %vm1020_vm10  ;;  %v1764_v23 = vsub.f32 %v13262_v20, %v15177_v9  ;;  %v5163_v1 = vadd.f32 %v5035_v19, %v4907_v58  ;;  %v15520_v46 = vld [vmem:[#allocation89_spill] sm:$0xff]  ;;  %v15521_v19 = vld [vmem:[#allocation94_spill] sm:$0xff] }
 0x517   : > { %v5037_v6 = vmul.f32 %v4781_v50, %v4095_v57  ;;  %vm1197_vm13 = vmand %vm786_vm9, %vm1021_vm11  ;;  %v6443_v31 = vsel %vm1196_vm12, 1.0, %v14403_v18  ;;  %v1765_v24 = vsub.f32 %v13262_v20, %v15178_v48  ;;  %v2194_v56 = vsub.f32 %v15196_v28, %v13262_v20 }
 0x518   : > { %v5166_v25 = vadd.f32 %v5038_v10, %v4910_v42  ;;  %v6444_v63 = vsel %vm1197_vm13, 1.0, %v14403_v18  ;;  %v1979_v7 = vmul.f32 %v15236_v4, %v1764_v23  ;;  %5731 = vmatmul.mubr.f32.gmra.mrb[58].mxu0 %v5163_v1  ;;  %v2195_v45 = vsub.f32 %v15180_v12, %v13262_v20  ;;  %v15523_v1 = vld [vmem:[#allocation90_spill] sm:$0xff] }
 0x519   : > { %v5165_v15 = vadd.f32 %v5037_v6, %v4909_v38  ;;  %v1980_v40 = vmul.f32 %v15197_v53, %v1765_v24  ;;  %v3085_v57 = vsub.f32 %v13262_v20, %v15368_v11  ;;  %v2409_v10 = vmul.f32 %v15369_v61, %v2194_v56  ;;  %v15522_v38 = vld [vmem:[#allocation57_spill] sm:$0xff]  ;;  %v15524_v24 = vld [vmem:[#allocation63_spill] sm:$0xff]  ;;  %v15527_v61 = vld [vmem:[#allocation64_spill] sm:$0xff] }
 0x51a   : > { %5875 = vmatprep.mubr.f32.mxu1 %v5166_v25  ;;  %v2569_v27 = vmul.f32 %v15520_v46, %v1979_v7  ;;  %v3086_v58 = vsub.f32 %v13262_v20, %v15371_v30  ;;  %v3475_v50 = vsub.f32 %v15521_v19, %v13262_v20  ;;  %v2410_v42 = vmul.f32 %v15522_v38, %v2195_v45  ;;  %v15526_v46 = vld [vmem:[#allocation66_spill] sm:$0xff] }
 0x51b   : > { %5876 = vmatmul.mubr.f32.gmra.mrb[58].mxu1 %v5165_v15  ;;  %v2570_v23 = vmul.f32 %v6443_v31, %v1980_v40  ;;  %v3280_v6 = vmul.f32 %v15523_v1, %v3085_v57  ;;  %v3476_v3 = vsub.f32 %v15524_v24, %v13262_v20  ;;  %v2729_v25 = vmul.f32 %v6443_v31, %v2409_v10  ;;  %v15528_v15 = vld [vmem:[#allocation117_spill] sm:$0xff]  ;;  %v15529_v40 = vld [vmem:[#allocation70_spill] sm:$0xff]  ;;  %v15532_v31 = vld [vmem:[#allocation79_spill] sm:$0xff] }
 0x51c   : > { %v3281_v56 = vmul.f32 %v15425_v0, %v3086_v58  ;;  %v3670_v7 = vmul.f32 %v15525_v33, %v3475_v50  ;;  %v4275_v22 = vsub.f32 %v13262_v20, %v15526_v46  ;;  %v2730_v54 = vmul.f32 %v6444_v63, %v2410_v42  ;;  %v15530_v1 = vld [vmem:[#allocation65_spill] sm:$0xff]  ;;  %v15533_v58 = vld [vmem:[#allocation72_spill] sm:$0xff] }
 0x51d   : > { %v3671_v19 = vmul.f32 %v15527_v61, %v3476_v3  ;;  %v3814_v30 = vmul.f32 %v3280_v6, %v15528_v15  ;;  %v4617_v45 = vsub.f32 %v15529_v40, %v13262_v20  ;;  %v2889_v57 = vadd.f32 %v2729_v25, %v2569_v27  ;;  %v15531_v24 = vld [vmem:[#allocation73_spill] sm:$0xff]  ;;  %v15534_v42 = vld [vmem:[#allocation80_spill] sm:$0xff]  ;;  %v15536_v27 = vld [vmem:[#allocation75_spill] sm:$0xff] }
 0x51e   : > { %v4446_v38 = vmul.f32 %v15530_v1, %v4275_v22  ;;  %vm787_vm14 = vcmp.ge.f32.partialorder %v13262_v20, %v15531_v24  ;;  %vm788_vm15 = vcmp.ge.f32.partialorder %v13262_v20, %v15532_v31  ;;  %v2890_v10 = vadd.f32 %v2730_v54, %v2570_v23  ;;  %v15535_v3 = vld [vmem:[#allocation85_spill] sm:$0xff]  ;;  %v15537_v25 = vld [vmem:[#allocation76_spill] sm:$0xff]  ;;  %v15538_v23 = vld [vmem:[#allocation95_spill] sm:$0xff] }
 0x51f   : > { %v4788_v50 = vmul.f32 %v15533_v58, %v4617_v45  ;;  %vm1022_vm0 = vcmp.lt.f32.partialorder %v13262_v20, %v15534_v42  ;;  %vm1023_vm1 = vcmp.lt.f32.partialorder %v13262_v20, %v15535_v3  ;;  %v3815_v6 = vmul.f32 %v3281_v56, %v2889_v57  ;;  %v15540_v31 = vld [vmem:[#allocation96_spill] sm:$0xff] }
 0x520   : > { %v3958_v15 = vmul.f32 %v3670_v7, %v2889_v57  ;;  %vm1198_vm2 = vmand %vm787_vm14, %vm1022_vm0  ;;  %v1766_v22 = vsub.f32 %v13262_v20, %v15536_v27  ;;  %v1767_v1 = vsub.f32 %v13262_v20, %v15537_v25  ;;  %v3959_v24 = vmul.f32 %v3671_v19, %v2890_v10  ;;  %v15539_v7 = vld [vmem:[#allocation82_spill] sm:$0xff] }
 0x521   : > { %vm1199_vm3 = vmand %vm788_vm15, %vm1023_vm1  ;;  %v6445_v54 = vsel %vm1198_vm2, 1.0, %v14403_v18  ;;  %v2196_v45 = vsub.f32 %v15538_v23, %v13262_v20  ;;  %v2197_v58 = vsub.f32 %v15511_v39, %v13262_v20  ;;  %v3087_v40 = vsub.f32 %v13262_v20, %v15540_v31 }
 0x522   : > { %v4102_v3 = vadd.f32 %v3958_v15, %v3814_v30  ;;  %v6446_v56 = vsel %vm1199_vm3, 1.0, %v14403_v18  ;;  %v1981_v57 = vmul.f32 %v15539_v7, %v1766_v22  ;;  %v1982_v27 = vmul.f32 %v15321_v34, %v1767_v1 }
 0x523   : > { %v4103_v42 = vadd.f32 %v3959_v24, %v3815_v6  ;;  %v2411_v25 = vmul.f32 %v15452_v13, %v2196_v45  ;;  %v2412_v19 = vmul.f32 %v15456_v5, %v2197_v58  ;;  %v3088_v30 = vsub.f32 %v13262_v20, %v15366_v29 }
 0x524   : > { %v4916_v46 = vmul.f32 %v4446_v38, %v4102_v3  ;;  %v2571_v23 = vmul.f32 %v6444_v63, %v1981_v57  ;;  %v2572_v61 = vmul.f32 %v6445_v54, %v1982_v27  ;;  %v3282_v1 = vmul.f32 %v11686_v55, %v3087_v40  ;;  %v563_v57 = vld [vmem:[%s8233_s6 + $0x70] sm:$0xff] }
 0x525   : > { %v5044_v15 = vmul.f32 %v4788_v50, %v4103_v42  ;;  %v2731_v39 = vmul.f32 %v6445_v54, %v2411_v25  ;;  %v2732_v22 = vmul.f32 %v6446_v56, %v2412_v19  ;;  %v3283_v24 = vmul.f32 %v11689_v36, %v3088_v30  ;;  %v564_v19 = vld [vmem:[%s8233_s6 + $0x78] sm:$0xff]  ;;  %s7553_s6 = scalar_lea.vmem %s13721_s5, 2048 }
 0x526   : > { %v3477_v58 = vsub.f32 %v15255_v8, %v13262_v20  ;;  %v3478_v38 = vsub.f32 %v15514_v32, %v13262_v20  ;;  %v4277_v63 = vsub.f32 %v13262_v20, %v11718_v49  ;;  %v3816_v45 = vmul.f32 %v3282_v1, %v2890_v10  ;;  %p7554_p4 = scmp.ne.s32.totalorder %s13721_s5, %s7553_s6  ;;  %p7561_p11 = scmp.lt.s32.totalorder %s7559_s3, %s7553_s6 }
 0x527   : > { %v5172_v6 = vadd.f32 %v5044_v15, %v4916_v46  ;;  %v2891_v27 = vadd.f32 %v2731_v39, %v2571_v23  ;;  %v2892_v50 = vadd.f32 %v2732_v22, %v2572_v61  ;;  %v4619_v56 = vsub.f32 %v15234_v47, %v13262_v20  ;;  %v13357_v46 = vpop.f32.mrb[42].mxu0 }
 0x528   : > { %v3672_v25 = vmul.f32 %v15211_v35, %v3477_v58  ;;  %v3673_v54 = vmul.f32 %v15214_v21, %v3478_v38  ;;  %v4448_v40 = vmul.f32 %v15396_v41, %v4277_v63  ;;  %v4274_v49 = vsub.f32 %v13262_v20, %v15344_v44  ;;  %15541 = vst [vmem:[#allocation88_spill] sm:$0xff] %v13357_v46  ;;  %v13362_v1 = vpop.f32.mrb[43].mxu0  ;;  %p7555_p6 = pnand %p7554_p4, %p15660_p3  ;;  %p7562_p7 = por %p7561_p11, %p7560_p5 }
 0x529   : > { %5735 = vmatprep.mubr.f32.mxu0 %v5172_v6  ;;  %v3817_v30 = vmul.f32 %v3283_v24, %v2891_v27  ;;  %v4616_v61 = vsub.f32 %v15397_v26, %v13262_v20  ;;  %v4276_v39 = vsub.f32 %v13262_v20, %v15346_v14  ;;  %v4790_v15 = vmul.f32 %v15190_v17, %v4619_v56  ;;  %v13367_v6 = vpop.f32.mrb[42].mxu1 }
 0x52a   : > { %v3960_v10 = vmul.f32 %v3672_v25, %v2891_v27  ;;  %v3961_v23 = vmul.f32 %v3673_v54, %v2892_v50  ;;  %v4618_v22 = vsub.f32 %v15193_v62, %v13262_v20  ;;  %15542 = vst [vmem:[#allocation89_spill] sm:$0xff] %v13362_v1  ;;  %v4445_v24 = vmul.f32 %v15192_v2, %v4274_v49  ;;  %v13371_v25 = vld [vmem:[%s8213_s17 + $0x78] sm:$0xff]  ;;  %v13375_v54 = vpop.f32.mrb[43].mxu1  ;;  %v15543_v49 = vld [vmem:[#allocation56_spill] sm:$0xff]  ;;  %p7556_p0 = pneg %p7555_p6 }
 0x52b   : > { %v4787_v58 = vmul.f32 %v15170_v52, %v4616_v61  ;;  %v4447_v38 = vmul.f32 %v15171_v43, %v4276_v39  ;;  %v7030_v63 = vpack.c.bf16 %v564_v19, %v563_v57  ;;  %vm796_vm4 = vcmp.ge.f32.partialorder %v13371_v25, %v15194_v16  ;;  %v13379_v57 = vld [vmem:[%s8213_s17 + $0x40] sm:$0xff] }
 0x52c   : > { %v4104_v46 = vadd.f32 %v3960_v10, %v3816_v45  ;;  %v4105_v27 = vadd.f32 %v3961_v23, %v3817_v30  ;;  %v4789_v50 = vmul.f32 %v15174_v59, %v4618_v22  ;;  %v4915_v56 = vmul.f32 %v4445_v24, %v15543_v49  ;;  %v13383_v10 = vld [vmem:[%s8213_s17 + $0x8] sm:$0xff]  ;;  %v15549_v49 = vld [vmem:[#allocation91_spill] sm:$0xff]  ;;  %p7563_p1 = pnand %p7562_p7, %p7556_p0 }
 0x52d   : > { %v5043_v61 = vmul.f32 %v4787_v58, %v4102_v3  ;;  %v4917_v1 = vmul.f32 %v4447_v38, %v4103_v42  ;;  %7031 = vmatprep.subr.bf16.mxu0 %v7030_v63  ;;  %7041 = vmatprep.subr.bf16.mxu1 %v7030_v63  ;;  %v541_v45 = vmax.f32 %v13379_v57, 0.0  ;;  %v534_v23 = vmax.f32 %v13383_v10, 0.0  ;;  %v15545_v58 = vld [vmem:[#allocation84_spill] sm:$0xff]  ;;  %v15594_v57 = vld [vmem:[#allocation62_spill] sm:$0xff]  ;;  %v15596_v10 = vld [vmem:[#allocation123_spill] sm:$0xff] }
 0x52e   : > { %v4918_v19 = vmul.f32 %v4448_v40, %v4104_v46  ;;  %v5046_v30 = vmul.f32 %v4790_v15, %v4105_v27  ;;  %v5045_v39 = vmul.f32 %v4789_v50, %v4104_v46  ;;  %7033 = vmatpush3.bf16.msra.mxu0 %v7030_v63  ;;  %7049 = vmatpush3.bf16.msra.mxu1 %v7030_v63  ;;  %v15547_v27 = vld [vmem:[#allocation90_spill] sm:$0xff] }
 0x52f   : > { %v5171_v22 = vadd.f32 %v5043_v61, %v4915_v56  ;;  %vm797_vm5 = vcmp.ge.f32.partialorder %v13371_v25, %v15172_v37  ;;  %vm1031_vm6 = vcmp.lt.f32.partialorder %v13371_v25, %v15175_v60  ;;  %vm1032_vm7 = vcmp.lt.f32.partialorder %v13371_v25, %v15176_v51  ;;  %v15548_v50 = vld [vmem:[#allocation94_spill] sm:$0xff] }
 0x530   : > { %v5174_v42 = vadd.f32 %v5046_v30, %v4918_v19  ;;  %v5173_v3 = vadd.f32 %v5045_v39, %v4917_v1  ;;  %vm1207_vm8 = vmand %vm796_vm4, %vm1031_vm6  ;;  %v1774_v40 = vsub.f32 %v13371_v25, %v15177_v9  ;;  %v1775_v46 = vsub.f32 %v13371_v25, %v15178_v48  ;;  %v15544_v1 = vld [vmem:[#allocation60_spill] sm:$0xff] }
 0x531   : > { %5736 = vmatmul.mubr.f32.gmra.mrb[60].mxu0 %v5171_v22  ;;  %vm1208_vm9 = vmand %vm797_vm5, %vm1032_vm7  ;;  %v6454_v37 = vsel %vm1207_vm8, 1.0, %v14403_v18  ;;  %v2204_v60 = vsub.f32 %v15196_v28, %v13371_v25  ;;  %v2205_v51 = vsub.f32 %v15180_v12, %v13371_v25  ;;  %v3094_v16 = vsub.f32 %v13371_v25, %v15368_v11  ;;  %v15546_v28 = vld [vmem:[#allocation57_spill] sm:$0xff] }
 0x532   : > { %5880 = vmatprep.mubr.f32.mxu1 %v5174_v42  ;;  %v6455_v15 = vsel %vm1208_vm9, 1.0, %v14403_v18  ;;  %v1989_v9 = vmul.f32 %v15236_v4, %v1774_v40  ;;  %v1990_v48 = vmul.f32 %v15197_v53, %v1775_v46  ;;  %v3095_v24 = vsub.f32 %v13371_v25, %v15544_v1  ;;  %v15550_v53 = vld [vmem:[#allocation63_spill] sm:$0xff]  ;;  %v15551_v42 = vld [vmem:[#allocation93_spill] sm:$0xff]  ;;  %v15552_v40 = vld [vmem:[#allocation64_spill] sm:$0xff] }
 0x533   : > { %5881 = vmatmul.mubr.f32.gmra.mrb[60].mxu1 %v5173_v3  ;;  %v2419_v38 = vmul.f32 %v15545_v58, %v2204_v60  ;;  %v2420_v63 = vmul.f32 %v15546_v28, %v2205_v51  ;;  %v3289_v12 = vmul.f32 %v15547_v27, %v3094_v16  ;;  %v3484_v11 = vsub.f32 %v15548_v50, %v13371_v25  ;;  %v15553_v60 = vld [vmem:[#allocation66_spill] sm:$0xff]  ;;  %v15561_v27 = vld [vmem:[#allocation75_spill] sm:$0xff] }
 0x534   : > { %v2579_v56 = vmul.f32 %v15549_v49, %v1989_v9  ;;  %v2580_v61 = vmul.f32 %v6454_v37, %v1990_v48  ;;  %v3290_v4 = vmul.f32 %v15425_v0, %v3095_v24  ;;  %v3485_v19 = vsub.f32 %v15550_v53, %v13371_v25  ;;  %v15554_v16 = vld [vmem:[#allocation70_spill] sm:$0xff]  ;;  %v15555_v48 = vld [vmem:[#allocation73_spill] sm:$0xff]  ;;  %v15556_v24 = vld [vmem:[#allocation79_spill] sm:$0xff] }
 0x535   : > { %v2739_v30 = vmul.f32 %v6454_v37, %v2419_v38  ;;  %v2740_v39 = vmul.f32 %v6455_v15, %v2420_v63  ;;  %v3679_v22 = vmul.f32 %v15525_v33, %v3484_v11  ;;  %v3823_v3 = vmul.f32 %v3289_v12, %v15551_v42  ;;  %v15557_v37 = vld [vmem:[#allocation80_spill] sm:$0xff]  ;;  %v15558_v33 = vld [vmem:[#allocation65_spill] sm:$0xff] }
 0x536   : > { %v3680_v46 = vmul.f32 %v15552_v40, %v3485_v19  ;;  %v4283_v51 = vsub.f32 %v13371_v25, %v15553_v60  ;;  %v4625_v9 = vsub.f32 %v15554_v16, %v13371_v25  ;;  %vm798_vm10 = vcmp.ge.f32.partialorder %v13371_v25, %v15555_v48  ;;  %v15559_v38 = vld [vmem:[#allocation72_spill] sm:$0xff]  ;;  %v15560_v63 = vld [vmem:[#allocation85_spill] sm:$0xff] }
 0x537   : > { %v2899_v0 = vadd.f32 %v2739_v30, %v2579_v56  ;;  %v2900_v1 = vadd.f32 %v2740_v39, %v2580_v61  ;;  %vm799_vm11 = vcmp.ge.f32.partialorder %v13371_v25, %v15556_v24  ;;  %vm1033_vm12 = vcmp.lt.f32.partialorder %v13371_v25, %v15557_v37  ;;  %v15562_v53 = vld [vmem:[#allocation76_spill] sm:$0xff]  ;;  %v15563_v39 = vld [vmem:[#allocation95_spill] sm:$0xff] }
 0x538   : > { %v4454_v58 = vmul.f32 %v15558_v33, %v4283_v51  ;;  %v4796_v28 = vmul.f32 %v15559_v38, %v4625_v9  ;;  %vm1034_vm13 = vcmp.lt.f32.partialorder %v13371_v25, %v15560_v63  ;;  %vm1209_vm14 = vmand %vm798_vm10, %vm1033_vm12  ;;  %v1776_v12 = vsub.f32 %v13371_v25, %v15561_v27  ;;  %v15564_v51 = vld [vmem:[#allocation98_spill] sm:$0xff] }
 0x539   : > { %v3824_v50 = vmul.f32 %v3290_v4, %v2899_v0  ;;  %v3967_v11 = vmul.f32 %v3679_v22, %v2899_v0  ;;  %v3968_v49 = vmul.f32 %v3680_v46, %v2900_v1  ;;  %vm1210_vm15 = vmand %vm799_vm11, %vm1034_vm13  ;;  %v6456_v56 = vsel %vm1209_vm14, 1.0, %v14403_v18 }
 0x53a   : > { %v6457_v61 = vsel %vm1210_vm15, 1.0, %v14403_v18  ;;  %v1777_v19 = vsub.f32 %v13371_v25, %v15562_v53  ;;  %v1991_v30 = vmul.f32 %v15539_v7, %v1776_v12  ;;  %v2206_v42 = vsub.f32 %v15563_v39, %v13371_v25  ;;  %v7286_v53 = vld [vmem:[%s8213_s17 + $0x10] sm:$0xff] }
 0x53b   : > { %v4111_v40 = vadd.f32 %v3967_v11, %v3823_v3  ;;  %v4112_v60 = vadd.f32 %v3968_v49, %v3824_v50  ;;  %v2207_v4 = vsub.f32 %v15564_v51, %v13371_v25  ;;  %v3096_v22 = vsub.f32 %v13371_v25, %v15540_v31 }
 0x53c   : > { %v1992_v46 = vmul.f32 %v15321_v34, %v1777_v19  ;;  %v2421_v18 = vmul.f32 %v15452_v13, %v2206_v42  ;;  %v2581_v16 = vmul.f32 %v6455_v15, %v1991_v30  ;;  %v3097_v9 = vsub.f32 %v13371_v25, %v15366_v29  ;;  %v15566_v30 = vld [vmem:[#allocation53_spill] sm:$0xff] }
 0x53d   : > { %v4924_v7 = vmul.f32 %v4454_v58, %v4111_v40  ;;  %v5052_v48 = vmul.f32 %v4796_v28, %v4112_v60  ;;  %v2422_v0 = vmul.f32 %v15456_v5, %v2207_v4  ;;  %v3291_v3 = vmul.f32 %v11686_v55, %v3096_v22  ;;  %v15565_v28 = vld [vmem:[#allocation110_spill] sm:$0xff] }
 0x53e   : > { %v2582_v24 = vmul.f32 %v6456_v56, %v1992_v46  ;;  %v2741_v37 = vmul.f32 %v6456_v56, %v2421_v18  ;;  %v3292_v33 = vmul.f32 %v11689_v36, %v3097_v9  ;;  %v3486_v31 = vsub.f32 %v15255_v8, %v13371_v25  ;;  %v7287_v4 = vld [vmem:[%s8213_s17 + $0x50] sm:$0xff]  ;;  %v7288_v46 = vld [vmem:[%s8213_s17 + $0x18] sm:$0xff] }
 0x53f   : > { %v5180_v34 = vadd.f32 %v5052_v48, %v4924_v7  ;;  %v2742_v38 = vmul.f32 %v6457_v61, %v2422_v0  ;;  %v3487_v13 = vsub.f32 %v15514_v32, %v13371_v25  ;;  %v3825_v15 = vmul.f32 %v3291_v3, %v2900_v1  ;;  %v13471_v1 = vpop.f32.mrb[44].mxu0  ;;  %v13486_v61 = vld [vmem:[%s8213_s17 + $0x48] sm:$0xff]  ;;  %v13498_v48 = vld [vmem:[%s8213_s17 + $0x58] sm:$0xff]  ;;  %v7290_v3 = vld [vmem:[%s8213_s17 + $0x20] sm:$0xff] }
 0x540   : > { %v2901_v29 = vadd.f32 %v2741_v37, %v2581_v16  ;;  %v3681_v58 = vmul.f32 %v15211_v35, %v3486_v31  ;;  %v4285_v5 = vsub.f32 %v13371_v25, %v15565_v28  ;;  %v4627_v55 = vsub.f32 %v15234_v47, %v13371_v25  ;;  %v13475_v50 = vpop.f32.mrb[45].mxu0 }
 0x541   : > { %5740 = vmatprep.mubr.f32.mxu0 %v5180_v34  ;;  %v2902_v36 = vadd.f32 %v2742_v38, %v2582_v24  ;;  %v3682_v63 = vmul.f32 %v15214_v21, %v3487_v13  ;;  %v4282_v8 = vsub.f32 %v13371_v25, %v15344_v44  ;;  %v4624_v32 = vsub.f32 %v15397_v26, %v13371_v25  ;;  %v13481_v26 = vpop.f32.mrb[44].mxu1  ;;  %v15567_v34 = vld [vmem:[#allocation140_spill] sm:$0xff] }
 0x542   : > { %v3826_v35 = vmul.f32 %v3292_v33, %v2901_v29  ;;  %v3969_v27 = vmul.f32 %v3681_v58, %v2901_v29  ;;  %v4456_v12 = vmul.f32 %v15396_v41, %v4285_v5  ;;  %v4798_v47 = vmul.f32 %v15190_v17, %v4627_v55  ;;  %v13490_v19 = vpop.f32.mrb[45].mxu1  ;;  %v15569_v29 = vld [vmem:[#allocation119_spill] sm:$0xff] }
 0x543   : > { %v3970_v11 = vmul.f32 %v3682_v63, %v2902_v36  ;;  %v4453_v21 = vmul.f32 %v15192_v2, %v4282_v8  ;;  %v4795_v49 = vmul.f32 %v15170_v52, %v4624_v32  ;;  %v4284_v44 = vsub.f32 %v13371_v25, %v15346_v14  ;;  %v15570_v5 = vld [vmem:[#allocation87_spill] sm:$0xff]  ;;  %v15572_v36 = vld [vmem:[#allocation114_spill] sm:$0xff]  ;;  %v15573_v63 = vld [vmem:[#allocation37_spill] sm:$0xff] }
 0x544   : > { %v4113_v56 = vadd.f32 %v3969_v27, %v3825_v15  ;;  %v4626_v41 = vsub.f32 %v15193_v62, %v13371_v25  ;;  %v542_v17 = vmax.f32 %v13486_v61, 0.0  ;;  %v535_v2 = vmax.f32 %v7286_v53, 0.0  ;;  %v15568_v15 = vld [vmem:[#allocation118_spill] sm:$0xff]  ;;  %v15582_v53 = vld [vmem:[#allocation115_spill] sm:$0xff] }
 0x545   : > { %v4114_v52 = vadd.f32 %v3970_v11, %v3826_v35  ;;  %v4923_v14 = vmul.f32 %v4453_v21, %v15566_v30  ;;  %v5051_v39 = vmul.f32 %v4795_v49, %v4111_v40  ;;  %v4455_v42 = vmul.f32 %v15171_v43, %v4284_v44  ;;  %v13503_v43 = vld [vmem:[%s8213_s17 + $0x60] sm:$0xff]  ;;  %v15574_v32 = vld [vmem:[#allocation42_spill] sm:$0xff]  ;;  %v15579_v49 = vld [vmem:[#allocation39_spill] sm:$0xff] }
 0x546   : > { %v4926_v51 = vmul.f32 %v4456_v12, %v4113_v56  ;;  %v4797_v62 = vmul.f32 %v15174_v59, %v4626_v41  ;;  %v543_v22 = vmax.f32 %v7287_v4, 0.0  ;;  %v536_v18 = vmax.f32 %v7288_v46, 0.0  ;;  %v13507_v59 = vld [vmem:[%s8213_s17 + $0x28] sm:$0xff]  ;;  %v15575_v35 = vld [vmem:[#allocation40_spill] sm:$0xff]  ;;  %v15587_v46 = vld [vmem:[#allocation122_spill] sm:$0xff] }
 0x547   : > { %v5054_v16 = vmul.f32 %v4798_v47, %v4114_v52  ;;  %v5179_v9 = vadd.f32 %v5051_v39, %v4923_v14  ;;  %v4925_v7 = vmul.f32 %v4455_v42, %v4112_v60  ;;  %v544_v0 = vmax.f32 %v13498_v48, 0.0  ;;  %v13512_v60 = vld [vmem:[%s8213_s17 + $0x30] sm:$0xff]  ;;  %v15576_v12 = vld [vmem:[#allocation41_spill] sm:$0xff]  ;;  %v15578_v21 = vld [vmem:[#allocation92_spill] sm:$0xff] }
 0x548   : > { %v5053_v40 = vmul.f32 %v4797_v62, %v4113_v56  ;;  %v537_v24 = vmax.f32 %v7290_v3, 0.0  ;;  %v545_v37 = vmax.f32 %v13503_v43, 0.0  ;;  %v538_v33 = vmax.f32 %v13507_v59, 0.0  ;;  %v15577_v47 = vld [vmem:[#allocation78_spill] sm:$0xff]  ;;  %v15581_v41 = vld [vmem:[#allocation105_spill] sm:$0xff]  ;;  %v15584_v14 = vld [vmem:[#allocation120_spill] sm:$0xff] }
 0x549   : > { %v5182_v31 = vadd.f32 %v5054_v16, %v4926_v51  ;;  %5741 = vmatmul.mubr.f32.gmra.mrb[62].mxu0 %v5179_v9  ;;  %v546_v38 = vmax.f32 %v15567_v34, 0.0  ;;  %v539_v13 = vmax.f32 %v13512_v60, 0.0  ;;  %v6500_v58 = vadd.f32 %v15569_v29, %v15568_v15  ;;  %v15580_v56 = vld [vmem:[#allocation38_spill] sm:$0xff]  ;;  %v15583_v52 = vld [vmem:[#allocation121_spill] sm:$0xff]  ;;  %v15590_v29 = vld [vmem:[#allocation71_spill] sm:$0xff] }
 0x54a   : > { %v5181_v28 = vadd.f32 %v5053_v40, %v4925_v7  ;;  %v15571_v55 = vmax.f32 %v15570_v5, 0.0  ;;  %v6580_v8 = vadd.f32 %v15573_v63, %v15572_v36  ;;  %v6503_v27 = vadd.f32 %v15575_v35, %v15574_v32  ;;  %v15585_v39 = vld [vmem:[#allocation106_spill] sm:$0xff]  ;;  %v15586_v4 = vld [vmem:[#allocation69_spill] sm:$0xff]  ;;  %v15589_v7 = vld [vmem:[#allocation116_spill] sm:$0xff] }
 0x54b   : > { %v6583_v11 = vadd.f32 %v15577_v47, %v15576_v12  ;;  %5885 = vmatprep.mubr.f32.mxu1 %v5182_v31  ;;  %v6506_v44 = vadd.f32 %v15579_v49, %v15578_v21  ;;  %v6586_v61 = vadd.f32 %v15581_v41, %v15580_v56  ;;  %v6509_v30 = vadd.f32 %v15583_v52, %v15582_v53  ;;  %v15588_v9 = vld [vmem:[#allocation54_spill] sm:$0xff]  ;;  %v15599_v35 = vld [vmem:[#allocation68_spill] sm:$0xff]  ;;  %v15601_v47 = vld [vmem:[#allocation125_spill] sm:$0xff] }
 0x54c   : > { %6850 = vmatprep.mubr.f32.mxu0 %v15571_v55  ;;  %v6589_v42 = vadd.f32 %v15585_v39, %v15584_v14  ;;  %5886 = vmatmul.mubr.f32.gmra.mrb[62].mxu1 %v5181_v28  ;;  %v5523_v51 = vadd.f32 %v6580_v8, %v6500_v58  ;;  %v6512_v16 = vadd.f32 %v15587_v46, %v15586_v4  ;;  %v547_v3 = vmax.f32 %v13262_v20, 0.0  ;;  %v15591_v58 = vld [vmem:[#allocation74_spill] sm:$0xff]  ;;  %v15592_v55 = vld [vmem:[#allocation55_spill] sm:$0xff]  ;;  %v15598_v20 = vld [vmem:[#allocation101_spill] sm:$0xff] }
 0x54d   : > { %v13533_v62 = vadd.f32 %v6583_v11, %v6503_v27  ;;  %v6592_v40 = vadd.f32 %v15589_v7, %v15588_v9  ;;  %6862 = vmatprep.mubr.f32.mxu1 %v541_v45  ;;  %6851 = vmatmul.mubr.f32.vlgmr.msra.gmra.mrb[64].mxu0 %v534_v23  ;;  %v5533_v31 = vadd.f32 %v6586_v61, %v6506_v44  ;;  %v15593_v36 = vld [vmem:[#allocation58_spill] sm:$0xff]  ;;  %v15595_v45 = vld [vmem:[#allocation124_spill] sm:$0xff]  ;;  %v15602_v21 = vld [vmem:[#allocation81_spill] sm:$0xff] }
 0x54e   : > { %v13544_v15 = vadd.f32 %v6589_v42, %v6509_v30  ;;  %v6515_v28 = vadd.f32 %v15591_v58, %v15590_v29  ;;  %6853 = vmatprep.mubr.f32.mxu0 %v535_v2  ;;  %v6595_v63 = vadd.f32 %v15593_v36, %v15592_v55  ;;  %v6518_v8 = vadd.f32 %v15595_v45, %v15594_v57  ;;  %v15597_v23 = vld [vmem:[#allocation112_spill] sm:$0xff]  ;;  %v15600_v12 = vld [vmem:[#allocation50_spill] sm:$0xff]  ;;  %v15603_v2 = vld [vmem:[#allocation47_spill] sm:$0xff] }
 0x54f   : > { %v13548_v5 = vadd.f32 %v6592_v40, %v6512_v16  ;;  %v6598_v32 = vadd.f32 %v15597_v23, %v15596_v10  ;;  %v6521_v27 = vadd.f32 %v15599_v35, %v15598_v20  ;;  %v6601_v11 = vadd.f32 %v15601_v47, %v15600_v12  ;;  %v15604_v44 = vld [vmem:[#allocation59_spill] sm:$0xff]  ;;  %v15606_v52 = vld [vmem:[#allocation104_spill] sm:$0xff]  ;;  %v15607_v30 = vld [vmem:[#allocation126_spill] sm:$0xff] }
 0x550   : > { %v6524_v49 = vadd.f32 %v15603_v2, %v15602_v21  ;;  %v15605_v56 = vld [vmem:[#allocation43_spill] sm:$0xff]  ;;  %6863 = vmatmul.mubr.f32.vlgmr.msra.gmra.mrb[64].mxu1 %v542_v17  ;;  %v5548_v61 = vadd.f32 %v6595_v63, %v6515_v28  ;;  %v6527_v14 = vadd.f32 %v15607_v30, %v15606_v52  ;;  %v15608_v39 = vld [vmem:[#allocation46_spill] sm:$0xff]  ;;  %v15610_v40 = vld [vmem:[#allocation128_spill] sm:$0xff] }
 0x551   : > { %v6604_v41 = vadd.f32 %v15605_v56, %v15604_v44  ;;  %v5553_v53 = vadd.f32 %v6598_v32, %v6518_v8  ;;  %v15609_v42 = vld [vmem:[#allocation127_spill] sm:$0xff]  ;;  %6865 = vmatprep.mubr.f32.mxu1 %v543_v22  ;;  %6854 = vmatmul.mubr.f32.gmra.mrb[66].mxu0 %v536_v18  ;;  %v5558_v9 = vadd.f32 %v6601_v11, %v6521_v27  ;;  %v15611_v29 = vld [vmem:[#allocation129_spill] sm:$0xff]  ;;  %v15614_v63 = vld [vmem:[#allocation48_spill] sm:$0xff] }
 0x552   : > { %v6607_v4 = vadd.f32 %v15609_v42, %v15608_v39  ;;  %v7294_v46 = vld [vmem:[%s8213_s17 + $0x38] sm:$0xff]  ;;  %v6530_v58 = vadd.f32 %v15611_v29, %v15610_v40  ;;  %6856 = vmatprep.mubr.f32.mxu0 %v537_v24  ;;  %v15612_v28 = vld [vmem:[#allocation113_spill] sm:$0xff]  ;;  %v15615_v57 = vld [vmem:[#allocation108_spill] sm:$0xff]  ;;  %v548_v42 = vmax.f32 %v13371_v25, 0.0  ;;  %s6065_s17 = sadd.s32 %s15658_s13, %s6465_s10 }
 0x553   : > { %v540_v16 = vmax.f32 %v7294_v46, 0.0  ;;  %v13569_v7 = vadd.f32 %v6604_v41, %v6524_v49  ;;  %v15613_v55 = vld [vmem:[#allocation77_spill] sm:$0xff]  ;;  %v6533_v45 = vadd.f32 %v15615_v57, %v15614_v63  ;;  %v15616_v8 = vld [vmem:[#allocation44_spill] sm:$0xff]  ;;  %v15618_v10 = vld [vmem:[#allocation130_spill] sm:$0xff]  ;;  %s6461_s11 = sshll.u32 %s6065_s17, 7 }
 0x554   : > { %v13573_v17 = vadd.f32 %v6607_v4, %v6527_v14  ;;  %v6610_v36 = vadd.f32 %v15613_v55, %v15612_v28  ;;  %v15617_v22 = vld [vmem:[#allocation45_spill] sm:$0xff]  ;;  %v15619_v23 = vld [vmem:[#allocation132_spill] sm:$0xff]  ;;  %v15620_v20 = vld [vmem:[#allocation131_spill] sm:$0xff]  ;;  %6866 = vmatmul.mubr.f32.gmra.mrb[66].mxu1 %v544_v0  ;;  %s13718_s29 = scalar_lea.hbm %s15659_s23, %s6461_s11 }
 0x555   : > { %v6613_v18 = vadd.f32 %v15617_v22, %v15616_v8  ;;  %v6536_v32 = vadd.f32 %v15619_v23, %v15618_v10  ;;  %v15621_v35 = vld [vmem:[#allocation49_spill] sm:$0xff]  ;;  %v15623_v47 = vld [vmem:[#allocation135_spill] sm:$0xff]  ;;  %v15624_v11 = vld [vmem:[#allocation134_spill] sm:$0xff]  ;;  %6868 = vmatprep.mubr.f32.mxu1 %v545_v37  ;;  %6857 = vmatmul.mubr.f32.gmra.mrb[68].mxu0 %v538_v33 }
 0x556   : > { %v6616_v27 = vadd.f32 %v15621_v35, %v15620_v20  ;;  %v15622_v12 = vld [vmem:[#allocation133_spill] sm:$0xff]  ;;  %v15625_v21 = vld [vmem:[#allocation136_spill] sm:$0xff]  ;;  %v13591_v49 = vadd.f32 %v6610_v36, %v6530_v58  ;;  %v15626_v56 = vld [vmem:[#allocation83_spill] sm:$0xff]  ;;  %6859 = vmatprep.mubr.f32.mxu0 %v539_v13 }
 0x557   : > { %v6539_v24 = vadd.f32 %v15623_v47, %v15622_v12  ;;  %v6619_v2 = vadd.f32 %v15625_v21, %v15624_v11  ;;  %v13593_v44 = vadd.f32 %v6613_v18, %v6533_v45  ;;  %v15627_v41 = vld [vmem:[#allocation138_spill] sm:$0xff]  ;;  %v15628_v30 = vld [vmem:[#allocation137_spill] sm:$0xff]  ;;  %v15629_v14 = vld [vmem:[#allocation139_spill] sm:$0xff] }
 0x558   : > { %v6542_v52 = vadd.f32 %v15627_v41, %v15626_v56  ;;  %v6622_v39 = vadd.f32 %v15629_v14, %v15628_v30  ;;  %v13604_v48 = vadd.f32 %v6616_v27, %v6536_v32  ;;  %v15630_v4 = vld [vmem:[#allocation99_spill] sm:$0xff]  ;;  %v15631_v46 = vld [vmem:[#allocation141_spill] sm:$0xff]  ;;  %v15633_v43 = vld [vmem:[#allocation142_spill] sm:$0xff]  ;;  %6869 = vmatmul.mubr.f32.gmra.mrb[68].mxu1 %v546_v38 }
 0x559   : > { %v13606_v0 = vadd.f32 %v6619_v2, %v6539_v24  ;;  %v6545_v40 = vadd.f32 %v15631_v46, %v15630_v4  ;;  %v15632_v58 = vld [vmem:[#allocation67_spill] sm:$0xff]  ;;  %v15634_v28 = vld [vmem:[#allocation100_spill] sm:$0xff]  ;;  %v15637_v25 = vld [vmem:[#allocation145_spill] sm:$0xff]  ;;  %6871 = vmatprep.mubr.f32.mxu1 %v547_v3  ;;  %6860 = vmatmul.mubr.f32.gmra.mrb[70].mxu0 %v540_v16 }
 0x55a   : > { %v13612_v29 = vadd.f32 %v6622_v39, %v6542_v52  ;;  %v6625_v37 = vadd.f32 %v15633_v43, %v15632_v58  ;;  %v15635_v59 = vld [vmem:[#allocation144_spill] sm:$0xff]  ;;  %v15636_v55 = vld [vmem:[#allocation143_spill] sm:$0xff]  ;;  %v15639_v57 = vld [vmem:[#allocation146_spill] sm:$0xff]  ;;  %v6679_v39 = vpop.f32.mrb[46].mxu0  ;;  %v6755_v43 = vadd.f32 %v13375_v54, %v13367_v6 }
 0x55b   : > { %v6660_v33 = vadd.f32 %v15635_v59, %v15634_v28  ;;  %v6740_v36 = vadd.f32 %v15637_v25, %v15636_v55  ;;  %v15638_v63 = vld [vmem:[#allocation111_spill] sm:$0xff]  ;;  %v15642_v10 = vld [vmem:[#allocation61_spill] sm:$0xff]  ;;  %v15643_v60 = vld [vmem:[#allocation102_spill] sm:$0xff]  ;;  %v6680_v3 = vpop.f32.mrb[47].mxu0  ;;  %v6759_v28 = vpop.f32.mrb[46].mxu1 }
 0x55c   : > { %v6663_v45 = vadd.f32 %v15639_v57, %v15638_v63  ;;  %v15640_v8 = vld [vmem:[#allocation103_spill] sm:$0xff]  ;;  %v6666_v13 = vadd.f32 %v15643_v60, %v15642_v10  ;;  %v15644_v23 = vld [vmem:[#allocation86_spill] sm:$0xff]  ;;  %v13630_v35 = vadd.f32 %v6625_v37, %v6545_v40  ;;  %v15646_v12 = vld [vmem:[#allocation148_spill] sm:$0xff]  ;;  %v6681_v37 = vadd.f32 %v6680_v3, %v6679_v39  ;;  %6872 = vmatmul.mubr.f32.gmra.mrb[70].mxu1 %v548_v42  ;;  %v6760_v55 = vpop.f32.mrb[47].mxu1 }
 0x55d   : > { %v15641_v22 = vld [vmem:[#allocation147_spill] sm:$0xff]  ;;  %v5668_v27 = vadd.f32 %v6660_v33, %v5523_v51  ;;  %v15648_v11 = vld [vmem:[#allocation149_spill] sm:$0xff]  ;;  %v15649_v21 = vld [vmem:[#allocation150_spill] sm:$0xff]  ;;  %v6761_v25 = vadd.f32 %v6760_v55, %v6759_v28 }
 0x55e   : > { %v6743_v18 = vadd.f32 %v15641_v22, %v15640_v8  ;;  %v15645_v32 = vld [vmem:[#allocation107_spill] sm:$0xff]  ;;  %v6749_v2 = vadd.f32 %v15649_v21, %v15648_v11  ;;  %v5673_v56 = vadd.f32 %v6663_v45, %v13533_v62  ;;  %v5678_v41 = vadd.f32 %v6666_v13, %v5533_v31  ;;  %v15650_v52 = vld [vmem:[#allocation52_spill] sm:$0xff]  ;;  %v15651_v30 = vld [vmem:[#allocation109_spill] sm:$0xff] }
 0x55f   : > { %v6746_v20 = vadd.f32 %v15645_v32, %v15644_v23  ;;  %v15647_v47 = vld [vmem:[#allocation51_spill] sm:$0xff]  ;;  %v6672_v14 = vadd.f32 %v15651_v30, %v15650_v52  ;;  %v15653_v4 = vld [vmem:[#allocation152_spill] sm:$0xff]  ;;  %v15655_v40 = vld [vmem:[#allocation89_spill] sm:$0xff]  ;;  %v6678_v62 = vadd.f32 %v13475_v50, %v13471_v1  ;;  %v6758_v31 = vadd.f32 %v13490_v19, %v13481_v26 }
 0x560   : > { %v6669_v24 = vadd.f32 %v15647_v47, %v15646_v12  ;;  %v15652_v38 = vld [vmem:[#allocation151_spill] sm:$0xff]  ;;  %v15654_v46 = vld [vmem:[#allocation88_spill] sm:$0xff]  ;;  %v5703_v33 = vadd.f32 %v6681_v37, %v5558_v9  ;;  %v13651_v63 = vadd.f32 %v6740_v36, %v5668_v27  ;;  %v13653_v6 = vadd.f32 %v6743_v18, %v5673_v56 }
 0x561   : > { %v6752_v51 = vadd.f32 %v15653_v4, %v15652_v38  ;;  %v6675_v58 = vadd.f32 %v15655_v40, %v15654_v46  ;;  %v5688_v16 = vadd.f32 %v6672_v14, %v13548_v5  ;;  %v5698_v59 = vadd.f32 %v6678_v62, %v5553_v53 }
 0x562   : > { %v5683_v34 = vadd.f32 %v6669_v24, %v13544_v15  ;;  %v13655_v54 = vadd.f32 %v6746_v20, %v5678_v41  ;;  %v13666_v36 = vadd.f32 %v6761_v25, %v5703_v33 }
 0x563   : > { %v5693_v15 = vadd.f32 %v6675_v58, %v5548_v61  ;;  %v13660_v53 = vadd.f32 %v6752_v51, %v5688_v16  ;;  %v13664_v42 = vadd.f32 %v6758_v31, %v5698_v59 }
 0x564   : > { %v13657_v26 = vadd.f32 %v6749_v2, %v5683_v34 }
 0x565   : > { %v13662_v9 = vadd.f32 %v6755_v43, %v5693_v15 }
 0x569   : > { %v6682_v5 = vpop.f32.mrb[48].mxu0 }
 0x56a   : > { %v6683_v57 = vpop.f32.mrb[49].mxu0 }
 0x56b   : > { %v6762_v1 = vpop.f32.mrb[48].mxu1  ;;  %v6684_v50 = vadd.f32 %v6683_v57, %v6682_v5 }
 0x56c   : > { %v6763_v45 = vpop.f32.mrb[49].mxu1 }
 0x56d   : > { %v5708_v19 = vadd.f32 %v6684_v50, %v13569_v7  ;;  %v6764_v61 = vadd.f32 %v6763_v45, %v6762_v1 }
 0x56f   : > { %v13668_v8 = vadd.f32 %v6764_v61, %v5708_v19 }
 0x582   : > { %v6685_v22 = vpop.f32.mrb[50].mxu0 }
 0x583   : > { %v6686_v18 = vpop.f32.mrb[51].mxu0 }
 0x584   : > { %v6687_v10 = vadd.f32 %v6686_v18, %v6685_v22  ;;  %v6765_v60 = vpop.f32.mrb[50].mxu1 }
 0x585   : > { %v6766_v23 = vpop.f32.mrb[51].mxu1 }
 0x586   : > { %v5713_v13 = vadd.f32 %v6687_v10, %v13573_v17  ;;  %v6767_v32 = vadd.f32 %v6766_v23, %v6765_v60 }
 0x588   : > { %v5858_v7 = vadd.f32 %v6767_v32, %v5713_v13 }
 0x59a   : > { %v6688_v20 = vpop.f32.mrb[52].mxu0 }
 0x59b   : > { %v6689_v27 = vpop.f32.mrb[53].mxu0 }
 0x59c   : > { %v6690_v12 = vadd.f32 %v6689_v27, %v6688_v20  ;;  %v6768_v47 = vpop.f32.mrb[52].mxu1 }
 0x59d   : > { %v6769_v11 = vpop.f32.mrb[53].mxu1 }
 0x59e   : > { %v5718_v24 = vadd.f32 %v6690_v12, %v13591_v49  ;;  %v6770_v21 = vadd.f32 %v6769_v11, %v6768_v47 }
 0x5a0   : > { %v13672_v2 = vadd.f32 %v6770_v21, %v5718_v24 }
 0x5b4   : > { %v6691_v56 = vpop.f32.mrb[54].mxu0 }
 0x5b5   : > { %v6692_v41 = vpop.f32.mrb[55].mxu0 }
 0x5b6   : > { %v6693_v52 = vadd.f32 %v6692_v41, %v6691_v56 }
 0x5b7   : > { %v6771_v30 = vpop.f32.mrb[54].mxu1 }
 0x5b8   : > { %v5723_v14 = vadd.f32 %v6693_v52, %v13593_v44  ;;  %v6772_v17 = vpop.f32.mrb[55].mxu1 }
 0x5b9   : > { %v6773_v39 = vadd.f32 %v6772_v17, %v6771_v30 }
 0x5bb   : > { %v5868_v34 = vadd.f32 %v6773_v39, %v5723_v14 }
 0x5d1   : > { %v6694_v38 = vpop.f32.mrb[56].mxu0 }
 0x5d2   : > { %v6695_v4 = vpop.f32.mrb[57].mxu0 }
 0x5d3   : > { %v6696_v46 = vadd.f32 %v6695_v4, %v6694_v38 }
 0x5d4   : > { %v6774_v51 = vpop.f32.mrb[56].mxu1 }
 0x5d5   : > { %v6775_v40 = vpop.f32.mrb[57].mxu1  ;;  %v5728_v49 = vadd.f32 %v6696_v46, %v13604_v48 }
 0x5d6   : > { %v6776_v58 = vadd.f32 %v6775_v40, %v6774_v51 }
 0x5d8   : > { %v13676_v43 = vadd.f32 %v6776_v58, %v5728_v49 }
 0x5eb   : > { %v6697_v3 = vpop.f32.mrb[58].mxu0 }
 0x5ec   : > { %v6698_v16 = vpop.f32.mrb[59].mxu0 }
 0x5ed   : > { %v6699_v31 = vadd.f32 %v6698_v16, %v6697_v3 }
 0x5ee   : > { %v6777_v62 = vpop.f32.mrb[58].mxu1 }
 0x5ef   : > { %v6778_v44 = vpop.f32.mrb[59].mxu1  ;;  %v5733_v37 = vadd.f32 %v6699_v31, %v13606_v0 }
 0x5f0   : > { %v6779_v15 = vadd.f32 %v6778_v44, %v6777_v62 }
 0x5f2   : > { %v5878_v28 = vadd.f32 %v6779_v15, %v5733_v37 }
 0x604   : > { %v6700_v59 = vpop.f32.mrb[60].mxu0 }
 0x605   : > { %v6701_v33 = vpop.f32.mrb[61].mxu0 }
 0x606   : > { %v6780_v55 = vpop.f32.mrb[60].mxu1  ;;  %v6702_v25 = vadd.f32 %v6701_v33, %v6700_v59 }
 0x607   : > { %v6781_v5 = vpop.f32.mrb[61].mxu1 }
 0x608   : > { %v5738_v48 = vadd.f32 %v6702_v25, %v13612_v29  ;;  %v6782_v57 = vadd.f32 %v6781_v5, %v6780_v55 }
 0x60a   : > { %v13680_v1 = vadd.f32 %v6782_v57, %v5738_v48 }
 0x61c   : > { %v6703_v50 = vpop.f32.mrb[62].mxu0 }
 0x61d   : > { %v6704_v45 = vpop.f32.mrb[63].mxu0 }
 0x61e   : > { %v6705_v19 = vadd.f32 %v6704_v45, %v6703_v50 }
 0x61f   : > { %v6783_v61 = vpop.f32.mrb[62].mxu1 }
 0x620   : > { %v5743_v0 = vadd.f32 %v6705_v19, %v13630_v35  ;;  %v6784_v22 = vpop.f32.mrb[63].mxu1  ;;  %v6852_v18 = vpop.f32.mrb[64].mxu0 }
 0x621   : > { %v6785_v10 = vadd.f32 %v6784_v22, %v6783_v61  ;;  %v5963_v60 = vadd.f32 %v6852_v18, %v13653_v6  ;;  %v5957_v13 = vpop.f32.mrb[65].mxu0 }
 0x622   : > { %v5958_v29 = vadd.f32 %v5957_v13, %v13651_v63 }
 0x623   : > { %6037 = vst [vmem:[%s13688_s12 + $0x8] sm:$0xff] %v5963_v60  ;;  %v6864_v23 = vpop.f32.mrb[64].mxu1  ;;  %v5888_v35 = vadd.f32 %v6785_v10, %v5743_v0 }
 0x624   : > { %v6003_v32 = vadd.f32 %v6864_v23, %v5858_v7  ;;  %6036 = vst [vmem:[%s13688_s12] sm:$0xff] %v5958_v29  ;;  %v5997_v20 = vpop.f32.mrb[65].mxu1  ;;  %v6855_v27 = vpop.f32.mrb[66].mxu0 }
 0x625   : > { %v5998_v6 = vadd.f32 %v5997_v20, %v13668_v8  ;;  %v5973_v63 = vadd.f32 %v6855_v27, %v13657_v26  ;;  %v5967_v12 = vpop.f32.mrb[67].mxu0 }
 0x626   : > { %6045 = vst [vmem:[%s13688_s12 + $0x48] sm:$0xff] %v6003_v32  ;;  %v5968_v47 = vadd.f32 %v5967_v12, %v13655_v54 }
 0x627   : > { %6044 = vst [vmem:[%s13688_s12 + $0x40] sm:$0xff] %v5998_v6  ;;  %6039 = vst [vmem:[%s13688_s12 + $0x18] sm:$0xff] %v5973_v63  ;;  %v6867_v7 = vpop.f32.mrb[66].mxu1 }
 0x628   : > { %v6013_v24 = vadd.f32 %v6867_v7, %v5868_v34  ;;  %6038 = vst [vmem:[%s13688_s12 + $0x10] sm:$0xff] %v5968_v47  ;;  %v6007_v11 = vpop.f32.mrb[67].mxu1  ;;  %v6858_v21 = vpop.f32.mrb[68].mxu0 }
 0x629   : > { %v6008_v8 = vadd.f32 %v6007_v11, %v13672_v2  ;;  %v5983_v26 = vadd.f32 %v6858_v21, %v13662_v9  ;;  %v5977_v56 = vpop.f32.mrb[69].mxu0 }
 0x62a   : > { %6047 = vst [vmem:[%s13688_s12 + $0x58] sm:$0xff] %v6013_v24  ;;  %v5978_v54 = vadd.f32 %v5977_v56, %v13660_v53 }
 0x62b   : > { %6046 = vst [vmem:[%s13688_s12 + $0x50] sm:$0xff] %v6008_v8  ;;  %6041 = vst [vmem:[%s13688_s12 + $0x28] sm:$0xff] %v5983_v26  ;;  %v6870_v41 = vpop.f32.mrb[68].mxu1 }
 0x62c   : > { %v6023_v52 = vadd.f32 %v6870_v41, %v5878_v28  ;;  %6040 = vst [vmem:[%s13688_s12 + $0x20] sm:$0xff] %v5978_v54  ;;  %v6017_v30 = vpop.f32.mrb[69].mxu1  ;;  %v6861_v14 = vpop.f32.mrb[70].mxu0 }
 0x62d   : > { %v6018_v9 = vadd.f32 %v6017_v30, %v13676_v43  ;;  %v5993_v2 = vadd.f32 %v6861_v14, %v13666_v36  ;;  %v5987_v17 = vpop.f32.mrb[71].mxu0 }
 0x62e   : > { %6049 = vst [vmem:[%s13688_s12 + $0x68] sm:$0xff] %v6023_v52  ;;  %v5988_v53 = vadd.f32 %v5987_v17, %v13664_v42 }
 0x62f   : > { %6048 = vst [vmem:[%s13688_s12 + $0x60] sm:$0xff] %v6018_v9  ;;  %6043 = vst [vmem:[%s13688_s12 + $0x38] sm:$0xff] %v5993_v2  ;;  %v6873_v39 = vpop.f32.mrb[70].mxu1 }
 0x630   : > { %v6033_v34 = vadd.f32 %v6873_v39, %v5888_v35  ;;  %6042 = vst [vmem:[%s13688_s12 + $0x30] sm:$0xff] %v5988_v53  ;;  %v6027_v38 = vpop.f32.mrb[71].mxu1 }
 0x631   : > { %v6028_v36 = vadd.f32 %v6027_v38, %v13680_v1 }
 0x632   : > { %6051 = vst [vmem:[%s13688_s12 + $0x78] sm:$0xff] %v6033_v34 }
 0x633   : > { %6050 = vst [vmem:[%s13688_s12 + $0x70] sm:$0xff] %v6028_v36 }
 0x634   : > { %7566 = shalt.err (!%p7563_p1)
}
 0x635   : > { %s7567_s16 = scalar_lea.hbm %s13718_s29, 2048  ;;  %s7571_s12 = scalar_lea.hbm %s15659_s23, 8192 }
 0x636   : > { %p7568_p13 = scmp.ne.s32.totalorder %s13718_s29, %s7567_s16  ;;  %p7572_p12 = scmp.lt.u32.totalorder %s13718_s29, %s15659_s23 }
 0x637   : > { %p7573_p9 = scmp.lt.u32.totalorder %s7571_s12, %s7567_s16  ;;  %p7575_p4 = scmp.lt.u32.totalorder %s7567_s16, %s13718_s29 }
 0x638   : > { %p7569_p2 = pnand %p7568_p13, %p15660_p3 }
 0x639   : > { %p7574_p10 = por %p7573_p9, %p7572_p12 }
 0x63a   : > { %p7570_p8 = pneg %p7569_p2 }
 0x63b   : > { %p7576_p6 = por %p7575_p4, %p7574_p10 }
 0x63d   : > { %p7577_p0 = pnand %p7576_p6, %p7570_p8 }
 0x63f   : > { %7580 = shalt.err (!%p7577_p0)
}
 0x640   : > { %s7731_s17 = smov 128   ;;  %s7732_s11 = smov 256  }
 0x641   : > { %s7733_s0 = smov 8  }
 0x642   : > { %7080 = dma.vmem_to_hbm [thread:$0]  (%p15660_p3), %s13721_s5, 2048, %s13718_s29, %s13728_s25, %s7731_s17, %s7732_s11, %s7733_s0  }
 0x643 PF: > { %s15661_s1 = sld [smem:[#allocation24_spill]]  ;;  %p7128_p5 = scmp.ge.s32.totalorder %s7715_s22, 2 }
 0x644   : > { %p15662_p11 = scmp.ne.s32.totalorder %s14340_s2, 0 }
 0x646   : > { %p7112_p7 = pnand %p7128_p5, %p15662_p11 }
 0x649   : > { %s6083_s6 = sand.u32 1, %s15661_s1  }
 0x64a   : > { %s6084_s26 = scalar_lea.sflag [#allocation4], %s6083_s6 }
 0x64b   : > { %7658 = dma.done.wait (!%p7112_p7), %s6084_s26, 2048  }
 0x64c   : > { %7660 = vsyncadd (!%p7112_p7), %s6084_s26, 4294965248  ;;  %s31_s22 = sadd.s32 1, %s7715_s22   ;;  %s15664_s3 = sld [smem:[#allocation25_spill]] }
 0x64d   : > { %p13757_p1 = scmp.ge.s32.totalorder %s31_s22, 6   ;;  %s15665_s10 = sld [smem:[#allocation26_spill]] }
 0x64e   : > { %s15666_s12 = sld [smem:[#allocation27_spill]]  ;;  %s15667_s15 = sld [smem:[#allocation29_spill]] }
 0x64f   : > { %s15668_s16 = sld [smem:[#allocation30_spill]]  ;;  %s15669_s2 = smov %s15685_s19 }
 0x650   : > { %s15672_s11 = smov %s15687_s27  ;;  %s15673_s13 = smov %s7683_s14 }
 0x651   : > { %s15674_s14 = smov %s8121_s9  ;;  %s15675_s17 = smov %s8109_s7 }
 0x652   : > { %s15671_s30 = smov %s15664_s3  ;;  %s15676_s18 = smov %s7707_s20 }
 0x653   : > { %s15677_s19 = smov %s7711_s21  ;;  %s15678_s20 = smov %s15681_s24 }
 0x654   : > { %s15679_s21 = smov %s15669_s2  ;;  %30 = sbr.rel (!%p13757_p1) target bundleno = 25 (0x19), region = 165 }
 0x65b   :  { %6089 = vsyncpa [#allocation3], 1 }
 0x65c   :  { %6091 = vsyncpa [#allocation3 + $0x1], 1 }
 0x65d   :  { %6092 = vsyncpa [#allocation6], 1 }
 0x65e   :  { %6093 = vsyncpa [#allocation9], 1 }
 0x65f   :  { %6094 = vsyncpa [#allocation12], 1 }
 0x660   :  { %6095 = vsyncpa [#allocation15], 1 }
 0x661   :  { %6097 = vsyncpa [#allocation15 + $0x1], 1 }
 0x662   :  { %6098 = vsyncpa [#allocation4], 1 }
 0x663   :  { %6100 = vsyncpa [#allocation4 + $0x1], 1 }

</bundles_post_ra>
